<compile_context>
chip_gen: v6e
topology: v6e:2x2x1
jax: 0.10.0
libtpu: 0.0.40
codegen_flags: <defaults>
</compile_context>

<pallas_src>
import jax
import jax.numpy as jnp
from jax import lax
from jax.experimental import pallas as pl
from jax.experimental.pallas import tpu as pltpu

EPS = 1e-5
MM_DTYPE = jnp.bfloat16   # MXU operand dtype; accumulation / BN / ReLU math stays f32.


# ----------------------------- kernel bodies --------------------------------

def _im2col_conv(apad_ref, patch_ref, w_ref):
    """One 3x3 / stride-1 conv tile: gather the 9 taps into `patch_ref`, one MXU matmul.

    apad_ref:  (H+2, W+2, Cin) zero-padded activations (MM_DTYPE), VMEM scratch
    patch_ref: (H,   W, 9*Cin) im2col scratch (MM_DTYPE), VMEM scratch
    w_ref:     (9*Cin, Cout)   folded conv weight (MM_DTYPE)
    returns:   (H*W, Cout) float32
    """
    Hp, Wp, cin = apad_ref.shape
    H, W = Hp - 2, Wp - 2
    for tap in range(9):                                   # static unroll, 9 VMEM copies
        dy, dx = tap // 3, tap % 3
        patch_ref[:, :, tap * cin:(tap + 1) * cin] = apad_ref[dy:dy + H, dx:dx + W, :]
    patch = patch_ref[...].reshape(H * W, 9 * cin)         # merge major dims only (cheap)
    return jnp.dot(patch, w_ref[...], preferred_element_type=jnp.float32)


def _store_conv_outputs(y, H, W, y_ref, psum_ref, pssq_ref):
    cout = y.shape[-1]
    y_ref[...] = y.reshape(1, H, W, cout)
    # Per-block partial BN statistics in f32 (reduced across blocks on the host).
    psum_ref[...] = jnp.sum(y, axis=0, keepdims=True)[None]        # (1, 1, Cout)
    pssq_ref[...] = jnp.sum(y * y, axis=0, keepdims=True)[None]    # (1, 1, Cout)


def conv1_stats_kernel(x_ref, w_ref, y_ref, psum_ref, pssq_ref, apad_ref, patch_ref):
    """y1 = conv3x3(x) for one image, plus per-image BN1 partial statistics."""
    _, H, W, _ = x_ref.shape
    apad_ref[...] = jnp.zeros_like(apad_ref)               # zero halo ring (conv padding=1)
    apad_ref[1:H + 1, 1:W + 1, :] = x_ref[0].astype(apad_ref.dtype)
    y = _im2col_conv(apad_ref, patch_ref, w_ref)
    _store_conv_outputs(y, H, W, y_ref, psum_ref, pssq_ref)


def bn_relu_conv2_stats_kernel(y1_ref, sc_ref, sh_ref, w_ref,
                               y_ref, psum_ref, pssq_ref, apad_ref, patch_ref):
    """act1 = relu(scale1*y1 + shift1) (BN1 folded to one FMA); y2 = conv3x3(act1); partial stats.

    act1 lives only in VMEM — it is never written back to HBM."""
    _, H, W, _ = y1_ref.shape
    act = jnp.maximum(y1_ref[0] * sc_ref[...] + sh_ref[...], 0.0)   # f32 elementwise
    apad_ref[...] = jnp.zeros_like(apad_ref)
    apad_ref[1:H + 1, 1:W + 1, :] = act.astype(apad_ref.dtype)
    y = _im2col_conv(apad_ref, patch_ref, w_ref)
    _store_conv_outputs(y, H, W, y_ref, psum_ref, pssq_ref)


def residual_bn_relu_kernel(x_ref, y2_ref, sc_ref, sh_ref, out_ref):
    """out = relu(x + scale2*y2 + shift2) on a lane-dense (1, H, W*C) block."""
    out_ref[...] = jnp.maximum(x_ref[...] + y2_ref[...] * sc_ref[...] + sh_ref[...], 0.0)


# ----------------------------- host-side glue -------------------------------

def _conv_stage_call(kernel_fn, args, in_specs, N, H, W, cin, cout):
    out_shape = (jax.ShapeDtypeStruct((N, H, W, cout), jnp.float32),   # conv output
                 jax.ShapeDtypeStruct((N, 1, cout), jnp.float32),      # partial sum
                 jax.ShapeDtypeStruct((N, 1, cout), jnp.float32))      # partial sum of squares
    out_specs = (pl.BlockSpec((1, H, W, cout), lambda n: (n, 0, 0, 0)),
                 pl.BlockSpec((1, 1, cout), lambda n: (n, 0, 0)),
                 pl.BlockSpec((1, 1, cout), lambda n: (n, 0, 0)))
    return pl.pallas_call(
        kernel_fn,
        out_shape=out_shape,
        grid=(N,),
        in_specs=in_specs,
        out_specs=out_specs,
        scratch_shapes=[pltpu.VMEM((H + 2, W + 2, cin), MM_DTYPE),     # padded activation
                        pltpu.VMEM((H, W, 9 * cin), MM_DTYPE)],        # im2col patches
        # Each grid step writes its own output blocks and its own partial-stats row, so the
        # batch axis is fully independent -> "parallel" (both TensorCores on v7x).
        compiler_params=pltpu.CompilerParams(dimension_semantics=("parallel",)),
    )(*args)


def _bn_scale_shift(psum, pssq, gamma, beta, count):
    # Fold batch-stat BN into a per-channel FMA: y_norm = scale*y + shift.
    s = jnp.sum(psum, axis=0)                                # (1, C)
    ss = jnp.sum(pssq, axis=0)                               # (1, C)
    mean = s / count
    var = jnp.maximum(ss / count - mean * mean, 0.0)         # biased var (training-mode BN)
    scale = gamma.reshape(1, -1) * lax.rsqrt(var + EPS)
    shift = beta.reshape(1, -1) - mean * scale
    return scale, shift


def _prep_w(w_oihw):
    # PyTorch OIHW (Cout, Cin, 3, 3) -> (3, 3, Cin, Cout) -> (9*Cin, Cout), tap-major rows,
    # matching the im2col lane order tap*Cin + c.
    cout, cin = w_oihw.shape[0], w_oihw.shape[1]
    return jnp.transpose(w_oihw, (2, 3, 1, 0)).reshape(9 * cin, cout).astype(MM_DTYPE)


@jax.jit
def resblock_forward(x_nchw, w1, g1, b1, w2, g2, b2):
    """ResBlock.forward with stride=1, downsample=Identity. NCHW in / NCHW out (float32)."""
    x = jnp.transpose(x_nchw, (0, 2, 3, 1)).astype(jnp.float32)        # NHWC, f32
    N, H, W, cin = x.shape
    cout = w1.shape[0]
    assert cin == cout, "downsample=None (Identity) requires in_channel == out_channel"
    # TODO(synk): stride != 1 and a non-Identity downsample branch are not implemented.

    w1k, w2k = _prep_w(w1), _prep_w(w2)
    count = N * H * W

    # --- stage 1: y1 = conv1(x), plus per-image BN1 partial statistics --------------------
    y1, ps1, pq1 = _conv_stage_call(
        conv1_stats_kernel, (x.astype(MM_DTYPE), w1k),
        in_specs=[pl.BlockSpec((1, H, W, cin), lambda n: (n, 0, 0, 0)),
                  pl.BlockSpec((9 * cin, cout), lambda n: (0, 0))],
        N=N, H=H, W=W, cin=cin, cout=cout)
    sc1, sh1 = _bn_scale_shift(ps1, pq1, g1, b1, count)

    # --- stage 2: y2 = conv2(relu(bn1(y1))), fused; plus BN2 partial statistics -----------
    y2, ps2, pq2 = _conv_stage_call(
        bn_relu_conv2_stats_kernel, (y1, sc1, sh1, w2k),
        in_specs=[pl.BlockSpec((1, H, W, cout), lambda n: (n, 0, 0, 0)),
                  pl.BlockSpec((1, cout), lambda n: (0, 0)),
                  pl.BlockSpec((1, cout), lambda n: (0, 0)),
                  pl.BlockSpec((9 * cout, cout), lambda n: (0, 0))],
        N=N, H=H, W=W, cin=cout, cout=cout)
    sc2, sh2 = _bn_scale_shift(ps2, pq2, g2, b2, count)

    # --- stage 3: out = relu(x + bn2(y2)), lane-dense (N, H, W*C) elementwise kernel ------
    wc = W * cout
    out2d = pl.pallas_call(
        residual_bn_relu_kernel,
        out_shape=jax.ShapeDtypeStruct((N, H, wc), jnp.float32),
        grid=(N,),
        in_specs=[pl.BlockSpec((1, H, wc), lambda n: (n, 0, 0)),
                  pl.BlockSpec((1, H, wc), lambda n: (n, 0, 0)),
                  pl.BlockSpec((1, wc), lambda n: (0, 0)),
                  pl.BlockSpec((1, wc), lambda n: (0, 0))],
        out_specs=pl.BlockSpec((1, H, wc), lambda n: (n, 0, 0)),
        compiler_params=pltpu.CompilerParams(dimension_semantics=("parallel",)),
    )(x.reshape(N, H, wc), y2.reshape(N, H, wc),
      jnp.tile(sc2, (1, W)), jnp.tile(sh2, (1, W)))

    out = out2d.reshape(N, H, W, cout)
    return jnp.transpose(out, (0, 3, 1, 2))                            # back to NCHW


# ----------------------------- reference & test ------------------------------

def _ref_forward(x, w1, g1, b1, w2, g2, b2):
    """Pure-JAX NCHW reference mirroring the PyTorch module (training-mode BN).

    Conv operands are rounded to MM_DTYPE to mirror the kernel's bf16 MXU policy
    (set MM_DTYPE = jnp.float32 above for exact f32 parity with the f32 module)."""
    q = lambda t: t.astype(MM_DTYPE).astype(jnp.float32)

    def conv(a, w):
        return lax.conv_general_dilated(
            q(a), q(w), window_strides=(1, 1), padding=((1, 1), (1, 1)),
            dimension_numbers=("NCHW", "OIHW", "NCHW"),
            precision=lax.Precision.HIGHEST,
        )

    def bn(y, g, b):
        m = jnp.mean(y, axis=(0, 2, 3), keepdims=True)
        v = jnp.mean((y - m) ** 2, axis=(0, 2, 3), keepdims=True)
        return (y - m) * lax.rsqrt(v + EPS) * g.reshape(1, -1, 1, 1) + b.reshape(1, -1, 1, 1)

    out = jnp.maximum(bn(conv(x, w1), g1, b1), 0.0)
    out = jnp.maximum(x + bn(conv(out, w2), g2, b2), 0.0)
    return out


if __name__ == "__main__":
    # batch=2, 16x16 spatial; C=128 so the MXU output / vector stores are lane-dense
    # (the kernels are general in C as long as in_channel == out_channel).
    N, C, H, W = 2, 128, 16, 16

    key = jax.random.PRNGKey(0)
    kx, kw1, kw2, kg1, kb1, kg2, kb2 = jax.random.split(key, 7)

    x = jax.random.normal(kx, (N, C, H, W), jnp.float32)
    w1 = 0.1 * jax.random.normal(kw1, (C, C, 3, 3), jnp.float32)    # conv1 weight (OIHW)
    w2 = 0.1 * jax.random.normal(kw2, (C, C, 3, 3), jnp.float32)    # conv2 weight (OIHW)
    g1 = 1.0 + 0.1 * jax.random.normal(kg1, (C,), jnp.float32)      # bn1 gamma
    b1 = 0.1 * jax.random.normal(kb1, (C,), jnp.float32)            # bn1 beta
    g2 = 1.0 + 0.1 * jax.random.normal(kg2, (C,), jnp.float32)      # bn2 gamma
    b2 = 0.1 * jax.random.normal(kb2, (C,), jnp.float32)            # bn2 beta
    # TODO(synk): BatchNorm running_mean/running_var bookkeeping (training side-effect)
    # is not reproduced; only the forward activation math is implemented.

    out = jax.block_until_ready(resblock_forward(x, w1, g1, b1, w2, g2, b2))
    ref = jax.block_until_ready(_ref_forward(x, w1, g1, b1, w2, g2, b2))

    assert out.shape == (N, C, H, W), out.shape
    max_err = float(jnp.max(jnp.abs(out - ref)))
    assert jnp.allclose(out, ref, atol=2e-3, rtol=2e-3), f"max|diff|={max_err:.3e}"
    print("KERNEL_OK")
</pallas_src>

<mosaic_0001>
module attributes {stable_mosaic.version = 11 : i64} {
  func.func @conv1_stats_kernel(%arg0: i32, %arg1: memref<1x16x16x128xbf16, #tpu.memory_space<vmem>>, %arg2: memref<1152x128xbf16, #tpu.memory_space<vmem>>, %arg3: memref<1x16x16x128xf32, #tpu.memory_space<vmem>>, %arg4: memref<1x1x128xf32, #tpu.memory_space<vmem>>, %arg5: memref<1x1x128xf32, #tpu.memory_space<vmem>>, %arg6: memref<18x18x128xbf16, #tpu.memory_space<vmem>>, %arg7: memref<16x16x1152xbf16, #tpu.memory_space<vmem>>) attributes {dimension_semantics = [#tpu.dimension_semantics<parallel>], iteration_bounds = array<i64: 2>, scalar_prefetch = 0 : i64, scratch_operands = 2 : i64, tpu.core_type = #tpu.core_type<tc>, window_params = [{transform_indices = @transform_0, window_bounds = array<i64: 1, 16, 16, 128>}, {pipeline_mode = #tpu.pipeline_mode<synchronous>, transform_indices = @transform_1, window_bounds = array<i64: 1152, 128>}, {transform_indices = @transform_2, window_bounds = array<i64: 1, 16, 16, 128>}, {transform_indices = @transform_3, window_bounds = array<i64: 1, 1, 128>}, {transform_indices = @transform_4, window_bounds = array<i64: 1, 1, 128>}]} {
    %cst = arith.constant 0.000000e+00 : bf16
    %0 = vector.broadcast %cst : bf16 to vector<18x18x128xbf16>
    %c0 = arith.constant 0 : index
    %c0_0 = arith.constant 0 : index
    %c0_1 = arith.constant 0 : index
    %1 = vector.load %arg6[%c0, %c0_0, %c0_1] : memref<18x18x128xbf16, #tpu.memory_space<vmem>>, vector<18x18x128xbf16>
    tpu.vector_store %arg6[%c0, %c0_0, %c0_1], %0 {strides = array<i32>} : memref<18x18x128xbf16, #tpu.memory_space<vmem>>, vector<18x18x128xbf16>,
    %c0_2 = arith.constant 0 : index
    %c0_3 = arith.constant 0 : index
    %c0_4 = arith.constant 0 : index
    %c0_5 = arith.constant 0 : index
    %2 = vector.load %arg1[%c0_2, %c0_3, %c0_4, %c0_5] : memref<1x16x16x128xbf16, #tpu.memory_space<vmem>>, vector<1x16x16x128xbf16>
    %3 = vector.shape_cast %2 : vector<1x16x16x128xbf16> to vector<16x16x128xbf16>
    %c1 = arith.constant 1 : index
    %c1_6 = arith.constant 1 : index
    %c0_7 = arith.constant 0 : index
    %4 = vector.load %arg6[%c1, %c1_6, %c0_7] : memref<18x18x128xbf16, #tpu.memory_space<vmem>>, vector<16x16x128xbf16>
    tpu.vector_store %arg6[%c1, %c1_6, %c0_7], %3 {strides = array<i32>} : memref<18x18x128xbf16, #tpu.memory_space<vmem>>, vector<16x16x128xbf16>,
    %c0_8 = arith.constant 0 : index
    %c0_9 = arith.constant 0 : index
    %c0_10 = arith.constant 0 : index
    %5 = vector.load %arg6[%c0_8, %c0_9, %c0_10] : memref<18x18x128xbf16, #tpu.memory_space<vmem>>, vector<16x16x128xbf16>
    %c0_11 = arith.constant 0 : index
    %c0_12 = arith.constant 0 : index
    %c0_13 = arith.constant 0 : index
    %6 = vector.load %arg7[%c0_11, %c0_12, %c0_13] : memref<16x16x1152xbf16, #tpu.memory_space<vmem>>, vector<16x16x128xbf16>
    tpu.vector_store %arg7[%c0_11, %c0_12, %c0_13], %5 {strides = array<i32>} : memref<16x16x1152xbf16, #tpu.memory_space<vmem>>, vector<16x16x128xbf16>,
    %c0_14 = arith.constant 0 : index
    %c1_15 = arith.constant 1 : index
    %c0_16 = arith.constant 0 : index
    %7 = vector.load %arg6[%c0_14, %c1_15, %c0_16] : memref<18x18x128xbf16, #tpu.memory_space<vmem>>, vector<16x16x128xbf16>
    %c0_17 = arith.constant 0 : index
    %c0_18 = arith.constant 0 : index
    %c128 = arith.constant 128 : index
    %8 = vector.load %arg7[%c0_17, %c0_18, %c128] : memref<16x16x1152xbf16, #tpu.memory_space<vmem>>, vector<16x16x128xbf16>
    tpu.vector_store %arg7[%c0_17, %c0_18, %c128], %7 {strides = array<i32>} : memref<16x16x1152xbf16, #tpu.memory_space<vmem>>, vector<16x16x128xbf16>,
    %c0_19 = arith.constant 0 : index
    %c2 = arith.constant 2 : index
    %c0_20 = arith.constant 0 : index
    %9 = vector.load %arg6[%c0_19, %c2, %c0_20] : memref<18x18x128xbf16, #tpu.memory_space<vmem>>, vector<16x16x128xbf16>
    %c0_21 = arith.constant 0 : index
    %c0_22 = arith.constant 0 : index
    %c256 = arith.constant 256 : index
    %10 = vector.load %arg7[%c0_21, %c0_22, %c256] : memref<16x16x1152xbf16, #tpu.memory_space<vmem>>, vector<16x16x128xbf16>
    tpu.vector_store %arg7[%c0_21, %c0_22, %c256], %9 {strides = array<i32>} : memref<16x16x1152xbf16, #tpu.memory_space<vmem>>, vector<16x16x128xbf16>,
    %c1_23 = arith.constant 1 : index
    %c0_24 = arith.constant 0 : index
    %c0_25 = arith.constant 0 : index
    %11 = vector.load %arg6[%c1_23, %c0_24, %c0_25] : memref<18x18x128xbf16, #tpu.memory_space<vmem>>, vector<16x16x128xbf16>
    %c0_26 = arith.constant 0 : index
    %c0_27 = arith.constant 0 : index
    %c384 = arith.constant 384 : index
    %12 = vector.load %arg7[%c0_26, %c0_27, %c384] : memref<16x16x1152xbf16, #tpu.memory_space<vmem>>, vector<16x16x128xbf16>
    tpu.vector_store %arg7[%c0_26, %c0_27, %c384], %11 {strides = array<i32>} : memref<16x16x1152xbf16, #tpu.memory_space<vmem>>, vector<16x16x128xbf16>,
    %c1_28 = arith.constant 1 : index
    %c1_29 = arith.constant 1 : index
    %c0_30 = arith.constant 0 : index
    %13 = vector.load %arg6[%c1_28, %c1_29, %c0_30] : memref<18x18x128xbf16, #tpu.memory_space<vmem>>, vector<16x16x128xbf16>
    %c0_31 = arith.constant 0 : index
    %c0_32 = arith.constant 0 : index
    %c512 = arith.constant 512 : index
    %14 = vector.load %arg7[%c0_31, %c0_32, %c512] : memref<16x16x1152xbf16, #tpu.memory_space<vmem>>, vector<16x16x128xbf16>
    tpu.vector_store %arg7[%c0_31, %c0_32, %c512], %13 {strides = array<i32>} : memref<16x16x1152xbf16, #tpu.memory_space<vmem>>, vector<16x16x128xbf16>,
    %c1_33 = arith.constant 1 : index
    %c2_34 = arith.constant 2 : index
    %c0_35 = arith.constant 0 : index
    %15 = vector.load %arg6[%c1_33, %c2_34, %c0_35] : memref<18x18x128xbf16, #tpu.memory_space<vmem>>, vector<16x16x128xbf16>
    %c0_36 = arith.constant 0 : index
    %c0_37 = arith.constant 0 : index
    %c640 = arith.constant 640 : index
    %16 = vector.load %arg7[%c0_36, %c0_37, %c640] : memref<16x16x1152xbf16, #tpu.memory_space<vmem>>, vector<16x16x128xbf16>
    tpu.vector_store %arg7[%c0_36, %c0_37, %c640], %15 {strides = array<i32>} : memref<16x16x1152xbf16, #tpu.memory_space<vmem>>, vector<16x16x128xbf16>,
    %c2_38 = arith.constant 2 : index
    %c0_39 = arith.constant 0 : index
    %c0_40 = arith.constant 0 : index
    %17 = vector.load %arg6[%c2_38, %c0_39, %c0_40] : memref<18x18x128xbf16, #tpu.memory_space<vmem>>, vector<16x16x128xbf16>
    %c0_41 = arith.constant 0 : index
    %c0_42 = arith.constant 0 : index
    %c768 = arith.constant 768 : index
    %18 = vector.load %arg7[%c0_41, %c0_42, %c768] : memref<16x16x1152xbf16, #tpu.memory_space<vmem>>, vector<16x16x128xbf16>
    tpu.vector_store %arg7[%c0_41, %c0_42, %c768], %17 {strides = array<i32>} : memref<16x16x1152xbf16, #tpu.memory_space<vmem>>, vector<16x16x128xbf16>,
    %c2_43 = arith.constant 2 : index
    %c1_44 = arith.constant 1 : index
    %c0_45 = arith.constant 0 : index
    %19 = vector.load %arg6[%c2_43, %c1_44, %c0_45] : memref<18x18x128xbf16, #tpu.memory_space<vmem>>, vector<16x16x128xbf16>
    %c0_46 = arith.constant 0 : index
    %c0_47 = arith.constant 0 : index
    %c896 = arith.constant 896 : index
    %20 = vector.load %arg7[%c0_46, %c0_47, %c896] : memref<16x16x1152xbf16, #tpu.memory_space<vmem>>, vector<16x16x128xbf16>
    tpu.vector_store %arg7[%c0_46, %c0_47, %c896], %19 {strides = array<i32>} : memref<16x16x1152xbf16, #tpu.memory_space<vmem>>, vector<16x16x128xbf16>,
    %c2_48 = arith.constant 2 : index
    %c2_49 = arith.constant 2 : index
    %c0_50 = arith.constant 0 : index
    %21 = vector.load %arg6[%c2_48, %c2_49, %c0_50] : memref<18x18x128xbf16, #tpu.memory_space<vmem>>, vector<16x16x128xbf16>
    %c0_51 = arith.constant 0 : index
    %c0_52 = arith.constant 0 : index
    %c1024 = arith.constant 1024 : index
    %22 = vector.load %arg7[%c0_51, %c0_52, %c1024] : memref<16x16x1152xbf16, #tpu.memory_space<vmem>>, vector<16x16x128xbf16>
    tpu.vector_store %arg7[%c0_51, %c0_52, %c1024], %21 {strides = array<i32>} : memref<16x16x1152xbf16, #tpu.memory_space<vmem>>, vector<16x16x128xbf16>,
    %c0_53 = arith.constant 0 : index
    %c0_54 = arith.constant 0 : index
    %c0_55 = arith.constant 0 : index
    %23 = vector.load %arg7[%c0_53, %c0_54, %c0_55] : memref<16x16x1152xbf16, #tpu.memory_space<vmem>>, vector<16x16x1152xbf16>
    %24 = vector.shape_cast %23 : vector<16x16x1152xbf16> to vector<256x1152xbf16>
    %c0_56 = arith.constant 0 : index
    %c0_57 = arith.constant 0 : index
    %25 = vector.load %arg2[%c0_56, %c0_57] : memref<1152x128xbf16, #tpu.memory_space<vmem>>, vector<1152x128xbf16>
    %cst_58 = arith.constant dense<0.000000e+00> : vector<256x128xf32>
    %26 = tpu.matmul %24, %25, %cst_58 {dimension_numbers = #tpu.dot_dimension_numbers<[1], [0], [0], [1], [0, 0, 1, 1], [], []>} : vector<256x1152xbf16>, vector<1152x128xbf16>, vector<256x128xf32> -> vector<256x128xf32>
    %27 = vector.shape_cast %26 : vector<256x128xf32> to vector<1x16x16x128xf32>
    %c0_59 = arith.constant 0 : index
    %c0_60 = arith.constant 0 : index
    %c0_61 = arith.constant 0 : index
    %c0_62 = arith.constant 0 : index
    %28 = vector.load %arg3[%c0_59, %c0_60, %c0_61, %c0_62] : memref<1x16x16x128xf32, #tpu.memory_space<vmem>>, vector<1x16x16x128xf32>
    tpu.vector_store %arg3[%c0_59, %c0_60, %c0_61, %c0_62], %27 {strides = array<i32>} : memref<1x16x16x128xf32, #tpu.memory_space<vmem>>, vector<1x16x16x128xf32>,
    %cst_63 = arith.constant dense<0.000000e+00> : vector<128xf32>
    %29 = vector.multi_reduction <add>, %26, %cst_63 [0] : vector<256x128xf32> to vector<128xf32>
    %30 = vector.shape_cast %29 : vector<128xf32> to vector<1x128xf32>
    %31 = vector.shape_cast %30 : vector<1x128xf32> to vector<1x1x128xf32>
    %c0_64 = arith.constant 0 : index
    %c0_65 = arith.constant 0 : index
    %c0_66 = arith.constant 0 : index
    %32 = vector.load %arg4[%c0_64, %c0_65, %c0_66] : memref<1x1x128xf32, #tpu.memory_space<vmem>>, vector<1x1x128xf32>
    tpu.vector_store %arg4[%c0_64, %c0_65, %c0_66], %31 {strides = array<i32>} : memref<1x1x128xf32, #tpu.memory_space<vmem>>, vector<1x1x128xf32>,
    %33 = arith.mulf %26, %26 : vector<256x128xf32>
    %cst_67 = arith.constant dense<0.000000e+00> : vector<128xf32>
    %34 = vector.multi_reduction <add>, %33, %cst_67 [0] : vector<256x128xf32> to vector<128xf32>
    %35 = vector.shape_cast %34 : vector<128xf32> to vector<1x128xf32>
    %36 = vector.shape_cast %35 : vector<1x128xf32> to vector<1x1x128xf32>
    %c0_68 = arith.constant 0 : index
    %c0_69 = arith.constant 0 : index
    %c0_70 = arith.constant 0 : index
    %37 = vector.load %arg5[%c0_68, %c0_69, %c0_70] : memref<1x1x128xf32, #tpu.memory_space<vmem>>, vector<1x1x128xf32>
    tpu.vector_store %arg5[%c0_68, %c0_69, %c0_70], %36 {strides = array<i32>} : memref<1x1x128xf32, #tpu.memory_space<vmem>>, vector<1x1x128xf32>,
    return
  }
  func.func @transform_0(%arg0: i32) -> (i32, i32, i32, i32) {
    %c0_i32 = arith.constant 0 : i32
    %c0_i32_0 = arith.constant 0 : i32
    %c0_i32_1 = arith.constant 0 : i32
    %c0_i32_2 = arith.constant 0 : i32
    return %arg0, %c0_i32, %c0_i32_0, %c0_i32_1 : i32, i32, i32, i32
  }
  func.func @transform_1(%arg0: i32) -> (i32, i32) {
    %c0_i32 = arith.constant 0 : i32
    %c0_i32_0 = arith.constant 0 : i32
    %c0_i32_1 = arith.constant 0 : i32
    return %c0_i32, %c0_i32_0 : i32, i32
  }
  func.func @transform_2(%arg0: i32) -> (i32, i32, i32, i32) {
    %c0_i32 = arith.constant 0 : i32
    %c0_i32_0 = arith.constant 0 : i32
    %c0_i32_1 = arith.constant 0 : i32
    %c0_i32_2 = arith.constant 0 : i32
    return %arg0, %c0_i32, %c0_i32_0, %c0_i32_1 : i32, i32, i32, i32
  }
  func.func @transform_3(%arg0: i32) -> (i32, i32, i32) {
    %c0_i32 = arith.constant 0 : i32
    %c0_i32_0 = arith.constant 0 : i32
    %c0_i32_1 = arith.constant 0 : i32
    return %arg0, %c0_i32, %c0_i32_0 : i32, i32, i32
  }
  func.func @transform_4(%arg0: i32) -> (i32, i32, i32) {
    %c0_i32 = arith.constant 0 : i32
    %c0_i32_0 = arith.constant 0 : i32
    %c0_i32_1 = arith.constant 0 : i32
    return %arg0, %c0_i32, %c0_i32_0 : i32, i32, i32
  }
}

module attributes {stable_mosaic.version = 11 : i64} {
  func.func @bn_relu_conv2_stats_kernel(%arg0: i32, %arg1: memref<1x16x16x128xf32, #tpu.memory_space<vmem>>, %arg2: memref<1x128xf32, #tpu.memory_space<vmem>>, %arg3: memref<1x128xf32, #tpu.memory_space<vmem>>, %arg4: memref<1152x128xbf16, #tpu.memory_space<vmem>>, %arg5: memref<1x16x16x128xf32, #tpu.memory_space<vmem>>, %arg6: memref<1x1x128xf32, #tpu.memory_space<vmem>>, %arg7: memref<1x1x128xf32, #tpu.memory_space<vmem>>, %arg8: memref<18x18x128xbf16, #tpu.memory_space<vmem>>, %arg9: memref<16x16x1152xbf16, #tpu.memory_space<vmem>>) attributes {dimension_semantics = [#tpu.dimension_semantics<parallel>], iteration_bounds = array<i64: 2>, scalar_prefetch = 0 : i64, scratch_operands = 2 : i64, tpu.core_type = #tpu.core_type<tc>, window_params = [{transform_indices = @transform_0, window_bounds = array<i64: 1, 16, 16, 128>}, {pipeline_mode = #tpu.pipeline_mode<synchronous>, transform_indices = @transform_1, window_bounds = array<i64: 1, 128>}, {pipeline_mode = #tpu.pipeline_mode<synchronous>, transform_indices = @transform_2, window_bounds = array<i64: 1, 128>}, {pipeline_mode = #tpu.pipeline_mode<synchronous>, transform_indices = @transform_3, window_bounds = array<i64: 1152, 128>}, {transform_indices = @transform_4, window_bounds = array<i64: 1, 16, 16, 128>}, {transform_indices = @transform_5, window_bounds = array<i64: 1, 1, 128>}, {transform_indices = @transform_6, window_bounds = array<i64: 1, 1, 128>}]} {
    %c0 = arith.constant 0 : index
    %c0_0 = arith.constant 0 : index
    %c0_1 = arith.constant 0 : index
    %c0_2 = arith.constant 0 : index
    %0 = vector.load %arg1[%c0, %c0_0, %c0_1, %c0_2] : memref<1x16x16x128xf32, #tpu.memory_space<vmem>>, vector<1x16x16x128xf32>
    %1 = vector.shape_cast %0 : vector<1x16x16x128xf32> to vector<16x16x128xf32>
    %c0_3 = arith.constant 0 : index
    %c0_4 = arith.constant 0 : index
    %2 = vector.load %arg2[%c0_3, %c0_4] : memref<1x128xf32, #tpu.memory_space<vmem>>, vector<1x128xf32>
    %3 = vector.shape_cast %2 : vector<1x128xf32> to vector<1x1x128xf32>
    %4 = vector.broadcast %3 : vector<1x1x128xf32> to vector<16x16x128xf32>
    %5 = arith.mulf %1, %4 : vector<16x16x128xf32>
    %c0_5 = arith.constant 0 : index
    %c0_6 = arith.constant 0 : index
    %6 = vector.load %arg3[%c0_5, %c0_6] : memref<1x128xf32, #tpu.memory_space<vmem>>, vector<1x128xf32>
    %7 = vector.shape_cast %6 : vector<1x128xf32> to vector<1x1x128xf32>
    %8 = vector.broadcast %7 : vector<1x1x128xf32> to vector<16x16x128xf32>
    %9 = arith.addf %5, %8 : vector<16x16x128xf32>
    %cst = arith.constant 0.000000e+00 : f32
    %10 = vector.broadcast %cst : f32 to vector<16x16x128xf32>
    %11 = arith.maximumf %9, %10 : vector<16x16x128xf32>
    %cst_7 = arith.constant 0.000000e+00 : bf16
    %12 = vector.broadcast %cst_7 : bf16 to vector<18x18x128xbf16>
    %c0_8 = arith.constant 0 : index
    %c0_9 = arith.constant 0 : index
    %c0_10 = arith.constant 0 : index
    %13 = vector.load %arg8[%c0_8, %c0_9, %c0_10] : memref<18x18x128xbf16, #tpu.memory_space<vmem>>, vector<18x18x128xbf16>
    tpu.vector_store %arg8[%c0_8, %c0_9, %c0_10], %12 {strides = array<i32>} : memref<18x18x128xbf16, #tpu.memory_space<vmem>>, vector<18x18x128xbf16>,
    %14 = arith.truncf %11 : vector<16x16x128xf32> to vector<16x16x128xbf16>
    %c1 = arith.constant 1 : index
    %c1_11 = arith.constant 1 : index
    %c0_12 = arith.constant 0 : index
    %15 = vector.load %arg8[%c1, %c1_11, %c0_12] : memref<18x18x128xbf16, #tpu.memory_space<vmem>>, vector<16x16x128xbf16>
    tpu.vector_store %arg8[%c1, %c1_11, %c0_12], %14 {strides = array<i32>} : memref<18x18x128xbf16, #tpu.memory_space<vmem>>, vector<16x16x128xbf16>,
    %c0_13 = arith.constant 0 : index
    %c0_14 = arith.constant 0 : index
    %c0_15 = arith.constant 0 : index
    %16 = vector.load %arg8[%c0_13, %c0_14, %c0_15] : memref<18x18x128xbf16, #tpu.memory_space<vmem>>, vector<16x16x128xbf16>
    %c0_16 = arith.constant 0 : index
    %c0_17 = arith.constant 0 : index
    %c0_18 = arith.constant 0 : index
    %17 = vector.load %arg9[%c0_16, %c0_17, %c0_18] : memref<16x16x1152xbf16, #tpu.memory_space<vmem>>, vector<16x16x128xbf16>
    tpu.vector_store %arg9[%c0_16, %c0_17, %c0_18], %16 {strides = array<i32>} : memref<16x16x1152xbf16, #tpu.memory_space<vmem>>, vector<16x16x128xbf16>,
    %c0_19 = arith.constant 0 : index
    %c1_20 = arith.constant 1 : index
    %c0_21 = arith.constant 0 : index
    %18 = vector.load %arg8[%c0_19, %c1_20, %c0_21] : memref<18x18x128xbf16, #tpu.memory_space<vmem>>, vector<16x16x128xbf16>
    %c0_22 = arith.constant 0 : index
    %c0_23 = arith.constant 0 : index
    %c128 = arith.constant 128 : index
    %19 = vector.load %arg9[%c0_22, %c0_23, %c128] : memref<16x16x1152xbf16, #tpu.memory_space<vmem>>, vector<16x16x128xbf16>
    tpu.vector_store %arg9[%c0_22, %c0_23, %c128], %18 {strides = array<i32>} : memref<16x16x1152xbf16, #tpu.memory_space<vmem>>, vector<16x16x128xbf16>,
    %c0_24 = arith.constant 0 : index
    %c2 = arith.constant 2 : index
    %c0_25 = arith.constant 0 : index
    %20 = vector.load %arg8[%c0_24, %c2, %c0_25] : memref<18x18x128xbf16, #tpu.memory_space<vmem>>, vector<16x16x128xbf16>
    %c0_26 = arith.constant 0 : index
    %c0_27 = arith.constant 0 : index
    %c256 = arith.constant 256 : index
    %21 = vector.load %arg9[%c0_26, %c0_27, %c256] : memref<16x16x1152xbf16, #tpu.memory_space<vmem>>, vector<16x16x128xbf16>
    tpu.vector_store %arg9[%c0_26, %c0_27, %c256], %20 {strides = array<i32>} : memref<16x16x1152xbf16, #tpu.memory_space<vmem>>, vector<16x16x128xbf16>,
    %c1_28 = arith.constant 1 : index
    %c0_29 = arith.constant 0 : index
    %c0_30 = arith.constant 0 : index
    %22 = vector.load %arg8[%c1_28, %c0_29, %c0_30] : memref<18x18x128xbf16, #tpu.memory_space<vmem>>, vector<16x16x128xbf16>
    %c0_31 = arith.constant 0 : index
    %c0_32 = arith.constant 0 : index
    %c384 = arith.constant 384 : index
    %23 = vector.load %arg9[%c0_31, %c0_32, %c384] : memref<16x16x1152xbf16, #tpu.memory_space<vmem>>, vector<16x16x128xbf16>
    tpu.vector_store %arg9[%c0_31, %c0_32, %c384], %22 {strides = array<i32>} : memref<16x16x1152xbf16, #tpu.memory_space<vmem>>, vector<16x16x128xbf16>,
    %c1_33 = arith.constant 1 : index
    %c1_34 = arith.constant 1 : index
    %c0_35 = arith.constant 0 : index
    %24 = vector.load %arg8[%c1_33, %c1_34, %c0_35] : memref<18x18x128xbf16, #tpu.memory_space<vmem>>, vector<16x16x128xbf16>
    %c0_36 = arith.constant 0 : index
    %c0_37 = arith.constant 0 : index
    %c512 = arith.constant 512 : index
    %25 = vector.load %arg9[%c0_36, %c0_37, %c512] : memref<16x16x1152xbf16, #tpu.memory_space<vmem>>, vector<16x16x128xbf16>
    tpu.vector_store %arg9[%c0_36, %c0_37, %c512], %24 {strides = array<i32>} : memref<16x16x1152xbf16, #tpu.memory_space<vmem>>, vector<16x16x128xbf16>,
    %c1_38 = arith.constant 1 : index
    %c2_39 = arith.constant 2 : index
    %c0_40 = arith.constant 0 : index
    %26 = vector.load %arg8[%c1_38, %c2_39, %c0_40] : memref<18x18x128xbf16, #tpu.memory_space<vmem>>, vector<16x16x128xbf16>
    %c0_41 = arith.constant 0 : index
    %c0_42 = arith.constant 0 : index
    %c640 = arith.constant 640 : index
    %27 = vector.load %arg9[%c0_41, %c0_42, %c640] : memref<16x16x1152xbf16, #tpu.memory_space<vmem>>, vector<16x16x128xbf16>
    tpu.vector_store %arg9[%c0_41, %c0_42, %c640], %26 {strides = array<i32>} : memref<16x16x1152xbf16, #tpu.memory_space<vmem>>, vector<16x16x128xbf16>,
    %c2_43 = arith.constant 2 : index
    %c0_44 = arith.constant 0 : index
    %c0_45 = arith.constant 0 : index
    %28 = vector.load %arg8[%c2_43, %c0_44, %c0_45] : memref<18x18x128xbf16, #tpu.memory_space<vmem>>, vector<16x16x128xbf16>
    %c0_46 = arith.constant 0 : index
    %c0_47 = arith.constant 0 : index
    %c768 = arith.constant 768 : index
    %29 = vector.load %arg9[%c0_46, %c0_47, %c768] : memref<16x16x1152xbf16, #tpu.memory_space<vmem>>, vector<16x16x128xbf16>
    tpu.vector_store %arg9[%c0_46, %c0_47, %c768], %28 {strides = array<i32>} : memref<16x16x1152xbf16, #tpu.memory_space<vmem>>, vector<16x16x128xbf16>,
    %c2_48 = arith.constant 2 : index
    %c1_49 = arith.constant 1 : index
    %c0_50 = arith.constant 0 : index
    %30 = vector.load %arg8[%c2_48, %c1_49, %c0_50] : memref<18x18x128xbf16, #tpu.memory_space<vmem>>, vector<16x16x128xbf16>
    %c0_51 = arith.constant 0 : index
    %c0_52 = arith.constant 0 : index
    %c896 = arith.constant 896 : index
    %31 = vector.load %arg9[%c0_51, %c0_52, %c896] : memref<16x16x1152xbf16, #tpu.memory_space<vmem>>, vector<16x16x128xbf16>
    tpu.vector_store %arg9[%c0_51, %c0_52, %c896], %30 {strides = array<i32>} : memref<16x16x1152xbf16, #tpu.memory_space<vmem>>, vector<16x16x128xbf16>,
    %c2_53 = arith.constant 2 : index
    %c2_54 = arith.constant 2 : index
    %c0_55 = arith.constant 0 : index
    %32 = vector.load %arg8[%c2_53, %c2_54, %c0_55] : memref<18x18x128xbf16, #tpu.memory_space<vmem>>, vector<16x16x128xbf16>
    %c0_56 = arith.constant 0 : index
    %c0_57 = arith.constant 0 : index
    %c1024 = arith.constant 1024 : index
    %33 = vector.load %arg9[%c0_56, %c0_57, %c1024] : memref<16x16x1152xbf16, #tpu.memory_space<vmem>>, vector<16x16x128xbf16>
    tpu.vector_store %arg9[%c0_56, %c0_57, %c1024], %32 {strides = array<i32>} : memref<16x16x1152xbf16, #tpu.memory_space<vmem>>, vector<16x16x128xbf16>,
    %c0_58 = arith.constant 0 : index
    %c0_59 = arith.constant 0 : index
    %c0_60 = arith.constant 0 : index
    %34 = vector.load %arg9[%c0_58, %c0_59, %c0_60] : memref<16x16x1152xbf16, #tpu.memory_space<vmem>>, vector<16x16x1152xbf16>
    %35 = vector.shape_cast %34 : vector<16x16x1152xbf16> to vector<256x1152xbf16>
    %c0_61 = arith.constant 0 : index
    %c0_62 = arith.constant 0 : index
    %36 = vector.load %arg4[%c0_61, %c0_62] : memref<1152x128xbf16, #tpu.memory_space<vmem>>, vector<1152x128xbf16>
    %cst_63 = arith.constant dense<0.000000e+00> : vector<256x128xf32>
    %37 = tpu.matmul %35, %36, %cst_63 {dimension_numbers = #tpu.dot_dimension_numbers<[1], [0], [0], [1], [0, 0, 1, 1], [], []>} : vector<256x1152xbf16>, vector<1152x128xbf16>, vector<256x128xf32> -> vector<256x128xf32>
    %38 = vector.shape_cast %37 : vector<256x128xf32> to vector<1x16x16x128xf32>
    %c0_64 = arith.constant 0 : index
    %c0_65 = arith.constant 0 : index
    %c0_66 = arith.constant 0 : index
    %c0_67 = arith.constant 0 : index
    %39 = vector.load %arg5[%c0_64, %c0_65, %c0_66, %c0_67] : memref<1x16x16x128xf32, #tpu.memory_space<vmem>>, vector<1x16x16x128xf32>
    tpu.vector_store %arg5[%c0_64, %c0_65, %c0_66, %c0_67], %38 {strides = array<i32>} : memref<1x16x16x128xf32, #tpu.memory_space<vmem>>, vector<1x16x16x128xf32>,
    %cst_68 = arith.constant dense<0.000000e+00> : vector<128xf32>
    %40 = vector.multi_reduction <add>, %37, %cst_68 [0] : vector<256x128xf32> to vector<128xf32>
    %41 = vector.shape_cast %40 : vector<128xf32> to vector<1x128xf32>
    %42 = vector.shape_cast %41 : vector<1x128xf32> to vector<1x1x128xf32>
    %c0_69 = arith.constant 0 : index
    %c0_70 = arith.constant 0 : index
    %c0_71 = arith.constant 0 : index
    %43 = vector.load %arg6[%c0_69, %c0_70, %c0_71] : memref<1x1x128xf32, #tpu.memory_space<vmem>>, vector<1x1x128xf32>
    tpu.vector_store %arg6[%c0_69, %c0_70, %c0_71], %42 {strides = array<i32>} : memref<1x1x128xf32, #tpu.memory_space<vmem>>, vector<1x1x128xf32>,
    %44 = arith.mulf %37, %37 : vector<256x128xf32>
    %cst_72 = arith.constant dense<0.000000e+00> : vector<128xf32>
    %45 = vector.multi_reduction <add>, %44, %cst_72 [0] : vector<256x128xf32> to vector<128xf32>
    %46 = vector.shape_cast %45 : vector<128xf32> to vector<1x128xf32>
    %47 = vector.shape_cast %46 : vector<1x128xf32> to vector<1x1x128xf32>
    %c0_73 = arith.constant 0 : index
    %c0_74 = arith.constant 0 : index
    %c0_75 = arith.constant 0 : index
    %48 = vector.load %arg7[%c0_73, %c0_74, %c0_75] : memref<1x1x128xf32, #tpu.memory_space<vmem>>, vector<1x1x128xf32>
    tpu.vector_store %arg7[%c0_73, %c0_74, %c0_75], %47 {strides = array<i32>} : memref<1x1x128xf32, #tpu.memory_space<vmem>>, vector<1x1x128xf32>,
    return
  }
  func.func @transform_0(%arg0: i32) -> (i32, i32, i32, i32) {
    %c0_i32 = arith.constant 0 : i32
    %c0_i32_0 = arith.constant 0 : i32
    %c0_i32_1 = arith.constant 0 : i32
    %c0_i32_2 = arith.constant 0 : i32
    return %arg0, %c0_i32, %c0_i32_0, %c0_i32_1 : i32, i32, i32, i32
  }
  func.func @transform_1(%arg0: i32) -> (i32, i32) {
    %c0_i32 = arith.constant 0 : i32
    %c0_i32_0 = arith.constant 0 : i32
    %c0_i32_1 = arith.constant 0 : i32
    return %c0_i32, %c0_i32_0 : i32, i32
  }
  func.func @transform_2(%arg0: i32) -> (i32, i32) {
    %c0_i32 = arith.constant 0 : i32
    %c0_i32_0 = arith.constant 0 : i32
    %c0_i32_1 = arith.constant 0 : i32
    return %c0_i32, %c0_i32_0 : i32, i32
  }
  func.func @transform_3(%arg0: i32) -> (i32, i32) {
    %c0_i32 = arith.constant 0 : i32
    %c0_i32_0 = arith.constant 0 : i32
    %c0_i32_1 = arith.constant 0 : i32
    return %c0_i32, %c0_i32_0 : i32, i32
  }
  func.func @transform_4(%arg0: i32) -> (i32, i32, i32, i32) {
    %c0_i32 = arith.constant 0 : i32
    %c0_i32_0 = arith.constant 0 : i32
    %c0_i32_1 = arith.constant 0 : i32
    %c0_i32_2 = arith.constant 0 : i32
    return %arg0, %c0_i32, %c0_i32_0, %c0_i32_1 : i32, i32, i32, i32
  }
  func.func @transform_5(%arg0: i32) -> (i32, i32, i32) {
    %c0_i32 = arith.constant 0 : i32
    %c0_i32_0 = arith.constant 0 : i32
    %c0_i32_1 = arith.constant 0 : i32
    return %arg0, %c0_i32, %c0_i32_0 : i32, i32, i32
  }
  func.func @transform_6(%arg0: i32) -> (i32, i32, i32) {
    %c0_i32 = arith.constant 0 : i32
    %c0_i32_0 = arith.constant 0 : i32
    %c0_i32_1 = arith.constant 0 : i32
    return %arg0, %c0_i32, %c0_i32_0 : i32, i32, i32
  }
}

module attributes {stable_mosaic.version = 11 : i64} {
  func.func @residual_bn_relu_kernel(%arg0: i32, %arg1: memref<1x16x2048xf32, #tpu.memory_space<vmem>>, %arg2: memref<1x16x2048xf32, #tpu.memory_space<vmem>>, %arg3: memref<1x2048xf32, #tpu.memory_space<vmem>>, %arg4: memref<1x2048xf32, #tpu.memory_space<vmem>>, %arg5: memref<1x16x2048xf32, #tpu.memory_space<vmem>>) attributes {dimension_semantics = [#tpu.dimension_semantics<parallel>], iteration_bounds = array<i64: 2>, scalar_prefetch = 0 : i64, scratch_operands = 0 : i64, tpu.core_type = #tpu.core_type<tc>, window_params = [{transform_indices = @transform_0, window_bounds = array<i64: 1, 16, 2048>}, {transform_indices = @transform_1, window_bounds = array<i64: 1, 16, 2048>}, {pipeline_mode = #tpu.pipeline_mode<synchronous>, transform_indices = @transform_2, window_bounds = array<i64: 1, 2048>}, {pipeline_mode = #tpu.pipeline_mode<synchronous>, transform_indices = @transform_3, window_bounds = array<i64: 1, 2048>}, {transform_indices = @transform_4, window_bounds = array<i64: 1, 16, 2048>}]} {
    %c0 = arith.constant 0 : index
    %c0_0 = arith.constant 0 : index
    %c0_1 = arith.constant 0 : index
    %0 = vector.load %arg1[%c0, %c0_0, %c0_1] : memref<1x16x2048xf32, #tpu.memory_space<vmem>>, vector<1x16x2048xf32>
    %c0_2 = arith.constant 0 : index
    %c0_3 = arith.constant 0 : index
    %c0_4 = arith.constant 0 : index
    %1 = vector.load %arg2[%c0_2, %c0_3, %c0_4] : memref<1x16x2048xf32, #tpu.memory_space<vmem>>, vector<1x16x2048xf32>
    %c0_5 = arith.constant 0 : index
    %c0_6 = arith.constant 0 : index
    %2 = vector.load %arg3[%c0_5, %c0_6] : memref<1x2048xf32, #tpu.memory_space<vmem>>, vector<1x2048xf32>
    %3 = vector.shape_cast %2 : vector<1x2048xf32> to vector<1x1x2048xf32>
    %4 = vector.broadcast %3 : vector<1x1x2048xf32> to vector<1x16x2048xf32>
    %5 = arith.mulf %1, %4 : vector<1x16x2048xf32>
    %6 = arith.addf %0, %5 : vector<1x16x2048xf32>
    %c0_7 = arith.constant 0 : index
    %c0_8 = arith.constant 0 : index
    %7 = vector.load %arg4[%c0_7, %c0_8] : memref<1x2048xf32, #tpu.memory_space<vmem>>, vector<1x2048xf32>
    %8 = vector.shape_cast %7 : vector<1x2048xf32> to vector<1x1x2048xf32>
    %9 = vector.broadcast %8 : vector<1x1x2048xf32> to vector<1x16x2048xf32>
    %10 = arith.addf %6, %9 : vector<1x16x2048xf32>
    %cst = arith.constant 0.000000e+00 : f32
    %11 = vector.broadcast %cst : f32 to vector<1x16x2048xf32>
    %12 = arith.maximumf %10, %11 : vector<1x16x2048xf32>
    %c0_9 = arith.constant 0 : index
    %c0_10 = arith.constant 0 : index
    %c0_11 = arith.constant 0 : index
    %13 = vector.load %arg5[%c0_9, %c0_10, %c0_11] : memref<1x16x2048xf32, #tpu.memory_space<vmem>>, vector<1x16x2048xf32>
    tpu.vector_store %arg5[%c0_9, %c0_10, %c0_11], %12 {strides = array<i32>} : memref<1x16x2048xf32, #tpu.memory_space<vmem>>, vector<1x16x2048xf32>,
    return
  }
  func.func @transform_0(%arg0: i32) -> (i32, i32, i32) {
    %c0_i32 = arith.constant 0 : i32
    %c0_i32_0 = arith.constant 0 : i32
    %c0_i32_1 = arith.constant 0 : i32
    return %arg0, %c0_i32, %c0_i32_0 : i32, i32, i32
  }
  func.func @transform_1(%arg0: i32) -> (i32, i32, i32) {
    %c0_i32 = arith.constant 0 : i32
    %c0_i32_0 = arith.constant 0 : i32
    %c0_i32_1 = arith.constant 0 : i32
    return %arg0, %c0_i32, %c0_i32_0 : i32, i32, i32
  }
  func.func @transform_2(%arg0: i32) -> (i32, i32) {
    %c0_i32 = arith.constant 0 : i32
    %c0_i32_0 = arith.constant 0 : i32
    %c0_i32_1 = arith.constant 0 : i32
    return %c0_i32, %c0_i32_0 : i32, i32
  }
  func.func @transform_3(%arg0: i32) -> (i32, i32) {
    %c0_i32 = arith.constant 0 : i32
    %c0_i32_0 = arith.constant 0 : i32
    %c0_i32_1 = arith.constant 0 : i32
    return %c0_i32, %c0_i32_0 : i32, i32
  }
  func.func @transform_4(%arg0: i32) -> (i32, i32, i32) {
    %c0_i32 = arith.constant 0 : i32
    %c0_i32_0 = arith.constant 0 : i32
    %c0_i32_1 = arith.constant 0 : i32
    return %arg0, %c0_i32, %c0_i32_0 : i32, i32, i32
  }
}

</mosaic_0001>

<bundles_post_ra>
// kernel: resblock_forward.5
= control target key start
LH: loop header
LB: loop body
LE: loop exit
PB: predicated region body
PF: predicated region fallthrough
CT: control target
= control target key end

     0   :  { %s734_s15 = smov 0   ;;  %s1079_s0 = inlined_call_operand.vmem [shape: f32[2,16,2048], index: 0, kind: input, shape index: {}]   ;;  %s1080_s1 = inlined_call_operand.vmem [shape: f32[2,16,2048], index: 1, kind: input, shape index: {}]   ;;  %s1081_s2 = inlined_call_operand.vmem [shape: f32[1,2048], index: 2, kind: input, shape index: {}]   ;;  %s1082_s3 = inlined_call_operand.vmem [shape: f32[1,2048], index: 3, kind: input, shape index: {}]   ;;  %s1083_s4 = inlined_call_operand.vmem [shape: f32[2,16,2048], index: 4, kind: output, shape index: {}]  }
   0x1 LB: > { %s677_s16 = sadd.s32 4294967295, %s707_s15   ;;  %p681_p0 = scmp.ge.s32.totalorder %s707_s15, 1  ;;  %s707_s15 = sphi %s734_s15, %s14_s15  }
   0x2   : > { %p172_p1 = scmp.lt.s32.totalorder %s707_s15, 3 }
   0x4   : > { %p173_p2 = pnand %p681_p0, %p172_p1 }
   0x5   : > { %p203_p3 = scmp.lt.s32.totalorder (!%p173_p2), %s677_s16, 1 }
   0x6   : > { %176 = sbr.rel (%p173_p2) target bundleno = 63 (0x3f), region = 36 }
   0xb   : > { %v286_v0 = vlaneseq  ;;  %s1085_s16 = smov (!%p203_p3, %s677_s16), 1  ;;  %v282_v2 = vld [vmem:[%s1081_s2] sm:$0xff]  ;;  %v867_v59 = vld [vmem:[%s1081_s2 + $0x8] sm:$0xff] }
   0xc   : > { %v748_v3 = vld [vmem:[%s1082_s3] sm:$0xff]  ;;  %s750_s21 = sshll.u32 %s1085_s16, 8 }
   0xd   : > { %v287_v1 = vshrl.u32 %v286_v0, 7  ;;  %s764_s24 = scalar_lea.vmem %s1079_s0, %s750_s21  ;;  %s770_s27 = scalar_lea.vmem %s1080_s1, %s750_s21 }
   0xe   : > { %v218_v12 = vld [vmem:[%s764_s24] sm:$0xff]  ;;  %v219_v18 = vld [vmem:[%s764_s24 + $0x8] sm:$0xff]  ;;  %v252_v20 = vld [vmem:[%s770_s27 + $0x10] sm:$0xff]  ;;  %s857_s30 = scalar_lea.vmem %s1083_s4, %s750_s21 }
   0xf   : > { %v752_v4 = vsub.s32 0, %v287_v1  ;;  %v754_v5 = vsub.s32 1, %v287_v1  ;;  %v756_v6 = vsub.s32 2, %v287_v1  ;;  %v758_v7 = vsub.s32 3, %v287_v1  ;;  %v250_v13 = vld [vmem:[%s770_s27] sm:$0xff]  ;;  %v251_v19 = vld [vmem:[%s770_s27 + $0x8] sm:$0xff] }
  0x10   : > { %v772_v8 = vsub.s32 4, %v287_v1  ;;  %v774_v9 = vsub.s32 5, %v287_v1  ;;  %v776_v10 = vsub.s32 6, %v287_v1  ;;  %v778_v11 = vsub.s32 7, %v287_v1  ;;  %v220_v27 = vld [vmem:[%s764_s24 + $0x10] sm:$0xff]  ;;  %v221_v28 = vld [vmem:[%s764_s24 + $0x18] sm:$0xff] }
  0x11   : > { %v783_v14 = vrot.slane %v282_v2, %v752_v4  ;;  %v787_v15 = vrot.slane %v748_v3, %v752_v4  ;;  %v790_v16 = vrot.slane %v282_v2, %v754_v5  ;;  %v794_v17 = vrot.slane %v748_v3, %v754_v5  ;;  %v253_v29 = vld [vmem:[%s770_s27 + $0x18] sm:$0xff]  ;;  %v222_v34 = vld [vmem:[%s764_s24 + $0x20] sm:$0xff]  ;;  %v255_v36 = vld [vmem:[%s770_s27 + $0x28] sm:$0xff] }
  0x12   : > { %v800_v21 = vrot.slane %v282_v2, %v756_v6  ;;  %v804_v22 = vrot.slane %v748_v3, %v756_v6  ;;  %v807_v23 = vrot.slane %v282_v2, %v758_v7  ;;  %v811_v24 = vrot.slane %v748_v3, %v758_v7  ;;  %v254_v35 = vld [vmem:[%s770_s27 + $0x20] sm:$0xff]  ;;  %v223_v42 = vld [vmem:[%s764_s24 + $0x28] sm:$0xff]  ;;  %v256_v43 = vld [vmem:[%s770_s27 + $0x30] sm:$0xff] }
  0x13   : > { %v366_v25 = vmul.f32 %v783_v14, %v250_v13  ;;  %v367_v26 = vmul.f32 %v790_v16, %v251_v19  ;;  %v819_v30 = vrot.slane %v282_v2, %v772_v8  ;;  %v823_v31 = vrot.slane %v748_v3, %v772_v8  ;;  %v224_v48 = vld [vmem:[%s764_s24 + $0x30] sm:$0xff]  ;;  %v257_v54 = vld [vmem:[%s770_s27 + $0x38] sm:$0xff]  ;;  %v874_v1 = vld [vmem:[%s1082_s3 + $0x8] sm:$0xff] }
  0x14   : > { %v368_v32 = vmul.f32 %v800_v21, %v252_v20  ;;  %v369_v33 = vmul.f32 %v807_v23, %v253_v29  ;;  %v831_v37 = vrot.slane %v282_v2, %v774_v9  ;;  %v835_v38 = vrot.slane %v748_v3, %v774_v9  ;;  %v225_v0 = vld [vmem:[%s764_s24 + $0x38] sm:$0xff]  ;;  %v258_v19 = vld [vmem:[%s770_s27 + $0x40] sm:$0xff] }
  0x15   : > { %v398_v39 = vadd.f32 %v366_v25, %v218_v12  ;;  %v399_v40 = vadd.f32 %v367_v26, %v219_v18  ;;  %v370_v41 = vmul.f32 %v819_v30, %v254_v35  ;;  %v841_v44 = vrot.slane %v282_v2, %v776_v10  ;;  %v260_v35 = vld [vmem:[%s770_s27 + $0x50] sm:$0xff] }
  0x16   : > { %v400_v45 = vadd.f32 %v368_v32, %v220_v27  ;;  %v401_v46 = vadd.f32 %v369_v33, %v221_v28  ;;  %v371_v47 = vmul.f32 %v831_v37, %v255_v36  ;;  %v847_v49 = vrot.slane %v748_v3, %v776_v10  ;;  %v259_v28 = vld [vmem:[%s770_s27 + $0x48] sm:$0xff]  ;;  %v226_v33 = vld [vmem:[%s764_s24 + $0x40] sm:$0xff] }
  0x17   : > { %v514_v50 = vadd.f32 %v787_v15, %v398_v39  ;;  %v515_v51 = vadd.f32 %v794_v17, %v399_v40  ;;  %v402_v52 = vadd.f32 %v370_v41, %v222_v34  ;;  %v372_v53 = vmul.f32 %v841_v44, %v256_v43  ;;  %v227_v40 = vld [vmem:[%s764_s24 + $0x48] sm:$0xff] }
  0x18   : > { %v516_v55 = vadd.f32 %v804_v22, %v400_v45  ;;  %v517_v56 = vadd.f32 %v811_v24, %v401_v46  ;;  %v403_v57 = vadd.f32 %v371_v47, %v223_v42  ;;  %v862_v58 = vrot.slane %v282_v2, %v778_v11  ;;  %v261_v42 = vld [vmem:[%s770_s27 + $0x58] sm:$0xff]  ;;  %v228_v46 = vld [vmem:[%s764_s24 + $0x50] sm:$0xff] }
  0x19   : > { %v546_v60 = vmax.f32 %v514_v50, 0.0  ;;  %v547_v61 = vmax.f32 %v515_v51, 0.0  ;;  %v518_v62 = vadd.f32 %v823_v31, %v402_v52  ;;  %v404_v63 = vadd.f32 %v372_v53, %v224_v48  ;;  %v262_v48 = vld [vmem:[%s770_s27 + $0x60] sm:$0xff]  ;;  %v229_v52 = vld [vmem:[%s764_s24 + $0x58] sm:$0xff] }
  0x1a   : > { %v548_v2 = vmax.f32 %v516_v55, 0.0  ;;  %v549_v12 = vmax.f32 %v517_v56, 0.0  ;;  %v519_v13 = vadd.f32 %v835_v38, %v403_v57  ;;  %v373_v18 = vmul.f32 %v862_v58, %v257_v54  ;;  %v230_v57 = vld [vmem:[%s764_s24 + $0x60] sm:$0xff] }
  0x1b   : > { %578 = vst [vmem:[%s857_s30] sm:$0xff] %v546_v60  ;;  %579 = vst [vmem:[%s857_s30 + $0x8] sm:$0xff] %v547_v61  ;;  %v550_v20 = vmax.f32 %v518_v62, 0.0  ;;  %v520_v25 = vadd.f32 %v847_v49, %v404_v63  ;;  %v884_v26 = vrot.slane %v748_v3, %v778_v11  ;;  %v888_v27 = vrot.slane %v867_v59, %v752_v4  ;;  %v263_v61 = vld [vmem:[%s770_s27 + $0x68] sm:$0xff] }
  0x1c   : > { %580 = vst [vmem:[%s857_s30 + $0x10] sm:$0xff] %v548_v2  ;;  %581 = vst [vmem:[%s857_s30 + $0x18] sm:$0xff] %v549_v12  ;;  %v551_v29 = vmax.f32 %v519_v13, 0.0  ;;  %v405_v32 = vadd.f32 %v373_v18, %v225_v0  ;;  %v896_v34 = vrot.slane %v874_v1, %v752_v4  ;;  %v900_v3 = vrot.slane %v867_v59, %v754_v5  ;;  %v264_v2 = vld [vmem:[%s770_s27 + $0x70] sm:$0xff]  ;;  %v231_v13 = vld [vmem:[%s764_s24 + $0x68] sm:$0xff] }
  0x1d   : > { %582 = vst [vmem:[%s857_s30 + $0x20] sm:$0xff] %v550_v20  ;;  %v552_v36 = vmax.f32 %v520_v25, 0.0  ;;  %v374_v39 = vmul.f32 %v888_v27, %v258_v19  ;;  %v908_v41 = vrot.slane %v874_v1, %v754_v5  ;;  %v912_v4 = vrot.slane %v867_v59, %v756_v6 }
  0x1e   : > { %583 = vst [vmem:[%s857_s30 + $0x28] sm:$0xff] %v551_v29  ;;  %v521_v43 = vadd.f32 %v884_v26, %v405_v32  ;;  %v375_v45 = vmul.f32 %v900_v3, %v259_v28  ;;  %v921_v47 = vrot.slane %v874_v1, %v756_v6  ;;  %v925_v5 = vrot.slane %v867_v59, %v758_v7  ;;  %v232_v32 = vld [vmem:[%s764_s24 + $0x70] sm:$0xff] }
  0x1f   : > { %584 = vst [vmem:[%s857_s30 + $0x30] sm:$0xff] %v552_v36  ;;  %v406_v50 = vadd.f32 %v374_v39, %v226_v33  ;;  %v376_v51 = vmul.f32 %v912_v4, %v260_v35  ;;  %v933_v53 = vrot.slane %v874_v1, %v758_v7  ;;  %v937_v6 = vrot.slane %v867_v59, %v772_v8  ;;  %v266_v33 = vld [vmem:[%s770_s27 + $0x80] sm:$0xff] }
  0x20   : > { %v553_v54 = vmax.f32 %v521_v43, 0.0  ;;  %v407_v55 = vadd.f32 %v375_v45, %v227_v40  ;;  %v377_v56 = vmul.f32 %v925_v5, %v261_v42  ;;  %v943_v60 = vrot.slane %v874_v1, %v772_v8  ;;  %v265_v40 = vld [vmem:[%s770_s27 + $0x78] sm:$0xff]  ;;  %v267_v42 = vld [vmem:[%s770_s27 + $0x88] sm:$0xff] }
  0x21   : > { %v522_v62 = vadd.f32 %v896_v34, %v406_v50  ;;  %v408_v7 = vadd.f32 %v376_v51, %v228_v46  ;;  %v378_v63 = vmul.f32 %v937_v6, %v262_v48  ;;  %v950_v0 = vrot.slane %v867_v59, %v774_v9  ;;  %v234_v50 = vld [vmem:[%s764_s24 + $0x80] sm:$0xff]  ;;  %v268_v51 = vld [vmem:[%s770_s27 + $0x90] sm:$0xff] }
  0x22   : > { %585 = vst [vmem:[%s857_s30 + $0x38] sm:$0xff] %v553_v54  ;;  %v523_v12 = vadd.f32 %v908_v41, %v407_v55  ;;  %v409_v8 = vadd.f32 %v377_v56, %v229_v52  ;;  %v958_v18 = vrot.slane %v874_v1, %v774_v9  ;;  %v962_v19 = vrot.slane %v867_v59, %v776_v10  ;;  %v233_v55 = vld [vmem:[%s764_s24 + $0x78] sm:$0xff] }
  0x23   : > { %v554_v20 = vmax.f32 %v522_v62, 0.0  ;;  %v524_v25 = vadd.f32 %v921_v47, %v408_v7  ;;  %v410_v28 = vadd.f32 %v378_v63, %v230_v57  ;;  %v379_v29 = vmul.f32 %v950_v0, %v263_v61  ;;  %v270_v61 = vld [vmem:[%s770_s27 + $0xa0] sm:$0xff] }
  0x24   : > { %v555_v35 = vmax.f32 %v523_v12, 0.0  ;;  %v525_v9 = vadd.f32 %v933_v53, %v409_v8  ;;  %v380_v36 = vmul.f32 %v962_v19, %v264_v2  ;;  %v972_v39 = vrot.slane %v874_v1, %v776_v10  ;;  %v269_v10 = vld [vmem:[%s770_s27 + $0x98] sm:$0xff]  ;;  %v236_v12 = vld [vmem:[%s764_s24 + $0x90] sm:$0xff] }
  0x25   : > { %586 = vst [vmem:[%s857_s30 + $0x40] sm:$0xff] %v554_v20  ;;  %v556_v43 = vmax.f32 %v524_v25, 0.0  ;;  %v526_v45 = vadd.f32 %v943_v60, %v410_v28  ;;  %v411_v46 = vadd.f32 %v379_v29, %v231_v13  ;;  %v980_v48 = vrot.slane %v867_v59, %v778_v11  ;;  %v235_v59 = vld [vmem:[%s764_s24 + $0x88] sm:$0xff]  ;;  %v237_v8 = vld [vmem:[%s764_s24 + $0x98] sm:$0xff]  ;;  %v238_v20 = vld [vmem:[%s764_s24 + $0xa0] sm:$0xff] }
  0x26   : > { %587 = vst [vmem:[%s857_s30 + $0x48] sm:$0xff] %v555_v35  ;;  %v557_v52 = vmax.f32 %v525_v9, 0.0  ;;  %v412_v54 = vadd.f32 %v380_v36, %v232_v32  ;;  %v989_v56 = vrot.slane %v874_v1, %v778_v11  ;;  %v382_v57 = vmul.f32 %v783_v14, %v266_v33  ;;  %v271_v25 = vld [vmem:[%s770_s27 + $0xa8] sm:$0xff]  ;;  %v272_v33 = vld [vmem:[%s770_s27 + $0xb0] sm:$0xff] }
  0x27   : > { %588 = vst [vmem:[%s857_s30 + $0x50] sm:$0xff] %v556_v43  ;;  %v558_v62 = vmax.f32 %v526_v45, 0.0  ;;  %v527_v7 = vadd.f32 %v958_v18, %v411_v46  ;;  %v381_v63 = vmul.f32 %v980_v48, %v265_v40  ;;  %v383_v2 = vmul.f32 %v790_v16, %v267_v42  ;;  %v273_v46 = vld [vmem:[%s770_s27 + $0xb8] sm:$0xff] }
  0x28   : > { %589 = vst [vmem:[%s857_s30 + $0x58] sm:$0xff] %v557_v52  ;;  %v528_v11 = vadd.f32 %v972_v39, %v412_v54  ;;  %v414_v14 = vadd.f32 %v382_v57, %v234_v50  ;;  %v384_v1 = vmul.f32 %v800_v21, %v268_v51  ;;  %v385_v13 = vmul.f32 %v807_v23, %v269_v10  ;;  %v239_v23 = vld [vmem:[%s764_s24 + $0xa8] sm:$0xff] }
  0x29   : > { %590 = vst [vmem:[%s857_s30 + $0x60] sm:$0xff] %v558_v62  ;;  %v559_v28 = vmax.f32 %v527_v7, 0.0  ;;  %v413_v29 = vadd.f32 %v381_v63, %v233_v55  ;;  %v415_v16 = vadd.f32 %v383_v2, %v235_v59  ;;  %v386_v32 = vmul.f32 %v819_v30, %v270_v61  ;;  %v240_v30 = vld [vmem:[%s764_s24 + $0xb0] sm:$0xff]  ;;  %v275_v52 = vld [vmem:[%s770_s27 + $0xc8] sm:$0xff]  ;;  %v241_v59 = vld [vmem:[%s764_s24 + $0xb8] sm:$0xff] }
  0x2a   : > { %v560_v35 = vmax.f32 %v528_v11, 0.0  ;;  %v530_v9 = vadd.f32 %v787_v15, %v414_v14  ;;  %v416_v36 = vadd.f32 %v384_v1, %v236_v12  ;;  %v417_v21 = vadd.f32 %v385_v13, %v237_v8  ;;  %v276_v61 = vld [vmem:[%s770_s27 + $0xd0] sm:$0xff]  ;;  %v242_v63 = vld [vmem:[%s764_s24 + $0xc0] sm:$0xff]  ;;  %v243_v2 = vld [vmem:[%s764_s24 + $0xc8] sm:$0xff] }
  0x2b   : > { %591 = vst [vmem:[%s857_s30 + $0x68] sm:$0xff] %v559_v28  ;;  %v529_v40 = vadd.f32 %v989_v56, %v413_v29  ;;  %v531_v42 = vadd.f32 %v794_v17, %v415_v16  ;;  %v418_v43 = vadd.f32 %v386_v32, %v238_v20  ;;  %v387_v45 = vmul.f32 %v831_v37, %v271_v25  ;;  %v274_v17 = vld [vmem:[%s770_s27 + $0xc0] sm:$0xff]  ;;  %v244_v1 = vld [vmem:[%s764_s24 + $0xd0] sm:$0xff]  ;;  %v245_v13 = vld [vmem:[%s764_s24 + $0xd8] sm:$0xff] }
  0x2c   : > { %592 = vst [vmem:[%s857_s30 + $0x70] sm:$0xff] %v560_v35  ;;  %v562_v15 = vmax.f32 %v530_v9, 0.0  ;;  %v532_v50 = vadd.f32 %v804_v22, %v416_v36  ;;  %v533_v51 = vadd.f32 %v811_v24, %v417_v21  ;;  %v388_v10 = vmul.f32 %v841_v44, %v272_v33  ;;  %v277_v22 = vld [vmem:[%s770_s27 + $0xd8] sm:$0xff]  ;;  %v278_v12 = vld [vmem:[%s770_s27 + $0xe0] sm:$0xff]  ;;  %v280_v33 = vld [vmem:[%s770_s27 + $0xf0] sm:$0xff] }
  0x2d   : > { %v561_v54 = vmax.f32 %v529_v40, 0.0  ;;  %v563_v37 = vmax.f32 %v531_v42, 0.0  ;;  %v534_v55 = vadd.f32 %v823_v31, %v418_v43  ;;  %v419_v57 = vadd.f32 %v387_v45, %v239_v23  ;;  %v246_v29 = vld [vmem:[%s764_s24 + $0xe0] sm:$0xff]  ;;  %v248_v42 = vld [vmem:[%s764_s24 + $0xf0] sm:$0xff]  ;;  %v281_v43 = vld [vmem:[%s770_s27 + $0xf8] sm:$0xff] }
  0x2e   : > { %594 = vst [vmem:[%s857_s30 + $0x80] sm:$0xff] %v562_v15  ;;  %v564_v24 = vmax.f32 %v532_v50, 0.0  ;;  %v565_v44 = vmax.f32 %v533_v51, 0.0  ;;  %v420_v62 = vadd.f32 %v388_v10, %v240_v30  ;;  %v389_v7 = vmul.f32 %v862_v58, %v273_v46  ;;  %v249_v15 = vld [vmem:[%s764_s24 + $0xf8] sm:$0xff] }
  0x2f   : > { %593 = vst [vmem:[%s857_s30 + $0x78] sm:$0xff] %v561_v54  ;;  %595 = vst [vmem:[%s857_s30 + $0x88] sm:$0xff] %v563_v37  ;;  %v566_v31 = vmax.f32 %v534_v55, 0.0  ;;  %v535_v8 = vadd.f32 %v835_v38, %v419_v57  ;;  %v390_v11 = vmul.f32 %v888_v27, %v274_v17  ;;  %v391_v14 = vmul.f32 %v900_v3, %v275_v52  ;;  %v279_v38 = vld [vmem:[%s770_s27 + $0xe8] sm:$0xff] }
  0x30   : > { %596 = vst [vmem:[%s857_s30 + $0x90] sm:$0xff] %v564_v24  ;;  %597 = vst [vmem:[%s857_s30 + $0x98] sm:$0xff] %v565_v44  ;;  %v536_v58 = vadd.f32 %v847_v49, %v420_v62  ;;  %v421_v20 = vadd.f32 %v389_v7, %v241_v59  ;;  %v392_v25 = vmul.f32 %v912_v4, %v276_v61  ;;  %v247_v4 = vld [vmem:[%s764_s24 + $0xe8] sm:$0xff] }
  0x31   : > { %v393_v28 = vmul.f32 %v925_v5, %v277_v22  ;;  %598 = vst [vmem:[%s857_s30 + $0xa0] sm:$0xff] %v566_v31  ;;  %v567_v27 = vmax.f32 %v535_v8, 0.0  ;;  %v422_v3 = vadd.f32 %v390_v11, %v242_v63  ;;  %v423_v16 = vadd.f32 %v391_v14, %v243_v2 }
  0x32   : > { %v394_v32 = vmul.f32 %v937_v6, %v278_v12  ;;  %v568_v49 = vmax.f32 %v536_v58, 0.0  ;;  %v537_v35 = vadd.f32 %v884_v26, %v421_v20  ;;  %v424_v9 = vadd.f32 %v392_v25, %v244_v1 }
  0x33   : > { %v425_v36 = vadd.f32 %v393_v28, %v245_v13  ;;  %599 = vst [vmem:[%s857_s30 + $0xa8] sm:$0xff] %v567_v27  ;;  %v538_v5 = vadd.f32 %v896_v34, %v422_v3  ;;  %v539_v21 = vadd.f32 %v908_v41, %v423_v16  ;;  %v395_v40 = vmul.f32 %v950_v0, %v279_v38 }
  0x34   : > { %v426_v23 = vadd.f32 %v394_v32, %v246_v29  ;;  %600 = vst [vmem:[%s857_s30 + $0xb0] sm:$0xff] %v568_v49  ;;  %v569_v6 = vmax.f32 %v537_v35, 0.0  ;;  %v540_v26 = vadd.f32 %v921_v47, %v424_v9  ;;  %v396_v30 = vmul.f32 %v962_v19, %v280_v33 }
  0x35   : > { %v541_v45 = vadd.f32 %v933_v53, %v425_v36  ;;  %v570_v34 = vmax.f32 %v538_v5, 0.0  ;;  %v571_v46 = vmax.f32 %v539_v21, 0.0  ;;  %v427_v0 = vadd.f32 %v395_v40, %v247_v4 }
  0x36   : > { %v542_v41 = vadd.f32 %v943_v60, %v426_v23  ;;  %601 = vst [vmem:[%s857_s30 + $0xb8] sm:$0xff] %v569_v6  ;;  %v572_v50 = vmax.f32 %v540_v26, 0.0  ;;  %v428_v10 = vadd.f32 %v396_v30, %v248_v42  ;;  %v397_v47 = vmul.f32 %v980_v48, %v281_v43 }
  0x37   : > { %v573_v51 = vmax.f32 %v541_v45, 0.0  ;;  %602 = vst [vmem:[%s857_s30 + $0xc0] sm:$0xff] %v570_v34  ;;  %603 = vst [vmem:[%s857_s30 + $0xc8] sm:$0xff] %v571_v46  ;;  %v543_v19 = vadd.f32 %v958_v18, %v427_v0 }
  0x38   : > { %v574_v53 = vmax.f32 %v542_v41, 0.0  ;;  %604 = vst [vmem:[%s857_s30 + $0xd0] sm:$0xff] %v572_v50  ;;  %v544_v60 = vadd.f32 %v972_v39, %v428_v10  ;;  %v429_v17 = vadd.f32 %v397_v47, %v249_v15 }
  0x39   : > { %605 = vst [vmem:[%s857_s30 + $0xd8] sm:$0xff] %v573_v51  ;;  %v575_v52 = vmax.f32 %v543_v19, 0.0 }
  0x3a   : > { %606 = vst [vmem:[%s857_s30 + $0xe0] sm:$0xff] %v574_v53  ;;  %v576_v54 = vmax.f32 %v544_v60, 0.0  ;;  %v545_v37 = vadd.f32 %v989_v56, %v429_v17 }
  0x3b   : > { %607 = vst [vmem:[%s857_s30 + $0xe8] sm:$0xff] %v575_v52 }
  0x3c   : > { %608 = vst [vmem:[%s857_s30 + $0xf0] sm:$0xff] %v576_v54  ;;  %v577_v55 = vmax.f32 %v545_v37, 0.0 }
  0x3e   : > { %609 = vst [vmem:[%s857_s30 + $0xf8] sm:$0xff] %v577_v55 }
  0x3f PF: > { %s14_s15 = sadd.s32 1, %s707_s15  }
  0x40   : > { %p11_p4 = scmp.ge.s32.totalorder %s14_s15, 4  }
  0x42   :  { %13 = sbr.rel (!%p11_p4) target bundleno = 1 (0x1), region = 69 }

// kernel: resblock_forward.3
= control target key start
LH: loop header
LB: loop body
LE: loop exit
PB: predicated region body
PF: predicated region fallthrough
CT: control target
= control target key end

     0   :  { %s6905_s15 = smov 0   ;;  %s8186_s0 = inlined_call_operand.vmem [shape: bf16[2,16,16,128], index: 0, kind: input, shape index: {}]   ;;  %s8187_s1 = inlined_call_operand.vmem [shape: bf16[1152,128], index: 1, kind: input, shape index: {}]   ;;  %s8188_s2 = inlined_call_operand.vmem [shape: f32[2,16,16,128], index: 2, kind: output, shape index: {0}]   ;;  %s8189_s3 = inlined_call_operand.vmem [shape: f32[2,1,128], index: 3, kind: output, shape index: {1}]   ;;  %s8190_s4 = inlined_call_operand.vmem [shape: f32[2,1,128], index: 4, kind: output, shape index: {2}]  }
   0x1 LB: > { %s5768_s16 = sadd.s32 4294967295, %s6877_s15   ;;  %p5772_p0 = scmp.ge.s32.totalorder %s6877_s15, 1  ;;  %s6877_s15 = sphi %s6905_s15, %s15_s15  }
   0x2   : > { %p167_p1 = scmp.lt.s32.totalorder %s6877_s15, 3 }
   0x4   : > { %p168_p2 = pnand %p5772_p0, %p167_p1 }
   0x6   : > { %171 = sbr.rel (%p168_p2) target bundleno = 753 (0x2f1), region = 28 }
   0xb   : > { %v6590_v0 = vld [vmem:[%s8187_s1 + $0x78] sm:$0xff]   ;;  %v6879_v2 = vmov 0   ;;  %v6592_v3 = vld [vmem:[%s8187_s1 + $0x70] sm:$0xff]   ;;  %v6594_v5 = vld [vmem:[%s8187_s1 + $0x68] sm:$0xff]   ;;  %p199_p3 = scmp.lt.s32.totalorder %s5768_s16, 1  ;;  %vm626_vm0 = vcmask 1043456  }
   0xc   : > { %v6591_v1 = vld [vmem:[%s8187_s1 + $0x38] sm:$0xff]   ;;  %216 = vst [vmem:[#allocation2] sm:$0xf] %v6879_v2  ;;  %217 = vst [vmem:[#allocation2 + $0x4] sm:$0xf] %v6879_v2  ;;  %6045 = vmatprep.subr.bf16.mxu0 %v6590_v0  ;;  %6565 = vmatprep.subr.bf16.mxu1 %v6590_v0  ;;  %v6593_v4 = vld [vmem:[%s8187_s1 + $0x30] sm:$0xff]  }
   0xd   : > { %218 = vst [vmem:[#allocation2 + $0x8] sm:$0x1] %v6879_v2  ;;  %219 = vst [vmem:[#allocation2 + $0xc] sm:$0xf] %v6879_v2  ;;  %6046 = vmatpush3.bf16.msra.mxu0 %v6591_v1  ;;  %6573 = vmatpush3.bf16.msra.mxu1 %v6591_v1  ;;  %v6595_v6 = vld [vmem:[%s8187_s1 + $0x28] sm:$0xff]   ;;  %v6596_v7 = vld [vmem:[%s8187_s1 + $0x60] sm:$0xff]  }
   0xe   : > { %220 = vst [vmem:[#allocation2 + $0x10] sm:$0xf] %v6879_v2  ;;  %221 = vst [vmem:[#allocation2 + $0x14] sm:$0x1] %v6879_v2  ;;  %6047 = vmatprep.subr.bf16.mxu0 %v6592_v3  ;;  %6566 = vmatprep.subr.bf16.mxu1 %v6592_v3  ;;  %s8227_s16 = smov (!%p199_p3, %s5768_s16), 1  ;;  %v6597_v8 = vld [vmem:[%s8187_s1 + $0x20] sm:$0xff]  }
   0xf   : > { %222 = vst [vmem:[#allocation2 + $0x18] sm:$0xf] %v6879_v2  ;;  %223 = vst [vmem:[#allocation2 + $0x1c] sm:$0xf] %v6879_v2  ;;  %v6598_v9 = vld [vmem:[%s8187_s1 + $0x58] sm:$0xff]   ;;  %s6043_s9 = sshll.u32 %s8227_s16, 7  ;;  %s211_s7 = scalar_lea.vmem %s8189_s3, %s8227_s16 }
  0x10   : > { %224 = vst [vmem:[#allocation2 + $0x20] sm:$0x1] %v6879_v2  ;;  %225 = vst [vmem:[#allocation2 + $0x24] sm:$0xf] %v6879_v2  ;;  %v6599_v10 = vld [vmem:[%s8187_s1 + $0x18] sm:$0xff]   ;;  %v6600_v11 = vld [vmem:[%s8187_s1 + $0x50] sm:$0xff]   ;;  %s6956_s18 = scalar_lea.vmem %s8186_s0, %s6043_s9  ;;  %s214_s10 = scalar_lea.vmem %s8190_s4, %s8227_s16 }
  0x11   : > { %226 = vst [vmem:[#allocation2 + $0x28] sm:$0xf] %v6879_v2  ;;  %227 = vst [vmem:[#allocation2 + $0x2c] sm:$0x1] %v6879_v2  ;;  %6048 = vmatpush3.bf16.msra.mxu0 %v6593_v4  ;;  %6574 = vmatpush3.bf16.msra.mxu1 %v6593_v4  ;;  %vm855_vm1 = vsmask.f32 3328 }
  0x12   : > { %228 = vst [vmem:[#allocation2 + $0x30] sm:$0xf] %v6879_v2  ;;  %229 = vst [vmem:[#allocation2 + $0x34] sm:$0xf] %v6879_v2  ;;  %6049 = vmatprep.subr.bf16.mxu0 %v6594_v5  ;;  %6567 = vmatprep.subr.bf16.mxu1 %v6594_v5  ;;  %v6601_v17 = vld [vmem:[%s8187_s1 + $0x10] sm:$0xff]   ;;  %v6602_v25 = vld [vmem:[%s8187_s1 + $0x48] sm:$0xff]  }
  0x13   : > { %230 = vst [vmem:[#allocation2 + $0x38] sm:$0x1] %v6879_v2  ;;  %231 = vst [vmem:[#allocation2 + $0x3c] sm:$0xf] %v6879_v2  ;;  %v743_v12 = vld [vmem:[#allocation2] sm:$0xf] }
  0x14   : > { %232 = vst [vmem:[#allocation2 + $0x40] sm:$0xf] %v6879_v2  ;;  %233 = vst [vmem:[#allocation2 + $0x44] sm:$0x1] %v6879_v2  ;;  %v744_v13 = vld [vmem:[#allocation2 + $0x4] sm:$0xf] }
  0x15   : > { %234 = vst [vmem:[#allocation2 + $0x48] sm:$0xf] %v6879_v2  ;;  %235 = vst [vmem:[#allocation2 + $0x4c] sm:$0xf] %v6879_v2  ;;  %6050 = vmatpush3.bf16.msra.mxu0 %v6595_v6  ;;  %6575 = vmatpush3.bf16.msra.mxu1 %v6595_v6  ;;  %v807_v14 = vld [vmem:[#allocation2] sm:$0xf] }
  0x16   : > { %236 = vst [vmem:[#allocation2 + $0x50] sm:$0x1] %v6879_v2  ;;  %237 = vst [vmem:[#allocation2 + $0x54] sm:$0xf] %v6879_v2  ;;  %6051 = vmatprep.subr.bf16.mxu0 %v6596_v7  ;;  %6568 = vmatprep.subr.bf16.mxu1 %v6596_v7  ;;  %v808_v15 = vld [vmem:[#allocation2 + $0x4] sm:$0xf] }
  0x17   : > { %238 = vst [vmem:[#allocation2 + $0x58] sm:$0xf] %v6879_v2  ;;  %239 = vst [vmem:[#allocation2 + $0x5c] sm:$0x1] %v6879_v2  ;;  %v809_v16 = vld [vmem:[#allocation2 + $0x8] sm:$0x1] }
  0x18   : > { %240 = vst [vmem:[#allocation2 + $0x60] sm:$0xf] %v6879_v2  ;;  %241 = vst [vmem:[#allocation2 + $0x64] sm:$0xf] %v6879_v2  ;;  %vm856_vm2 = vsmask.f32 7440 }
  0x19   : > { %242 = vst [vmem:[#allocation2 + $0x68] sm:$0x1] %v6879_v2  ;;  %243 = vst [vmem:[#allocation2 + $0x6c] sm:$0xf] %v6879_v2  ;;  %6052 = vmatpush3.bf16.msra.mxu0 %v6597_v8  ;;  %6576 = vmatpush3.bf16.msra.mxu1 %v6597_v8  ;;  %v859_v18 = vshrl.u32 %v807_v14, 16  ;;  %v862_v19 = vshll.u32 %v807_v14, 16 }
  0x1a   : > { %244 = vst [vmem:[#allocation2 + $0x70] sm:$0xf] %v6879_v2  ;;  %245 = vst [vmem:[#allocation2 + $0x74] sm:$0x1] %v6879_v2  ;;  %6053 = vmatprep.subr.bf16.mxu0 %v6598_v9  ;;  %6569 = vmatprep.subr.bf16.mxu1 %v6598_v9  ;;  %v868_v20 = vshll.u32 %v808_v15, 16  ;;  %v872_v21 = vshrl.u32 %v808_v15, 16 }
  0x1b   : > { %246 = vst [vmem:[#allocation2 + $0x78] sm:$0xf] %v6879_v2  ;;  %247 = vst [vmem:[#allocation2 + $0x7c] sm:$0xf] %v6879_v2  ;;  %v878_v22 = vshll.u32 %v809_v16, 16  ;;  %v861_v26 = vrot.slane %v859_v18, 4 }
  0x1c   : > { %248 = vst [vmem:[#allocation2 + $0x80] sm:$0x1] %v6879_v2  ;;  %249 = vst [vmem:[#allocation2 + $0x84] sm:$0xf] %v6879_v2  ;;  %v292_v23 = vld [vmem:[%s6956_s18 + $0x58] sm:$0xf] }
  0x1d   : > { %250 = vst [vmem:[#allocation2 + $0x88] sm:$0xf] %v6879_v2  ;;  %251 = vst [vmem:[#allocation2 + $0x8c] sm:$0x1] %v6879_v2  ;;  %6054 = vmatpush3.bf16.msra.mxu0 %v6599_v10  ;;  %6577 = vmatpush3.bf16.msra.mxu1 %v6599_v10  ;;  %v293_v24 = vld [vmem:[%s6956_s18 + $0x5c] sm:$0xf] }
  0x1e   : > { %252 = vst [vmem:[#allocation2 + $0x90] sm:$0xf] %v6879_v2  ;;  %253 = vst [vmem:[#allocation2 + $0x94] sm:$0xf] %v6879_v2  ;;  %6055 = vmatprep.subr.bf16.mxu0 %v6600_v11  ;;  %6570 = vmatprep.subr.bf16.mxu1 %v6600_v11  ;;  %v864_v27 = vrot.slane %v862_v19, 5  ;;  %v870_v28 = vrot.slane %v868_v20, 5 }
  0x1f   : > { %254 = vst [vmem:[#allocation2 + $0x98] sm:$0x1] %v6879_v2  ;;  %255 = vst [vmem:[#allocation2 + $0x9c] sm:$0xf] %v6879_v2  ;;  %vm633_vm3 = vcmask 1040384   ;;  %v6603_v29 = vld [vmem:[%s8187_s1 + $0x8] sm:$0xff]  }
  0x20   : > { %256 = vst [vmem:[#allocation2 + $0xa0] sm:$0xf] %v6879_v2  ;;  %257 = vst [vmem:[#allocation2 + $0xa4] sm:$0x1] %v6879_v2  ;;  %v874_v30 = vrot.slane %v872_v21, 4  ;;  %v493_v31 = vshrl.u32 %v292_v23, 16  ;;  %v865_v34 = vor.u32 %v864_v27, %v861_v26 }
  0x21   : > { %258 = vst [vmem:[#allocation2 + $0xa8] sm:$0xf] %v6879_v2  ;;  %259 = vst [vmem:[#allocation2 + $0xac] sm:$0xf] %v6879_v2  ;;  %vm302_vm4 = vsmask.f32 256  ;;  %6056 = vmatpush3.bf16.msra.mxu0 %v6601_v17  ;;  %6578 = vmatpush3.bf16.msra.mxu1 %v6601_v17 }
  0x22   : > { %260 = vst [vmem:[#allocation2 + $0xb0] sm:$0x1] %v6879_v2  ;;  %261 = vst [vmem:[#allocation2 + $0xb4] sm:$0xf] %v6879_v2  ;;  %vm303_vm5 = vsmask.f32 4368  ;;  %v875_v39 = vor.u32 %v874_v30, %v870_v28  ;;  %6057 = vmatprep.subr.bf16.mxu0 %v6602_v25  ;;  %6571 = vmatprep.subr.bf16.mxu1 %v6602_v25 }
  0x23   : > { %262 = vst [vmem:[#allocation2 + $0xb8] sm:$0xf] %v6879_v2  ;;  %263 = vst [vmem:[#allocation2 + $0xbc] sm:$0x1] %v6879_v2  ;;  %v6604_v32 = vld [vmem:[%s8187_s1 + $0x40] sm:$0xff]   ;;  %v496_v35 = vshll.u32 %v292_v23, 16 }
  0x24   : > { %264 = vst [vmem:[#allocation2 + $0xc0] sm:$0xf] %v6879_v2  ;;  %265 = vst [vmem:[#allocation2 + $0xc4] sm:$0xf] %v6879_v2  ;;  %v501_v36 = vshrl.u32 %v293_v24, 16  ;;  %v504_v37 = vshll.u32 %v293_v24, 16 }
  0x25   : > { %266 = vst [vmem:[#allocation2 + $0xc8] sm:$0x1] %v6879_v2  ;;  %267 = vst [vmem:[#allocation2 + $0xcc] sm:$0xf] %v6879_v2  ;;  %v708_v38 = vld [vmem:[#allocation2 + $0x90] sm:$0xf]  ;;  %6058 = vmatpush3.bf16.msra.mxu0 %v6603_v29  ;;  %6579 = vmatpush3.bf16.msra.mxu1 %v6603_v29 }
  0x26   : > { %268 = vst [vmem:[#allocation2 + $0xd0] sm:$0xf] %v6879_v2  ;;  %269 = vst [vmem:[#allocation2 + $0xd4] sm:$0x1] %v6879_v2  ;;  %v880_v40 = vrot.slane %v878_v22, 5  ;;  %v495_v41 = vrot.slane %v493_v31, 7  ;;  %6059 = vmatprep.subr.bf16.mxu0 %v6604_v32  ;;  %6572 = vmatprep.subr.bf16.mxu1 %v6604_v32 }
  0x27   : > { %775 = vst [vmem:[#allocation3] sm:$0xf] %v743_v12  ;;  %776 = vst [vmem:[#allocation3 + $0x24] sm:$0xf] %v744_v13  ;;  %vm627_vm7 = vsmask.f32 7938 }
  0x28   : > { %vm6974_vm6 = vmor %vm855_vm1, %vm856_vm2  ;;  %v712_v43 = vld [vmem:[#allocation2 + $0x98] sm:$0x1]  ;;  %v866_v44 = vrot.slane %v865_v34, 4  ;;  %v503_v45 = vrot.slane %v501_v36, 7  ;;  %v876_v47 = vrot.slane %v875_v39, 4  ;;  %v498_v49 = vor.u32 %v496_v35, %v495_v41  ;;  %v6605_v56 = vld [vmem:[%s8187_s1] sm:$0xff]  }
  0x29   : > { %vm6980_vm8 = vmand %vm633_vm3, %vm302_vm4  ;;  %v499_v50 = vrot.slane %v495_v41, 4  ;;  %v270_v54 = vld [vmem:[%s6956_s18] sm:$0xf]  ;;  %v271_v55 = vld [vmem:[%s6956_s18 + $0x4] sm:$0xf]  ;;  %6060 = vmatpush3.bf16.msra.mxu0 %v6605_v56  ;;  %6580 = vmatpush3.bf16.msra.mxu1 %v6605_v56  ;;  %vm1402_vm11 = vcmask 1042432  }
  0x2a   : > { %vm6985_vm9 = vmand %vm626_vm0, %vm627_vm7  ;;  %v871_v51 = vsel %vm6974_vm6, %v866_v44, %v870_v28  ;;  %v506_v52 = vor.u32 %v504_v37, %v503_v45  ;;  %v508_v53 = vrot.slane %v503_v45, 4  ;;  %v881_v57 = vsel %vm6974_vm6, %v876_v47, %v880_v40  ;;  %v6612_v59 = vld [vmem:[%s8187_s1 + $0xf8] sm:$0xff]   ;;  %v629_v3 = vld [vmem:[#allocation2 + $0xc] sm:$0xf] }
  0x2b   : > { %vm6991_vm10 = vmor %vm302_vm4, %vm303_vm5  ;;  %1274 = vst [vmem:[#allocation3 + $0x4] sm:$0xf] %v871_v51  ;;  %v709_v58 = vsel %vm6985_vm9, %v498_v49, %v708_v38  ;;  %v6613_v60 = vld [vmem:[%s8187_s1 + $0x178] sm:$0xff]   ;;  %v306_v61 = vshrl.u32 %v270_v54, 16  ;;  %v309_v62 = vshll.u32 %v270_v54, 16  ;;  %v314_v1 = vshrl.u32 %v271_v55, 16  ;;  %6157 = vmatprep.subr.bf16.mxu1 %v6612_v59 }
  0x2c   : > { %1275 = vst [vmem:[#allocation3 + $0x28] sm:$0xf] %v881_v57  ;;  %v507_v63 = vsel %vm6991_vm10, %v499_v50, %v506_v52  ;;  %710 = vst [vmem:[#allocation2 + $0x90] sm:$0xf] %v709_v58  ;;  %v713_v0 = vsel %vm6980_vm8, %v508_v53, %v712_v43  ;;  %v317_v2 = vshll.u32 %v271_v55, 16  ;;  %6269 = vmatprep.subr.bf16.mxu0 %v6613_v60  ;;  %v6617_v14 = vld [vmem:[%s8187_s1 + $0x138] sm:$0xff]  }
  0x2d   : > { %711 = vst [vmem:[#allocation2 + $0x94] sm:$0xf] %v507_v63  ;;  %714 = vst [vmem:[#allocation2 + $0x98] sm:$0x1] %v713_v0  ;;  %v308_v4 = vrot.slane %v306_v61, 7  ;;  %v316_v6 = vrot.slane %v314_v1, 7 }
  0x2e   : > { %v635_v5 = vld [vmem:[#allocation2 + $0x14] sm:$0x1]  ;;  %v294_v11 = vld [vmem:[%s6956_s18 + $0x60] sm:$0xf]  ;;  %v295_v12 = vld [vmem:[%s6956_s18 + $0x64] sm:$0xf] }
  0x2f   : > { %v311_v7 = vor.u32 %v309_v62, %v308_v4  ;;  %v312_v8 = vrot.slane %v308_v4, 4  ;;  %v319_v9 = vor.u32 %v317_v2, %v316_v6  ;;  %v321_v10 = vrot.slane %v316_v6, 4  ;;  %v715_v21 = vld [vmem:[#allocation2 + $0x9c] sm:$0xf]  ;;  %v6630_v22 = vld [vmem:[%s8187_s1 + $0x170] sm:$0xff]  }
  0x30   : > { %v510_v15 = vshrl.u32 %v294_v11, 16  ;;  %v513_v16 = vshll.u32 %v294_v11, 16  ;;  %v518_v17 = vshrl.u32 %v295_v12, 16  ;;  %v521_v20 = vshll.u32 %v295_v12, 16  ;;  %v6606_v23 = vld [vmem:[#allocation3] ss:$36 sps:$4 sm:$0xff]  }
  0x31   : > { %v630_v13 = vsel %vm6985_vm9, %v311_v7, %v629_v3  ;;  %v320_v18 = vsel %vm6991_vm10, %v312_v8, %v319_v9  ;;  %v636_v19 = vsel %vm6980_vm8, %v321_v10, %v635_v5  ;;  %v272_v44 = vld [vmem:[%s6956_s18 + $0x8] sm:$0xf]  ;;  %v6632_v45 = vld [vmem:[%s8187_s1 + $0x130] sm:$0xff]   ;;  %v719_v2 = vld [vmem:[#allocation2 + $0xa4] sm:$0x1]  ;;  %vm1403_vm12 = vcmask 1046532  }
  0x32   : > { %631 = vst [vmem:[#allocation2 + $0xc] sm:$0xf] %v630_v13  ;;  %632 = vst [vmem:[#allocation2 + $0x10] sm:$0xf] %v320_v18  ;;  %v512_v25 = vrot.slane %v510_v15, 7  ;;  %v520_v41 = vrot.slane %v518_v17, 7 }
  0x33   : > { %v6608_v24 = vld [vmem:[#allocation3 + $0x4] ss:$36 sps:$4 sm:$0xff]   ;;  %637 = vst [vmem:[#allocation2 + $0x14] sm:$0x1] %v636_v19  ;;  %v767_v26 = vld [vmem:[#allocation2 + $0x90] sm:$0xf]  ;;  %vm7172_vm13 = vmor %vm1402_vm11, %vm1403_vm12 }
  0x34   : > { %v768_v27 = vld [vmem:[#allocation2 + $0x94] sm:$0xf]  ;;  %v843_v28 = vld [vmem:[#allocation2 + $0x90] sm:$0xf]  ;;  %4750 = vmatprep.mubr.bf16.mxu0 %v6608_v24  ;;  %799 = vst [vmem:[#allocation3 + $0x360] sm:$0xf] %v767_v26  ;;  %v515_v34 = vor.u32 %v513_v16, %v512_v25  ;;  %v523_v55 = vor.u32 %v521_v20, %v520_v41 }
  0x35   : > { %800 = vst [vmem:[#allocation3 + $0x384] sm:$0xf] %v768_v27  ;;  %v844_v29 = vld [vmem:[#allocation2 + $0x94] sm:$0xf]  ;;  %v845_v30 = vld [vmem:[#allocation2 + $0x98] sm:$0x1]  ;;  %4751 = vmatmul.mubr.bf16.vlgmr.msra.gmra.mxu0 %v6606_v23 }
  0x36   : > { %v1147_v31 = vshrl.u32 %v843_v28, 16  ;;  %v1150_v32 = vshll.u32 %v843_v28, 16  ;;  %v1156_v35 = vshll.u32 %v844_v29, 16  ;;  %v1160_v36 = vshrl.u32 %v844_v29, 16  ;;  %6270 = vmatpush3.bf16.msra.mxu0 %v6617_v14  ;;  %v273_v7 = vld [vmem:[%s6956_s18 + $0xc] sm:$0xf] }
  0x37   : > { %v1166_v37 = vshll.u32 %v845_v30, 16  ;;  %v516_v38 = vrot.slane %v512_v25, 4  ;;  %v716_v43 = vsel %vm6985_vm9, %v515_v34, %v715_v21  ;;  %v323_v51 = vshrl.u32 %v272_v44, 16  ;;  %6271 = vmatprep.subr.bf16.mxu0 %v6630_v22  ;;  %v638_v16 = vld [vmem:[#allocation2 + $0x18] sm:$0xf] }
  0x38   : > { %v1149_v39 = vrot.slane %v1147_v31, 4  ;;  %v1152_v40 = vrot.slane %v1150_v32, 5  ;;  %v1158_v47 = vrot.slane %v1156_v35, 5  ;;  %v1162_v49 = vrot.slane %v1160_v36, 4  ;;  %717 = vst [vmem:[#allocation2 + $0x9c] sm:$0xf] %v716_v43 }
  0x39   : > { %v1168_v50 = vrot.slane %v1166_v37, 5  ;;  %v745_v53 = vld [vmem:[#allocation2 + $0xc] sm:$0xf]  ;;  %v525_v56 = vrot.slane %v520_v41, 4  ;;  %v326_v57 = vshll.u32 %v272_v44, 16  ;;  %v524_v6 = vsel %vm6991_vm10, %v516_v38, %v523_v55  ;;  %v6616_v41 = vld [vmem:[%s8187_s1 + $0xb8] sm:$0xff]  }
  0x3a   : > { %v1153_v52 = vor.u32 %v1152_v40, %v1149_v39  ;;  %v810_v54 = vld [vmem:[#allocation2 + $0xc] sm:$0xf]  ;;  %v1163_v58 = vor.u32 %v1162_v49, %v1158_v47  ;;  %v746_v59 = vld [vmem:[#allocation2 + $0x10] sm:$0xf]  ;;  %777 = vst [vmem:[#allocation3 + $0x48] sm:$0xf] %v745_v53  ;;  %6272 = vmatpush3.bf16.msra.mxu0 %v6632_v45 }
  0x3b   : > { %v811_v60 = vld [vmem:[#allocation2 + $0x10] sm:$0xf]  ;;  %v812_v61 = vld [vmem:[#allocation2 + $0x14] sm:$0x1]  ;;  %778 = vst [vmem:[#allocation3 + $0x6c] sm:$0xf] %v746_v59  ;;  %v720_v15 = vsel %vm6980_vm8, %v525_v56, %v719_v2 }
  0x3c   : > { %v1154_v62 = vrot.slane %v1153_v52, 4  ;;  %v883_v63 = vshrl.u32 %v810_v54, 16  ;;  %v886_v0 = vshll.u32 %v810_v54, 16  ;;  %v892_v1 = vshll.u32 %v811_v60, 16  ;;  %718 = vst [vmem:[#allocation2 + $0xa0] sm:$0xf] %v524_v6 }
  0x3d   : > { %v1164_v3 = vrot.slane %v1163_v58, 4  ;;  %v896_v4 = vshrl.u32 %v811_v60, 16  ;;  %v902_v5 = vshll.u32 %v812_v61, 16  ;;  %721 = vst [vmem:[#allocation2 + $0xa4] sm:$0x1] %v720_v15  ;;  %v325_v20 = vrot.slane %v323_v51, 7 }
  0x3e   : > { %v1159_v8 = vsel %vm6974_vm6, %v1154_v62, %v1158_v47  ;;  %v885_v9 = vrot.slane %v883_v63, 4  ;;  %v888_v10 = vrot.slane %v886_v0, 5  ;;  %v894_v11 = vrot.slane %v892_v1, 5  ;;  %v642_v26 = vld [vmem:[#allocation2 + $0x20] sm:$0x1]  ;;  %v6646_v39 = vld [vmem:[%s8187_s1 + $0x168] sm:$0xff]  }
  0x3f   : > { %v1169_v12 = vsel %vm6974_vm6, %v1164_v3, %v1168_v50  ;;  %1298 = vst [vmem:[#allocation3 + $0x364] sm:$0xf] %v1159_v8  ;;  %v898_v13 = vrot.slane %v896_v4, 4  ;;  %v904_v14 = vrot.slane %v902_v5, 5  ;;  %v769_v18 = vld [vmem:[#allocation2 + $0x9c] sm:$0xf]  ;;  %v328_v28 = vor.u32 %v326_v57, %v325_v20  ;;  %6273 = vmatprep.subr.bf16.mxu0 %v6646_v39 }
  0x40   : > { %1299 = vst [vmem:[#allocation3 + $0x388] sm:$0xf] %v1169_v12  ;;  %v889_v17 = vor.u32 %v888_v10, %v885_v9  ;;  %v846_v19 = vld [vmem:[#allocation2 + $0x9c] sm:$0xf]  ;;  %v331_v21 = vshrl.u32 %v273_v7, 16  ;;  %v334_v25 = vshll.u32 %v273_v7, 16 }
  0x41   : > { %v899_v22 = vor.u32 %v898_v13, %v894_v11  ;;  %801 = vst [vmem:[#allocation3 + $0x3a8] sm:$0xf] %v769_v18  ;;  %v1171_v23 = vshrl.u32 %v846_v19, 16  ;;  %v1174_v24 = vshll.u32 %v846_v19, 16  ;;  %v329_v29 = vrot.slane %v325_v20, 4  ;;  %v6619_v47 = vld [vmem:[%s8187_s1 + $0xf0] sm:$0xff]  }
  0x42   : > { %v890_v27 = vrot.slane %v889_v17, 4  ;;  %v333_v30 = vrot.slane %v331_v21, 7  ;;  %v639_v38 = vsel %vm6985_vm9, %v328_v28, %v638_v16  ;;  %v6609_v53 = vld [vmem:[#allocation3 + $0x360] ss:$36 sps:$4 sm:$0xff]   ;;  %v296_v59 = vld [vmem:[%s6956_s18 + $0x68] sm:$0xf] }
  0x43   : > { %v900_v31 = vrot.slane %v899_v22, 4  ;;  %v1173_v32 = vrot.slane %v1171_v23, 4  ;;  %v1176_v34 = vrot.slane %v1174_v24, 5  ;;  %v770_v43 = vld [vmem:[#allocation2 + $0xa0] sm:$0xf]  ;;  %v527_v62 = vshrl.u32 %v296_v59, 16 }
  0x44   : > { %v895_v35 = vsel %vm6974_vm6, %v890_v27, %v894_v11  ;;  %v336_v36 = vor.u32 %v334_v25, %v333_v30  ;;  %v338_v37 = vrot.slane %v333_v30, 4  ;;  %v847_v44 = vld [vmem:[#allocation2 + $0xa0] sm:$0xf]  ;;  %640 = vst [vmem:[#allocation2 + $0x18] sm:$0xf] %v639_v38  ;;  %v530_v63 = vshll.u32 %v296_v59, 16 }
  0x45   : > { %v905_v40 = vsel %vm6974_vm6, %v900_v31, %v904_v14  ;;  %1276 = vst [vmem:[#allocation3 + $0x4c] sm:$0xf] %v895_v35  ;;  %v1177_v45 = vor.u32 %v1176_v34, %v1173_v32  ;;  %802 = vst [vmem:[#allocation3 + $0x3cc] sm:$0xf] %v770_v43  ;;  %v1180_v49 = vshll.u32 %v847_v44, 16  ;;  %v1184_v50 = vshrl.u32 %v847_v44, 16 }
  0x46   : > { %1277 = vst [vmem:[#allocation3 + $0x70] sm:$0xf] %v905_v40  ;;  %v337_v51 = vsel %vm6991_vm10, %v329_v29, %v336_v36  ;;  %v643_v52 = vsel %vm6980_vm8, %v338_v37, %v642_v26  ;;  %v848_v56 = vld [vmem:[#allocation2 + $0xa4] sm:$0x1]  ;;  %v297_v61 = vld [vmem:[%s6956_s18 + $0x6c] sm:$0xf] }
  0x47   : > { %v6611_v54 = vld [vmem:[#allocation3 + $0x364] ss:$36 sps:$4 sm:$0xff]   ;;  %v1178_v55 = vrot.slane %v1177_v45, 4  ;;  %641 = vst [vmem:[#allocation2 + $0x1c] sm:$0xf] %v337_v51  ;;  %v1182_v57 = vrot.slane %v1180_v49, 5 }
  0x48   : > { %644 = vst [vmem:[#allocation2 + $0x20] sm:$0x1] %v643_v52  ;;  %v1186_v58 = vrot.slane %v1184_v50, 4  ;;  %4846 = vmatprep.mubr.bf16.mxu1 %v6611_v54  ;;  %v1190_v60 = vshll.u32 %v848_v56, 16  ;;  %v6651_v0 = vld [vmem:[%s8187_s1 + $0x128] sm:$0xff]   ;;  %v6620_v1 = vld [vmem:[%s8187_s1 + $0xb0] sm:$0xff]  }
  0x49   : > { %4847 = vmatmul.mubr.bf16.vlgmr.msra.gmra.mxu1 %v6609_v53  ;;  %v1183_v2 = vsel %vm6974_vm6, %v1178_v55, %v1182_v57  ;;  %v6623_v4 = vld [vmem:[%s8187_s1 + $0xe8] sm:$0xff]   ;;  %v535_v5 = vshrl.u32 %v297_v61, 16  ;;  %v538_v6 = vshll.u32 %v297_v61, 16  ;;  %v529_v8 = vrot.slane %v527_v62, 7  ;;  %6274 = vmatpush3.bf16.msra.mxu0 %v6651_v0  ;;  %v6618_v14 = vld [vmem:[#allocation3 + $0x48] ss:$36 sps:$4 sm:$0xff]  }
  0x4a   : > { %v1187_v3 = vor.u32 %v1186_v58, %v1182_v57  ;;  %6158 = vmatpush3.bf16.msra.mxu1 %v6616_v41  ;;  %v1192_v7 = vrot.slane %v1190_v60, 5  ;;  %1300 = vst [vmem:[#allocation3 + $0x3ac] sm:$0xf] %v1183_v2  ;;  %v722_v9 = vld [vmem:[#allocation2 + $0xa8] sm:$0xf]  ;;  %v6629_v28 = vld [vmem:[%s8187_s1 + $0xe0] sm:$0xff]  }
  0x4b   : > { %6159 = vmatprep.subr.bf16.mxu1 %v6619_v47  ;;  %v747_v11 = vld [vmem:[#allocation2 + $0x18] sm:$0xf]  ;;  %v6627_v16 = vld [vmem:[%s8187_s1 + $0xa8] sm:$0xff]   ;;  %v532_v17 = vor.u32 %v530_v63, %v529_v8  ;;  %v274_v26 = vld [vmem:[%s6956_s18 + $0x10] sm:$0xf]  ;;  %v533_v29 = vrot.slane %v529_v8, 4 }
  0x4c   : > { %v1188_v10 = vrot.slane %v1187_v3, 4  ;;  %v813_v12 = vld [vmem:[#allocation2 + $0x18] sm:$0xf]  ;;  %779 = vst [vmem:[#allocation3 + $0x90] sm:$0xf] %v747_v11  ;;  %v537_v30 = vrot.slane %v535_v5, 7 }
  0x4d   : > { %v6614_v13 = vld [vmem:[#allocation3 + $0x4c] ss:$36 sps:$4 sm:$0xff]   ;;  %v907_v15 = vshrl.u32 %v813_v12, 16  ;;  %v910_v23 = vshll.u32 %v813_v12, 16  ;;  %v723_v31 = vsel %vm6985_vm9, %v532_v17, %v722_v9  ;;  %v275_v32 = vld [vmem:[%s6956_s18 + $0x14] sm:$0xf] }
  0x4e   : > { %v1193_v18 = vsel %vm6974_vm6, %v1188_v10, %v1192_v7  ;;  %v748_v19 = vld [vmem:[#allocation2 + $0x1c] sm:$0xf]  ;;  %4758 = vmatprep.mubr.bf16.mxu0 %v6614_v13  ;;  %6160 = vmatpush3.bf16.msra.mxu1 %v6620_v1  ;;  %v6631_v37 = vld [vmem:[%s8187_s1 + $0xa0] sm:$0xff]   ;;  %724 = vst [vmem:[#allocation2 + $0xa8] sm:$0xf] %v723_v31  ;;  %v340_v39 = vshrl.u32 %v274_v26, 16  ;;  %v540_v41 = vor.u32 %v538_v6, %v537_v30 }
  0x4f   : > { %v814_v20 = vld [vmem:[#allocation2 + $0x1c] sm:$0xf]  ;;  %v815_v21 = vld [vmem:[#allocation2 + $0x20] sm:$0x1]  ;;  %1301 = vst [vmem:[#allocation3 + $0x3d0] sm:$0xf] %v1193_v18  ;;  %4759 = vmatmul.mubr.bf16.gmra.mxu0 %v6618_v14  ;;  %6161 = vmatprep.subr.bf16.mxu1 %v6623_v4 }
  0x50   : > { %780 = vst [vmem:[#allocation3 + $0xb4] sm:$0xf] %v748_v19  ;;  %v909_v22 = vrot.slane %v907_v15, 4  ;;  %v916_v24 = vshll.u32 %v814_v20, 16  ;;  %v920_v25 = vshrl.u32 %v814_v20, 16  ;;  %v926_v27 = vshll.u32 %v815_v21, 16 }
  0x51   : > { %v912_v34 = vrot.slane %v910_v23, 5  ;;  %v726_v38 = vld [vmem:[#allocation2 + $0xb0] sm:$0x1]  ;;  %v542_v43 = vrot.slane %v537_v30, 4  ;;  %v343_v44 = vshll.u32 %v274_v26, 16  ;;  %v342_v50 = vrot.slane %v340_v39, 7 }
  0x52   : > { %v918_v35 = vrot.slane %v916_v24, 5  ;;  %v922_v36 = vrot.slane %v920_v25, 4  ;;  %v928_v40 = vrot.slane %v926_v27, 5  ;;  %v645_v45 = vld [vmem:[#allocation2 + $0x24] sm:$0xf]  ;;  %6162 = vmatpush3.bf16.msra.mxu1 %v6627_v16  ;;  %v348_v51 = vshrl.u32 %v275_v32, 16 }
  0x53   : > { %v913_v47 = vor.u32 %v912_v34, %v909_v22  ;;  %6163 = vmatprep.subr.bf16.mxu1 %v6629_v28  ;;  %v541_v52 = vsel %vm6991_vm10, %v533_v29, %v540_v41  ;;  %v727_v53 = vsel %vm6980_vm8, %v542_v43, %v726_v38  ;;  %v6635_v54 = vld [vmem:[%s8187_s1 + $0xd8] sm:$0xff]   ;;  %v351_v55 = vshll.u32 %v275_v32, 16  ;;  %v649_v60 = vld [vmem:[#allocation2 + $0x2c] sm:$0x1]  ;;  %v6626_v63 = vld [vmem:[#allocation3 + $0x3a8] ss:$36 sps:$4 sm:$0xff]  }
  0x54   : > { %v923_v49 = vor.u32 %v922_v36, %v918_v35  ;;  %725 = vst [vmem:[#allocation2 + $0xac] sm:$0xf] %v541_v52  ;;  %728 = vst [vmem:[#allocation2 + $0xb0] sm:$0x1] %v727_v53  ;;  %v345_v58 = vor.u32 %v343_v44, %v342_v50  ;;  %v346_v59 = vrot.slane %v342_v50, 4  ;;  %v6639_v61 = vld [vmem:[%s8187_s1 + $0x98] sm:$0xff]  }
  0x55   : > { %v914_v56 = vrot.slane %v913_v47, 4  ;;  %v350_v0 = vrot.slane %v348_v51, 7  ;;  %v6641_v1 = vld [vmem:[%s8187_s1 + $0xd0] sm:$0xff]   ;;  %v771_v7 = vld [vmem:[#allocation2 + $0xa8] sm:$0xf]  ;;  %v6653_v44 = vld [vmem:[%s8187_s1 + $0xc0] sm:$0xff]  }
  0x56   : > { %v924_v57 = vrot.slane %v923_v49, 4  ;;  %v6621_v62 = vld [vmem:[#allocation3 + $0x3ac] ss:$36 sps:$4 sm:$0xff]   ;;  %6164 = vmatpush3.bf16.msra.mxu1 %v6631_v37  ;;  %v646_v4 = vsel %vm6985_vm9, %v345_v58, %v645_v45  ;;  %v298_v5 = vld [vmem:[%s6956_s18 + $0x70] sm:$0xf] }
  0x57   : > { %v919_v2 = vsel %vm6974_vm6, %v914_v56, %v918_v35  ;;  %v299_v6 = vld [vmem:[%s6956_s18 + $0x74] sm:$0xf]  ;;  %4854 = vmatprep.mubr.bf16.mxu1 %v6621_v62  ;;  %v849_v8 = vld [vmem:[#allocation2 + $0xa8] sm:$0xf]  ;;  %6165 = vmatprep.subr.bf16.mxu1 %v6635_v54  ;;  %v353_v9 = vor.u32 %v351_v55, %v350_v0  ;;  %v355_v10 = vrot.slane %v350_v0, 4  ;;  %v544_v11 = vshrl.u32 %v298_v5, 16 }
  0x58   : > { %v929_v3 = vsel %vm6974_vm6, %v924_v57, %v928_v40  ;;  %1278 = vst [vmem:[#allocation3 + $0x94] sm:$0xf] %v919_v2  ;;  %647 = vst [vmem:[#allocation2 + $0x24] sm:$0xf] %v646_v4  ;;  %4855 = vmatmul.mubr.bf16.gmra.mxu1 %v6626_v63  ;;  %v1195_v12 = vshrl.u32 %v849_v8, 16  ;;  %v1198_v13 = vshll.u32 %v849_v8, 16 }
  0x59   : > { %1279 = vst [vmem:[#allocation3 + $0xb8] sm:$0xf] %v929_v3  ;;  %803 = vst [vmem:[#allocation3 + $0x3f0] sm:$0xf] %v771_v7  ;;  %v6642_v14 = vld [vmem:[%s8187_s1 + $0x90] sm:$0xff]   ;;  %v547_v15 = vshll.u32 %v298_v5, 16  ;;  %v354_v17 = vsel %vm6991_vm10, %v346_v59, %v353_v9  ;;  %v650_v18 = vsel %vm6980_vm8, %v355_v10, %v649_v60 }
  0x5a   : > { %v552_v16 = vshrl.u32 %v299_v6, 16  ;;  %v546_v19 = vrot.slane %v544_v11, 7  ;;  %v555_v20 = vshll.u32 %v299_v6, 16  ;;  %v729_v21 = vld [vmem:[#allocation2 + $0xb4] sm:$0xf]  ;;  %v1197_v22 = vrot.slane %v1195_v12, 4  ;;  %6166 = vmatpush3.bf16.msra.mxu1 %v6639_v61 }
  0x5b   : > { %v1200_v23 = vrot.slane %v1198_v13, 5  ;;  %648 = vst [vmem:[#allocation2 + $0x28] sm:$0xf] %v354_v17  ;;  %651 = vst [vmem:[#allocation2 + $0x2c] sm:$0x1] %v650_v18  ;;  %v6645_v26 = vld [vmem:[%s8187_s1 + $0xc8] sm:$0xff]   ;;  %6167 = vmatprep.subr.bf16.mxu1 %v6641_v1 }
  0x5c   : > { %v554_v24 = vrot.slane %v552_v16, 7  ;;  %v733_v25 = vld [vmem:[#allocation2 + $0xbc] sm:$0x1]  ;;  %v772_v27 = vld [vmem:[#allocation2 + $0xac] sm:$0xf]  ;;  %v549_v30 = vor.u32 %v547_v15, %v546_v19  ;;  %v6663_v37 = vld [vmem:[%s8187_s1 + $0x160] sm:$0xff]  }
  0x5d   : > { %v850_v28 = vld [vmem:[#allocation2 + $0xac] sm:$0xf]  ;;  %v851_v29 = vld [vmem:[#allocation2 + $0xb0] sm:$0x1]  ;;  %804 = vst [vmem:[#allocation3 + $0x414] sm:$0xf] %v772_v27  ;;  %v1201_v31 = vor.u32 %v1200_v23, %v1197_v22  ;;  %6275 = vmatprep.subr.bf16.mxu0 %v6663_v37 }
  0x5e   : > { %v1204_v32 = vshll.u32 %v850_v28, 16  ;;  %v1208_v34 = vshrl.u32 %v850_v28, 16  ;;  %v1214_v35 = vshll.u32 %v851_v29, 16  ;;  %v6650_v36 = vld [vmem:[%s8187_s1 + $0x88] sm:$0xff]   ;;  %v550_v38 = vrot.slane %v546_v19, 4  ;;  %6168 = vmatpush3.bf16.msra.mxu1 %v6642_v14  ;;  %v6654_v5 = vld [vmem:[%s8187_s1 + $0x80] sm:$0xff]  }
  0x5f   : > { %v557_v39 = vor.u32 %v555_v20, %v554_v24  ;;  %v559_v40 = vrot.slane %v554_v24, 4  ;;  %v730_v41 = vsel %vm6985_vm9, %v549_v30, %v729_v21  ;;  %v276_v43 = vld [vmem:[%s6956_s18 + $0x18] sm:$0xf]  ;;  %v1202_v47 = vrot.slane %v1201_v31, 4  ;;  %v6628_v50 = vld [vmem:[#allocation3 + $0x90] ss:$36 sps:$4 sm:$0xff]   ;;  %6169 = vmatprep.subr.bf16.mxu1 %v6645_v26 }
  0x60   : > { %v6624_v45 = vld [vmem:[#allocation3 + $0x94] ss:$36 sps:$4 sm:$0xff]   ;;  %v1206_v49 = vrot.slane %v1204_v32, 5  ;;  %731 = vst [vmem:[#allocation2 + $0xb4] sm:$0xf] %v730_v41  ;;  %v1210_v51 = vrot.slane %v1208_v34, 4 }
  0x61   : > { %v1216_v52 = vrot.slane %v1214_v35, 5  ;;  %v749_v53 = vld [vmem:[#allocation2 + $0x24] sm:$0xf]  ;;  %v558_v54 = vsel %vm6991_vm10, %v550_v38, %v557_v39  ;;  %v734_v55 = vsel %vm6980_vm8, %v559_v40, %v733_v25  ;;  %4766 = vmatprep.mubr.bf16.mxu0 %v6624_v45  ;;  %v7142_v58 = vld [vmem:[%s6956_s18 + $0x1c] sm:$0xf]  ;;  %v357_v59 = vshrl.u32 %v276_v43, 16 }
  0x62   : > { %v1207_v56 = vsel %vm6974_vm6, %v1202_v47, %v1206_v49  ;;  %781 = vst [vmem:[#allocation3 + $0xd8] sm:$0xf] %v749_v53  ;;  %v816_v57 = vld [vmem:[#allocation2 + $0x24] sm:$0xf]  ;;  %732 = vst [vmem:[#allocation2 + $0xb8] sm:$0xf] %v558_v54  ;;  %4767 = vmatmul.mubr.bf16.gmra.mxu0 %v6628_v50  ;;  %v1211_v61 = vor.u32 %v1210_v51, %v1206_v49  ;;  %6170 = vmatpush3.bf16.msra.mxu1 %v6650_v36 }
  0x63   : > { %735 = vst [vmem:[#allocation2 + $0xbc] sm:$0x1] %v734_v55  ;;  %v360_v60 = vshll.u32 %v276_v43, 16  ;;  %1302 = vst [vmem:[#allocation3 + $0x3f4] sm:$0xf] %v1207_v56  ;;  %v931_v1 = vshrl.u32 %v816_v57, 16  ;;  %6171 = vmatprep.subr.bf16.mxu1 %v6653_v44 }
  0x64   : > { %v750_v62 = vld [vmem:[#allocation2 + $0x28] sm:$0xf]  ;;  %v818_v0 = vld [vmem:[#allocation2 + $0x2c] sm:$0x1]  ;;  %v934_v2 = vshll.u32 %v816_v57, 16  ;;  %v6658_v6 = vld [vmem:[%s8187_s1 + $0x1f8] sm:$0xff]  }
  0x65   : > { %v817_v63 = vld [vmem:[#allocation2 + $0x28] sm:$0xf]  ;;  %782 = vst [vmem:[#allocation3 + $0xfc] sm:$0xf] %v750_v62  ;;  %v1212_v7 = vrot.slane %v1211_v61, 4  ;;  %v950_v8 = vshll.u32 %v818_v0, 16 }
  0x66   : > { %v940_v3 = vshll.u32 %v817_v63, 16  ;;  %v944_v4 = vshrl.u32 %v817_v63, 16  ;;  %v7150_v9 = vrot.slane %v357_v59, 7  ;;  %v365_v10 = vshrl.u32 %v7142_v58, 16  ;;  %v652_v11 = vld [vmem:[#allocation2 + $0x30] sm:$0xf]  ;;  %6172 = vmatpush3.bf16.msra.mxu1 %v6654_v5 }
  0x67   : > { %v933_v12 = vrot.slane %v931_v1, 4  ;;  %v936_v13 = vrot.slane %v934_v2, 5  ;;  %v1217_v16 = vsel %vm6974_vm6, %v1212_v7, %v1216_v52  ;;  %v952_v17 = vrot.slane %v950_v8, 5  ;;  %v773_v18 = vld [vmem:[#allocation2 + $0xb4] sm:$0xf]  ;;  %6381 = vmatprep.subr.bf16.mxu1 %v6658_v6  ;;  %v6664_v36 = vld [vmem:[%s8187_s1 + $0x120] sm:$0xff]  }
  0x68   : > { %v942_v14 = vrot.slane %v940_v3, 5  ;;  %v946_v15 = vrot.slane %v944_v4, 4  ;;  %v852_v19 = vld [vmem:[#allocation2 + $0xb4] sm:$0xf]  ;;  %v362_v20 = vor.u32 %v360_v60, %v7150_v9  ;;  %v363_v21 = vrot.slane %v7150_v9, 4  ;;  %6276 = vmatpush3.bf16.msra.mxu0 %v6664_v36  ;;  %v6673_v47 = vld [vmem:[%s8187_s1 + $0x158] sm:$0xff]  }
  0x69   : > { %1303 = vst [vmem:[#allocation3 + $0x418] sm:$0xf] %v1217_v16  ;;  %v937_v22 = vor.u32 %v936_v13, %v933_v12  ;;  %805 = vst [vmem:[#allocation3 + $0x438] sm:$0xf] %v773_v18  ;;  %v1219_v24 = vshrl.u32 %v852_v19, 16  ;;  %v1222_v25 = vshll.u32 %v852_v19, 16  ;;  %6277 = vmatprep.subr.bf16.mxu0 %v6673_v47 }
  0x6a   : > { %v947_v23 = vor.u32 %v946_v15, %v942_v14  ;;  %v774_v26 = vld [vmem:[#allocation2 + $0xb8] sm:$0xf]  ;;  %v854_v28 = vld [vmem:[#allocation2 + $0xbc] sm:$0x1]  ;;  %v653_v29 = vsel %vm6985_vm9, %v362_v20, %v652_v11  ;;  %v367_v40 = vrot.slane %v365_v10, 7  ;;  %v368_v45 = vshll.u32 %v7142_v58, 16 }
  0x6b   : > { %v853_v27 = vld [vmem:[#allocation2 + $0xb8] sm:$0xf]  ;;  %v938_v30 = vrot.slane %v937_v22, 4  ;;  %806 = vst [vmem:[#allocation3 + $0x45c] sm:$0xf] %v774_v26  ;;  %v1221_v32 = vrot.slane %v1219_v24, 4 }
  0x6c   : > { %v948_v31 = vrot.slane %v947_v23, 4  ;;  %v1224_v34 = vrot.slane %v1222_v25, 5  ;;  %654 = vst [vmem:[#allocation2 + $0x30] sm:$0xf] %v653_v29  ;;  %v656_v35 = vld [vmem:[#allocation2 + $0x38] sm:$0x1]  ;;  %v370_v54 = vor.u32 %v368_v45, %v367_v40 }
  0x6d   : > { %v1228_v37 = vshll.u32 %v853_v27, 16  ;;  %v1232_v38 = vshrl.u32 %v853_v27, 16  ;;  %v1238_v39 = vshll.u32 %v854_v28, 16  ;;  %v943_v41 = vsel %vm6974_vm6, %v938_v30, %v942_v14  ;;  %v1306_v55 = vld [vmem:[#allocation2] sm:$0xe]  ;;  %v6678_v11 = vld [vmem:[%s8187_s1 + $0x118] sm:$0xff]  }
  0x6e   : > { %v953_v43 = vsel %vm6974_vm6, %v948_v31, %v952_v17  ;;  %v1225_v44 = vor.u32 %v1224_v34, %v1221_v32  ;;  %1280 = vst [vmem:[#allocation3 + $0xdc] sm:$0xf] %v943_v41  ;;  %v372_v51 = vrot.slane %v367_v40, 4  ;;  %v6638_v58 = vld [vmem:[#allocation3 + $0x3f0] ss:$36 sps:$4 sm:$0xff]   ;;  %v5777_v61 = vrot.slane %v1306_v55, 9  ;;  %6278 = vmatpush3.bf16.msra.mxu0 %v6678_v11 }
  0x6f   : > { %1281 = vst [vmem:[#allocation3 + $0x100] sm:$0xf] %v953_v43  ;;  %v1230_v49 = vrot.slane %v1228_v37, 5  ;;  %v1234_v50 = vrot.slane %v1232_v38, 4  ;;  %v1240_v53 = vrot.slane %v1238_v39, 5  ;;  %v371_v63 = vsel %vm6991_vm10, %v363_v21, %v370_v54  ;;  %v6687_v25 = vld [vmem:[%s8187_s1 + $0x150] sm:$0xff]  }
  0x70   : > { %v1226_v52 = vrot.slane %v1225_v44, 4  ;;  %v6633_v57 = vld [vmem:[#allocation3 + $0x3f4] ss:$36 sps:$4 sm:$0xff]   ;;  %v657_v60 = vsel %vm6980_vm8, %v372_v51, %v656_v35  ;;  %v1307_v0 = vld [vmem:[#allocation2 + $0x4] sm:$0xf]  ;;  %6279 = vmatprep.subr.bf16.mxu0 %v6687_v25 }
  0x71   : > { %v1235_v59 = vor.u32 %v1234_v50, %v1230_v49  ;;  %658 = vst [vmem:[#allocation2 + $0x38] sm:$0x1] %v657_v60  ;;  %v1308_v1 = vld [vmem:[#allocation2 + $0x8] sm:$0x1]  ;;  %v1581_v2 = vld [vmem:[#allocation2 + $0xc] sm:$0xf]  ;;  %4862 = vmatprep.mubr.bf16.mxu1 %v6633_v57 }
  0x72   : > { %v1231_v62 = vsel %vm6974_vm6, %v1226_v52, %v1230_v49  ;;  %655 = vst [vmem:[#allocation2 + $0x34] sm:$0xf] %v371_v63  ;;  %v1407_v6 = vrot.slane %v1307_v0, 5  ;;  %1613 = vst [vmem:[#allocation3 + $0xc] sm:$0xf] %v1581_v2  ;;  %4863 = vmatmul.mubr.bf16.gmra.mxu1 %v6638_v58  ;;  %v1410_v9 = vrot.slane %v1308_v1, 5 }
  0x73   : > { %v1236_v3 = vrot.slane %v1235_v59, 4  ;;  %1304 = vst [vmem:[#allocation3 + $0x43c] sm:$0xf] %v1231_v62  ;;  %v751_v4 = vld [vmem:[#allocation2 + $0x30] sm:$0xf]  ;;  %v6699_v63 = vld [vmem:[%s8187_s1 + $0x148] sm:$0xff]  }
  0x74   : > { %v819_v5 = vld [vmem:[#allocation2 + $0x30] sm:$0xf]  ;;  %783 = vst [vmem:[#allocation3 + $0x120] sm:$0xf] %v751_v4  ;;  %v1408_v13 = vsel %vm7172_vm13, %v5777_v61, %v1407_v6  ;;  %v1409_v14 = vrot.slane %v1407_v6, 4 }
  0x75   : > { %v955_v7 = vshrl.u32 %v819_v5, 16  ;;  %v958_v8 = vshll.u32 %v819_v5, 16  ;;  %v1582_v10 = vld [vmem:[#allocation2 + $0x10] sm:$0xf]  ;;  %v1241_v12 = vsel %vm6974_vm6, %v1236_v3, %v1240_v53  ;;  %1549 = vst [vmem:[#allocation3 + $0x8] sm:$0xf] %v1408_v13 }
  0x76   : > { %1614 = vst [vmem:[#allocation3 + $0x30] sm:$0xf] %v1582_v10  ;;  %v6636_v15 = vld [vmem:[#allocation3 + $0xdc] ss:$36 sps:$4 sm:$0xff]   ;;  %1305 = vst [vmem:[#allocation3 + $0x460] sm:$0xf] %v1241_v12  ;;  %v1411_v19 = vsel %vm7172_vm13, %v1409_v14, %v1410_v9 }
  0x77   : > { %v957_v16 = vrot.slane %v955_v7, 4  ;;  %v960_v17 = vrot.slane %v958_v8, 5  ;;  %v6640_v18 = vld [vmem:[#allocation3 + $0xd8] ss:$36 sps:$4 sm:$0xff]   ;;  %v278_v20 = vld [vmem:[%s6956_s18 + $0x20] sm:$0xf]  ;;  %4774 = vmatprep.mubr.bf16.mxu0 %v6636_v15 }
  0x78   : > { %v279_v21 = vld [vmem:[%s6956_s18 + $0x24] sm:$0xf]  ;;  %1550 = vst [vmem:[#allocation3 + $0x2c] sm:$0xf] %v1411_v19  ;;  %v374_v23 = vshrl.u32 %v278_v20, 16  ;;  %4775 = vmatmul.mubr.bf16.gmra.mxu0 %v6640_v18  ;;  %v377_v27 = vshll.u32 %v278_v20, 16 }
  0x79   : > { %v961_v22 = vor.u32 %v960_v17, %v957_v16  ;;  %v382_v24 = vshrl.u32 %v279_v21, 16  ;;  %v821_v26 = vld [vmem:[#allocation2 + $0x38] sm:$0x1]  ;;  %v385_v28 = vshll.u32 %v279_v21, 16  ;;  %v6688_v29 = vld [vmem:[%s8187_s1 + $0x110] sm:$0xff]   ;;  %v6703_v9 = vld [vmem:[%s8187_s1 + $0x108] sm:$0xff]  }
  0x7a   : > { %v752_v30 = vld [vmem:[#allocation2 + $0x34] sm:$0xf]  ;;  %v659_v34 = vld [vmem:[#allocation2 + $0x3c] sm:$0xf]  ;;  %v974_v37 = vshll.u32 %v821_v26, 16  ;;  %v376_v38 = vrot.slane %v374_v23, 7  ;;  %6280 = vmatpush3.bf16.msra.mxu0 %v6688_v29 }
  0x7b   : > { %v820_v31 = vld [vmem:[#allocation2 + $0x34] sm:$0xf]  ;;  %v962_v32 = vrot.slane %v961_v22, 4  ;;  %784 = vst [vmem:[#allocation3 + $0x144] sm:$0xf] %v752_v30  ;;  %v384_v40 = vrot.slane %v382_v24, 7  ;;  %6281 = vmatprep.subr.bf16.mxu0 %v6699_v63 }
  0x7c   : > { %v964_v35 = vshll.u32 %v820_v31, 16  ;;  %v968_v36 = vshrl.u32 %v820_v31, 16  ;;  %v663_v39 = vld [vmem:[#allocation2 + $0x44] sm:$0x1]  ;;  %v379_v45 = vor.u32 %v377_v27, %v376_v38  ;;  %v6649_v47 = vld [vmem:[#allocation3 + $0x438] ss:$36 sps:$4 sm:$0xff]  }
  0x7d   : > { %v6643_v41 = vld [vmem:[#allocation3 + $0x43c] ss:$36 sps:$4 sm:$0xff]   ;;  %v380_v49 = vrot.slane %v376_v38, 4  ;;  %v387_v50 = vor.u32 %v385_v28, %v384_v40  ;;  %v389_v51 = vrot.slane %v384_v40, 4  ;;  %v976_v54 = vrot.slane %v974_v37, 5 }
  0x7e   : > { %v966_v43 = vrot.slane %v964_v35, 5  ;;  %v970_v44 = vrot.slane %v968_v36, 4  ;;  %4870 = vmatprep.mubr.bf16.mxu1 %v6643_v41  ;;  %v6657_v55 = vld [vmem:[#allocation3 + $0xc] ss:$36 sps:$4 sm:$0xff]   ;;  %v660_v57 = vsel %vm6985_vm9, %v379_v45, %v659_v34  ;;  %v1309_v61 = vld [vmem:[#allocation2 + $0xc] sm:$0xe]  ;;  %6282 = vmatpush3.bf16.msra.mxu0 %v6703_v9 }
  0x7f   : > { %4871 = vmatmul.mubr.bf16.gmra.mxu1 %v6649_v47  ;;  %v388_v58 = vsel %vm6991_vm10, %v380_v49, %v387_v50  ;;  %661 = vst [vmem:[#allocation2 + $0x3c] sm:$0xf] %v660_v57  ;;  %v664_v59 = vsel %vm6980_vm8, %v389_v51, %v663_v39  ;;  %v1310_v62 = vld [vmem:[#allocation2 + $0x10] sm:$0xf]  ;;  %v6655_v0 = vld [vmem:[#allocation3 + $0x8] ss:$36 sps:$4 sm:$0xff]  }
  0x80   : > { %v967_v52 = vsel %vm6974_vm6, %v962_v32, %v966_v43  ;;  %v971_v53 = vor.u32 %v970_v44, %v966_v43  ;;  %4911 = vmatprep.mubr.bf16.mxu1 %v6657_v55  ;;  %662 = vst [vmem:[#allocation2 + $0x40] sm:$0xf] %v388_v58  ;;  %665 = vst [vmem:[#allocation2 + $0x44] sm:$0x1] %v664_v59  ;;  %v1311_v1 = vld [vmem:[#allocation2 + $0x14] sm:$0x1] }
  0x81   : > { %1282 = vst [vmem:[#allocation3 + $0x124] sm:$0xf] %v967_v52  ;;  %v5778_v2 = vrot.slane %v1309_v61, 9  ;;  %v1414_v3 = vrot.slane %v1310_v62, 5  ;;  %v1583_v4 = vld [vmem:[#allocation2 + $0x18] sm:$0xf] }
  0x82   : > { %v972_v60 = vrot.slane %v971_v53, 4  ;;  %v1417_v6 = vrot.slane %v1311_v1, 5  ;;  %v1584_v7 = vld [vmem:[#allocation2 + $0x1c] sm:$0xf]  ;;  %1615 = vst [vmem:[#allocation3 + $0x54] sm:$0xf] %v1583_v4 }
  0x83   : > { %v280_v8 = vld [vmem:[%s6956_s18 + $0x28] sm:$0xf]  ;;  %v1415_v10 = vsel %vm7172_vm13, %v5778_v2, %v1414_v3  ;;  %v1416_v11 = vrot.slane %v1414_v3, 4  ;;  %1616 = vst [vmem:[#allocation3 + $0x78] sm:$0xf] %v1584_v7  ;;  %v6661_v15 = vld [vmem:[%s8187_s1 + $0x1b8] sm:$0xff]  }
  0x84   : > { %v977_v5 = vsel %vm6974_vm6, %v972_v60, %v976_v54  ;;  %v281_v12 = vld [vmem:[%s6956_s18 + $0x2c] sm:$0xf]  ;;  %v391_v13 = vshrl.u32 %v280_v8, 16  ;;  %v394_v14 = vshll.u32 %v280_v8, 16  ;;  %1551 = vst [vmem:[#allocation3 + $0x50] sm:$0xf] %v1415_v10 }
  0x85   : > { %1283 = vst [vmem:[#allocation3 + $0x148] sm:$0xf] %v977_v5  ;;  %v399_v16 = vshrl.u32 %v281_v12, 16  ;;  %v1418_v17 = vsel %vm7172_vm13, %v1416_v11, %v1417_v6  ;;  %v402_v19 = vshll.u32 %v281_v12, 16  ;;  %v666_v20 = vld [vmem:[#allocation2 + $0x48] sm:$0xf] }
  0x86   : > { %v393_v18 = vrot.slane %v391_v13, 7  ;;  %v6674_v21 = vld [vmem:[%s8187_s1 + $0x1f0] sm:$0xff]   ;;  %v753_v22 = vld [vmem:[#allocation2 + $0x3c] sm:$0xf]  ;;  %1552 = vst [vmem:[#allocation3 + $0x74] sm:$0xf] %v1418_v17 }
  0x87   : > { %v822_v23 = vld [vmem:[#allocation2 + $0x3c] sm:$0xf]  ;;  %v401_v24 = vrot.slane %v399_v16, 7  ;;  %v6679_v25 = vld [vmem:[%s8187_s1 + $0x1b0] sm:$0xff]   ;;  %v754_v26 = vld [vmem:[#allocation2 + $0x40] sm:$0xf]  ;;  %4912 = vmatmul.mubr.bf16.vlgmr.msra.gmra.mxu1 %v6655_v0 }
  0x88   : > { %785 = vst [vmem:[#allocation3 + $0x168] sm:$0xf] %v753_v22  ;;  %v823_v27 = vld [vmem:[#allocation2 + $0x40] sm:$0xf]  ;;  %v824_v28 = vld [vmem:[#allocation2 + $0x44] sm:$0x1]  ;;  %v396_v29 = vor.u32 %v394_v14, %v393_v18  ;;  %6382 = vmatpush3.bf16.msra.mxu1 %v6661_v15 }
  0x89   : > { %v670_v30 = vld [vmem:[#allocation2 + $0x50] sm:$0x1]  ;;  %v1312_v31 = vld [vmem:[#allocation2 + $0x18] sm:$0xe]  ;;  %v1313_v32 = vld [vmem:[#allocation2 + $0x1c] sm:$0xf]  ;;  %v404_v43 = vor.u32 %v402_v19, %v401_v24  ;;  %6383 = vmatprep.subr.bf16.mxu1 %v6674_v21 }
  0x8a   : > { %v6691_v34 = vld [vmem:[%s8187_s1 + $0x1e8] sm:$0xff]   ;;  %786 = vst [vmem:[#allocation3 + $0x18c] sm:$0xf] %v754_v26  ;;  %v979_v35 = vshrl.u32 %v822_v23, 16  ;;  %v982_v36 = vshll.u32 %v822_v23, 16  ;;  %v988_v37 = vshll.u32 %v823_v27, 16  ;;  %v667_v52 = vsel %vm6985_vm9, %v396_v29, %v666_v20 }
  0x8b   : > { %v992_v38 = vshrl.u32 %v823_v27, 16  ;;  %v1314_v39 = vld [vmem:[#allocation2 + $0x20] sm:$0x1]  ;;  %v998_v40 = vshll.u32 %v824_v28, 16  ;;  %v397_v41 = vrot.slane %v393_v18, 4  ;;  %v406_v44 = vrot.slane %v401_v24, 4 }
  0x8c   : > { %v1585_v45 = vld [vmem:[#allocation2 + $0x24] sm:$0xf]  ;;  %v6647_v49 = vld [vmem:[#allocation3 + $0x124] ss:$36 sps:$4 sm:$0xff]   ;;  %v981_v51 = vrot.slane %v979_v35, 4  ;;  %v984_v53 = vrot.slane %v982_v36, 5  ;;  %6384 = vmatpush3.bf16.msra.mxu1 %v6679_v25 }
  0x8d   : > { %v6713_v47 = vld [vmem:[%s8187_s1 + $0x140] sm:$0xff]   ;;  %v6652_v50 = vld [vmem:[#allocation3 + $0x120] ss:$36 sps:$4 sm:$0xff]   ;;  %1617 = vst [vmem:[#allocation3 + $0x9c] sm:$0xf] %v1585_v45  ;;  %v990_v54 = vrot.slane %v988_v37, 5  ;;  %4782 = vmatprep.mubr.bf16.mxu0 %v6647_v49  ;;  %v405_v60 = vsel %vm6991_vm10, %v397_v41, %v404_v43  ;;  %v671_v61 = vsel %vm6980_vm8, %v406_v44, %v670_v30  ;;  %6385 = vmatprep.subr.bf16.mxu1 %v6691_v34 }
  0x8e   : > { %v994_v55 = vrot.slane %v992_v38, 4  ;;  %v1000_v57 = vrot.slane %v998_v40, 5  ;;  %668 = vst [vmem:[#allocation2 + $0x48] sm:$0xf] %v667_v52  ;;  %v6695_v58 = vld [vmem:[%s8187_s1 + $0x1a8] sm:$0xff]   ;;  %6283 = vmatprep.subr.bf16.mxu0 %v6713_v47  ;;  %v6714_v59 = vld [vmem:[%s8187_s1 + $0x100] sm:$0xff]   ;;  %4783 = vmatmul.mubr.bf16.gmra.mxu0 %v6652_v50  ;;  %v985_v1 = vor.u32 %v984_v53, %v981_v51 }
  0x8f   : > { %v5779_v62 = vrot.slane %v1312_v31, 9  ;;  %v1421_v63 = vrot.slane %v1313_v32, 5  ;;  %v1586_v0 = vld [vmem:[#allocation2 + $0x28] sm:$0xf]  ;;  %v6665_v3 = vld [vmem:[#allocation3 + $0x54] ss:$36 sps:$4 sm:$0xff]   ;;  %6284 = vmatpush3.bf16.msra.mxu0 %v6714_v59 }
  0x90   : > { %v995_v2 = vor.u32 %v994_v55, %v990_v54  ;;  %669 = vst [vmem:[#allocation2 + $0x4c] sm:$0xf] %v405_v60  ;;  %672 = vst [vmem:[#allocation2 + $0x50] sm:$0x1] %v671_v61  ;;  %v6669_v4 = vld [vmem:[#allocation3 + $0x50] ss:$36 sps:$4 sm:$0xff]   ;;  %4919 = vmatprep.mubr.bf16.mxu1 %v6665_v3  ;;  %6386 = vmatpush3.bf16.msra.mxu1 %v6695_v58 }
  0x91   : > { %v1424_v5 = vrot.slane %v1314_v39, 5  ;;  %1618 = vst [vmem:[#allocation3 + $0xc0] sm:$0xf] %v1586_v0  ;;  %v1422_v6 = vsel %vm7172_vm13, %v5779_v62, %v1421_v63  ;;  %v1423_v7 = vrot.slane %v1421_v63, 4  ;;  %v6707_v8 = vld [vmem:[%s8187_s1 + $0x1e0] sm:$0xff]   ;;  %v986_v9 = vrot.slane %v985_v1, 4  ;;  %4920 = vmatmul.mubr.bf16.gmra.mxu1 %v6669_v4 }
  0x92   : > { %v996_v10 = vrot.slane %v995_v2, 4  ;;  %1553 = vst [vmem:[#allocation3 + $0x98] sm:$0xf] %v1422_v6  ;;  %v282_v11 = vld [vmem:[%s6956_s18 + $0x30] sm:$0xf]  ;;  %v6711_v20 = vld [vmem:[%s8187_s1 + $0x1a0] sm:$0xff]   ;;  %6387 = vmatprep.subr.bf16.mxu1 %v6707_v8 }
  0x93   : > { %v1425_v12 = vsel %vm7172_vm13, %v1423_v7, %v1424_v5  ;;  %v283_v13 = vld [vmem:[%s6956_s18 + $0x34] sm:$0xf]  ;;  %v408_v14 = vshrl.u32 %v282_v11, 16  ;;  %v411_v15 = vshll.u32 %v282_v11, 16  ;;  %v991_v16 = vsel %vm6974_vm6, %v986_v9, %v990_v54  ;;  %v6723_v21 = vld [vmem:[%s8187_s1 + $0x1d8] sm:$0xff]  }
  0x94   : > { %v1001_v17 = vsel %vm6974_vm6, %v996_v10, %v1000_v57  ;;  %1554 = vst [vmem:[#allocation3 + $0xbc] sm:$0xf] %v1425_v12  ;;  %v416_v18 = vshrl.u32 %v283_v13, 16  ;;  %v419_v19 = vshll.u32 %v283_v13, 16  ;;  %1284 = vst [vmem:[#allocation3 + $0x16c] sm:$0xf] %v991_v16  ;;  %6388 = vmatpush3.bf16.msra.mxu1 %v6711_v20 }
  0x95   : > { %1285 = vst [vmem:[#allocation3 + $0x190] sm:$0xf] %v1001_v17  ;;  %v755_v22 = vld [vmem:[#allocation2 + $0x48] sm:$0xf]  ;;  %v410_v24 = vrot.slane %v408_v14, 7  ;;  %v6724_v26 = vld [vmem:[%s8187_s1 + $0x238] sm:$0xff]   ;;  %6389 = vmatprep.subr.bf16.mxu1 %v6723_v21 }
  0x96   : > { %v825_v23 = vld [vmem:[#allocation2 + $0x48] sm:$0xf]  ;;  %v673_v25 = vld [vmem:[#allocation2 + $0x54] sm:$0xf]  ;;  %787 = vst [vmem:[#allocation3 + $0x1b0] sm:$0xf] %v755_v22  ;;  %6517 = vmatprep.subr.bf16.mxu0 %v6724_v26 }
  0x97   : > { %v1003_v27 = vshrl.u32 %v825_v23, 16  ;;  %v1006_v28 = vshll.u32 %v825_v23, 16  ;;  %v418_v29 = vrot.slane %v416_v18, 7  ;;  %v677_v30 = vld [vmem:[#allocation2 + $0x5c] sm:$0x1]  ;;  %v413_v36 = vor.u32 %v411_v15, %v410_v24  ;;  %v6738_v3 = vld [vmem:[%s8187_s1 + $0x1d0] sm:$0xff]  }
  0x98   : > { %v6728_v31 = vld [vmem:[%s8187_s1 + $0x198] sm:$0xff]   ;;  %v756_v32 = vld [vmem:[#allocation2 + $0x4c] sm:$0xf]  ;;  %v827_v35 = vld [vmem:[#allocation2 + $0x50] sm:$0x1]  ;;  %v414_v43 = vrot.slane %v410_v24, 4 }
  0x99   : > { %v826_v34 = vld [vmem:[#allocation2 + $0x4c] sm:$0xf]  ;;  %788 = vst [vmem:[#allocation3 + $0x1d4] sm:$0xf] %v756_v32  ;;  %v1005_v37 = vrot.slane %v1003_v27, 4  ;;  %v1008_v38 = vrot.slane %v1006_v28, 5  ;;  %v421_v44 = vor.u32 %v419_v19, %v418_v29  ;;  %v674_v51 = vsel %vm6985_vm9, %v413_v36, %v673_v25  ;;  %6390 = vmatpush3.bf16.msra.mxu1 %v6728_v31 }
  0x9a   : > { %v1012_v39 = vshll.u32 %v826_v34, 16  ;;  %v1016_v40 = vshrl.u32 %v826_v34, 16  ;;  %v1022_v41 = vshll.u32 %v827_v35, 16  ;;  %v423_v45 = vrot.slane %v418_v29, 4  ;;  %v1315_v52 = vld [vmem:[#allocation2 + $0x24] sm:$0xe]  ;;  %6391 = vmatprep.subr.bf16.mxu1 %v6738_v3 }
  0x9b   : > { %v1009_v47 = vor.u32 %v1008_v38, %v1005_v37  ;;  %v1316_v53 = vld [vmem:[#allocation2 + $0x28] sm:$0xf]  ;;  %v6671_v55 = vld [vmem:[#allocation3 + $0x9c] ss:$36 sps:$4 sm:$0xff]   ;;  %v422_v57 = vsel %vm6991_vm10, %v414_v43, %v421_v44  ;;  %675 = vst [vmem:[#allocation2 + $0x54] sm:$0xf] %v674_v51 }
  0x9c   : > { %v1014_v49 = vrot.slane %v1012_v39, 5  ;;  %v1018_v50 = vrot.slane %v1016_v40, 4  ;;  %v1024_v54 = vrot.slane %v1022_v41, 5  ;;  %v678_v58 = vsel %vm6980_vm8, %v423_v45, %v677_v30  ;;  %v6677_v59 = vld [vmem:[#allocation3 + $0x98] ss:$36 sps:$4 sm:$0xff]   ;;  %4927 = vmatprep.mubr.bf16.mxu1 %v6671_v55  ;;  %v6753_v20 = vld [vmem:[%s8187_s1 + $0x1c8] sm:$0xff]  }
  0x9d   : > { %v6659_v60 = vld [vmem:[#allocation3 + $0x16c] ss:$36 sps:$4 sm:$0xff]   ;;  %v1010_v61 = vrot.slane %v1009_v47, 4  ;;  %676 = vst [vmem:[#allocation2 + $0x58] sm:$0xf] %v422_v57  ;;  %v5780_v63 = vrot.slane %v1315_v52, 9  ;;  %4928 = vmatmul.mubr.bf16.gmra.mxu1 %v6677_v59 }
  0x9e   : > { %v1019_v62 = vor.u32 %v1018_v50, %v1014_v49  ;;  %679 = vst [vmem:[#allocation2 + $0x5c] sm:$0x1] %v678_v58  ;;  %v6662_v0 = vld [vmem:[#allocation3 + $0x168] ss:$36 sps:$4 sm:$0xff]   ;;  %v1317_v1 = vld [vmem:[#allocation2 + $0x2c] sm:$0x1]  ;;  %4790 = vmatprep.mubr.bf16.mxu0 %v6659_v60 }
  0x9f   : > { %v1428_v2 = vrot.slane %v1316_v53, 5  ;;  %v1015_v4 = vsel %vm6974_vm6, %v1010_v61, %v1014_v49  ;;  %v1431_v6 = vrot.slane %v1317_v1, 5  ;;  %v1587_v7 = vld [vmem:[#allocation2 + $0x30] sm:$0xf]  ;;  %v1588_v8 = vld [vmem:[#allocation2 + $0x34] sm:$0xf]  ;;  %4791 = vmatmul.mubr.bf16.gmra.mxu0 %v6662_v0 }
  0xa0   : > { %v1020_v5 = vrot.slane %v1019_v62, 4  ;;  %1286 = vst [vmem:[#allocation3 + $0x1b4] sm:$0xf] %v1015_v4  ;;  %1619 = vst [vmem:[#allocation3 + $0xe4] sm:$0xf] %v1587_v7  ;;  %v6743_v16 = vld [vmem:[%s8187_s1 + $0x190] sm:$0xff]  }
  0xa1   : > { %v1429_v9 = vsel %vm7172_vm13, %v5780_v63, %v1428_v2  ;;  %v1430_v10 = vrot.slane %v1428_v2, 4  ;;  %1620 = vst [vmem:[#allocation3 + $0x108] sm:$0xf] %v1588_v8  ;;  %v284_v11 = vld [vmem:[%s6956_s18 + $0x38] sm:$0xf]  ;;  %6392 = vmatpush3.bf16.msra.mxu1 %v6743_v16  ;;  %v6758_v50 = vld [vmem:[%s8187_s1 + $0x188] sm:$0xff]  }
  0xa2   : > { %v285_v12 = vld [vmem:[%s6956_s18 + $0x3c] sm:$0xf]  ;;  %v1025_v13 = vsel %vm6974_vm6, %v1020_v5, %v1024_v54  ;;  %1555 = vst [vmem:[#allocation3 + $0xe0] sm:$0xf] %v1429_v9  ;;  %v425_v14 = vshrl.u32 %v284_v11, 16  ;;  %v428_v18 = vshll.u32 %v284_v11, 16  ;;  %6393 = vmatprep.subr.bf16.mxu1 %v6753_v20 }
  0xa3   : > { %v433_v15 = vshrl.u32 %v285_v12, 16  ;;  %1287 = vst [vmem:[#allocation3 + $0x1d8] sm:$0xf] %v1025_v13  ;;  %v1432_v17 = vsel %vm7172_vm13, %v1430_v10, %v1431_v6  ;;  %v436_v19 = vshll.u32 %v285_v12, 16  ;;  %v757_v21 = vld [vmem:[#allocation2 + $0x54] sm:$0xf] }
  0xa4   : > { %v828_v22 = vld [vmem:[#allocation2 + $0x54] sm:$0xf]  ;;  %1556 = vst [vmem:[#allocation3 + $0x104] sm:$0xf] %v1432_v17  ;;  %v427_v23 = vrot.slane %v425_v14, 7  ;;  %v6768_v12 = vld [vmem:[%s8187_s1 + $0x1c0] sm:$0xff]  }
  0xa5   : > { %v435_v24 = vrot.slane %v433_v15, 7  ;;  %v680_v25 = vld [vmem:[#allocation2 + $0x60] sm:$0xf]  ;;  %v758_v26 = vld [vmem:[#allocation2 + $0x58] sm:$0xf]  ;;  %v1027_v29 = vshrl.u32 %v828_v22, 16  ;;  %6394 = vmatpush3.bf16.msra.mxu1 %v6758_v50 }
  0xa6   : > { %789 = vst [vmem:[#allocation3 + $0x1f8] sm:$0xf] %v757_v21  ;;  %v829_v27 = vld [vmem:[#allocation2 + $0x58] sm:$0xf]  ;;  %v830_v28 = vld [vmem:[#allocation2 + $0x5c] sm:$0x1]  ;;  %v430_v36 = vor.u32 %v428_v18, %v427_v23  ;;  %6395 = vmatprep.subr.bf16.mxu1 %v6768_v12 }
  0xa7   : > { %790 = vst [vmem:[#allocation3 + $0x21c] sm:$0xf] %v758_v26  ;;  %v1030_v30 = vshll.u32 %v828_v22, 16  ;;  %v1036_v31 = vshll.u32 %v829_v27, 16  ;;  %v1040_v32 = vshrl.u32 %v829_v27, 16  ;;  %v1046_v35 = vshll.u32 %v830_v28, 16 }
  0xa8   : > { %v684_v34 = vld [vmem:[#allocation2 + $0x68] sm:$0x1]  ;;  %v431_v37 = vrot.slane %v427_v23, 4  ;;  %v438_v38 = vor.u32 %v436_v19, %v435_v24  ;;  %v1029_v39 = vrot.slane %v1027_v29, 4  ;;  %v440_v45 = vrot.slane %v435_v24, 4 }
  0xa9   : > { %v1032_v40 = vrot.slane %v1030_v30, 5  ;;  %v1038_v41 = vrot.slane %v1036_v31, 5  ;;  %v1042_v43 = vrot.slane %v1040_v32, 4  ;;  %v681_v47 = vsel %vm6985_vm9, %v430_v36, %v680_v25  ;;  %v1318_v49 = vld [vmem:[#allocation2 + $0x30] sm:$0xe] }
  0xaa   : > { %v439_v44 = vsel %vm6991_vm10, %v431_v37, %v438_v38  ;;  %v6667_v51 = vld [vmem:[#allocation3 + $0x1b4] ss:$36 sps:$4 sm:$0xff]   ;;  %v1048_v55 = vrot.slane %v1046_v35, 5  ;;  %682 = vst [vmem:[#allocation2 + $0x60] sm:$0xf] %v681_v47  ;;  %v685_v58 = vsel %vm6980_vm8, %v440_v45, %v684_v34  ;;  %v5781_v60 = vrot.slane %v1318_v49, 9 }
  0xab   : > { %v6670_v52 = vld [vmem:[#allocation3 + $0x1b0] ss:$36 sps:$4 sm:$0xff]   ;;  %v1033_v53 = vor.u32 %v1032_v40, %v1029_v39  ;;  %v1043_v54 = vor.u32 %v1042_v43, %v1038_v41  ;;  %683 = vst [vmem:[#allocation2 + $0x64] sm:$0xf] %v439_v44  ;;  %v6681_v57 = vld [vmem:[#allocation3 + $0xe4] ss:$36 sps:$4 sm:$0xff]   ;;  %4798 = vmatprep.mubr.bf16.mxu0 %v6667_v51 }
  0xac   : > { %v6685_v59 = vld [vmem:[#allocation3 + $0xe0] ss:$36 sps:$4 sm:$0xff]   ;;  %686 = vst [vmem:[#allocation2 + $0x68] sm:$0x1] %v685_v58  ;;  %v1319_v63 = vld [vmem:[#allocation2 + $0x34] sm:$0xf]  ;;  %4799 = vmatmul.mubr.bf16.gmra.mxu0 %v6670_v52  ;;  %4935 = vmatprep.mubr.bf16.mxu1 %v6681_v57 }
  0xad   : > { %v1034_v61 = vrot.slane %v1033_v53, 4  ;;  %v1044_v62 = vrot.slane %v1043_v54, 4  ;;  %v1320_v0 = vld [vmem:[#allocation2 + $0x38] sm:$0x1]  ;;  %v1435_v1 = vrot.slane %v1319_v63, 5  ;;  %4936 = vmatmul.mubr.bf16.gmra.mxu1 %v6685_v59 }
  0xae   : > { %v1438_v2 = vrot.slane %v1320_v0, 5  ;;  %v1589_v3 = vld [vmem:[#allocation2 + $0x3c] sm:$0xf]  ;;  %v1590_v4 = vld [vmem:[#allocation2 + $0x40] sm:$0xf] }
  0xaf   : > { %v1039_v5 = vsel %vm6974_vm6, %v1034_v61, %v1038_v41  ;;  %v1049_v6 = vsel %vm6974_vm6, %v1044_v62, %v1048_v55  ;;  %1621 = vst [vmem:[#allocation3 + $0x12c] sm:$0xf] %v1589_v3  ;;  %1622 = vst [vmem:[#allocation3 + $0x150] sm:$0xf] %v1590_v4  ;;  %v286_v7 = vld [vmem:[%s6956_s18 + $0x40] sm:$0xf]  ;;  %v1436_v8 = vsel %vm7172_vm13, %v5781_v60, %v1435_v1 }
  0xb0   : > { %1288 = vst [vmem:[#allocation3 + $0x1fc] sm:$0xf] %v1039_v5  ;;  %1289 = vst [vmem:[#allocation3 + $0x220] sm:$0xf] %v1049_v6  ;;  %v1437_v9 = vrot.slane %v1435_v1, 4  ;;  %v442_v11 = vshrl.u32 %v286_v7, 16 }
  0xb1   : > { %v287_v10 = vld [vmem:[%s6956_s18 + $0x44] sm:$0xf]  ;;  %1557 = vst [vmem:[#allocation3 + $0x128] sm:$0xf] %v1436_v8  ;;  %v445_v13 = vshll.u32 %v286_v7, 16 }
  0xb2   : > { %v450_v14 = vshrl.u32 %v287_v10, 16  ;;  %v453_v15 = vshll.u32 %v287_v10, 16  ;;  %v759_v16 = vld [vmem:[#allocation2 + $0x60] sm:$0xf]  ;;  %v760_v17 = vld [vmem:[#allocation2 + $0x64] sm:$0xf]  ;;  %v1439_v19 = vsel %vm7172_vm13, %v1437_v9, %v1438_v2 }
  0xb3   : > { %v831_v18 = vld [vmem:[#allocation2 + $0x60] sm:$0xf]  ;;  %v687_v20 = vld [vmem:[#allocation2 + $0x6c] sm:$0xf]  ;;  %791 = vst [vmem:[#allocation3 + $0x240] sm:$0xf] %v759_v16 }
  0xb4   : > { %792 = vst [vmem:[#allocation3 + $0x264] sm:$0xf] %v760_v17  ;;  %v832_v21 = vld [vmem:[#allocation2 + $0x64] sm:$0xf]  ;;  %v1051_v22 = vshrl.u32 %v831_v18, 16  ;;  %v1054_v23 = vshll.u32 %v831_v18, 16 }
  0xb5   : > { %1558 = vst [vmem:[#allocation3 + $0x14c] sm:$0xf] %v1439_v19  ;;  %v444_v24 = vrot.slane %v442_v11, 7  ;;  %v452_v25 = vrot.slane %v450_v14, 7  ;;  %v833_v26 = vld [vmem:[#allocation2 + $0x68] sm:$0x1] }
  0xb6   : > { %v1060_v27 = vshll.u32 %v832_v21, 16  ;;  %v1064_v28 = vshrl.u32 %v832_v21, 16  ;;  %v691_v29 = vld [vmem:[#allocation2 + $0x74] sm:$0x1]  ;;  %v1053_v30 = vrot.slane %v1051_v22, 4  ;;  %v1056_v31 = vrot.slane %v1054_v23, 5 }
  0xb7   : > { %v1070_v32 = vshll.u32 %v833_v26, 16  ;;  %v447_v34 = vor.u32 %v445_v13, %v444_v24  ;;  %v448_v37 = vrot.slane %v444_v24, 4  ;;  %v455_v38 = vor.u32 %v453_v15, %v452_v25  ;;  %v1321_v39 = vld [vmem:[#allocation2 + $0x3c] sm:$0xe]  ;;  %v6675_v40 = vld [vmem:[#allocation3 + $0x1fc] ss:$36 sps:$4 sm:$0xff]  }
  0xb8   : > { %v1062_v35 = vrot.slane %v1060_v27, 5  ;;  %v1066_v36 = vrot.slane %v1064_v28, 4  ;;  %v1057_v41 = vor.u32 %v1056_v31, %v1053_v30  ;;  %v457_v44 = vrot.slane %v452_v25, 4  ;;  %v6680_v47 = vld [vmem:[#allocation3 + $0x1f8] ss:$36 sps:$4 sm:$0xff]   ;;  %4806 = vmatprep.mubr.bf16.mxu0 %v6675_v40  ;;  %v6773_v10 = vld [vmem:[%s8187_s1 + $0x180] sm:$0xff]  }
  0xb9   : > { %v1072_v43 = vrot.slane %v1070_v32, 5  ;;  %v688_v45 = vsel %vm6985_vm9, %v447_v34, %v687_v20  ;;  %v456_v50 = vsel %vm6991_vm10, %v448_v37, %v455_v38  ;;  %v1322_v51 = vld [vmem:[#allocation2 + $0x40] sm:$0xf]  ;;  %v5782_v52 = vrot.slane %v1321_v39, 9  ;;  %v1323_v55 = vld [vmem:[#allocation2 + $0x44] sm:$0x1]  ;;  %4807 = vmatmul.mubr.bf16.gmra.mxu0 %v6680_v47  ;;  %6396 = vmatpush3.bf16.msra.mxu1 %v6773_v10 }
  0xba   : > { %v1067_v49 = vor.u32 %v1066_v36, %v1062_v35  ;;  %689 = vst [vmem:[#allocation2 + $0x6c] sm:$0xf] %v688_v45  ;;  %v1058_v53 = vrot.slane %v1057_v41, 4  ;;  %690 = vst [vmem:[#allocation2 + $0x70] sm:$0xf] %v456_v50  ;;  %v692_v54 = vsel %vm6980_vm8, %v457_v44, %v691_v29  ;;  %v1442_v57 = vrot.slane %v1322_v51, 5 }
  0xbb   : > { %v1591_v58 = vld [vmem:[#allocation2 + $0x48] sm:$0xf]  ;;  %693 = vst [vmem:[#allocation2 + $0x74] sm:$0x1] %v692_v54  ;;  %v1445_v1 = vrot.slane %v1323_v55, 5 }
  0xbc   : > { %v1068_v59 = vrot.slane %v1067_v49, 4  ;;  %v6689_v60 = vld [vmem:[#allocation3 + $0x12c] ss:$36 sps:$4 sm:$0xff]   ;;  %1623 = vst [vmem:[#allocation3 + $0x174] sm:$0xf] %v1591_v58  ;;  %v1063_v62 = vsel %vm6974_vm6, %v1058_v53, %v1062_v35  ;;  %v1443_v63 = vsel %vm7172_vm13, %v5782_v52, %v1442_v57  ;;  %v1444_v0 = vrot.slane %v1442_v57, 4 }
  0xbd   : > { %v6694_v61 = vld [vmem:[#allocation3 + $0x128] ss:$36 sps:$4 sm:$0xff]   ;;  %v1592_v2 = vld [vmem:[#allocation2 + $0x4c] sm:$0xf]  ;;  %1290 = vst [vmem:[#allocation3 + $0x244] sm:$0xf] %v1063_v62  ;;  %4943 = vmatprep.mubr.bf16.mxu1 %v6689_v60 }
  0xbe   : > { %v1073_v3 = vsel %vm6974_vm6, %v1068_v59, %v1072_v43  ;;  %1559 = vst [vmem:[#allocation3 + $0x170] sm:$0xf] %v1443_v63  ;;  %1624 = vst [vmem:[#allocation3 + $0x198] sm:$0xf] %v1592_v2  ;;  %v288_v4 = vld [vmem:[%s6956_s18 + $0x48] sm:$0xf]  ;;  %4944 = vmatmul.mubr.bf16.gmra.mxu1 %v6694_v61  ;;  %v1446_v6 = vsel %vm7172_vm13, %v1444_v0, %v1445_v1 }
  0xbf   : > { %v289_v5 = vld [vmem:[%s6956_s18 + $0x4c] sm:$0xf]  ;;  %1291 = vst [vmem:[#allocation3 + $0x268] sm:$0xf] %v1073_v3  ;;  %v459_v7 = vshrl.u32 %v288_v4, 16  ;;  %v462_v8 = vshll.u32 %v288_v4, 16 }
  0xc0   : > { %v467_v9 = vshrl.u32 %v289_v5, 16  ;;  %1560 = vst [vmem:[#allocation3 + $0x194] sm:$0xf] %v1446_v6  ;;  %v470_v11 = vshll.u32 %v289_v5, 16  ;;  %v694_v12 = vld [vmem:[#allocation2 + $0x78] sm:$0xf] }
  0xc1   : > { %v761_v13 = vld [vmem:[#allocation2 + $0x6c] sm:$0xf]  ;;  %v461_v15 = vrot.slane %v459_v7, 7  ;;  %v762_v17 = vld [vmem:[#allocation2 + $0x70] sm:$0xf] }
  0xc2   : > { %v834_v14 = vld [vmem:[#allocation2 + $0x6c] sm:$0xf]  ;;  %v469_v16 = vrot.slane %v467_v9, 7  ;;  %793 = vst [vmem:[#allocation3 + $0x288] sm:$0xf] %v761_v13 }
  0xc3   : > { %v835_v18 = vld [vmem:[#allocation2 + $0x70] sm:$0xf]  ;;  %v1075_v19 = vshrl.u32 %v834_v14, 16  ;;  %v1078_v20 = vshll.u32 %v834_v14, 16  ;;  %v698_v21 = vld [vmem:[#allocation2 + $0x80] sm:$0x1]  ;;  %v464_v25 = vor.u32 %v462_v8, %v461_v15 }
  0xc4   : > { %794 = vst [vmem:[#allocation3 + $0x2ac] sm:$0xf] %v762_v17  ;;  %v836_v22 = vld [vmem:[#allocation2 + $0x74] sm:$0x1]  ;;  %v1084_v23 = vshll.u32 %v835_v18, 16  ;;  %v1088_v24 = vshrl.u32 %v835_v18, 16  ;;  %v472_v30 = vor.u32 %v470_v11, %v469_v16 }
  0xc5   : > { %v465_v26 = vrot.slane %v461_v15, 4  ;;  %v1077_v27 = vrot.slane %v1075_v19, 4  ;;  %v1080_v28 = vrot.slane %v1078_v20, 5  ;;  %v1094_v29 = vshll.u32 %v836_v22, 16  ;;  %v6686_v37 = vld [vmem:[#allocation3 + $0x240] ss:$36 sps:$4 sm:$0xff]  }
  0xc6   : > { %v1086_v31 = vrot.slane %v1084_v23, 5  ;;  %v1090_v32 = vrot.slane %v1088_v24, 4  ;;  %v474_v34 = vrot.slane %v469_v16, 4  ;;  %v695_v35 = vsel %vm6985_vm9, %v464_v25, %v694_v12  ;;  %v6683_v36 = vld [vmem:[#allocation3 + $0x244] ss:$36 sps:$4 sm:$0xff]  }
  0xc7   : > { %v1081_v38 = vor.u32 %v1080_v28, %v1077_v27  ;;  %v473_v39 = vsel %vm6991_vm10, %v465_v26, %v472_v30  ;;  %696 = vst [vmem:[#allocation2 + $0x78] sm:$0xf] %v695_v35  ;;  %v1096_v41 = vrot.slane %v1094_v29, 5  ;;  %v6697_v43 = vld [vmem:[#allocation3 + $0x174] ss:$36 sps:$4 sm:$0xff]   ;;  %4814 = vmatprep.mubr.bf16.mxu0 %v6683_v36 }
  0xc8   : > { %v1091_v40 = vor.u32 %v1090_v32, %v1086_v31  ;;  %697 = vst [vmem:[#allocation2 + $0x7c] sm:$0xf] %v473_v39  ;;  %v699_v44 = vsel %vm6980_vm8, %v474_v34, %v698_v21  ;;  %v6702_v45 = vld [vmem:[#allocation3 + $0x170] ss:$36 sps:$4 sm:$0xff]   ;;  %4815 = vmatmul.mubr.bf16.gmra.mxu0 %v6686_v37  ;;  %4951 = vmatprep.mubr.bf16.mxu1 %v6697_v43  ;;  %v1326_v52 = vld [vmem:[#allocation2 + $0x50] sm:$0x1] }
  0xc9   : > { %v1082_v47 = vrot.slane %v1081_v38, 4  ;;  %700 = vst [vmem:[#allocation2 + $0x80] sm:$0x1] %v699_v44  ;;  %v1324_v49 = vld [vmem:[#allocation2 + $0x48] sm:$0xe]  ;;  %4952 = vmatmul.mubr.bf16.gmra.mxu1 %v6702_v45  ;;  %v1452_v57 = vrot.slane %v1326_v52, 5 }
  0xca   : > { %v1325_v50 = vld [vmem:[#allocation2 + $0x4c] sm:$0xf]  ;;  %v1092_v51 = vrot.slane %v1091_v40, 4  ;;  %v5783_v53 = vrot.slane %v1324_v49, 9  ;;  %v1593_v58 = vld [vmem:[#allocation2 + $0x54] sm:$0xf] }
  0xcb   : > { %v1449_v54 = vrot.slane %v1325_v50, 5  ;;  %v1087_v55 = vsel %vm6974_vm6, %v1082_v47, %v1086_v31  ;;  %v1594_v59 = vld [vmem:[#allocation2 + $0x58] sm:$0xf]  ;;  %1625 = vst [vmem:[#allocation3 + $0x1bc] sm:$0xf] %v1593_v58 }
  0xcc   : > { %v1097_v60 = vsel %vm6974_vm6, %v1092_v51, %v1096_v41  ;;  %1292 = vst [vmem:[#allocation3 + $0x28c] sm:$0xf] %v1087_v55  ;;  %1626 = vst [vmem:[#allocation3 + $0x1e0] sm:$0xf] %v1594_v59  ;;  %v290_v63 = vld [vmem:[%s6956_s18 + $0x50] sm:$0xf] }
  0xcd   : > { %v1450_v61 = vsel %vm7172_vm13, %v5783_v53, %v1449_v54  ;;  %v1451_v62 = vrot.slane %v1449_v54, 4  ;;  %1293 = vst [vmem:[#allocation3 + $0x2b0] sm:$0xf] %v1097_v60  ;;  %v291_v0 = vld [vmem:[%s6956_s18 + $0x54] sm:$0xf]  ;;  %v476_v4 = vshrl.u32 %v290_v63, 16 }
  0xce   : > { %1561 = vst [vmem:[#allocation3 + $0x1b8] sm:$0xf] %v1450_v61  ;;  %v763_v1 = vld [vmem:[#allocation2 + $0x78] sm:$0xf]  ;;  %v479_v5 = vshll.u32 %v290_v63, 16  ;;  %v484_v14 = vshrl.u32 %v291_v0, 16 }
  0xcf   : > { %v837_v2 = vld [vmem:[#allocation2 + $0x78] sm:$0xf]  ;;  %v1453_v3 = vsel %vm7172_vm13, %v1451_v62, %v1452_v57  ;;  %v764_v6 = vld [vmem:[#allocation2 + $0x7c] sm:$0xf]  ;;  %795 = vst [vmem:[#allocation3 + $0x2d0] sm:$0xf] %v763_v1 }
  0xd0   : > { %v838_v7 = vld [vmem:[#allocation2 + $0x7c] sm:$0xf]  ;;  %v1099_v8 = vshrl.u32 %v837_v2, 16  ;;  %v1102_v9 = vshll.u32 %v837_v2, 16  ;;  %1562 = vst [vmem:[#allocation3 + $0x1dc] sm:$0xf] %v1453_v3 }
  0xd1   : > { %796 = vst [vmem:[#allocation3 + $0x2f4] sm:$0xf] %v764_v6  ;;  %v839_v10 = vld [vmem:[#allocation2 + $0x80] sm:$0x1]  ;;  %v1108_v11 = vshll.u32 %v838_v7, 16  ;;  %v1112_v12 = vshrl.u32 %v838_v7, 16 }
  0xd2   : > { %v478_v13 = vrot.slane %v476_v4, 7  ;;  %v1101_v15 = vrot.slane %v1099_v8, 4  ;;  %v1104_v16 = vrot.slane %v1102_v9, 5  ;;  %v1118_v17 = vshll.u32 %v839_v10, 16  ;;  %v701_v19 = vld [vmem:[#allocation2 + $0x84] sm:$0xf] }
  0xd3   : > { %v487_v18 = vshll.u32 %v291_v0, 16  ;;  %v1110_v20 = vrot.slane %v1108_v11, 5  ;;  %v1114_v21 = vrot.slane %v1112_v12, 4  ;;  %v705_v23 = vld [vmem:[#allocation2 + $0x8c] sm:$0x1]  ;;  %v486_v26 = vrot.slane %v484_v14, 7 }
  0xd4   : > { %v481_v22 = vor.u32 %v479_v5, %v478_v13  ;;  %v1105_v24 = vor.u32 %v1104_v16, %v1101_v15  ;;  %v482_v25 = vrot.slane %v478_v13, 4  ;;  %v6692_v27 = vld [vmem:[#allocation3 + $0x28c] ss:$36 sps:$4 sm:$0xff]   ;;  %v1120_v30 = vrot.slane %v1118_v17, 5  ;;  %v6705_v37 = vld [vmem:[#allocation3 + $0x1bc] ss:$36 sps:$4 sm:$0xff]  }
  0xd5   : > { %v6696_v28 = vld [vmem:[#allocation3 + $0x288] ss:$36 sps:$4 sm:$0xff]   ;;  %v1115_v29 = vor.u32 %v1114_v21, %v1110_v20  ;;  %v489_v34 = vor.u32 %v487_v18, %v486_v26  ;;  %v491_v35 = vrot.slane %v486_v26, 4  ;;  %4822 = vmatprep.mubr.bf16.mxu0 %v6692_v27  ;;  %4959 = vmatprep.mubr.bf16.mxu1 %v6705_v37  ;;  %v1327_v44 = vld [vmem:[#allocation2 + $0x54] sm:$0xe] }
  0xd6   : > { %v702_v31 = vsel %vm6985_vm9, %v481_v22, %v701_v19  ;;  %v1106_v32 = vrot.slane %v1105_v24, 4  ;;  %4823 = vmatmul.mubr.bf16.gmra.mxu0 %v6696_v28  ;;  %v1328_v45 = vld [vmem:[#allocation2 + $0x58] sm:$0xf]  ;;  %v1329_v47 = vld [vmem:[#allocation2 + $0x5c] sm:$0x1]  ;;  %v5784_v49 = vrot.slane %v1327_v44, 9 }
  0xd7   : > { %703 = vst [vmem:[#allocation2 + $0x84] sm:$0xf] %v702_v31  ;;  %v1116_v36 = vrot.slane %v1115_v29, 4  ;;  %v6710_v38 = vld [vmem:[#allocation3 + $0x1b8] ss:$36 sps:$4 sm:$0xff]   ;;  %v490_v40 = vsel %vm6991_vm10, %v482_v25, %v489_v34  ;;  %v706_v41 = vsel %vm6980_vm8, %v491_v35, %v705_v23  ;;  %v1456_v50 = vrot.slane %v1328_v45, 5 }
  0xd8   : > { %v1111_v39 = vsel %vm6974_vm6, %v1106_v32, %v1110_v20  ;;  %704 = vst [vmem:[#allocation2 + $0x88] sm:$0xf] %v490_v40  ;;  %707 = vst [vmem:[#allocation2 + $0x8c] sm:$0x1] %v706_v41  ;;  %4960 = vmatmul.mubr.bf16.gmra.mxu1 %v6710_v38  ;;  %v1459_v51 = vrot.slane %v1329_v47, 5 }
  0xd9   : > { %v1121_v43 = vsel %vm6974_vm6, %v1116_v36, %v1120_v30  ;;  %1294 = vst [vmem:[#allocation3 + $0x2d4] sm:$0xf] %v1111_v39  ;;  %v1595_v52 = vld [vmem:[#allocation2 + $0x60] sm:$0xf]  ;;  %v1596_v53 = vld [vmem:[#allocation2 + $0x64] sm:$0xf]  ;;  %v1457_v57 = vsel %vm7172_vm13, %v5784_v49, %v1456_v50 }
  0xda   : > { %1295 = vst [vmem:[#allocation3 + $0x2f8] sm:$0xf] %v1121_v43  ;;  %1627 = vst [vmem:[#allocation3 + $0x204] sm:$0xf] %v1595_v52  ;;  %v1645_v54 = vld [vmem:[#allocation2 + $0xc] sm:$0xf] }
  0xdb   : > { %v1646_v55 = vld [vmem:[#allocation2 + $0x10] sm:$0xf]  ;;  %v1458_v58 = vrot.slane %v1456_v50, 4  ;;  %1628 = vst [vmem:[#allocation3 + $0x228] sm:$0xf] %v1596_v53  ;;  %v1694_v60 = vshrl.u32 %v1645_v54, 16 }
  0xdc   : > { %v1647_v59 = vld [vmem:[#allocation2 + $0x14] sm:$0x1]  ;;  %v1697_v61 = vshll.u32 %v1645_v54, 16  ;;  %1563 = vst [vmem:[#allocation3 + $0x200] sm:$0xf] %v1457_v57  ;;  %v1703_v0 = vshll.u32 %v1646_v55, 16 }
  0xdd   : > { %v1707_v1 = vshrl.u32 %v1646_v55, 16  ;;  %v1460_v4 = vsel %vm7172_vm13, %v1458_v58, %v1459_v51  ;;  %v1696_v5 = vrot.slane %v1694_v60, 4  ;;  %v2141_v6 = vld [vmem:[#allocation2 + $0xc] sm:$0xe]  ;;  %v1713_v10 = vshll.u32 %v1647_v59, 16 }
  0xde   : > { %v765_v62 = vld [vmem:[#allocation2 + $0x84] sm:$0xf]  ;;  %1564 = vst [vmem:[#allocation3 + $0x224] sm:$0xf] %v1460_v4  ;;  %v1699_v7 = vrot.slane %v1697_v61, 5  ;;  %v1705_v8 = vrot.slane %v1703_v0, 5 }
  0xdf   : > { %v840_v63 = vld [vmem:[#allocation2 + $0x84] sm:$0xf]  ;;  %797 = vst [vmem:[#allocation3 + $0x318] sm:$0xf] %v765_v62  ;;  %v1709_v9 = vrot.slane %v1707_v1, 4  ;;  %v1715_v23 = vrot.slane %v1713_v10, 5 }
  0xe0   : > { %v1123_v2 = vshrl.u32 %v840_v63, 16  ;;  %v1126_v3 = vshll.u32 %v840_v63, 16  ;;  %v2142_v11 = vld [vmem:[#allocation2 + $0x10] sm:$0xf]  ;;  %v766_v12 = vld [vmem:[#allocation2 + $0x88] sm:$0xf]  ;;  %v1700_v18 = vor.u32 %v1699_v7, %v1696_v5 }
  0xe1   : > { %v841_v13 = vld [vmem:[#allocation2 + $0x88] sm:$0xf]  ;;  %v6700_v15 = vld [vmem:[#allocation3 + $0x2d4] ss:$36 sps:$4 sm:$0xff]   ;;  %798 = vst [vmem:[#allocation3 + $0x33c] sm:$0xf] %v766_v12  ;;  %v1710_v19 = vor.u32 %v1709_v9, %v1705_v8 }
  0xe2   : > { %v1125_v14 = vrot.slane %v1123_v2, 4  ;;  %v6704_v16 = vld [vmem:[#allocation3 + $0x2d0] ss:$36 sps:$4 sm:$0xff]   ;;  %v1128_v17 = vrot.slane %v1126_v3, 5  ;;  %v1132_v21 = vshll.u32 %v841_v13, 16  ;;  %v1136_v22 = vshrl.u32 %v841_v13, 16  ;;  %4830 = vmatprep.mubr.bf16.mxu0 %v6700_v15 }
  0xe3   : > { %v842_v20 = vld [vmem:[#allocation2 + $0x8c] sm:$0x1]  ;;  %v5793_v24 = vrot.slane %v2141_v6, 9  ;;  %v1701_v27 = vrot.slane %v1700_v18, 4  ;;  %v1711_v28 = vrot.slane %v1710_v19, 4  ;;  %4831 = vmatmul.mubr.bf16.gmra.mxu0 %v6704_v16  ;;  %v2239_v32 = vrot.slane %v2142_v11, 5 }
  0xe4   : > { %v1129_v25 = vor.u32 %v1128_v17, %v1125_v14  ;;  %v1142_v26 = vshll.u32 %v842_v20, 16  ;;  %v2143_v29 = vld [vmem:[#allocation2 + $0x14] sm:$0x1]  ;;  %v1134_v30 = vrot.slane %v1132_v21, 5  ;;  %v1138_v31 = vrot.slane %v1136_v22, 4 }
  0xe5   : > { %v2242_v34 = vrot.slane %v2143_v29, 5  ;;  %v1706_v37 = vsel %vm6974_vm6, %v1701_v27, %v1705_v8  ;;  %v1716_v38 = vsel %vm6974_vm6, %v1711_v28, %v1715_v23  ;;  %v1330_v39 = vld [vmem:[#allocation2 + $0x60] sm:$0xe]  ;;  %v1331_v40 = vld [vmem:[#allocation2 + $0x64] sm:$0xf]  ;;  %v2240_v45 = vsel %vm7172_vm13, %v5793_v24, %v2239_v32 }
  0xe6   : > { %v1130_v35 = vrot.slane %v1129_v25, 4  ;;  %v1144_v36 = vrot.slane %v1142_v26, 5  ;;  %v1139_v41 = vor.u32 %v1138_v31, %v1134_v30  ;;  %v6715_v43 = vld [vmem:[#allocation3 + $0x204] ss:$36 sps:$4 sm:$0xff]   ;;  %2109 = vst [vmem:[#allocation3 + $0x10] sm:$0xf] %v1706_v37 }
  0xe7   : > { %v6717_v44 = vld [vmem:[#allocation3 + $0x200] ss:$36 sps:$4 sm:$0xff]   ;;  %2110 = vst [vmem:[#allocation3 + $0x34] sm:$0xf] %v1716_v38  ;;  %v2241_v47 = vrot.slane %v2239_v32, 4  ;;  %v5785_v51 = vrot.slane %v1330_v39, 9  ;;  %4967 = vmatprep.mubr.bf16.mxu1 %v6715_v43 }
  0xe8   : > { %v1135_v49 = vsel %vm6974_vm6, %v1130_v35, %v1134_v30  ;;  %2381 = vst [vmem:[#allocation3 + $0x14] sm:$0xf] %v2240_v45  ;;  %v1332_v50 = vld [vmem:[#allocation2 + $0x68] sm:$0x1]  ;;  %v1463_v52 = vrot.slane %v1331_v40, 5  ;;  %v1140_v54 = vrot.slane %v1139_v41, 4  ;;  %4968 = vmatmul.mubr.bf16.gmra.mxu1 %v6717_v44 }
  0xe9   : > { %v1597_v53 = vld [vmem:[#allocation2 + $0x6c] sm:$0xf]  ;;  %1296 = vst [vmem:[#allocation3 + $0x31c] sm:$0xf] %v1135_v49  ;;  %v2243_v55 = vsel %vm7172_vm13, %v2241_v47, %v2242_v34  ;;  %v1466_v57 = vrot.slane %v1332_v50, 5 }
  0xea   : > { %v1598_v58 = vld [vmem:[#allocation2 + $0x70] sm:$0xf]  ;;  %1629 = vst [vmem:[#allocation3 + $0x24c] sm:$0xf] %v1597_v53  ;;  %2382 = vst [vmem:[#allocation3 + $0x38] sm:$0xf] %v2243_v55  ;;  %v1464_v59 = vsel %vm7172_vm13, %v5785_v51, %v1463_v52  ;;  %v1145_v61 = vsel %vm6974_vm6, %v1140_v54, %v1144_v36 }
  0xeb   : > { %v1465_v60 = vrot.slane %v1463_v52, 4  ;;  %1630 = vst [vmem:[#allocation3 + $0x270] sm:$0xf] %v1598_v58  ;;  %1565 = vst [vmem:[#allocation3 + $0x248] sm:$0xf] %v1464_v59 }
  0xec   : > { %v1648_v62 = vld [vmem:[#allocation2 + $0x18] sm:$0xf]  ;;  %v1649_v63 = vld [vmem:[#allocation2 + $0x1c] sm:$0xf]  ;;  %1297 = vst [vmem:[#allocation3 + $0x340] sm:$0xf] %v1145_v61 }
  0xed   : > { %v1467_v0 = vsel %vm7172_vm13, %v1465_v60, %v1466_v57  ;;  %v1650_v1 = vld [vmem:[#allocation2 + $0x20] sm:$0x1]  ;;  %v1718_v2 = vshrl.u32 %v1648_v62, 16  ;;  %v1721_v3 = vshll.u32 %v1648_v62, 16  ;;  %v1727_v4 = vshll.u32 %v1649_v63, 16 }
  0xee   : > { %1566 = vst [vmem:[#allocation3 + $0x26c] sm:$0xf] %v1467_v0  ;;  %v1731_v5 = vshrl.u32 %v1649_v63, 16  ;;  %v1737_v6 = vshll.u32 %v1650_v1, 16  ;;  %v2144_v7 = vld [vmem:[#allocation2 + $0x18] sm:$0xe] }
  0xef   : > { %v2145_v8 = vld [vmem:[#allocation2 + $0x1c] sm:$0xf]  ;;  %v1720_v9 = vrot.slane %v1718_v2, 4  ;;  %v1723_v10 = vrot.slane %v1721_v3, 5  ;;  %v1729_v11 = vrot.slane %v1727_v4, 5  ;;  %v5794_v13 = vrot.slane %v2144_v7, 9 }
  0xf0   : > { %v2146_v12 = vld [vmem:[#allocation2 + $0x20] sm:$0x1]  ;;  %v1733_v14 = vrot.slane %v1731_v5, 4  ;;  %v2246_v15 = vrot.slane %v2145_v8, 5  ;;  %v1739_v20 = vrot.slane %v1737_v6, 5 }
  0xf1   : > { %v2249_v16 = vrot.slane %v2146_v12, 5  ;;  %v1724_v17 = vor.u32 %v1723_v10, %v1720_v9  ;;  %v6720_v18 = vld [vmem:[#allocation3 + $0x14] ss:$36 sps:$4 sm:$0xff]   ;;  %v1335_v36 = vld [vmem:[#allocation2 + $0x74] sm:$0x1] }
  0xf2   : > { %v1734_v19 = vor.u32 %v1733_v14, %v1729_v11  ;;  %v2247_v21 = vsel %vm7172_vm13, %v5794_v13, %v2246_v15  ;;  %v2248_v22 = vrot.slane %v2246_v15, 4  ;;  %v1333_v24 = vld [vmem:[#allocation2 + $0x6c] sm:$0xe]  ;;  %v1334_v25 = vld [vmem:[#allocation2 + $0x70] sm:$0xf]  ;;  %v1473_v39 = vrot.slane %v1335_v36, 5 }
  0xf3   : > { %v1725_v23 = vrot.slane %v1724_v17, 4  ;;  %2383 = vst [vmem:[#allocation3 + $0x5c] sm:$0xf] %v2247_v21  ;;  %v6708_v26 = vld [vmem:[#allocation3 + $0x31c] ss:$36 sps:$4 sm:$0xff]   ;;  %v5786_v34 = vrot.slane %v1333_v24, 9 }
  0xf4   : > { %v6712_v27 = vld [vmem:[#allocation3 + $0x318] ss:$36 sps:$4 sm:$0xff]   ;;  %v1735_v28 = vrot.slane %v1734_v19, 4  ;;  %v2250_v29 = vsel %vm7172_vm13, %v2248_v22, %v2249_v16  ;;  %v6721_v30 = vld [vmem:[#allocation3 + $0x24c] ss:$36 sps:$4 sm:$0xff]   ;;  %4838 = vmatprep.mubr.bf16.mxu0 %v6708_v26  ;;  %v1470_v37 = vrot.slane %v1334_v25, 5 }
  0xf5   : > { %v6725_v31 = vld [vmem:[#allocation3 + $0x248] ss:$36 sps:$4 sm:$0xff]   ;;  %v1730_v32 = vsel %vm6974_vm6, %v1725_v23, %v1729_v11  ;;  %2384 = vst [vmem:[#allocation3 + $0x80] sm:$0xf] %v2250_v29  ;;  %v1599_v38 = vld [vmem:[#allocation2 + $0x78] sm:$0xf]  ;;  %4839 = vmatmul.mubr.bf16.gmra.mxu0 %v6712_v27  ;;  %4975 = vmatprep.mubr.bf16.mxu1 %v6721_v30 }
  0xf6   : > { %v1740_v35 = vsel %vm6974_vm6, %v1735_v28, %v1739_v20  ;;  %2111 = vst [vmem:[#allocation3 + $0x58] sm:$0xf] %v1730_v32  ;;  %v1600_v40 = vld [vmem:[#allocation2 + $0x7c] sm:$0xf]  ;;  %1631 = vst [vmem:[#allocation3 + $0x294] sm:$0xf] %v1599_v38  ;;  %5072 = vmatprep.mubr.bf16.mxu0 %v6720_v18  ;;  %4976 = vmatmul.mubr.bf16.gmra.mxu1 %v6725_v31  ;;  %v1471_v43 = vsel %vm7172_vm13, %v5786_v34, %v1470_v37 }
  0xf7   : > { %2112 = vst [vmem:[#allocation3 + $0x7c] sm:$0xf] %v1740_v35  ;;  %v1651_v41 = vld [vmem:[#allocation2 + $0x24] sm:$0xf]  ;;  %v1472_v44 = vrot.slane %v1470_v37, 4  ;;  %v6739_v12 = vld [vmem:[%s8187_s1 + $0x230] sm:$0xff]  }
  0xf8   : > { %1632 = vst [vmem:[#allocation3 + $0x2b8] sm:$0xf] %v1600_v40  ;;  %v1652_v45 = vld [vmem:[#allocation2 + $0x28] sm:$0xf]  ;;  %v1653_v47 = vld [vmem:[#allocation2 + $0x2c] sm:$0x1] }
  0xf9   : > { %v1742_v49 = vshrl.u32 %v1651_v41, 16  ;;  %v6718_v50 = vld [vmem:[#allocation3 + $0x10] ss:$36 sps:$4 sm:$0xff]   ;;  %1567 = vst [vmem:[#allocation3 + $0x290] sm:$0xf] %v1471_v43  ;;  %v1745_v51 = vshll.u32 %v1651_v41, 16  ;;  %v1474_v57 = vsel %vm7172_vm13, %v1472_v44, %v1473_v39 }
  0xfa   : > { %v1751_v52 = vshll.u32 %v1652_v45, 16  ;;  %v1755_v53 = vshrl.u32 %v1652_v45, 16  ;;  %v1761_v54 = vshll.u32 %v1653_v47, 16  ;;  %v2147_v55 = vld [vmem:[#allocation2 + $0x24] sm:$0xe]  ;;  %v6754_v21 = vld [vmem:[%s8187_s1 + $0x228] sm:$0xff]  }
  0xfb   : > { %v1744_v58 = vrot.slane %v1742_v49, 4  ;;  %v2148_v59 = vld [vmem:[#allocation2 + $0x28] sm:$0xf]  ;;  %v2149_v60 = vld [vmem:[#allocation2 + $0x2c] sm:$0x1]  ;;  %v5795_v61 = vrot.slane %v2147_v55, 9 }
  0xfc   : > { %1568 = vst [vmem:[#allocation3 + $0x2b4] sm:$0xf] %v1474_v57  ;;  %v1747_v62 = vrot.slane %v1745_v51, 5  ;;  %v1753_v63 = vrot.slane %v1751_v52, 5  ;;  %v1757_v0 = vrot.slane %v1755_v53, 4  ;;  %v1763_v1 = vrot.slane %v1761_v54, 5 }
  0xfd   : > { %v1336_v2 = vld [vmem:[#allocation2 + $0x78] sm:$0xe]  ;;  %v2253_v3 = vrot.slane %v2148_v59, 5  ;;  %v2256_v4 = vrot.slane %v2149_v60, 5  ;;  %v1337_v5 = vld [vmem:[#allocation2 + $0x7c] sm:$0xf]  ;;  %5073 = vmatmul.mubr.bf16.vlgmr.msra.gmra.mxu0 %v6718_v50  ;;  %v6061_v50 = vpop.f32.mrf.mxu0 }
  0xfe   : > { %v1338_v6 = vld [vmem:[#allocation2 + $0x80] sm:$0x1]  ;;  %v1748_v7 = vor.u32 %v1747_v62, %v1744_v58  ;;  %v1758_v8 = vor.u32 %v1757_v0, %v1753_v63  ;;  %v5787_v9 = vrot.slane %v1336_v2, 9  ;;  %v1477_v10 = vrot.slane %v1337_v5, 5  ;;  %v1601_v11 = vld [vmem:[#allocation2 + $0x84] sm:$0xf] }
  0xff   : > { %v6726_v13 = vld [vmem:[#allocation3 + $0x5c] ss:$36 sps:$4 sm:$0xff]   ;;  %v2254_v14 = vsel %vm7172_vm13, %v5795_v61, %v2253_v3  ;;  %v2255_v15 = vrot.slane %v2253_v3, 4  ;;  %1633 = vst [vmem:[#allocation3 + $0x2dc] sm:$0xf] %v1601_v11  ;;  %v1480_v24 = vrot.slane %v1338_v6, 5  ;;  %v6062_v2 = vpop.f32.mrf.mxu0 }
 0x100   : > { %v1749_v16 = vrot.slane %v1748_v7, 4  ;;  %v1759_v17 = vrot.slane %v1758_v8, 4  ;;  %2385 = vst [vmem:[#allocation3 + $0xa4] sm:$0xf] %v2254_v14  ;;  %v1478_v18 = vsel %vm7172_vm13, %v5787_v9, %v1477_v10  ;;  %v1479_v19 = vrot.slane %v1477_v10, 4  ;;  %5080 = vmatprep.mubr.bf16.mxu0 %v6726_v13  ;;  %v6870_v22 = vld [vmem:[%s8187_s1 + $0x238] sm:$0xff]  }
 0x101   : > { %v1602_v20 = vld [vmem:[#allocation2 + $0x88] sm:$0xf]  ;;  %6518 = vmatpush3.bf16.msra.mxu0 %v6870_v22  ;;  %v2257_v23 = vsel %vm7172_vm13, %v2255_v15, %v2256_v4  ;;  %1569 = vst [vmem:[#allocation3 + $0x2d8] sm:$0xf] %v1478_v18  ;;  %v6729_v25 = vld [vmem:[#allocation3 + $0x58] ss:$36 sps:$4 sm:$0xff]   ;;  %v7426_v6 = vadd.f32 %v6062_v2, %v6061_v50 }
 0x102   : > { %1634 = vst [vmem:[#allocation3 + $0x300] sm:$0xf] %v1602_v20  ;;  %v1754_v26 = vsel %vm6974_vm6, %v1749_v16, %v1753_v63  ;;  %v1764_v27 = vsel %vm6974_vm6, %v1759_v17, %v1763_v1  ;;  %2386 = vst [vmem:[#allocation3 + $0xc8] sm:$0xf] %v2257_v23  ;;  %6519 = vmatprep.subr.bf16.mxu0 %v6739_v12  ;;  %v1654_v28 = vld [vmem:[#allocation2 + $0x30] sm:$0xf]  ;;  %v1481_v31 = vsel %vm7172_vm13, %v1479_v19, %v1480_v24 }
 0x103   : > { %v6730_v29 = vld [vmem:[#allocation3 + $0x294] ss:$36 sps:$4 sm:$0xff]   ;;  %2113 = vst [vmem:[#allocation3 + $0xa0] sm:$0xf] %v1754_v26  ;;  %2114 = vst [vmem:[#allocation3 + $0xc4] sm:$0xf] %v1764_v27 }
 0x104   : > { %v6732_v30 = vld [vmem:[#allocation3 + $0x290] ss:$36 sps:$4 sm:$0xff]   ;;  %v1766_v32 = vshrl.u32 %v1654_v28, 16  ;;  %1570 = vst [vmem:[#allocation3 + $0x2fc] sm:$0xf] %v1481_v31  ;;  %v1769_v36 = vshll.u32 %v1654_v28, 16  ;;  %4983 = vmatprep.mubr.bf16.mxu1 %v6730_v29 }
 0x105   : > { %v1655_v34 = vld [vmem:[#allocation2 + $0x34] sm:$0xf]  ;;  %v1656_v35 = vld [vmem:[#allocation2 + $0x38] sm:$0x1]  ;;  %v6769_v37 = vld [vmem:[%s8187_s1 + $0x220] sm:$0xff]   ;;  %6520 = vmatpush3.bf16.msra.mxu0 %v6739_v12  ;;  %4984 = vmatmul.mubr.bf16.gmra.mxu1 %v6732_v30 }
 0x106   : > { %v1768_v38 = vrot.slane %v1766_v32, 4  ;;  %v1775_v39 = vshll.u32 %v1655_v34, 16  ;;  %v1779_v40 = vshrl.u32 %v1655_v34, 16  ;;  %v1785_v41 = vshll.u32 %v1656_v35, 16  ;;  %v2150_v43 = vld [vmem:[#allocation2 + $0x30] sm:$0xe]  ;;  %6521 = vmatprep.subr.bf16.mxu0 %v6754_v21  ;;  %5081 = vmatmul.mubr.bf16.gmra.mxu0 %v6729_v25 }
 0x107   : > { %v1771_v44 = vrot.slane %v1769_v36, 5  ;;  %v2151_v45 = vld [vmem:[#allocation2 + $0x34] sm:$0xf]  ;;  %v2152_v47 = vld [vmem:[#allocation2 + $0x38] sm:$0x1]  ;;  %v5796_v49 = vrot.slane %v2150_v43, 9 }
 0x108   : > { %v1777_v51 = vrot.slane %v1775_v39, 5  ;;  %v1781_v52 = vrot.slane %v1779_v40, 4  ;;  %v1787_v53 = vrot.slane %v1785_v41, 5  ;;  %v2260_v54 = vrot.slane %v2151_v45, 5  ;;  %v1339_v58 = vld [vmem:[#allocation2 + $0x84] sm:$0xe] }
 0x109   : > { %v1772_v55 = vor.u32 %v1771_v44, %v1768_v38  ;;  %v2263_v57 = vrot.slane %v2152_v47, 5  ;;  %v6784_v59 = vld [vmem:[%s8187_s1 + $0x218] sm:$0xff]   ;;  %v1340_v63 = vld [vmem:[#allocation2 + $0x88] sm:$0xf]  ;;  %v1341_v0 = vld [vmem:[#allocation2 + $0x8c] sm:$0x1]  ;;  %6522 = vmatpush3.bf16.msra.mxu0 %v6754_v21 }
 0x10a   : > { %v1782_v60 = vor.u32 %v1781_v52, %v1777_v51  ;;  %v2261_v61 = vsel %vm7172_vm13, %v5796_v49, %v2260_v54  ;;  %v2262_v62 = vrot.slane %v2260_v54, 4  ;;  %v5788_v1 = vrot.slane %v1339_v58, 9  ;;  %v6733_v3 = vld [vmem:[#allocation3 + $0xa4] ss:$36 sps:$4 sm:$0xff]   ;;  %6523 = vmatprep.subr.bf16.mxu0 %v6769_v37  ;;  %v6736_v8 = vld [vmem:[#allocation3 + $0x2dc] ss:$36 sps:$4 sm:$0xff]  }
 0x10b   : > { %v1773_v4 = vrot.slane %v1772_v55, 4  ;;  %2387 = vst [vmem:[#allocation3 + $0xec] sm:$0xf] %v2261_v61  ;;  %v1484_v5 = vrot.slane %v1340_v63, 5  ;;  %v6735_v7 = vld [vmem:[#allocation3 + $0xa0] ss:$36 sps:$4 sm:$0xff]   ;;  %5088 = vmatprep.mubr.bf16.mxu0 %v6733_v3  ;;  %4991 = vmatprep.mubr.bf16.mxu1 %v6736_v8 }
 0x10c   : > { %v1783_v9 = vrot.slane %v1782_v60, 4  ;;  %v2264_v10 = vsel %vm7172_vm13, %v2262_v62, %v2263_v57  ;;  %v6740_v11 = vld [vmem:[#allocation3 + $0x2d8] ss:$36 sps:$4 sm:$0xff]   ;;  %v1487_v15 = vrot.slane %v1341_v0, 5  ;;  %v1657_v19 = vld [vmem:[#allocation2 + $0x3c] sm:$0xf] }
 0x10d   : > { %v1778_v12 = vsel %vm6974_vm6, %v1773_v4, %v1777_v51  ;;  %2388 = vst [vmem:[#allocation3 + $0x110] sm:$0xf] %v2264_v10  ;;  %v1485_v13 = vsel %vm7172_vm13, %v5788_v1, %v1484_v5  ;;  %v1486_v14 = vrot.slane %v1484_v5, 4  ;;  %v1603_v16 = vld [vmem:[#allocation2 + $0x90] sm:$0xf]  ;;  %6524 = vmatpush3.bf16.msra.mxu0 %v6769_v37  ;;  %4992 = vmatmul.mubr.bf16.gmra.mxu1 %v6740_v11  ;;  %v1790_v23 = vshrl.u32 %v1657_v19, 16  ;;  %v7454_v5 = vpop.f32.mrf.mxu0 }
 0x10e   : > { %v1788_v17 = vsel %vm6974_vm6, %v1783_v9, %v1787_v53  ;;  %2115 = vst [vmem:[#allocation3 + $0xe8] sm:$0xf] %v1778_v12  ;;  %1571 = vst [vmem:[#allocation3 + $0x320] sm:$0xf] %v1485_v13  ;;  %v1604_v18 = vld [vmem:[#allocation2 + $0x94] sm:$0xf]  ;;  %6525 = vmatprep.subr.bf16.mxu0 %v6784_v59  ;;  %5089 = vmatmul.mubr.bf16.gmra.mxu0 %v6735_v7 }
 0x10f   : > { %1635 = vst [vmem:[#allocation3 + $0x324] sm:$0xf] %v1603_v16  ;;  %v1658_v20 = vld [vmem:[#allocation2 + $0x40] sm:$0xf]  ;;  %2116 = vst [vmem:[#allocation3 + $0x10c] sm:$0xf] %v1788_v17  ;;  %v1488_v21 = vsel %vm7172_vm13, %v1486_v14, %v1487_v15  ;;  %v6133_v16 = vpop.f32.mrf.mxu1 }
 0x110   : > { %1636 = vst [vmem:[#allocation3 + $0x348] sm:$0xf] %v1604_v18  ;;  %v1659_v22 = vld [vmem:[#allocation2 + $0x44] sm:$0x1]  ;;  %v1793_v24 = vshll.u32 %v1657_v19, 16  ;;  %v1799_v25 = vshll.u32 %v1658_v20, 16 }
 0x111   : > { %v6796_v26 = vld [vmem:[%s8187_s1 + $0x210] sm:$0xff]   ;;  %1572 = vst [vmem:[#allocation3 + $0x344] sm:$0xf] %v1488_v21  ;;  %v1803_v27 = vshrl.u32 %v1658_v20, 16  ;;  %v1809_v28 = vshll.u32 %v1659_v22, 16  ;;  %v1792_v31 = vrot.slane %v1790_v23, 4  ;;  %6526 = vmatpush3.bf16.msra.mxu0 %v6784_v59 }
 0x112   : > { %v2153_v29 = vld [vmem:[#allocation2 + $0x3c] sm:$0xe]  ;;  %v2154_v30 = vld [vmem:[#allocation2 + $0x40] sm:$0xf]  ;;  %v1795_v32 = vrot.slane %v1793_v24, 5  ;;  %v1801_v34 = vrot.slane %v1799_v25, 5  ;;  %6527 = vmatprep.subr.bf16.mxu0 %v6796_v26  ;;  %v7458_v25 = vpop.f32.mrf.mxu0 }
 0x113   : > { %v2155_v35 = vld [vmem:[#allocation2 + $0x44] sm:$0x1]  ;;  %v5797_v36 = vrot.slane %v2153_v29, 9  ;;  %v1805_v37 = vrot.slane %v1803_v27, 4  ;;  %v2267_v38 = vrot.slane %v2154_v30, 5  ;;  %v6809_v41 = vld [vmem:[%s8187_s1 + $0x208] sm:$0xff]  }
 0x114   : > { %v2270_v39 = vrot.slane %v2155_v35, 5  ;;  %v1342_v40 = vld [vmem:[#allocation2 + $0x90] sm:$0xe]  ;;  %v1796_v43 = vor.u32 %v1795_v32, %v1792_v31  ;;  %v1811_v44 = vrot.slane %v1809_v28, 5  ;;  %v1343_v45 = vld [vmem:[#allocation2 + $0x94] sm:$0xf] }
 0x115   : > { %v1344_v47 = vld [vmem:[#allocation2 + $0x98] sm:$0x1]  ;;  %v5789_v49 = vrot.slane %v1342_v40, 9  ;;  %v1806_v50 = vor.u32 %v1805_v37, %v1801_v34  ;;  %v2268_v51 = vsel %vm7172_vm13, %v5797_v36, %v2267_v38  ;;  %v2269_v52 = vrot.slane %v2267_v38, 4  ;;  %v1605_v54 = vld [vmem:[#allocation2 + $0x9c] sm:$0xf]  ;;  %6528 = vmatpush3.bf16.msra.mxu0 %v6796_v26  ;;  %v6134_v26 = vpop.f32.mrf.mxu1 }
 0x116   : > { %v1491_v53 = vrot.slane %v1343_v45, 5  ;;  %v1606_v55 = vld [vmem:[#allocation2 + $0xa0] sm:$0xf]  ;;  %v1797_v57 = vrot.slane %v1796_v43, 4  ;;  %2389 = vst [vmem:[#allocation3 + $0x134] sm:$0xf] %v2268_v51  ;;  %6529 = vmatprep.subr.bf16.mxu0 %v6809_v41  ;;  %v7460_v29 = vadd.f32 %v6134_v26, %v6133_v16 }
 0x117   : > { %v1494_v58 = vrot.slane %v1344_v47, 5  ;;  %1637 = vst [vmem:[#allocation3 + $0x36c] sm:$0xf] %v1605_v54  ;;  %1638 = vst [vmem:[#allocation3 + $0x390] sm:$0xf] %v1606_v55  ;;  %v1807_v61 = vrot.slane %v1806_v50, 4  ;;  %v2271_v62 = vsel %vm7172_vm13, %v2269_v52, %v2270_v39  ;;  %v6067_v47 = vpop.f32.mrf.mxu0  ;;  %v7471_v54 = vpop.f32.mrf.mxu1 }
 0x118   : > { %v6741_v59 = vld [vmem:[#allocation3 + $0xec] ss:$36 sps:$4 sm:$0xff]   ;;  %v1492_v63 = vsel %vm7172_vm13, %v5789_v49, %v1491_v53  ;;  %v6745_v0 = vld [vmem:[#allocation3 + $0x324] ss:$36 sps:$4 sm:$0xff]   ;;  %v1802_v2 = vsel %vm6974_vm6, %v1797_v57, %v1801_v34  ;;  %2390 = vst [vmem:[#allocation3 + $0x158] sm:$0xf] %v2271_v62 }
 0x119   : > { %v6744_v60 = vld [vmem:[#allocation3 + $0xe8] ss:$36 sps:$4 sm:$0xff]   ;;  %v6747_v1 = vld [vmem:[#allocation3 + $0x320] ss:$36 sps:$4 sm:$0xff]   ;;  %v1493_v3 = vrot.slane %v1491_v53, 4  ;;  %5096 = vmatprep.mubr.bf16.mxu0 %v6741_v59  ;;  %v1812_v4 = vsel %vm6974_vm6, %v1807_v61, %v1811_v44  ;;  %4999 = vmatprep.mubr.bf16.mxu1 %v6745_v0  ;;  %v6068_v61 = vpop.f32.mrf.mxu0 }
 0x11a   : > { %1573 = vst [vmem:[#allocation3 + $0x368] sm:$0xf] %v1492_v63  ;;  %2117 = vst [vmem:[#allocation3 + $0x130] sm:$0xf] %v1802_v2  ;;  %5097 = vmatmul.mubr.bf16.gmra.mxu0 %v6744_v60  ;;  %v1660_v8 = vld [vmem:[#allocation2 + $0x48] sm:$0xf]  ;;  %5000 = vmatmul.mubr.bf16.gmra.mxu1 %v6747_v1  ;;  %v7477_v2 = vadd.f32 %v6068_v61, %v6067_v47 }
 0x11b   : > { %2118 = vst [vmem:[#allocation3 + $0x154] sm:$0xf] %v1812_v4  ;;  %v1495_v7 = vsel %vm7172_vm13, %v1493_v3, %v1494_v58  ;;  %v1661_v9 = vld [vmem:[#allocation2 + $0x4c] sm:$0xf]  ;;  %v1662_v10 = vld [vmem:[#allocation2 + $0x50] sm:$0x1]  ;;  %6530 = vmatpush3.bf16.msra.mxu0 %v6809_v41 }
 0x11c   : > { %1574 = vst [vmem:[#allocation3 + $0x38c] sm:$0xf] %v1495_v7  ;;  %v1814_v11 = vshrl.u32 %v1660_v8, 16  ;;  %v1817_v12 = vshll.u32 %v1660_v8, 16  ;;  %v1823_v13 = vshll.u32 %v1661_v9, 16  ;;  %v1827_v14 = vshrl.u32 %v1661_v9, 16 }
 0x11d   : > { %v2156_v15 = vld [vmem:[#allocation2 + $0x48] sm:$0xe]  ;;  %v1833_v17 = vshll.u32 %v1662_v10, 16  ;;  %v2157_v18 = vld [vmem:[#allocation2 + $0x4c] sm:$0xf]  ;;  %v6822_v30 = vld [vmem:[%s8187_s1 + $0x200] sm:$0xff]  }
 0x11e   : > { %v2158_v19 = vld [vmem:[#allocation2 + $0x50] sm:$0x1]  ;;  %v5798_v20 = vrot.slane %v2156_v15, 9  ;;  %v1816_v21 = vrot.slane %v1814_v11, 4  ;;  %v1819_v22 = vrot.slane %v1817_v12, 5  ;;  %v1825_v23 = vrot.slane %v1823_v13, 5  ;;  %6531 = vmatprep.subr.bf16.mxu0 %v6822_v30 }
 0x11f   : > { %v1829_v24 = vrot.slane %v1827_v14, 4  ;;  %v2274_v27 = vrot.slane %v2157_v18, 5  ;;  %v2277_v28 = vrot.slane %v2158_v19, 5  ;;  %v1835_v34 = vrot.slane %v1833_v17, 5  ;;  %v1345_v35 = vld [vmem:[#allocation2 + $0x9c] sm:$0xe]  ;;  %6532 = vmatpush3.bf16.msra.mxu0 %v6822_v30  ;;  %v7481_v14 = vpop.f32.mrf.mxu1 }
 0x120   : > { %v1820_v31 = vor.u32 %v1819_v22, %v1816_v21  ;;  %v1346_v36 = vld [vmem:[#allocation2 + $0xa0] sm:$0xf]  ;;  %v1347_v39 = vld [vmem:[#allocation2 + $0xa4] sm:$0x1]  ;;  %v5790_v40 = vrot.slane %v1345_v35, 9 }
 0x121   : > { %v1830_v32 = vor.u32 %v1829_v24, %v1825_v23  ;;  %v2275_v37 = vsel %vm7172_vm13, %v5798_v20, %v2274_v27  ;;  %v2276_v38 = vrot.slane %v2274_v27, 4  ;;  %v1498_v41 = vrot.slane %v1346_v36, 5  ;;  %v6748_v43 = vld [vmem:[#allocation3 + $0x134] ss:$36 sps:$4 sm:$0xff]   ;;  %v6751_v49 = vld [vmem:[#allocation3 + $0x36c] ss:$36 sps:$4 sm:$0xff]  }
 0x122   : > { %v6750_v44 = vld [vmem:[#allocation3 + $0x130] ss:$36 sps:$4 sm:$0xff]   ;;  %v1821_v45 = vrot.slane %v1820_v31, 4  ;;  %2391 = vst [vmem:[#allocation3 + $0x17c] sm:$0xf] %v2275_v37  ;;  %5104 = vmatprep.mubr.bf16.mxu0 %v6748_v43  ;;  %v1501_v58 = vrot.slane %v1347_v39, 5  ;;  %5007 = vmatprep.mubr.bf16.mxu1 %v6751_v49  ;;  %v7487_v43 = vpop.f32.mrf.mxu0 }
 0x123   : > { %v6755_v50 = vld [vmem:[#allocation3 + $0x368] ss:$36 sps:$4 sm:$0xff]   ;;  %v1831_v51 = vrot.slane %v1830_v32, 4  ;;  %v2278_v52 = vsel %vm7172_vm13, %v2276_v38, %v2277_v28  ;;  %v1499_v53 = vsel %vm7172_vm13, %v5790_v40, %v1498_v41  ;;  %v1500_v57 = vrot.slane %v1498_v41, 4  ;;  %v1607_v59 = vld [vmem:[#allocation2 + $0xa8] sm:$0xf]  ;;  %5105 = vmatmul.mubr.bf16.gmra.mxu0 %v6750_v44  ;;  %v6139_v38 = vpop.f32.mrf.mxu1 }
 0x124   : > { %v1826_v55 = vsel %vm6974_vm6, %v1821_v45, %v1825_v23  ;;  %2392 = vst [vmem:[#allocation3 + $0x1a0] sm:$0xf] %v2278_v52  ;;  %1575 = vst [vmem:[#allocation3 + $0x3b0] sm:$0xf] %v1499_v53  ;;  %v1608_v60 = vld [vmem:[#allocation2 + $0xac] sm:$0xf]  ;;  %5008 = vmatmul.mubr.bf16.gmra.mxu1 %v6755_v50 }
 0x125   : > { %v1836_v62 = vsel %vm6974_vm6, %v1831_v51, %v1835_v34  ;;  %2119 = vst [vmem:[#allocation3 + $0x178] sm:$0xf] %v1826_v55  ;;  %1639 = vst [vmem:[#allocation3 + $0x3b4] sm:$0xf] %v1607_v59  ;;  %v1663_v63 = vld [vmem:[#allocation2 + $0x54] sm:$0xf]  ;;  %v1502_v3 = vsel %vm7172_vm13, %v1500_v57, %v1501_v58  ;;  %v6140_v50 = vpop.f32.mrf.mxu1 }
 0x126   : > { %1640 = vst [vmem:[#allocation3 + $0x3d8] sm:$0xf] %v1608_v60  ;;  %v1664_v0 = vld [vmem:[#allocation2 + $0x58] sm:$0xf]  ;;  %v1665_v1 = vld [vmem:[#allocation2 + $0x5c] sm:$0x1]  ;;  %v7495_v57 = vadd.f32 %v6140_v50, %v6139_v38 }
 0x127   : > { %2120 = vst [vmem:[#allocation3 + $0x19c] sm:$0xf] %v1836_v62  ;;  %v1838_v4 = vshrl.u32 %v1663_v63, 16  ;;  %v1841_v7 = vshll.u32 %v1663_v63, 16  ;;  %v1847_v8 = vshll.u32 %v1664_v0, 16  ;;  %v1851_v10 = vshrl.u32 %v1664_v0, 16  ;;  %v7499_v0 = vpop.f32.mrf.mxu0 }
 0x128   : > { %v2159_v9 = vld [vmem:[#allocation2 + $0x54] sm:$0xe]  ;;  %1576 = vst [vmem:[#allocation3 + $0x3d4] sm:$0xf] %v1502_v3  ;;  %v1857_v11 = vshll.u32 %v1665_v1, 16 }
 0x129   : > { %v2160_v12 = vld [vmem:[#allocation2 + $0x58] sm:$0xf]  ;;  %v2161_v13 = vld [vmem:[#allocation2 + $0x5c] sm:$0x1]  ;;  %v1840_v15 = vrot.slane %v1838_v4, 4  ;;  %v1843_v16 = vrot.slane %v1841_v7, 5 }
 0x12a   : > { %v1849_v17 = vrot.slane %v1847_v8, 5  ;;  %v5799_v18 = vrot.slane %v2159_v9, 9  ;;  %v1348_v19 = vld [vmem:[#allocation2 + $0xa8] sm:$0xe]  ;;  %v1853_v20 = vrot.slane %v1851_v10, 4  ;;  %v1859_v21 = vrot.slane %v1857_v11, 5 }
 0x12b   : > { %v2281_v22 = vrot.slane %v2160_v12, 5  ;;  %v2284_v23 = vrot.slane %v2161_v13, 5  ;;  %v1349_v24 = vld [vmem:[#allocation2 + $0xac] sm:$0xf]  ;;  %v1844_v26 = vor.u32 %v1843_v16, %v1840_v15  ;;  %v1350_v27 = vld [vmem:[#allocation2 + $0xb0] sm:$0x1] }
 0x12c   : > { %v5791_v28 = vrot.slane %v1348_v19, 9  ;;  %v1505_v30 = vrot.slane %v1349_v24, 5  ;;  %v1609_v31 = vld [vmem:[#allocation2 + $0xb4] sm:$0xf]  ;;  %v1854_v32 = vor.u32 %v1853_v20, %v1849_v17  ;;  %v1508_v36 = vrot.slane %v1350_v27, 5  ;;  %v6073_v19 = vpop.f32.mrf.mxu0 }
 0x12d   : > { %v2282_v34 = vsel %vm7172_vm13, %v5799_v18, %v2281_v22  ;;  %v2283_v35 = vrot.slane %v2281_v22, 4  ;;  %v1610_v37 = vld [vmem:[#allocation2 + $0xb8] sm:$0xf]  ;;  %1641 = vst [vmem:[#allocation3 + $0x3fc] sm:$0xf] %v1609_v31  ;;  %v1845_v39 = vrot.slane %v1844_v26, 4 }
 0x12e   : > { %2393 = vst [vmem:[#allocation3 + $0x1c4] sm:$0xf] %v2282_v34  ;;  %v1506_v40 = vsel %vm7172_vm13, %v5791_v28, %v1505_v30  ;;  %v1507_v41 = vrot.slane %v1505_v30, 4  ;;  %1642 = vst [vmem:[#allocation3 + $0x420] sm:$0xf] %v1610_v37  ;;  %v1855_v47 = vrot.slane %v1854_v32, 4  ;;  %v6074_v30 = vpop.f32.mrf.mxu0 }
 0x12f   : > { %v6756_v44 = vld [vmem:[#allocation3 + $0x17c] ss:$36 sps:$4 sm:$0xff]   ;;  %v2285_v49 = vsel %vm7172_vm13, %v2283_v35, %v2284_v23  ;;  %1577 = vst [vmem:[#allocation3 + $0x3f8] sm:$0xf] %v1506_v40  ;;  %v6760_v51 = vld [vmem:[#allocation3 + $0x3b4] ss:$36 sps:$4 sm:$0xff]   ;;  %v1850_v53 = vsel %vm6974_vm6, %v1845_v39, %v1849_v17  ;;  %v7505_v35 = vadd.f32 %v6074_v30, %v6073_v19 }
 0x130   : > { %v6759_v45 = vld [vmem:[#allocation3 + $0x178] ss:$36 sps:$4 sm:$0xff]   ;;  %v6762_v52 = vld [vmem:[#allocation3 + $0x3b0] ss:$36 sps:$4 sm:$0xff]   ;;  %2394 = vst [vmem:[#allocation3 + $0x1e8] sm:$0xf] %v2285_v49  ;;  %v1509_v55 = vsel %vm7172_vm13, %v1507_v41, %v1508_v36  ;;  %5112 = vmatprep.mubr.bf16.mxu0 %v6756_v44  ;;  %v1860_v58 = vsel %vm6974_vm6, %v1855_v47, %v1859_v21  ;;  %5015 = vmatprep.mubr.bf16.mxu1 %v6760_v51 }
 0x131   : > { %2121 = vst [vmem:[#allocation3 + $0x1c0] sm:$0xf] %v1850_v53  ;;  %1578 = vst [vmem:[#allocation3 + $0x41c] sm:$0xf] %v1509_v55  ;;  %v1666_v59 = vld [vmem:[#allocation2 + $0x60] sm:$0xf]  ;;  %5113 = vmatmul.mubr.bf16.gmra.mxu0 %v6759_v45  ;;  %5016 = vmatmul.mubr.bf16.gmra.mxu1 %v6762_v52 }
 0x132   : > { %2122 = vst [vmem:[#allocation3 + $0x1e4] sm:$0xf] %v1860_v58  ;;  %v1667_v60 = vld [vmem:[#allocation2 + $0x64] sm:$0xf]  ;;  %v1668_v61 = vld [vmem:[#allocation2 + $0x68] sm:$0x1] }
 0x133   : > { %v1862_v62 = vshrl.u32 %v1666_v59, 16  ;;  %v1865_v63 = vshll.u32 %v1666_v59, 16  ;;  %v1871_v1 = vshll.u32 %v1667_v60, 16  ;;  %v1875_v3 = vshrl.u32 %v1667_v60, 16  ;;  %v2162_v7 = vld [vmem:[#allocation2 + $0x60] sm:$0xe] }
 0x134   : > { %v1881_v4 = vshll.u32 %v1668_v61, 16  ;;  %v2163_v10 = vld [vmem:[#allocation2 + $0x64] sm:$0xf]  ;;  %v2164_v11 = vld [vmem:[#allocation2 + $0x68] sm:$0x1]  ;;  %v5800_v15 = vrot.slane %v2162_v7, 9 }
 0x135   : > { %v1864_v8 = vrot.slane %v1862_v62, 4  ;;  %v1867_v9 = vrot.slane %v1865_v63, 5  ;;  %v1873_v12 = vrot.slane %v1871_v1, 5  ;;  %v1877_v13 = vrot.slane %v1875_v3, 4  ;;  %v300_v22 = vld [vmem:[%s6956_s18 + $0x78] sm:$0xf]  ;;  %v7515_v63 = vpop.f32.mrf.mxu1 }
 0x136   : > { %v2288_v17 = vrot.slane %v2163_v10, 5  ;;  %v2291_v18 = vrot.slane %v2164_v11, 5  ;;  %v1883_v21 = vrot.slane %v1881_v4, 5  ;;  %v301_v23 = vld [vmem:[%s6956_s18 + $0x7c] sm:$0xf]  ;;  %v561_v39 = vshrl.u32 %v300_v22, 16 }
 0x137   : > { %v1868_v16 = vor.u32 %v1867_v9, %v1864_v8  ;;  %v1878_v20 = vor.u32 %v1877_v13, %v1873_v12  ;;  %v6766_v24 = vld [vmem:[#allocation3 + $0x3fc] ss:$36 sps:$4 sm:$0xff]   ;;  %v6763_v31 = vld [vmem:[#allocation3 + $0x1c4] ss:$36 sps:$4 sm:$0xff]   ;;  %v564_v40 = vshll.u32 %v300_v22, 16  ;;  %v569_v45 = vshrl.u32 %v301_v23, 16  ;;  %v7526_v46 = vpop.f32.mrf.mxu1 }
 0x138   : > { %v2289_v27 = vsel %vm7172_vm13, %v5800_v15, %v2288_v17  ;;  %v2290_v28 = vrot.slane %v2288_v17, 4  ;;  %5023 = vmatprep.mubr.bf16.mxu1 %v6766_v24  ;;  %v6770_v36 = vld [vmem:[#allocation3 + $0x3f8] ss:$36 sps:$4 sm:$0xff]   ;;  %5120 = vmatprep.mubr.bf16.mxu0 %v6763_v31  ;;  %v572_v47 = vshll.u32 %v301_v23, 16  ;;  %v1352_v49 = vld [vmem:[#allocation2 + $0xb8] sm:$0xf] }
 0x139   : > { %v1869_v26 = vrot.slane %v1868_v16, 4  ;;  %v6765_v32 = vld [vmem:[#allocation3 + $0x1c0] ss:$36 sps:$4 sm:$0xff]   ;;  %v1879_v34 = vrot.slane %v1878_v20, 4  ;;  %2395 = vst [vmem:[#allocation3 + $0x20c] sm:$0xf] %v2289_v27  ;;  %5024 = vmatmul.mubr.bf16.gmra.mxu1 %v6770_v36 }
 0x13a   : > { %v2292_v38 = vsel %vm7172_vm13, %v2290_v28, %v2291_v18  ;;  %v1351_v41 = vld [vmem:[#allocation2 + $0xb4] sm:$0xe]  ;;  %v1353_v50 = vld [vmem:[#allocation2 + $0xbc] sm:$0x1]  ;;  %5121 = vmatmul.mubr.bf16.gmra.mxu0 %v6765_v32  ;;  %v563_v51 = vrot.slane %v561_v39, 7  ;;  %v1512_v53 = vrot.slane %v1352_v49, 5 }
 0x13b   : > { %v1874_v37 = vsel %vm6974_vm6, %v1869_v26, %v1873_v12  ;;  %v1884_v44 = vsel %vm6974_vm6, %v1879_v34, %v1883_v21  ;;  %2396 = vst [vmem:[#allocation3 + $0x230] sm:$0xf] %v2292_v38  ;;  %v5792_v52 = vrot.slane %v1351_v41, 9  ;;  %v1515_v55 = vrot.slane %v1353_v50, 5  ;;  %v1669_v58 = vld [vmem:[#allocation2 + $0x6c] sm:$0xf]  ;;  %v7528_v34 = vpop.f32.mrf.mxu0 }
 0x13c   : > { %2123 = vst [vmem:[#allocation3 + $0x208] sm:$0xf] %v1874_v37  ;;  %2124 = vst [vmem:[#allocation3 + $0x22c] sm:$0xf] %v1884_v44  ;;  %v7513_v59 = vrot.slane %v569_v45, 7  ;;  %v1886_v62 = vshrl.u32 %v1669_v58, 16  ;;  %v566_v1 = vor.u32 %v564_v40, %v563_v51 }
 0x13d   : > { %v736_v60 = vld [vmem:[#allocation2 + $0xc0] sm:$0xf]  ;;  %v1670_v61 = vld [vmem:[#allocation2 + $0x70] sm:$0xf]  ;;  %v567_v3 = vrot.slane %v563_v51, 4  ;;  %v1513_v4 = vsel %vm7172_vm13, %v5792_v52, %v1512_v53  ;;  %v1514_v7 = vrot.slane %v1512_v53, 4  ;;  %v6145_v53 = vpop.f32.mrf.mxu1 }
 0x13e   : > { %v1671_v8 = vld [vmem:[#allocation2 + $0x74] sm:$0x1]  ;;  %v2165_v9 = vld [vmem:[#allocation2 + $0x6c] sm:$0xe]  ;;  %v574_v10 = vor.u32 %v572_v47, %v7513_v59  ;;  %1579 = vst [vmem:[#allocation3 + $0x440] sm:$0xf] %v1513_v4  ;;  %v737_v16 = vsel %vm6985_vm9, %v566_v1, %v736_v60 }
 0x13f   : > { %v1888_v11 = vrot.slane %v1886_v62, 4  ;;  %v1889_v12 = vshll.u32 %v1669_v58, 16  ;;  %v2166_v13 = vld [vmem:[#allocation2 + $0x70] sm:$0xf]  ;;  %v2167_v15 = vld [vmem:[#allocation2 + $0x74] sm:$0x1]  ;;  %v1516_v17 = vsel %vm7172_vm13, %v1514_v7, %v1515_v55  ;;  %v7534_v62 = vpop.f32.mrf.mxu0 }
 0x140   : > { %v1895_v18 = vshll.u32 %v1670_v61, 16  ;;  %v1899_v19 = vshrl.u32 %v1670_v61, 16  ;;  %v2414_v20 = vld [vmem:[#allocation2 + $0x18] sm:$0xf]  ;;  %v2415_v21 = vld [vmem:[#allocation2 + $0x1c] sm:$0xf]  ;;  %v575_v22 = vsel %vm6991_vm10, %v567_v3, %v574_v10 }
 0x141   : > { %738 = vst [vmem:[#allocation2 + $0xc0] sm:$0xf] %v737_v16  ;;  %1580 = vst [vmem:[#allocation3 + $0x464] sm:$0xf] %v1516_v17  ;;  %v1891_v23 = vrot.slane %v1889_v12, 5  ;;  %v1905_v24 = vshll.u32 %v1671_v8, 16 }
 0x142   : > { %v5801_v26 = vrot.slane %v2165_v9, 9  ;;  %2446 = vst [vmem:[#allocation3 + $0x18] sm:$0xf] %v2414_v20  ;;  %2447 = vst [vmem:[#allocation3 + $0x3c] sm:$0xf] %v2415_v21  ;;  %v1897_v28 = vrot.slane %v1895_v18, 5  ;;  %v6146_v9 = vpop.f32.mrf.mxu1 }
 0x143   : > { %v2478_v27 = vld [vmem:[#allocation2 + $0x18] sm:$0xf]  ;;  %739 = vst [vmem:[#allocation2 + $0xc4] sm:$0xf] %v575_v22  ;;  %v1901_v30 = vrot.slane %v1899_v19, 4  ;;  %v2295_v31 = vrot.slane %v2166_v13, 5  ;;  %v1892_v37 = vor.u32 %v1891_v23, %v1888_v11  ;;  %v7540_v16 = vadd.f32 %v6146_v9, %v6145_v53 }
 0x144   : > { %v2298_v32 = vrot.slane %v2167_v15, 5  ;;  %v6771_v36 = vld [vmem:[#allocation3 + $0x20c] ss:$36 sps:$4 sm:$0xff]   ;;  %v1907_v38 = vrot.slane %v1905_v24, 5  ;;  %v2479_v44 = vld [vmem:[#allocation2 + $0x1c] sm:$0xf]  ;;  %v7542_v23 = vpop.f32.mrf.mxu1 }
 0x145   : > { %v6774_v48 = vld [vmem:[#allocation3 + $0x208] ss:$36 sps:$4 sm:$0xff]   ;;  %v1902_v39 = vor.u32 %v1901_v30, %v1897_v28  ;;  %v2296_v40 = vsel %vm7172_vm13, %v5801_v26, %v2295_v31  ;;  %v2297_v41 = vrot.slane %v2295_v31, 4  ;;  %v2527_v47 = vshrl.u32 %v2478_v27, 16  ;;  %5128 = vmatprep.mubr.bf16.mxu0 %v6771_v36  ;;  %v1672_v8 = vld [vmem:[#allocation2 + $0x78] sm:$0xf]  ;;  %v6079_v30 = vpop.f32.mrf.mxu0 }
 0x146   : > { %v2480_v45 = vld [vmem:[#allocation2 + $0x20] sm:$0x1]  ;;  %v1893_v49 = vrot.slane %v1892_v37, 4  ;;  %2397 = vst [vmem:[#allocation3 + $0x254] sm:$0xf] %v2296_v40  ;;  %v2530_v50 = vshll.u32 %v2478_v27, 16  ;;  %5129 = vmatmul.mubr.bf16.gmra.mxu0 %v6774_v48 }
 0x147   : > { %v2536_v51 = vshll.u32 %v2479_v44, 16  ;;  %v2540_v52 = vshrl.u32 %v2479_v44, 16  ;;  %v1903_v55 = vrot.slane %v1902_v39, 4  ;;  %v2299_v58 = vsel %vm7172_vm13, %v2297_v41, %v2298_v32  ;;  %v1673_v13 = vld [vmem:[#allocation2 + $0x7c] sm:$0xf]  ;;  %v6080_v53 = vpop.f32.mrf.mxu0  ;;  %s6044_s18 = sshll.u32 %s8227_s16, 8 }
 0x148   : > { %v2529_v60 = vrot.slane %v2527_v47, 4  ;;  %v2546_v61 = vshll.u32 %v2480_v45, 16  ;;  %v1898_v1 = vsel %vm6974_vm6, %v1893_v49, %v1897_v28  ;;  %2398 = vst [vmem:[#allocation3 + $0x278] sm:$0xf] %v2299_v58  ;;  %v2532_v3 = vrot.slane %v2530_v50, 5  ;;  %s8063_s30 = scalar_lea.vmem %s8188_s2, %s6044_s18 }
 0x149   : > { %v2538_v4 = vrot.slane %v2536_v51, 5  ;;  %v2542_v7 = vrot.slane %v2540_v52, 4  ;;  %v1611_v10 = vld [vmem:[#allocation2 + $0xc0] sm:$0xf]  ;;  %v1908_v11 = vsel %vm6974_vm6, %v1903_v55, %v1907_v38  ;;  %2125 = vst [vmem:[#allocation3 + $0x250] sm:$0xf] %v1898_v1  ;;  %v7548_v55 = vpop.f32.mrf.mxu1 }
 0x14a   : > { %v2548_v12 = vrot.slane %v2546_v61, 5  ;;  %v1910_v15 = vshrl.u32 %v1672_v8, 16  ;;  %v1612_v17 = vld [vmem:[#allocation2 + $0xc4] sm:$0xf]  ;;  %1643 = vst [vmem:[#allocation3 + $0x444] sm:$0xf] %v1611_v10  ;;  %v2533_v18 = vor.u32 %v2532_v3, %v2529_v60 }
 0x14b   : > { %2126 = vst [vmem:[#allocation3 + $0x274] sm:$0xf] %v1908_v11  ;;  %v2543_v19 = vor.u32 %v2542_v7, %v2538_v4  ;;  %v1674_v20 = vld [vmem:[#allocation2 + $0x80] sm:$0x1]  ;;  %v1913_v21 = vshll.u32 %v1672_v8, 16  ;;  %v1919_v22 = vshll.u32 %v1673_v13, 16 }
 0x14c   : > { %1644 = vst [vmem:[#allocation3 + $0x468] sm:$0xf] %v1612_v17  ;;  %v1912_v24 = vrot.slane %v1910_v15, 4  ;;  %v1923_v26 = vshrl.u32 %v1673_v13, 16  ;;  %v1929_v27 = vshll.u32 %v1674_v20, 16  ;;  %v2534_v31 = vrot.slane %v2533_v18, 4 }
 0x14d   : > { %v2168_v28 = vld [vmem:[#allocation2 + $0x78] sm:$0xe]  ;;  %v2544_v32 = vrot.slane %v2543_v19, 4  ;;  %v1915_v36 = vrot.slane %v1913_v21, 5  ;;  %v1921_v48 = vrot.slane %v1919_v22, 5  ;;  %v6151_v21 = vpop.f32.mrf.mxu1 }
 0x14e   : > { %v2169_v37 = vld [vmem:[#allocation2 + $0x7c] sm:$0xf]  ;;  %v1925_v38 = vrot.slane %v1923_v26, 4  ;;  %v1931_v39 = vrot.slane %v1929_v27, 5  ;;  %v2170_v40 = vld [vmem:[#allocation2 + $0x80] sm:$0x1]  ;;  %v2539_v45 = vsel %vm6974_vm6, %v2534_v31, %v2538_v4  ;;  %v7552_v4 = vadd.f32 %v6080_v53, %v6079_v30 }
 0x14f   : > { %v5802_v41 = vrot.slane %v2168_v28, 9  ;;  %v2302_v44 = vrot.slane %v2169_v37, 5  ;;  %v2549_v47 = vsel %vm6974_vm6, %v2544_v32, %v2548_v12  ;;  %v1916_v49 = vor.u32 %v1915_v36, %v1912_v24  ;;  %v2416_v51 = vld [vmem:[#allocation2 + $0x24] sm:$0xf]  ;;  %v2417_v52 = vld [vmem:[#allocation2 + $0x28] sm:$0xf]  ;;  %v6152_v36 = vpop.f32.mrf.mxu1 }
 0x150   : > { %v2305_v50 = vrot.slane %v2170_v40, 5  ;;  %2942 = vst [vmem:[#allocation3 + $0x1c] sm:$0xf] %v2539_v45  ;;  %2943 = vst [vmem:[#allocation3 + $0x40] sm:$0xf] %v2549_v47  ;;  %v1926_v58 = vor.u32 %v1925_v38, %v1921_v48 }
 0x151   : > { %v2303_v60 = vsel %vm7172_vm13, %v5802_v41, %v2302_v44  ;;  %v2304_v61 = vrot.slane %v2302_v44, 4  ;;  %2448 = vst [vmem:[#allocation3 + $0x60] sm:$0xf] %v2416_v51  ;;  %2449 = vst [vmem:[#allocation3 + $0x84] sm:$0xf] %v2417_v52  ;;  %v1917_v7 = vrot.slane %v1916_v49, 4  ;;  %v7562_v47 = vpop.f32.mrf.mxu1 }
 0x152   : > { %v2481_v1 = vld [vmem:[#allocation2 + $0x24] sm:$0xf]  ;;  %v2482_v3 = vld [vmem:[#allocation2 + $0x28] sm:$0xf]  ;;  %2399 = vst [vmem:[#allocation3 + $0x29c] sm:$0xf] %v2303_v60 }
 0x153   : > { %v2483_v8 = vld [vmem:[#allocation2 + $0x2c] sm:$0x1]  ;;  %v2551_v9 = vshrl.u32 %v2481_v1, 16  ;;  %v2554_v10 = vshll.u32 %v2481_v1, 16  ;;  %v1927_v12 = vrot.slane %v1926_v58, 4  ;;  %v2306_v13 = vsel %vm7172_vm13, %v2304_v61, %v2305_v50  ;;  %8201 = vst [vmem:[#allocation4_spill] sm:$0xff] %v7562_v47 }
 0x154   : > { %v6778_v11 = vld [vmem:[#allocation3 + $0x254] ss:$36 sps:$4 sm:$0xff]   ;;  %v2560_v15 = vshll.u32 %v2482_v3, 16  ;;  %v6775_v17 = vld [vmem:[#allocation3 + $0x444] ss:$36 sps:$4 sm:$0xff]   ;;  %v1922_v19 = vsel %vm6974_vm6, %v1917_v7, %v1921_v48  ;;  %v2564_v28 = vshrl.u32 %v2482_v3, 16  ;;  %v7564_v7 = vpop.f32.mrf.mxu0 }
 0x155   : > { %v6777_v18 = vld [vmem:[#allocation3 + $0x440] ss:$36 sps:$4 sm:$0xff]   ;;  %2400 = vst [vmem:[#allocation3 + $0x2c0] sm:$0xf] %v2306_v13  ;;  %v2553_v20 = vrot.slane %v2551_v9, 4  ;;  %5136 = vmatprep.mubr.bf16.mxu0 %v6778_v11  ;;  %v1932_v24 = vsel %vm6974_vm6, %v1927_v12, %v1931_v39  ;;  %v2556_v26 = vrot.slane %v2554_v10, 5  ;;  %5031 = vmatprep.mubr.bf16.mxu1 %v6775_v17  ;;  %v7560_v39 = vadd.f32 %v6152_v36, %v6151_v21 }
 0x156   : > { %v6780_v22 = vld [vmem:[#allocation3 + $0x250] ss:$36 sps:$4 sm:$0xff]   ;;  %2127 = vst [vmem:[#allocation3 + $0x298] sm:$0xf] %v1922_v19  ;;  %v2562_v27 = vrot.slane %v2560_v15, 5  ;;  %v2570_v30 = vshll.u32 %v2483_v8, 16  ;;  %5032 = vmatmul.mubr.bf16.gmra.mxu1 %v6777_v18  ;;  %v7566_v8 = vpop.f32.mrf.mxu1 }
 0x157   : > { %2128 = vst [vmem:[#allocation3 + $0x2bc] sm:$0xf] %v1932_v24  ;;  %v1675_v31 = vld [vmem:[#allocation2 + $0x84] sm:$0xf]  ;;  %v1676_v32 = vld [vmem:[#allocation2 + $0x88] sm:$0xf]  ;;  %5137 = vmatmul.mubr.bf16.gmra.mxu0 %v6780_v22  ;;  %v2557_v48 = vor.u32 %v2556_v26, %v2553_v20 }
 0x158   : > { %v2566_v37 = vrot.slane %v2564_v28, 4  ;;  %v1677_v38 = vld [vmem:[#allocation2 + $0x8c] sm:$0x1]  ;;  %v1934_v40 = vshrl.u32 %v1675_v31, 16  ;;  %v1937_v41 = vshll.u32 %v1675_v31, 16  ;;  %v2572_v44 = vrot.slane %v2570_v30, 5  ;;  %v6173_v20 = vpop.f32.mrf.mxu1 }
 0x159   : > { %v1943_v45 = vshll.u32 %v1676_v32, 16  ;;  %v6781_v49 = vld [vmem:[#allocation3 + $0x18] ss:$36 sps:$4 sm:$0xff]   ;;  %v2558_v51 = vrot.slane %v2557_v48, 4  ;;  %v1947_v61 = vshrl.u32 %v1676_v32, 16  ;;  %v1953_v1 = vshll.u32 %v1677_v38, 16  ;;  %v7574_v48 = vpop.f32.mrf.mxu0 }
 0x15a   : > { %v6783_v50 = vld [vmem:[#allocation3 + $0x1c] ss:$36 sps:$4 sm:$0xff]   ;;  %v2567_v52 = vor.u32 %v2566_v37, %v2562_v27  ;;  %v1936_v53 = vrot.slane %v1934_v40, 4  ;;  %v1939_v58 = vrot.slane %v1937_v41, 5  ;;  %v2171_v3 = vld [vmem:[#allocation2 + $0x84] sm:$0xe]  ;;  %v6174_v37 = vpop.f32.mrf.mxu1 }
 0x15b   : > { %v1945_v60 = vrot.slane %v1943_v45, 5  ;;  %8202 = vst [vmem:[#allocation5_spill] sm:$0xff] %v7566_v8  ;;  %5233 = vmatprep.mubr.bf16.mxu1 %v6783_v50  ;;  %v2563_v9 = vsel %vm6974_vm6, %v2558_v51, %v2562_v27  ;;  %v2172_v12 = vld [vmem:[#allocation2 + $0x88] sm:$0xf]  ;;  %v2173_v13 = vld [vmem:[#allocation2 + $0x8c] sm:$0x1]  ;;  %v6175_v45 = vadd.f32 %v6174_v37, %v6173_v20 }
 0x15c   : > { %v2568_v10 = vrot.slane %v2567_v52, 4  ;;  %v1940_v11 = vor.u32 %v1939_v58, %v1936_v53  ;;  %v5803_v15 = vrot.slane %v2171_v3, 9  ;;  %2944 = vst [vmem:[#allocation3 + $0x64] sm:$0xf] %v2563_v9  ;;  %v1949_v17 = vrot.slane %v1947_v61, 4  ;;  %v6176_v58 = vpop.f32.mrf.mxu1 }
 0x15d   : > { %v2309_v18 = vrot.slane %v2172_v12, 5  ;;  %v2312_v19 = vrot.slane %v2173_v13, 5  ;;  %v6785_v21 = vld [vmem:[#allocation3 + $0x29c] ss:$36 sps:$4 sm:$0xff]   ;;  %v1955_v30 = vrot.slane %v1953_v1, 5  ;;  %v7581_v1 = vadd.f32 %v6175_v45, %v7426_v6 }
 0x15e   : > { %v6787_v22 = vld [vmem:[#allocation3 + $0x298] ss:$36 sps:$4 sm:$0xff]   ;;  %v2573_v24 = vsel %vm6974_vm6, %v2568_v10, %v2572_v44  ;;  %v1941_v26 = vrot.slane %v1940_v11, 4  ;;  %v1950_v28 = vor.u32 %v1949_v17, %v1945_v60  ;;  %5144 = vmatprep.mubr.bf16.mxu0 %v6785_v21  ;;  %5234 = vmatmul.mubr.bf16.vlgmr.msra.gmra.mxu1 %v6781_v49  ;;  %v2486_v44 = vld [vmem:[#allocation2 + $0x38] sm:$0x1]  ;;  %v6066_v13 = vadd.f32 %v7458_v25, %v7454_v5  ;;  %v6177_v17 = vpop.f32.mrf.mxu1 }
 0x15f   : > { %2945 = vst [vmem:[#allocation3 + $0x88] sm:$0xf] %v2573_v24  ;;  %v2310_v27 = vsel %vm7172_vm13, %v5803_v15, %v2309_v18  ;;  %v2311_v31 = vrot.slane %v2309_v18, 4  ;;  %v2418_v32 = vld [vmem:[#allocation2 + $0x30] sm:$0xf]  ;;  %5145 = vmatmul.mubr.bf16.gmra.mxu0 %v6787_v22  ;;  %v6085_v15 = vpop.f32.mrf.mxu0  ;;  %v6178_v22 = vadd.f32 %v6177_v17, %v6176_v58 }
 0x160   : > { %v2419_v36 = vld [vmem:[#allocation2 + $0x34] sm:$0xf]  ;;  %v1946_v38 = vsel %vm6974_vm6, %v1941_v26, %v1945_v60  ;;  %2401 = vst [vmem:[#allocation3 + $0x2e4] sm:$0xf] %v2310_v27  ;;  %2450 = vst [vmem:[#allocation3 + $0xa8] sm:$0xf] %v2418_v32  ;;  %v6179_v25 = vpop.f32.mrf.mxu1 }
 0x161   : > { %2451 = vst [vmem:[#allocation3 + $0xcc] sm:$0xf] %v2419_v36  ;;  %v2484_v40 = vld [vmem:[#allocation2 + $0x30] sm:$0xf]  ;;  %v2485_v41 = vld [vmem:[#allocation2 + $0x34] sm:$0xf]  ;;  %v2313_v51 = vsel %vm7172_vm13, %v2311_v31, %v2312_v19  ;;  %v6086_v27 = vpop.f32.mrf.mxu0  ;;  %v7589_v5 = vadd.f32 %v6178_v22, %v6066_v13 }
 0x162   : > { %v1951_v50 = vrot.slane %v1950_v28, 4  ;;  %2129 = vst [vmem:[#allocation3 + $0x2e0] sm:$0xf] %v1946_v38  ;;  %v2575_v52 = vshrl.u32 %v2484_v40, 16  ;;  %v2578_v53 = vshll.u32 %v2484_v40, 16  ;;  %v2584_v49 = vshll.u32 %v2485_v41, 16 }
 0x163   : > { %2402 = vst [vmem:[#allocation3 + $0x308] sm:$0xf] %v2313_v51  ;;  %v2588_v61 = vshrl.u32 %v2485_v41, 16  ;;  %v2594_v60 = vshll.u32 %v2486_v44, 16  ;;  %v1678_v11 = vld [vmem:[#allocation2 + $0x90] sm:$0xf]  ;;  %v7587_v38 = vadd.f32 %v6086_v27, %v6085_v15  ;;  %v7595_v22 = vpop.f32.mrf.mxu0 }
 0x164   : > { %v1956_v3 = vsel %vm6974_vm6, %v1951_v50, %v1955_v30  ;;  %v2577_v9 = vrot.slane %v2575_v52, 4  ;;  %v2580_v10 = vrot.slane %v2578_v53, 5  ;;  %v1679_v12 = vld [vmem:[#allocation2 + $0x94] sm:$0xf]  ;;  %v2586_v18 = vrot.slane %v2584_v49, 5  ;;  %v6180_v49 = vpop.f32.mrf.mxu1 }
 0x165   : > { %2130 = vst [vmem:[#allocation3 + $0x304] sm:$0xf] %v1956_v3  ;;  %v2590_v19 = vrot.slane %v2588_v61, 4  ;;  %v2596_v20 = vrot.slane %v2594_v60, 5  ;;  %v1680_v21 = vld [vmem:[#allocation2 + $0x98] sm:$0x1] }
 0x166   : > { %v2581_v6 = vor.u32 %v2580_v10, %v2577_v9  ;;  %v1958_v24 = vshrl.u32 %v1678_v11, 16  ;;  %v1961_v26 = vshll.u32 %v1678_v11, 16  ;;  %v1967_v28 = vshll.u32 %v1679_v12, 16  ;;  %v2174_v30 = vld [vmem:[#allocation2 + $0x90] sm:$0xe] }
 0x167   : > { %v6788_v31 = vld [vmem:[#allocation3 + $0x64] ss:$36 sps:$4 sm:$0xff]   ;;  %v2591_v36 = vor.u32 %v2590_v19, %v2586_v18  ;;  %v1971_v37 = vshrl.u32 %v1679_v12, 16  ;;  %v2175_v50 = vld [vmem:[#allocation2 + $0x94] sm:$0xf]  ;;  %v1977_v53 = vshll.u32 %v1680_v21, 16 }
 0x168   : > { %v6792_v32 = vld [vmem:[#allocation3 + $0x60] ss:$36 sps:$4 sm:$0xff]   ;;  %v2582_v40 = vrot.slane %v2581_v6, 4  ;;  %v1960_v41 = vrot.slane %v1958_v24, 4  ;;  %v1963_v44 = vrot.slane %v1961_v26, 5  ;;  %v1969_v45 = vrot.slane %v1967_v28, 5  ;;  %5241 = vmatprep.mubr.bf16.mxu1 %v6788_v31  ;;  %v6182_v6 = vpop.f32.mrf.mxu1 }
 0x169   : > { %v2592_v51 = vrot.slane %v2591_v36, 4  ;;  %v1973_v52 = vrot.slane %v1971_v37, 4  ;;  %v2176_v58 = vld [vmem:[#allocation2 + $0x98] sm:$0x1]  ;;  %5242 = vmatmul.mubr.bf16.gmra.mxu1 %v6792_v32  ;;  %v5804_v3 = vrot.slane %v2174_v30, 9  ;;  %v2316_v9 = vrot.slane %v2175_v50, 5 }
 0x16a   : > { %v2587_v61 = vsel %vm6974_vm6, %v2582_v40, %v2586_v18  ;;  %v1964_v60 = vor.u32 %v1963_v44, %v1960_v41  ;;  %v2420_v10 = vld [vmem:[#allocation2 + $0x3c] sm:$0xf]  ;;  %v2421_v11 = vld [vmem:[#allocation2 + $0x40] sm:$0xf]  ;;  %v1979_v15 = vrot.slane %v1977_v53, 5  ;;  %v2319_v17 = vrot.slane %v2176_v58, 5 }
 0x16b   : > { %v2597_v12 = vsel %vm6974_vm6, %v2592_v51, %v2596_v20  ;;  %2946 = vst [vmem:[#allocation3 + $0xac] sm:$0xf] %v2587_v61  ;;  %v1974_v13 = vor.u32 %v1973_v52, %v1969_v45  ;;  %2452 = vst [vmem:[#allocation3 + $0xf0] sm:$0xf] %v2420_v10  ;;  %v2487_v19 = vld [vmem:[#allocation2 + $0x3c] sm:$0xf]  ;;  %v2317_v28 = vsel %vm7172_vm13, %v5804_v3, %v2316_v9  ;;  %v6183_v51 = vpop.f32.mrf.mxu1 }
 0x16c   : > { %2453 = vst [vmem:[#allocation3 + $0x114] sm:$0xf] %v2421_v11  ;;  %v2488_v21 = vld [vmem:[#allocation2 + $0x40] sm:$0xf]  ;;  %v6793_v24 = vld [vmem:[#allocation3 + $0x2e0] ss:$36 sps:$4 sm:$0xff]   ;;  %v6181_v30 = vadd.f32 %v6180_v49, %v6179_v25 }
 0x16d   : > { %v6790_v18 = vld [vmem:[#allocation3 + $0x2e4] ss:$36 sps:$4 sm:$0xff]   ;;  %2947 = vst [vmem:[#allocation3 + $0xd0] sm:$0xf] %v2597_v12  ;;  %v1965_v26 = vrot.slane %v1964_v60, 4  ;;  %v1975_v20 = vrot.slane %v1974_v13, 4  ;;  %v7605_v60 = vpop.f32.mrf.mxu0 }
 0x16e   : > { %v2318_v27 = vrot.slane %v2316_v9, 4  ;;  %2403 = vst [vmem:[#allocation3 + $0x32c] sm:$0xf] %v2317_v28  ;;  %v2489_v31 = vld [vmem:[#allocation2 + $0x44] sm:$0x1]  ;;  %v2599_v32 = vshrl.u32 %v2487_v19, 16  ;;  %5152 = vmatprep.mubr.bf16.mxu0 %v6790_v18 }
 0x16f   : > { %v2602_v36 = vshll.u32 %v2487_v19, 16  ;;  %v1970_v37 = vsel %vm6974_vm6, %v1965_v26, %v1969_v45  ;;  %v2608_v40 = vshll.u32 %v2488_v21, 16  ;;  %v2612_v41 = vshrl.u32 %v2488_v21, 16  ;;  %v1681_v50 = vld [vmem:[#allocation2 + $0x9c] sm:$0xf]  ;;  %5153 = vmatmul.mubr.bf16.gmra.mxu0 %v6793_v24 }
 0x170   : > { %v2618_v44 = vshll.u32 %v2489_v31, 16  ;;  %v1980_v52 = vsel %vm6974_vm6, %v1975_v20, %v1979_v15  ;;  %2131 = vst [vmem:[#allocation3 + $0x328] sm:$0xf] %v1970_v37  ;;  %v2320_v25 = vsel %vm7172_vm13, %v2318_v27, %v2319_v17  ;;  %v2601_v53 = vrot.slane %v2599_v32, 4  ;;  %v1682_v49 = vld [vmem:[#allocation2 + $0xa0] sm:$0xf]  ;;  %v6185_v20 = vpop.f32.mrf.mxu1  ;;  %v6091_v37 = vpop.f32.mrf.mxu0 }
 0x171   : > { %v2604_v58 = vrot.slane %v2602_v36, 5  ;;  %v1683_v61 = vld [vmem:[#allocation2 + $0xa4] sm:$0x1]  ;;  %2132 = vst [vmem:[#allocation3 + $0x34c] sm:$0xf] %v1980_v52  ;;  %v2610_v45 = vrot.slane %v2608_v40, 5  ;;  %v6072_v36 = vadd.f32 %v7499_v0, %v7487_v43  ;;  %v7610_v40 = vadd.f32 %v6181_v30, %v7477_v2 }
 0x172   : > { %2404 = vst [vmem:[#allocation3 + $0x350] sm:$0xf] %v2320_v25  ;;  %v2614_v3 = vrot.slane %v2612_v41, 4  ;;  %v2620_v9 = vrot.slane %v2618_v44, 5  ;;  %v1982_v10 = vshrl.u32 %v1681_v50, 16  ;;  %v1985_v13 = vshll.u32 %v1681_v50, 16  ;;  %v6092_v43 = vpop.f32.mrf.mxu0 }
 0x173   : > { %v2177_v11 = vld [vmem:[#allocation2 + $0x9c] sm:$0xe]  ;;  %v2605_v12 = vor.u32 %v2604_v58, %v2601_v53  ;;  %v1991_v15 = vshll.u32 %v1682_v49, 16  ;;  %v1995_v19 = vshrl.u32 %v1682_v49, 16  ;;  %v2178_v21 = vld [vmem:[#allocation2 + $0xa0] sm:$0xf]  ;;  %v6184_v41 = vadd.f32 %v6183_v51, %v6182_v6  ;;  %v6186_v58 = vpop.f32.mrf.mxu1 }
 0x174   : > { %v2615_v18 = vor.u32 %v2614_v3, %v2610_v45  ;;  %v1984_v17 = vrot.slane %v1982_v10, 4  ;;  %v2001_v24 = vshll.u32 %v1683_v61, 16  ;;  %v2179_v26 = vld [vmem:[#allocation2 + $0xa4] sm:$0x1]  ;;  %v5805_v28 = vrot.slane %v2177_v11, 9 }
 0x175   : > { %v6794_v27 = vld [vmem:[#allocation3 + $0xac] ss:$36 sps:$4 sm:$0xff]   ;;  %v2606_v32 = vrot.slane %v2605_v12, 4  ;;  %v1987_v50 = vrot.slane %v1985_v13, 5  ;;  %v1993_v52 = vrot.slane %v1991_v15, 5  ;;  %v1997_v25 = vrot.slane %v1995_v19, 4 }
 0x176   : > { %v6799_v31 = vld [vmem:[#allocation3 + $0xa8] ss:$36 sps:$4 sm:$0xff]   ;;  %v2616_v44 = vrot.slane %v2615_v18, 4  ;;  %v2422_v53 = vld [vmem:[#allocation2 + $0x48] sm:$0xf]  ;;  %5249 = vmatprep.mubr.bf16.mxu1 %v6794_v27  ;;  %v2003_v61 = vrot.slane %v2001_v24, 5  ;;  %v7616_v12 = vadd.f32 %v6092_v43, %v6091_v37  ;;  %v7622_v18 = vadd.f32 %v6184_v41, %v6072_v36  ;;  %v6188_v24 = vpop.f32.mrf.mxu1 }
 0x177   : > { %v2611_v49 = vsel %vm6974_vm6, %v2606_v32, %v2610_v45  ;;  %v2323_v3 = vrot.slane %v2178_v21, 5  ;;  %v2326_v10 = vrot.slane %v2179_v26, 5  ;;  %v2423_v11 = vld [vmem:[#allocation2 + $0x4c] sm:$0xf]  ;;  %2454 = vst [vmem:[#allocation3 + $0x138] sm:$0xf] %v2422_v53  ;;  %5250 = vmatmul.mubr.bf16.gmra.mxu1 %v6799_v31  ;;  %v1988_v0 = vor.u32 %v1987_v50, %v1984_v17  ;;  %v7620_v21 = vpop.f32.mrf.mxu0 }
 0x178   : > { %v2621_v2 = vsel %vm6974_vm6, %v2616_v44, %v2620_v9  ;;  %2948 = vst [vmem:[#allocation3 + $0xf4] sm:$0xf] %v2611_v49  ;;  %v1998_v6 = vor.u32 %v1997_v25, %v1993_v52  ;;  %2455 = vst [vmem:[#allocation3 + $0x15c] sm:$0xf] %v2423_v11  ;;  %v2490_v30 = vld [vmem:[#allocation2 + $0x48] sm:$0xf]  ;;  %v6187_v9 = vadd.f32 %v6186_v58, %v6185_v20 }
 0x179   : > { %v2491_v51 = vld [vmem:[#allocation2 + $0x4c] sm:$0xf]  ;;  %v6797_v13 = vld [vmem:[#allocation3 + $0x32c] ss:$36 sps:$4 sm:$0xff]   ;;  %2949 = vst [vmem:[#allocation3 + $0x118] sm:$0xf] %v2621_v2  ;;  %v2324_v15 = vsel %vm7172_vm13, %v5805_v28, %v2323_v3  ;;  %v7631_v43 = vpop.f32.mrf.mxu0  ;;  %v6189_v2 = vpop.f32.mrf.mxu1 }
 0x17a   : > { %v6800_v45 = vld [vmem:[#allocation3 + $0x328] ss:$36 sps:$4 sm:$0xff]   ;;  %v2325_v19 = vrot.slane %v2323_v3, 4  ;;  %v1989_v17 = vrot.slane %v1988_v0, 4  ;;  %v1999_v26 = vrot.slane %v1998_v6, 4  ;;  %v2623_v31 = vshrl.u32 %v2490_v30, 16  ;;  %5160 = vmatprep.mubr.bf16.mxu0 %v6797_v13 }
 0x17b   : > { %2405 = vst [vmem:[#allocation3 + $0x374] sm:$0xf] %v2324_v15  ;;  %v2492_v27 = vld [vmem:[#allocation2 + $0x50] sm:$0x1]  ;;  %v2626_v32 = vshll.u32 %v2490_v30, 16  ;;  %v2632_v44 = vshll.u32 %v2491_v51, 16  ;;  %5161 = vmatmul.mubr.bf16.gmra.mxu0 %v6800_v45 }
 0x17c   : > { %v2327_v37 = vsel %vm7172_vm13, %v2325_v19, %v2326_v10  ;;  %v2636_v50 = vshrl.u32 %v2491_v51, 16  ;;  %v2642_v28 = vshll.u32 %v2492_v27, 16  ;;  %v1994_v36 = vsel %vm6974_vm6, %v1989_v17, %v1993_v52  ;;  %v1684_v53 = vld [vmem:[#allocation2 + $0xa8] sm:$0xf]  ;;  %v1685_v10 = vld [vmem:[#allocation2 + $0xac] sm:$0xf] }
 0x17d   : > { %v2004_v20 = vsel %vm6974_vm6, %v1999_v26, %v2003_v61  ;;  %2406 = vst [vmem:[#allocation3 + $0x398] sm:$0xf] %v2327_v37  ;;  %v2625_v41 = vrot.slane %v2623_v31, 4  ;;  %v2628_v25 = vrot.slane %v2626_v32, 5  ;;  %2133 = vst [vmem:[#allocation3 + $0x370] sm:$0xf] %v1994_v36  ;;  %v6078_v31 = vadd.f32 %v7534_v62, %v7528_v34 }
 0x17e   : > { %2134 = vst [vmem:[#allocation3 + $0x394] sm:$0xf] %v2004_v20  ;;  %v2634_v49 = vrot.slane %v2632_v44, 5  ;;  %v2638_v3 = vrot.slane %v2636_v50, 4  ;;  %v2006_v11 = vshrl.u32 %v1684_v53, 16  ;;  %v2009_v6 = vshll.u32 %v1684_v53, 16 }
 0x17f   : > { %v2629_v0 = vor.u32 %v2628_v25, %v2625_v41  ;;  %v1686_v52 = vld [vmem:[#allocation2 + $0xb0] sm:$0x1]  ;;  %v2015_v30 = vshll.u32 %v1685_v10, 16  ;;  %v2019_v61 = vshrl.u32 %v1685_v10, 16  ;;  %v2644_v13 = vrot.slane %v2642_v28, 5  ;;  %v6097_v25 = vpop.f32.mrf.mxu0 }
 0x180   : > { %v2639_v51 = vor.u32 %v2638_v3, %v2634_v49  ;;  %v2008_v45 = vrot.slane %v2006_v11, 4  ;;  %v2025_v15 = vshll.u32 %v1686_v52, 16  ;;  %v2180_v19 = vld [vmem:[#allocation2 + $0xa8] sm:$0xe]  ;;  %v6801_v17 = vld [vmem:[#allocation3 + $0xf4] ss:$36 sps:$4 sm:$0xff]   ;;  %v7636_v32 = vadd.f32 %v6187_v9, %v7505_v35 }
 0x181   : > { %v6805_v26 = vld [vmem:[#allocation3 + $0xf0] ss:$36 sps:$4 sm:$0xff]   ;;  %v2630_v27 = vrot.slane %v2629_v0, 4  ;;  %v6190_v37 = vadd.f32 %v6189_v2, %v6188_v24  ;;  %v2011_v50 = vrot.slane %v2009_v6, 5  ;;  %v2017_v36 = vrot.slane %v2015_v30, 5  ;;  %5257 = vmatprep.mubr.bf16.mxu1 %v6801_v17  ;;  %v6191_v0 = vpop.f32.mrf.mxu1  ;;  %v6098_v52 = vpop.f32.mrf.mxu0 }
 0x182   : > { %v2640_v44 = vrot.slane %v2639_v51, 4  ;;  %v2021_v20 = vrot.slane %v2019_v61, 4  ;;  %v2181_v41 = vld [vmem:[#allocation2 + $0xac] sm:$0xf]  ;;  %v2027_v53 = vrot.slane %v2025_v15, 5  ;;  %v5806_v10 = vrot.slane %v2180_v19, 9  ;;  %5258 = vmatmul.mubr.bf16.gmra.mxu1 %v6805_v26 }
 0x183   : > { %v2635_v28 = vsel %vm6974_vm6, %v2630_v27, %v2634_v49  ;;  %v2182_v3 = vld [vmem:[#allocation2 + $0xb0] sm:$0x1]  ;;  %v2330_v11 = vrot.slane %v2181_v41, 5  ;;  %v2012_v34 = vor.u32 %v2011_v50, %v2008_v45  ;;  %v2424_v24 = vld [vmem:[#allocation2 + $0x54] sm:$0xf]  ;;  %v7644_v61 = vadd.f32 %v6098_v52, %v6097_v25  ;;  %v7648_v26 = vpop.f32.mrf.mxu0 }
 0x184   : > { %v2645_v35 = vsel %vm6974_vm6, %v2640_v44, %v2644_v13  ;;  %2950 = vst [vmem:[#allocation3 + $0x13c] sm:$0xf] %v2635_v28  ;;  %v2022_v62 = vor.u32 %v2021_v20, %v2017_v36  ;;  %v2333_v9 = vrot.slane %v2182_v3, 5  ;;  %v2425_v2 = vld [vmem:[#allocation2 + $0x58] sm:$0xf]  ;;  %v7646_v51 = vadd.f32 %v6190_v37, %v6078_v31  ;;  %v6192_v13 = vpop.f32.mrf.mxu1 }
 0x185   : > { %v6803_v6 = vld [vmem:[#allocation3 + $0x374] ss:$36 sps:$4 sm:$0xff]   ;;  %2951 = vst [vmem:[#allocation3 + $0x160] sm:$0xf] %v2645_v35  ;;  %v2331_v49 = vsel %vm7172_vm13, %v5806_v10, %v2330_v11  ;;  %v2332_v30 = vrot.slane %v2330_v11, 4  ;;  %v2013_v45 = vrot.slane %v2012_v34, 4  ;;  %v6193_v27 = vadd.f32 %v6192_v13, %v6191_v0 }
 0x186   : > { %2456 = vst [vmem:[#allocation3 + $0x180] sm:$0xf] %v2424_v24  ;;  %2457 = vst [vmem:[#allocation3 + $0x1a4] sm:$0xf] %v2425_v2  ;;  %v6806_v15 = vld [vmem:[#allocation3 + $0x370] ss:$36 sps:$4 sm:$0xff]   ;;  %5168 = vmatprep.mubr.bf16.mxu0 %v6803_v6  ;;  %v6194_v24 = vpop.f32.mrf.mxu1 }
 0x187   : > { %v2023_v19 = vrot.slane %v2022_v62, 4  ;;  %2407 = vst [vmem:[#allocation3 + $0x3bc] sm:$0xf] %v2331_v49  ;;  %v2493_v17 = vld [vmem:[#allocation2 + $0x54] sm:$0xf]  ;;  %v2334_v44 = vsel %vm7172_vm13, %v2332_v30, %v2333_v9  ;;  %5169 = vmatmul.mubr.bf16.gmra.mxu0 %v6806_v15  ;;  %v2018_v31 = vsel %vm6974_vm6, %v2013_v45, %v2017_v36  ;;  %v7656_v30 = vpop.f32.mrf.mxu0 }
 0x188   : > { %v2494_v50 = vld [vmem:[#allocation2 + $0x58] sm:$0xf]  ;;  %v2495_v20 = vld [vmem:[#allocation2 + $0x5c] sm:$0x1]  ;;  %v2647_v41 = vshrl.u32 %v2493_v17, 16  ;;  %v2650_v25 = vshll.u32 %v2493_v17, 16 }
 0x189   : > { %v2028_v37 = vsel %vm6974_vm6, %v2023_v19, %v2027_v53  ;;  %2408 = vst [vmem:[#allocation3 + $0x3e0] sm:$0xf] %v2334_v44  ;;  %v2656_v28 = vshll.u32 %v2494_v50, 16  ;;  %v2660_v3 = vshrl.u32 %v2494_v50, 16  ;;  %v1687_v10 = vld [vmem:[#allocation2 + $0xb4] sm:$0xf] }
 0x18a   : > { %v1688_v11 = vld [vmem:[#allocation2 + $0xb8] sm:$0xf]  ;;  %2135 = vst [vmem:[#allocation3 + $0x3b8] sm:$0xf] %v2018_v31  ;;  %2136 = vst [vmem:[#allocation3 + $0x3dc] sm:$0xf] %v2028_v37 }
 0x18b   : > { %v2649_v0 = vrot.slane %v2647_v41, 4  ;;  %v2652_v35 = vrot.slane %v2650_v25, 5  ;;  %v2666_v34 = vshll.u32 %v2495_v20, 16  ;;  %v1689_v62 = vld [vmem:[#allocation2 + $0xbc] sm:$0x1]  ;;  %v2030_v9 = vshrl.u32 %v1687_v10, 16 }
 0x18c   : > { %v2658_v2 = vrot.slane %v2656_v28, 5  ;;  %v2662_v52 = vrot.slane %v2660_v3, 4  ;;  %v2033_v6 = vshll.u32 %v1687_v10, 16  ;;  %v2039_v36 = vshll.u32 %v1688_v11, 16  ;;  %v2183_v49 = vld [vmem:[#allocation2 + $0xb4] sm:$0xe] }
 0x18d   : > { %v2653_v53 = vor.u32 %v2652_v35, %v2649_v0  ;;  %v2668_v13 = vrot.slane %v2666_v34, 5  ;;  %v2032_v15 = vrot.slane %v2030_v9, 4  ;;  %v2043_v45 = vshrl.u32 %v1688_v11, 16  ;;  %v2184_v19 = vld [vmem:[#allocation2 + $0xb8] sm:$0xf]  ;;  %v6195_v0 = vpop.f32.mrf.mxu1 }
 0x18e   : > { %v6807_v17 = vld [vmem:[#allocation3 + $0x13c] ss:$36 sps:$4 sm:$0xff]   ;;  %v2663_v50 = vor.u32 %v2662_v52, %v2658_v2  ;;  %v2035_v41 = vrot.slane %v2033_v6, 5  ;;  %v6084_v20 = vadd.f32 %v7574_v48, %v7564_v7  ;;  %v7661_v25 = vadd.f32 %v6193_v27, %v7552_v4  ;;  %v2185_v10 = vld [vmem:[#allocation2 + $0xbc] sm:$0x1]  ;;  %v6103_v52 = vpop.f32.mrf.mxu0 }
 0x18f   : > { %v6812_v44 = vld [vmem:[#allocation3 + $0x138] ss:$36 sps:$4 sm:$0xff]   ;;  %v2654_v31 = vrot.slane %v2653_v53, 4  ;;  %v2041_v37 = vrot.slane %v2039_v36, 5  ;;  %v2045_v28 = vrot.slane %v2043_v45, 4  ;;  %v2049_v3 = vshll.u32 %v1689_v62, 16  ;;  %5265 = vmatprep.mubr.bf16.mxu1 %v6807_v17 }
 0x190   : > { %v2664_v35 = vrot.slane %v2663_v50, 4  ;;  %v2036_v11 = vor.u32 %v2035_v41, %v2032_v15  ;;  %v5807_v34 = vrot.slane %v2183_v49, 9  ;;  %v2337_v9 = vrot.slane %v2184_v19, 5  ;;  %v2426_v58 = vld [vmem:[#allocation2 + $0x60] sm:$0xf]  ;;  %5266 = vmatmul.mubr.bf16.gmra.mxu1 %v6812_v44  ;;  %v6104_v19 = vpop.f32.mrf.mxu0 }
 0x191   : > { %v2659_v7 = vsel %vm6974_vm6, %v2654_v31, %v2658_v2  ;;  %v2046_v48 = vor.u32 %v2045_v28, %v2041_v37  ;;  %v2051_v4 = vrot.slane %v2049_v3, 5  ;;  %v2340_v27 = vrot.slane %v2185_v10, 5  ;;  %v2427_v6 = vld [vmem:[#allocation2 + $0x64] sm:$0xf]  ;;  %2458 = vst [vmem:[#allocation3 + $0x1c8] sm:$0xf] %v2426_v58  ;;  %v6197_v31 = vpop.f32.mrf.mxu1 }
 0x192   : > { %v2496_v36 = vld [vmem:[#allocation2 + $0x60] sm:$0xf]  ;;  %v6810_v62 = vld [vmem:[#allocation3 + $0x3bc] ss:$36 sps:$4 sm:$0xff]   ;;  %v2669_v53 = vsel %vm6974_vm6, %v2664_v35, %v2668_v13  ;;  %2952 = vst [vmem:[#allocation3 + $0x184] sm:$0xf] %v2659_v7  ;;  %v2338_v49 = vsel %vm7172_vm13, %v5807_v34, %v2337_v9  ;;  %v7669_v58 = vadd.f32 %v6104_v19, %v6103_v52  ;;  %v6196_v41 = vadd.f32 %v6195_v0, %v6194_v24  ;;  %v7677_v0 = vpop.f32.mrf.mxu0 }
 0x193   : > { %v2037_v15 = vrot.slane %v2036_v11, 4  ;;  %v2339_v45 = vrot.slane %v2337_v9, 4  ;;  %2459 = vst [vmem:[#allocation3 + $0x1ec] sm:$0xf] %v2427_v6  ;;  %v6813_v17 = vld [vmem:[#allocation3 + $0x3b8] ss:$36 sps:$4 sm:$0xff]   ;;  %5176 = vmatprep.mubr.bf16.mxu0 %v6810_v62  ;;  %v6198_v52 = vpop.f32.mrf.mxu1 }
 0x194   : > { %2953 = vst [vmem:[#allocation3 + $0x1a8] sm:$0xf] %v2669_v53  ;;  %v2047_v2 = vrot.slane %v2046_v48, 4  ;;  %2409 = vst [vmem:[#allocation3 + $0x404] sm:$0xf] %v2338_v49  ;;  %v2671_v50 = vshrl.u32 %v2496_v36, 16  ;;  %5177 = vmatmul.mubr.bf16.gmra.mxu0 %v6813_v17  ;;  %v7679_v6 = vadd.f32 %v6196_v41, %v6084_v20 }
 0x195   : > { %v2497_v44 = vld [vmem:[#allocation2 + $0x64] sm:$0xf]  ;;  %v2042_v13 = vsel %vm6974_vm6, %v2037_v15, %v2041_v37  ;;  %v2341_v28 = vsel %vm7172_vm13, %v2339_v45, %v2340_v27  ;;  %v2498_v3 = vld [vmem:[#allocation2 + $0x68] sm:$0x1]  ;;  %v2674_v10 = vshll.u32 %v2496_v36, 16  ;;  %v6199_v36 = vadd.f32 %v6198_v52, %v6197_v31  ;;  %v6200_v45 = vpop.f32.mrf.mxu1 }
 0x196   : > { %v2680_v35 = vshll.u32 %v2497_v44, 16  ;;  %v2052_v11 = vsel %vm6974_vm6, %v2047_v2, %v2051_v4  ;;  %2137 = vst [vmem:[#allocation3 + $0x400] sm:$0xf] %v2042_v13  ;;  %2410 = vst [vmem:[#allocation3 + $0x428] sm:$0xf] %v2341_v28  ;;  %v2673_v34 = vrot.slane %v2671_v50, 4 }
 0x197   : > { %v2684_v9 = vshrl.u32 %v2497_v44, 16  ;;  %v2690_v24 = vshll.u32 %v2498_v3, 16  ;;  %2138 = vst [vmem:[#allocation3 + $0x424] sm:$0xf] %v2052_v11  ;;  %v2676_v37 = vrot.slane %v2674_v10, 5  ;;  %v8203_v53 = vrot.slane %v7513_v59, 4  ;;  %v7685_v3 = vpop.f32.mrf.mxu0  ;;  %v6201_v59 = vpop.f32.mrf.mxu1 }
 0x198   : > { %v2682_v7 = vrot.slane %v2680_v35, 5  ;;  %v740_v48 = vld [vmem:[#allocation2 + $0xc8] sm:$0x1]  ;;  %v1690_v27 = vld [vmem:[#allocation2 + $0xc0] sm:$0xf]  ;;  %v6090_v11 = vadd.f32 %v7605_v60, %v7595_v22 }
 0x199   : > { %v2686_v62 = vrot.slane %v2684_v9, 4  ;;  %v741_v4 = vsel %vm6980_vm8, %v8203_v53, %v740_v48  ;;  %v1691_v15 = vld [vmem:[#allocation2 + $0xc4] sm:$0xf]  ;;  %v2054_v49 = vshrl.u32 %v1690_v27, 16  ;;  %v2677_v19 = vor.u32 %v2676_v37, %v2673_v34  ;;  %v2186_v50 = vld [vmem:[#allocation2 + $0xc0] sm:$0xe] }
 0x19a   : > { %742 = vst [vmem:[#allocation2 + $0xc8] sm:$0x1] %v741_v4  ;;  %v2057_v17 = vshll.u32 %v1690_v27, 16  ;;  %v2063_v2 = vshll.u32 %v1691_v15, 16  ;;  %v2067_v44 = vshrl.u32 %v1691_v15, 16  ;;  %v2692_v28 = vrot.slane %v2690_v24, 5 }
 0x19b   : > { %v2687_v13 = vor.u32 %v2686_v62, %v2682_v7  ;;  %v2056_v20 = vrot.slane %v2054_v49, 4  ;;  %v2187_v41 = vld [vmem:[#allocation2 + $0xc4] sm:$0xf]  ;;  %v5808_v31 = vrot.slane %v2186_v50, 9  ;;  %v6814_v10 = vld [vmem:[#allocation3 + $0x184] ss:$36 sps:$4 sm:$0xff]   ;;  %v7690_v34 = vadd.f32 %v6199_v36, %v7587_v38 }
 0x19c   : > { %v6818_v42 = vld [vmem:[#allocation3 + $0x180] ss:$36 sps:$4 sm:$0xff]   ;;  %v2678_v35 = vrot.slane %v2677_v19, 4  ;;  %v6202_v9 = vadd.f32 %v6201_v59, %v6200_v45  ;;  %v2059_v37 = vrot.slane %v2057_v17, 5  ;;  %v2065_v48 = vrot.slane %v2063_v2, 5  ;;  %5273 = vmatprep.mubr.bf16.mxu1 %v6814_v10  ;;  %v6109_v17 = vpop.f32.mrf.mxu0 }
 0x19d   : > { %v2688_v52 = vrot.slane %v2687_v13, 4  ;;  %v2069_v24 = vrot.slane %v2067_v44, 4  ;;  %v2428_v27 = vld [vmem:[#allocation2 + $0x6c] sm:$0xf]  ;;  %v2344_v53 = vrot.slane %v2187_v41, 5  ;;  %5274 = vmatmul.mubr.bf16.gmra.mxu1 %v6818_v42  ;;  %v7700_v41 = vpop.f32.mrf.mxu1 }
 0x19e   : > { %v2683_v62 = vsel %vm6974_vm6, %v2678_v35, %v2682_v7  ;;  %v2429_v4 = vld [vmem:[#allocation2 + $0x70] sm:$0xf]  ;;  %2460 = vst [vmem:[#allocation3 + $0x210] sm:$0xf] %v2428_v27  ;;  %v2499_v15 = vld [vmem:[#allocation2 + $0x6c] sm:$0xf]  ;;  %v7694_v49 = vadd.f32 %v6202_v9, %v6090_v11  ;;  %v2060_v36 = vor.u32 %v2059_v37, %v2056_v20  ;;  %v7704_v20 = vadd.f32 %v7631_v43, %v7620_v21  ;;  %v6110_v35 = vpop.f32.mrf.mxu0 }
 0x19f   : > { %v6816_v22 = vld [vmem:[#allocation3 + $0x404] ss:$36 sps:$4 sm:$0xff]   ;;  %v2693_v60 = vsel %vm6974_vm6, %v2688_v52, %v2692_v28  ;;  %2954 = vst [vmem:[#allocation3 + $0x1cc] sm:$0xf] %v2683_v62  ;;  %v2070_v45 = vor.u32 %v2069_v24, %v2065_v48  ;;  %2461 = vst [vmem:[#allocation3 + $0x234] sm:$0xf] %v2429_v4  ;;  %v2345_v7 = vsel %vm7172_vm13, %v5808_v31, %v2344_v53  ;;  %v6204_v24 = vpop.f32.mrf.mxu1 }
 0x1a0   : > { %v6819_v38 = vld [vmem:[#allocation3 + $0x400] ss:$36 sps:$4 sm:$0xff]   ;;  %v2695_v19 = vshrl.u32 %v2499_v15, 16  ;;  %2955 = vst [vmem:[#allocation3 + $0x1f0] sm:$0xf] %v2693_v60  ;;  %v2346_v2 = vrot.slane %v2344_v53, 4  ;;  %5184 = vmatprep.mubr.bf16.mxu0 %v6816_v22  ;;  %v6112_v22 = vpop.f32.mrf.mxu0 }
 0x1a1   : > { %v2500_v44 = vld [vmem:[#allocation2 + $0x70] sm:$0xf]  ;;  %v2501_v50 = vld [vmem:[#allocation2 + $0x74] sm:$0x1]  ;;  %v2698_v13 = vshll.u32 %v2499_v15, 16  ;;  %v2061_v10 = vrot.slane %v2060_v36, 4  ;;  %5185 = vmatmul.mubr.bf16.gmra.mxu0 %v6819_v38 }
 0x1a2   : > { %v1692_v59 = vld [vmem:[#allocation2 + $0xc8] sm:$0x1]  ;;  %v2071_v28 = vrot.slane %v2070_v45, 4  ;;  %2411 = vst [vmem:[#allocation3 + $0x44c] sm:$0xf] %v2345_v7  ;;  %v2697_v9 = vrot.slane %v2695_v19, 4  ;;  %v6206_v19 = vpop.f32.mrf.mxu1 }
 0x1a3   : > { %v2188_v42 = vld [vmem:[#allocation2 + $0xc8] sm:$0x1]  ;;  %v2073_v11 = vshll.u32 %v1692_v59, 16  ;;  %v2700_v52 = vrot.slane %v2698_v13, 5  ;;  %v2974_v37 = vld [vmem:[#allocation2 + $0x18] sm:$0xe]  ;;  %v2066_v27 = vsel %vm6974_vm6, %v2061_v10, %v2065_v48 }
 0x1a4   : > { %v2347_v31 = vrot.slane %v2188_v42, 5  ;;  %v2704_v62 = vshll.u32 %v2500_v44, 16  ;;  %v2708_v53 = vshrl.u32 %v2500_v44, 16  ;;  %v2714_v4 = vshll.u32 %v2501_v50, 16  ;;  %v2975_v15 = vld [vmem:[#allocation2 + $0x1c] sm:$0xf]  ;;  %v6113_v44 = vpop.f32.mrf.mxu0 }
 0x1a5   : > { %v2075_v60 = vrot.slane %v2073_v11, 5  ;;  %2139 = vst [vmem:[#allocation3 + $0x448] sm:$0xf] %v2066_v27  ;;  %v2701_v43 = vor.u32 %v2700_v52, %v2697_v9  ;;  %v2976_v38 = vld [vmem:[#allocation2 + $0x20] sm:$0x1]  ;;  %v5809_v36 = vrot.slane %v2974_v37, 9 }
 0x1a6   : > { %v2348_v21 = vsel %vm7172_vm13, %v2346_v2, %v2347_v31  ;;  %v2977_v45 = vld [vmem:[#allocation2 + $0x24] sm:$0xe]  ;;  %v2706_v7 = vrot.slane %v2704_v62, 5  ;;  %v2710_v13 = vrot.slane %v2708_v53, 4  ;;  %v2716_v59 = vrot.slane %v2714_v4, 5  ;;  %v6207_v2 = vpop.f32.mrf.mxu1 }
 0x1a7   : > { %2412 = vst [vmem:[#allocation3 + $0x470] sm:$0xf] %v2348_v21  ;;  %v3072_v48 = vrot.slane %v2975_v15, 5  ;;  %v2978_v10 = vld [vmem:[#allocation2 + $0x28] sm:$0xf]  ;;  %v2076_v50 = vsel %vm6974_vm6, %v2071_v28, %v2075_v60  ;;  %v2702_v42 = vrot.slane %v2701_v43, 4  ;;  %v7714_v53 = vadd.f32 %v6110_v35, %v6109_v17 }
 0x1a8   : > { %v3075_v11 = vrot.slane %v2976_v38, 5  ;;  %v2979_v27 = vld [vmem:[#allocation2 + $0x2c] sm:$0x1]  ;;  %v5810_v8 = vrot.slane %v2977_v45, 9  ;;  %v6820_v31 = vld [vmem:[#allocation3 + $0x1cc] ss:$36 sps:$4 sm:$0xff]   ;;  %v2711_v52 = vor.u32 %v2710_v13, %v2706_v7  ;;  %v7718_v43 = vadd.f32 %v6113_v44, %v6112_v22 }
 0x1a9   : > { %2140 = vst [vmem:[#allocation3 + $0x46c] sm:$0xf] %v2076_v50  ;;  %v6825_v9 = vld [vmem:[#allocation3 + $0x1c8] ss:$36 sps:$4 sm:$0xff]   ;;  %v3073_v37 = vsel %vm7172_vm13, %v5809_v36, %v3072_v48  ;;  %v3074_v62 = vrot.slane %v3072_v48, 4  ;;  %v2707_v4 = vsel %vm6974_vm6, %v2702_v42, %v2706_v7  ;;  %v3079_v28 = vrot.slane %v2978_v10, 5  ;;  %5281 = vmatprep.mubr.bf16.mxu1 %v6820_v31 }
 0x1aa   : > { %3214 = vst [vmem:[#allocation3 + $0x20] sm:$0xf] %v3073_v37  ;;  %v3082_v15 = vrot.slane %v2979_v27, 5  ;;  %v2430_v60 = vld [vmem:[#allocation2 + $0x78] sm:$0xf]  ;;  %v2712_v38 = vrot.slane %v2711_v52, 4  ;;  %v6205_v36 = vadd.f32 %v6204_v24, %v7700_v41  ;;  %v6208_v7 = vadd.f32 %v6207_v2, %v6206_v19  ;;  %5282 = vmatmul.mubr.bf16.gmra.mxu1 %v6825_v9  ;;  %v6115_v9 = vpop.f32.mrf.mxu0 }
 0x1ab   : > { %v2431_v21 = vld [vmem:[#allocation2 + $0x7c] sm:$0xf]  ;;  %2956 = vst [vmem:[#allocation3 + $0x214] sm:$0xf] %v2707_v4  ;;  %v3076_v45 = vsel %vm7172_vm13, %v3074_v62, %v3075_v11  ;;  %2462 = vst [vmem:[#allocation3 + $0x258] sm:$0xf] %v2430_v60  ;;  %v3080_v13 = vsel %vm7172_vm13, %v5810_v8, %v3079_v28 }
 0x1ac   : > { %2463 = vst [vmem:[#allocation3 + $0x27c] sm:$0xf] %v2431_v21  ;;  %v2502_v17 = vld [vmem:[#allocation2 + $0x78] sm:$0xf]  ;;  %v2503_v35 = vld [vmem:[#allocation2 + $0x7c] sm:$0xf]  ;;  %v2717_v50 = vsel %vm6974_vm6, %v2712_v38, %v2716_v59  ;;  %v7730_v52 = vadd.f32 %v6205_v36, %v7616_v12 }
 0x1ad   : > { %3215 = vst [vmem:[#allocation3 + $0x44] sm:$0xf] %v3076_v45  ;;  %v3081_v22 = vrot.slane %v3079_v28, 4  ;;  %v2504_v48 = vld [vmem:[#allocation2 + $0x80] sm:$0x1]  ;;  %v2719_v10 = vshrl.u32 %v2502_v17, 16 }
 0x1ae   : > { %v2722_v44 = vshll.u32 %v2502_v17, 16  ;;  %3216 = vst [vmem:[#allocation3 + $0x68] sm:$0xf] %v3080_v13  ;;  %v2728_v42 = vshll.u32 %v2503_v35, 16  ;;  %v2732_v11 = vshrl.u32 %v2503_v35, 16  ;;  %v2738_v27 = vshll.u32 %v2504_v48, 16  ;;  %v6116_v17 = vpop.f32.mrf.mxu0  ;;  %v6209_v35 = vpop.f32.mrf.mxu1 }
 0x1af   : > { %v2980_v31 = vld [vmem:[#allocation2 + $0x30] sm:$0xe]  ;;  %2957 = vst [vmem:[#allocation3 + $0x238] sm:$0xf] %v2717_v50  ;;  %v3083_v41 = vsel %vm7172_vm13, %v3081_v22, %v3082_v15  ;;  %v2721_v24 = vrot.slane %v2719_v10, 4  ;;  %v7733_v15 = vadd.f32 %v6208_v7, %v7704_v20  ;;  %v7735_v36 = vadd.f32 %v6116_v17, %v6115_v9 }
 0x1b0   : > { %v2724_v19 = vrot.slane %v2722_v44, 5  ;;  %v2981_v2 = vld [vmem:[#allocation2 + $0x34] sm:$0xf]  ;;  %v2982_v8 = vld [vmem:[#allocation2 + $0x38] sm:$0x1]  ;;  %v2730_v37 = vrot.slane %v2728_v42, 5 }
 0x1b1   : > { %3217 = vst [vmem:[#allocation3 + $0x8c] sm:$0xf] %v3083_v41  ;;  %v2734_v59 = vrot.slane %v2732_v11, 4  ;;  %v2740_v62 = vrot.slane %v2738_v27, 5  ;;  %v5811_v4 = vrot.slane %v2980_v31, 9  ;;  %v3086_v45 = vrot.slane %v2981_v2, 5  ;;  %v6118_v27 = vpop.f32.mrf.mxu0  ;;  %v6210_v31 = vpop.f32.mrf.mxu1 }
 0x1b2   : > { %v2983_v28 = vld [vmem:[#allocation2 + $0x3c] sm:$0xe]  ;;  %v6823_v60 = vld [vmem:[#allocation3 + $0x44c] ss:$36 sps:$4 sm:$0xff]   ;;  %v2725_v38 = vor.u32 %v2724_v19, %v2721_v24  ;;  %v3089_v22 = vrot.slane %v2982_v8, 5  ;;  %v6211_v24 = vadd.f32 %v6210_v31, %v6209_v35 }
 0x1b3   : > { %v6826_v21 = vld [vmem:[#allocation3 + $0x448] ss:$36 sps:$4 sm:$0xff]   ;;  %v2735_v13 = vor.u32 %v2734_v59, %v2730_v37  ;;  %v5812_v12 = vrot.slane %v2983_v28, 9  ;;  %5192 = vmatprep.mubr.bf16.mxu0 %v6823_v60  ;;  %v3087_v44 = vsel %vm7172_vm13, %v5811_v4, %v3086_v45  ;;  %v3088_v50 = vrot.slane %v3086_v45, 4  ;;  %v6119_v4 = vpop.f32.mrf.mxu0  ;;  %v6212_v28 = vpop.f32.mrf.mxu1 }
 0x1b4   : > { %v2984_v48 = vld [vmem:[#allocation2 + $0x40] sm:$0xf]  ;;  %v2726_v10 = vrot.slane %v2725_v38, 4  ;;  %v2985_v42 = vld [vmem:[#allocation2 + $0x44] sm:$0x1]  ;;  %5193 = vmatmul.mubr.bf16.gmra.mxu0 %v6826_v21  ;;  %v7750_v45 = vadd.f32 %v6211_v24, %v7644_v61 }
 0x1b5   : > { %v3093_v11 = vrot.slane %v2984_v48, 5  ;;  %v6830_v20 = vld [vmem:[#allocation3 + $0x20] ss:$36 sps:$4 sm:$0xff]   ;;  %v2736_v7 = vrot.slane %v2735_v13, 4  ;;  %3218 = vst [vmem:[#allocation3 + $0xb0] sm:$0xf] %v3087_v44  ;;  %v3090_v2 = vsel %vm7172_vm13, %v3088_v50, %v3089_v22  ;;  %v6213_v22 = vpop.f32.mrf.mxu1 }
 0x1b6   : > { %v3096_v41 = vrot.slane %v2985_v42, 5  ;;  %v2731_v19 = vsel %vm6974_vm6, %v2726_v10, %v2730_v37  ;;  %v2432_v59 = vld [vmem:[#allocation2 + $0x84] sm:$0xf]  ;;  %v6827_v60 = vld [vmem:[#allocation3 + $0x214] ss:$36 sps:$4 sm:$0xff]   ;;  %6533 = vmatprep.mubr.bf16.mxu0 %v6830_v20  ;;  %v7747_v37 = vadd.f32 %v6119_v4, %v6118_v27  ;;  %v6102_v10 = vadd.f32 %v7656_v30, %v7648_v26 }
 0x1b7   : > { %v3094_v8 = vsel %vm7172_vm13, %v5812_v12, %v3093_v11  ;;  %v3095_v9 = vrot.slane %v3093_v11, 4  ;;  %v6829_v21 = vld [vmem:[#allocation3 + $0x210] ss:$36 sps:$4 sm:$0xff]   ;;  %v2741_v38 = vsel %vm6974_vm6, %v2736_v7, %v2740_v62  ;;  %2958 = vst [vmem:[#allocation3 + $0x25c] sm:$0xf] %v2731_v19  ;;  %5289 = vmatprep.mubr.bf16.mxu1 %v6827_v60  ;;  %v6214_v44 = vadd.f32 %v6213_v22, %v6212_v28 }
 0x1b8   : > { %3219 = vst [vmem:[#allocation3 + $0xd4] sm:$0xf] %v3090_v2  ;;  %3220 = vst [vmem:[#allocation3 + $0xf8] sm:$0xf] %v3094_v8  ;;  %v6831_v17 = vld [vmem:[#allocation3 + $0x68] ss:$36 sps:$4 sm:$0xff]   ;;  %5290 = vmatmul.mubr.bf16.gmra.mxu1 %v6829_v21 }
 0x1b9   : > { %2464 = vst [vmem:[#allocation3 + $0x2a0] sm:$0xf] %v2432_v59  ;;  %2959 = vst [vmem:[#allocation3 + $0x280] sm:$0xf] %v2741_v38  ;;  %v3097_v35 = vsel %vm7172_vm13, %v3095_v9, %v3096_v41  ;;  %v2433_v13 = vld [vmem:[#allocation2 + $0x88] sm:$0xf]  ;;  %v7756_v24 = vadd.f32 %v6214_v44, %v6102_v10  ;;  %v6121_v59 = vpop.f32.mrf.mxu0 }
 0x1ba   : > { %3221 = vst [vmem:[#allocation3 + $0x11c] sm:$0xf] %v3097_v35  ;;  %2465 = vst [vmem:[#allocation3 + $0x2c4] sm:$0xf] %v2433_v13  ;;  %v2505_v62 = vld [vmem:[#allocation2 + $0x84] sm:$0xf] }
 0x1bb   : > { %v2506_v48 = vld [vmem:[#allocation2 + $0x88] sm:$0xf]  ;;  %v2507_v12 = vld [vmem:[#allocation2 + $0x8c] sm:$0x1]  ;;  %v2743_v61 = vshrl.u32 %v2505_v62, 16  ;;  %v2746_v50 = vshll.u32 %v2505_v62, 16  ;;  %v6122_v13 = vpop.f32.mrf.mxu0 }
 0x1bc   : > { %v2752_v42 = vshll.u32 %v2506_v48, 16  ;;  %v2756_v11 = vshrl.u32 %v2506_v48, 16  ;;  %v2986_v27 = vld [vmem:[#allocation2 + $0x48] sm:$0xe]  ;;  %v2762_v31 = vshll.u32 %v2507_v12, 16  ;;  %6534 = vmatmul.mubr.bf16.vlgmr.msra.gmra.mxu0 %v6831_v17  ;;  %v7760_v10 = vadd.f32 %v6122_v13, %v6121_v59 }
 0x1bd   : > { %v2987_v20 = vld [vmem:[#allocation2 + $0x4c] sm:$0xf]  ;;  %v2988_v7 = vld [vmem:[#allocation2 + $0x50] sm:$0x1]  ;;  %v5813_v41 = vrot.slane %v2986_v27, 9  ;;  %v2745_v19 = vrot.slane %v2743_v61, 4  ;;  %v6124_v17 = vpop.f32.mrf.mxu0 }
 0x1be   : > { %v2748_v2 = vrot.slane %v2746_v50, 5  ;;  %v2754_v8 = vrot.slane %v2752_v42, 5  ;;  %v2758_v9 = vrot.slane %v2756_v11, 4  ;;  %v2764_v26 = vrot.slane %v2762_v31, 5  ;;  %v2989_v28 = vld [vmem:[#allocation2 + $0x54] sm:$0xe]  ;;  %v6215_v31 = vpop.f32.mrf.mxu1 }
 0x1bf   : > { %v3100_v30 = vrot.slane %v2987_v20, 5  ;;  %v3103_v4 = vrot.slane %v2988_v7, 5  ;;  %v6835_v60 = vld [vmem:[#allocation3 + $0xb0] ss:$36 sps:$4 sm:$0xff]   ;;  %v5814_v35 = vrot.slane %v2989_v28, 9 }
 0x1c0   : > { %v2749_v21 = vor.u32 %v2748_v2, %v2745_v19  ;;  %v2759_v38 = vor.u32 %v2758_v9, %v2754_v8  ;;  %v6832_v22 = vld [vmem:[#allocation3 + $0x258] ss:$36 sps:$4 sm:$0xff]   ;;  %6537 = vmatprep.mubr.bf16.mxu0 %v6835_v60  ;;  %v2990_v11 = vld [vmem:[#allocation2 + $0x58] sm:$0xf]  ;;  %v2991_v27 = vld [vmem:[#allocation2 + $0x5c] sm:$0x1]  ;;  %v6125_v2 = vpop.f32.mrf.mxu0 }
 0x1c1   : > { %v6834_v62 = vld [vmem:[#allocation3 + $0x25c] ss:$36 sps:$4 sm:$0xff]   ;;  %v3101_v48 = vsel %vm7172_vm13, %v5813_v41, %v3100_v30  ;;  %v3102_v12 = vrot.slane %v3100_v30, 4  ;;  %v3107_v20 = vrot.slane %v2990_v11, 5  ;;  %v3110_v7 = vrot.slane %v2991_v27, 5 }
 0x1c2   : > { %v6836_v44 = vld [vmem:[#allocation3 + $0xf8] ss:$36 sps:$4 sm:$0xff]   ;;  %3222 = vst [vmem:[#allocation3 + $0x140] sm:$0xf] %v3101_v48  ;;  %5297 = vmatprep.mubr.bf16.mxu1 %v6834_v62  ;;  %v2750_v61 = vrot.slane %v2749_v21, 4  ;;  %v2760_v50 = vrot.slane %v2759_v38, 4  ;;  %v7768_v60 = vadd.f32 %v6125_v2, %v6124_v17  ;;  %v6216_v21 = vpop.f32.mrf.mxu1 }
 0x1c3   : > { %v3104_v42 = vsel %vm7172_vm13, %v3102_v12, %v3103_v4  ;;  %5298 = vmatmul.mubr.bf16.gmra.mxu1 %v6832_v22  ;;  %v2434_v41 = vld [vmem:[#allocation2 + $0x90] sm:$0xf]  ;;  %v2435_v19 = vld [vmem:[#allocation2 + $0x94] sm:$0xf]  ;;  %v2510_v28 = vld [vmem:[#allocation2 + $0x98] sm:$0x1]  ;;  %v3108_v38 = vsel %vm7172_vm13, %v5814_v35, %v3107_v20 }
 0x1c4   : > { %3223 = vst [vmem:[#allocation3 + $0x164] sm:$0xf] %v3104_v42  ;;  %v2755_v9 = vsel %vm6974_vm6, %v2750_v61, %v2754_v8  ;;  %v2765_v59 = vsel %vm6974_vm6, %v2760_v50, %v2764_v26  ;;  %2466 = vst [vmem:[#allocation3 + $0x2e8] sm:$0xf] %v2434_v41  ;;  %v2508_v30 = vld [vmem:[#allocation2 + $0x90] sm:$0xf]  ;;  %6538 = vmatmul.mubr.bf16.gmra.mxu0 %v6836_v44  ;;  %v6218_v42 = vpop.f32.mrf.mxu1 }
 0x1c5   : > { %2467 = vst [vmem:[#allocation3 + $0x30c] sm:$0xf] %v2435_v19  ;;  %v2509_v4 = vld [vmem:[#allocation2 + $0x94] sm:$0xf]  ;;  %2960 = vst [vmem:[#allocation3 + $0x2a4] sm:$0xf] %v2755_v9 }
 0x1c6   : > { %2961 = vst [vmem:[#allocation3 + $0x2c8] sm:$0xf] %v2765_v59  ;;  %v3109_v13 = vrot.slane %v3107_v20, 4  ;;  %v2767_v22 = vshrl.u32 %v2508_v30, 16  ;;  %v2770_v62 = vshll.u32 %v2508_v30, 16  ;;  %v2776_v26 = vshll.u32 %v2509_v4, 16  ;;  %v6219_v44 = vpop.f32.mrf.mxu1 }
 0x1c7   : > { %v2992_v8 = vld [vmem:[#allocation2 + $0x60] sm:$0xe]  ;;  %3224 = vst [vmem:[#allocation3 + $0x188] sm:$0xf] %v3108_v38  ;;  %v2780_v48 = vshrl.u32 %v2509_v4, 16  ;;  %v2786_v12 = vshll.u32 %v2510_v28, 16 }
 0x1c8   : > { %v2993_v61 = vld [vmem:[#allocation2 + $0x64] sm:$0xf]  ;;  %v5815_v50 = vrot.slane %v2992_v8, 9  ;;  %v3111_v17 = vsel %vm7172_vm13, %v3109_v13, %v3110_v7  ;;  %v2769_v11 = vrot.slane %v2767_v22, 4  ;;  %v2772_v27 = vrot.slane %v2770_v62, 5 }
 0x1c9   : > { %v2994_v41 = vld [vmem:[#allocation2 + $0x68] sm:$0x1]  ;;  %v3114_v19 = vrot.slane %v2993_v61, 5  ;;  %3225 = vst [vmem:[#allocation3 + $0x1ac] sm:$0xf] %v3111_v17  ;;  %v2778_v35 = vrot.slane %v2776_v26, 5  ;;  %v6217_v8 = vadd.f32 %v6216_v21, %v6215_v31  ;;  %v6108_v22 = vadd.f32 %v7685_v3, %v7677_v0 }
 0x1ca   : > { %v2782_v20 = vrot.slane %v2780_v48, 4  ;;  %v2788_v2 = vrot.slane %v2786_v12, 5  ;;  %v3117_v9 = vrot.slane %v2994_v41, 5  ;;  %v2773_v59 = vor.u32 %v2772_v27, %v2769_v11  ;;  %v2995_v28 = vld [vmem:[#allocation2 + $0x6c] sm:$0xe] }
 0x1cb   : > { %v3115_v30 = vsel %vm7172_vm13, %v5815_v50, %v3114_v19  ;;  %v3116_v4 = vrot.slane %v3114_v19, 4  ;;  %v2996_v38 = vld [vmem:[#allocation2 + $0x70] sm:$0xf]  ;;  %v6840_v47 = vld [vmem:[#allocation3 + $0x140] ss:$36 sps:$4 sm:$0xff]   ;;  %v6220_v62 = vadd.f32 %v6219_v44, %v6218_v42  ;;  %v5816_v12 = vrot.slane %v2995_v28, 9 }
 0x1cc   : > { %v2783_v7 = vor.u32 %v2782_v20, %v2778_v35  ;;  %3226 = vst [vmem:[#allocation3 + $0x1d0] sm:$0xf] %v3115_v30  ;;  %v2997_v13 = vld [vmem:[#allocation2 + $0x74] sm:$0x1]  ;;  %v2774_v26 = vrot.slane %v2773_v59, 4  ;;  %v3121_v61 = vrot.slane %v2996_v38, 5  ;;  %6541 = vmatprep.mubr.bf16.mxu0 %v6840_v47  ;;  %v7781_v21 = vadd.f32 %v6217_v8, %v7669_v58  ;;  %v6127_v58 = vpop.f32.mrf.mxu0  ;;  %v6221_v30 = vpop.f32.mrf.mxu1 }
 0x1cd   : > { %v3118_v48 = vsel %vm7172_vm13, %v3116_v4, %v3117_v9  ;;  %v2436_v17 = vld [vmem:[#allocation2 + $0x9c] sm:$0xf]  ;;  %v3124_v31 = vrot.slane %v2997_v13, 5  ;;  %v7783_v27 = vadd.f32 %v6220_v62, %v6108_v22  ;;  %v2437_v19 = vld [vmem:[#allocation2 + $0xa0] sm:$0xf] }
 0x1ce   : > { %v6837_v50 = vld [vmem:[#allocation3 + $0x2a0] ss:$36 sps:$4 sm:$0xff]   ;;  %v2784_v11 = vrot.slane %v2783_v7, 4  ;;  %3227 = vst [vmem:[#allocation3 + $0x1f4] sm:$0xf] %v3118_v48  ;;  %v2779_v3 = vsel %vm6974_vm6, %v2774_v26, %v2778_v35  ;;  %v3122_v42 = vsel %vm7172_vm13, %v5816_v12, %v3121_v61  ;;  %v3123_v41 = vrot.slane %v3121_v61, 4  ;;  %v6128_v7 = vpop.f32.mrf.mxu0  ;;  %v6222_v48 = vpop.f32.mrf.mxu1 }
 0x1cf   : > { %2468 = vst [vmem:[#allocation3 + $0x330] sm:$0xf] %v2436_v17  ;;  %v6839_v0 = vld [vmem:[#allocation3 + $0x2a4] ss:$36 sps:$4 sm:$0xff]   ;;  %2962 = vst [vmem:[#allocation3 + $0x2ec] sm:$0xf] %v2779_v3  ;;  %v7793_v26 = vadd.f32 %v6128_v7, %v6127_v58 }
 0x1d0   : > { %v2789_v47 = vsel %vm6974_vm6, %v2784_v11, %v2788_v2  ;;  %3228 = vst [vmem:[#allocation3 + $0x218] sm:$0xf] %v3122_v42  ;;  %v2511_v20 = vld [vmem:[#allocation2 + $0x9c] sm:$0xf]  ;;  %v2512_v9 = vld [vmem:[#allocation2 + $0xa0] sm:$0xf]  ;;  %5305 = vmatprep.mubr.bf16.mxu1 %v6839_v0  ;;  %v3125_v59 = vsel %vm7172_vm13, %v3123_v41, %v3124_v31  ;;  %v6223_v42 = vadd.f32 %v6222_v48, %v6221_v30  ;;  %v6224_v41 = vpop.f32.mrf.mxu1 }
 0x1d1   : > { %v6841_v44 = vld [vmem:[#allocation3 + $0x188] ss:$36 sps:$4 sm:$0xff]   ;;  %2963 = vst [vmem:[#allocation3 + $0x310] sm:$0xf] %v2789_v47  ;;  %2469 = vst [vmem:[#allocation3 + $0x354] sm:$0xf] %v2437_v19  ;;  %5306 = vmatmul.mubr.bf16.gmra.mxu1 %v6837_v50  ;;  %v6130_v50 = vpop.f32.mrf.mxu0 }
 0x1d2   : > { %v2513_v35 = vld [vmem:[#allocation2 + $0xa4] sm:$0x1]  ;;  %3229 = vst [vmem:[#allocation3 + $0x23c] sm:$0xf] %v3125_v59  ;;  %v2791_v4 = vshrl.u32 %v2511_v20, 16  ;;  %v2794_v28 = vshll.u32 %v2511_v20, 16  ;;  %6542 = vmatmul.mubr.bf16.gmra.mxu0 %v6841_v44  ;;  %v6225_v30 = vpop.f32.mrf.mxu1 }
 0x1d3   : > { %v2800_v2 = vshll.u32 %v2512_v9, 16  ;;  %v2804_v38 = vshrl.u32 %v2512_v9, 16  ;;  %v2998_v8 = vld [vmem:[#allocation2 + $0x78] sm:$0xe]  ;;  %v2810_v13 = vshll.u32 %v2513_v35, 16  ;;  %v6131_v35 = vpop.f32.mrf.mxu0  ;;  %v6226_v48 = vadd.f32 %v6225_v30, %v6224_v41 }
 0x1d4   : > { %v2999_v22 = vld [vmem:[#allocation2 + $0x7c] sm:$0xf]  ;;  %v5817_v62 = vrot.slane %v2998_v8, 9  ;;  %v2793_v12 = vrot.slane %v2791_v4, 4  ;;  %v2796_v61 = vrot.slane %v2794_v28, 5 }
 0x1d5   : > { %v2802_v17 = vrot.slane %v2800_v2, 5  ;;  %v2806_v11 = vrot.slane %v2804_v38, 4  ;;  %v3000_v31 = vld [vmem:[#allocation2 + $0x80] sm:$0x1]  ;;  %v6845_v0 = vld [vmem:[#allocation3 + $0x1d0] ss:$36 sps:$4 sm:$0xff]   ;;  %v7797_v2 = vadd.f32 %v6131_v35, %v6130_v50  ;;  %v7800_v38 = vadd.f32 %v6223_v42, %v7714_v53 }
 0x1d6   : > { %v3128_v3 = vrot.slane %v2999_v22, 5  ;;  %v2797_v47 = vor.u32 %v2796_v61, %v2793_v12  ;;  %v2812_v20 = vrot.slane %v2810_v13, 5  ;;  %v3131_v9 = vrot.slane %v3000_v31, 5  ;;  %v3001_v44 = vld [vmem:[#allocation2 + $0x84] sm:$0xe]  ;;  %6545 = vmatprep.mubr.bf16.mxu0 %v6845_v0  ;;  %v6285_v13 = vpop.f32.mrf.mxu0 }
 0x1d7   : > { %v2807_v19 = vor.u32 %v2806_v11, %v2802_v17  ;;  %v3002_v59 = vld [vmem:[#allocation2 + $0x88] sm:$0xf]  ;;  %v3003_v28 = vld [vmem:[#allocation2 + $0x8c] sm:$0x1]  ;;  %v6842_v8 = vld [vmem:[#allocation3 + $0x2e8] ss:$36 sps:$4 sm:$0xff]  }
 0x1d8   : > { %v3129_v58 = vsel %vm7172_vm13, %v5817_v62, %v3128_v3  ;;  %v3130_v4 = vrot.slane %v3128_v3, 4  ;;  %v6844_v7 = vld [vmem:[#allocation3 + $0x2ec] ss:$36 sps:$4 sm:$0xff]   ;;  %v2798_v22 = vrot.slane %v2797_v47, 4  ;;  %v5818_v62 = vrot.slane %v3001_v44, 9  ;;  %v6286_v42 = vpop.f32.mrf.mxu0 }
 0x1d9   : > { %3230 = vst [vmem:[#allocation3 + $0x260] sm:$0xf] %v3129_v58  ;;  %v6846_v12 = vld [vmem:[#allocation3 + $0x218] ss:$36 sps:$4 sm:$0xff]   ;;  %v2808_v61 = vrot.slane %v2807_v19, 4  ;;  %5313 = vmatprep.mubr.bf16.mxu1 %v6844_v7  ;;  %v3135_v53 = vrot.slane %v3002_v59, 5  ;;  %v7807_v47 = vadd.f32 %v6226_v48, %v7718_v43  ;;  %v6287_v44 = vadd.f32 %v6286_v42, %v6285_v13 }
 0x1da   : > { %v3132_v11 = vsel %vm7172_vm13, %v3130_v4, %v3131_v9  ;;  %v2803_v31 = vsel %vm6974_vm6, %v2798_v22, %v2802_v17  ;;  %v3138_v50 = vrot.slane %v3003_v28, 5  ;;  %v2438_v0 = vld [vmem:[#allocation2 + $0xa8] sm:$0xf]  ;;  %v2439_v3 = vld [vmem:[#allocation2 + $0xac] sm:$0xf]  ;;  %5314 = vmatmul.mubr.bf16.gmra.mxu1 %v6842_v8  ;;  %6546 = vmatmul.mubr.bf16.gmra.mxu0 %v6846_v12  ;;  %v6288_v28 = vpop.f32.mrf.mxu0 }
 0x1db   : > { %3231 = vst [vmem:[#allocation3 + $0x284] sm:$0xf] %v3132_v11  ;;  %8204 = vst [vmem:[#allocation6_spill] sm:$0xff] %v7807_v47  ;;  %v2813_v41 = vsel %vm6974_vm6, %v2808_v61, %v2812_v20  ;;  %v2514_v19 = vld [vmem:[#allocation2 + $0xa8] sm:$0xf]  ;;  %v3136_v59 = vsel %vm7172_vm13, %v5818_v62, %v3135_v53  ;;  %v3137_v35 = vrot.slane %v3135_v53, 4  ;;  %v6227_v62 = vpop.f32.mrf.mxu1 }
 0x1dc   : > { %2964 = vst [vmem:[#allocation3 + $0x334] sm:$0xf] %v2803_v31  ;;  %2470 = vst [vmem:[#allocation3 + $0x378] sm:$0xf] %v2438_v0  ;;  %v2515_v9 = vld [vmem:[#allocation2 + $0xac] sm:$0xf]  ;;  %v6289_v31 = vpop.f32.mrf.mxu0 }
 0x1dd   : > { %2471 = vst [vmem:[#allocation3 + $0x39c] sm:$0xf] %v2439_v3  ;;  %v2516_v17 = vld [vmem:[#allocation2 + $0xb0] sm:$0x1]  ;;  %2965 = vst [vmem:[#allocation3 + $0x358] sm:$0xf] %v2813_v41  ;;  %v3139_v48 = vsel %vm7172_vm13, %v3137_v35, %v3138_v50  ;;  %v7818_v50 = vadd.f32 %v6287_v44, %v7581_v1 }
 0x1de   : > { %v2815_v58 = vshrl.u32 %v2514_v19, 16  ;;  %v2818_v43 = vshll.u32 %v2514_v19, 16  ;;  %v3004_v4 = vld [vmem:[#allocation2 + $0x90] sm:$0xe]  ;;  %3232 = vst [vmem:[#allocation3 + $0x2a8] sm:$0xf] %v3136_v59  ;;  %v6291_v35 = vpop.f32.mrf.mxu0 }
 0x1df   : > { %v2824_v30 = vshll.u32 %v2515_v9, 16  ;;  %v2828_v8 = vshrl.u32 %v2515_v9, 16  ;;  %v2834_v20 = vshll.u32 %v2516_v17, 16  ;;  %v3005_v7 = vld [vmem:[#allocation2 + $0x94] sm:$0xf]  ;;  %v5819_v22 = vrot.slane %v3004_v4, 9 }
 0x1e0   : > { %v2817_v12 = vrot.slane %v2815_v58, 4  ;;  %v2820_v13 = vrot.slane %v2818_v43, 5  ;;  %v3006_v61 = vld [vmem:[#allocation2 + $0x98] sm:$0x1]  ;;  %v3142_v11 = vrot.slane %v3005_v7, 5  ;;  %v6228_v58 = vpop.f32.mrf.mxu1 }
 0x1e1   : > { %3233 = vst [vmem:[#allocation3 + $0x2cc] sm:$0xf] %v3139_v48  ;;  %v2826_v53 = vrot.slane %v2824_v30, 5  ;;  %v2830_v0 = vrot.slane %v2828_v8, 4  ;;  %v2836_v3 = vrot.slane %v2834_v20, 5  ;;  %v3145_v42 = vrot.slane %v3006_v61, 5  ;;  %v6292_v61 = vpop.f32.mrf.mxu0 }
 0x1e2   : > { %v2821_v41 = vor.u32 %v2820_v13, %v2817_v12  ;;  %v3143_v19 = vsel %vm7172_vm13, %v5819_v22, %v3142_v11  ;;  %v3144_v9 = vrot.slane %v3142_v11, 4  ;;  %v3007_v17 = vld [vmem:[#allocation2 + $0x9c] sm:$0xe]  ;;  %v3008_v59 = vld [vmem:[#allocation2 + $0xa0] sm:$0xf]  ;;  %v6290_v30 = vadd.f32 %v6289_v31, %v6288_v28  ;;  %v6230_v11 = vpop.f32.mrf.mxu1 }
 0x1e3   : > { %v6850_v43 = vld [vmem:[#allocation3 + $0x260] ss:$36 sps:$4 sm:$0xff]   ;;  %v2831_v4 = vor.u32 %v2830_v0, %v2826_v53  ;;  %3234 = vst [vmem:[#allocation3 + $0x2f0] sm:$0xf] %v3143_v19  ;;  %v3009_v7 = vld [vmem:[#allocation2 + $0xa4] sm:$0x1]  ;;  %v6229_v8 = vadd.f32 %v6228_v58, %v6227_v62  ;;  %v6293_v28 = vadd.f32 %v6292_v61, %v6291_v35 }
 0x1e4   : > { %v2822_v20 = vrot.slane %v2821_v41, 4  ;;  %v3146_v48 = vsel %vm7172_vm13, %v3144_v9, %v3145_v42  ;;  %v5820_v12 = vrot.slane %v3007_v17, 9  ;;  %v3149_v22 = vrot.slane %v3008_v59, 5  ;;  %v2440_v13 = vld [vmem:[#allocation2 + $0xb4] sm:$0xf]  ;;  %6549 = vmatprep.mubr.bf16.mxu0 %v6850_v43  ;;  %v6294_v17 = vpop.f32.mrf.mxu0  ;;  %v6231_v59 = vpop.f32.mrf.mxu1 }
 0x1e5   : > { %v6847_v47 = vld [vmem:[#allocation3 + $0x330] ss:$36 sps:$4 sm:$0xff]   ;;  %v2832_v44 = vrot.slane %v2831_v4, 4  ;;  %3235 = vst [vmem:[#allocation3 + $0x314] sm:$0xf] %v3146_v48  ;;  %v7823_v0 = vadd.f32 %v6290_v30, %v7589_v5  ;;  %v7826_v31 = vadd.f32 %v6229_v8, %v7735_v36  ;;  %v3152_v19 = vrot.slane %v3009_v7, 5 }
 0x1e6   : > { %v6849_v1 = vld [vmem:[#allocation3 + $0x334] ss:$36 sps:$4 sm:$0xff]   ;;  %2472 = vst [vmem:[#allocation3 + $0x3c0] sm:$0xf] %v2440_v13  ;;  %v2827_v62 = vsel %vm6974_vm6, %v2822_v20, %v2826_v53  ;;  %v3150_v42 = vsel %vm7172_vm13, %v5820_v12, %v3149_v22  ;;  %v3151_v41 = vrot.slane %v3149_v22, 4  ;;  %v7835_v53 = vadd.f32 %v6293_v28, %v7610_v40  ;;  %v6295_v20 = vpop.f32.mrf.mxu0 }
 0x1e7   : > { %v2441_v9 = vld [vmem:[#allocation2 + $0xb8] sm:$0xf]  ;;  %5321 = vmatprep.mubr.bf16.mxu1 %v6849_v1  ;;  %v2837_v5 = vsel %vm6974_vm6, %v2832_v44, %v2836_v3  ;;  %2966 = vst [vmem:[#allocation3 + $0x37c] sm:$0xf] %v2827_v62  ;;  %3236 = vst [vmem:[#allocation3 + $0x338] sm:$0xf] %v3150_v42  ;;  %v6232_v43 = vadd.f32 %v6231_v59, %v6230_v11  ;;  %v6233_v3 = vpop.f32.mrf.mxu1  ;;  %v6296_v61 = vadd.f32 %v6295_v20, %v6294_v17 }
 0x1e8   : > { %2473 = vst [vmem:[#allocation3 + $0x3e4] sm:$0xf] %v2441_v9  ;;  %v2517_v36 = vld [vmem:[#allocation2 + $0xb4] sm:$0xf]  ;;  %v2518_v35 = vld [vmem:[#allocation2 + $0xb8] sm:$0xf]  ;;  %5322 = vmatmul.mubr.bf16.gmra.mxu1 %v6847_v47  ;;  %v3153_v7 = vsel %vm7172_vm13, %v3151_v41, %v3152_v19  ;;  %v6297_v47 = vpop.f32.mrf.mxu0 }
 0x1e9   : > { %v2519_v58 = vld [vmem:[#allocation2 + $0xbc] sm:$0x1]  ;;  %v6851_v4 = vld [vmem:[#allocation3 + $0x2a8] ss:$36 sps:$4 sm:$0xff]   ;;  %2967 = vst [vmem:[#allocation3 + $0x3a0] sm:$0xf] %v2837_v5  ;;  %v7840_v44 = vadd.f32 %v6232_v43, %v7747_v37  ;;  %v6234_v28 = vpop.f32.mrf.mxu1  ;;  %v7843_v17 = vadd.f32 %v6296_v61, %v7622_v18 }
 0x1ea   : > { %v2839_v30 = vshrl.u32 %v2517_v36, 16  ;;  %v2842_v8 = vshll.u32 %v2517_v36, 16  ;;  %3237 = vst [vmem:[#allocation3 + $0x35c] sm:$0xf] %v3153_v7  ;;  %v2848_v48 = vshll.u32 %v2518_v35, 16  ;;  %v2852_v12 = vshrl.u32 %v2518_v35, 16  ;;  %6550 = vmatmul.mubr.bf16.gmra.mxu0 %v6851_v4 }
 0x1eb   : > { %v2858_v22 = vshll.u32 %v2519_v58, 16  ;;  %v3010_v13 = vld [vmem:[#allocation2 + $0xa8] sm:$0xe]  ;;  %v3011_v11 = vld [vmem:[#allocation2 + $0xac] sm:$0xf]  ;;  %v6298_v58 = vpop.f32.mrf.mxu0  ;;  %v6236_v4 = vpop.f32.mrf.mxu1  ;;  %v6235_v20 = vadd.f32 %v6234_v28, %v6233_v3 }
 0x1ec   : > { %v2841_v40 = vrot.slane %v2839_v30, 4  ;;  %v2844_v1 = vrot.slane %v2842_v8, 5  ;;  %v2850_v62 = vrot.slane %v2848_v48, 5  ;;  %v2854_v42 = vrot.slane %v2852_v12, 4  ;;  %v3012_v19 = vld [vmem:[#allocation2 + $0xb0] sm:$0x1] }
 0x1ed   : > { %v2860_v41 = vrot.slane %v2858_v22, 5  ;;  %v5821_v9 = vrot.slane %v3010_v13, 9  ;;  %v6855_v59 = vld [vmem:[#allocation3 + $0x2f0] ss:$36 sps:$4 sm:$0xff]   ;;  %v3156_v36 = vrot.slane %v3011_v11, 5  ;;  %v3159_v35 = vrot.slane %v3012_v19, 5 }
 0x1ee   : > { %v2845_v5 = vor.u32 %v2844_v1, %v2841_v40  ;;  %v2855_v7 = vor.u32 %v2854_v42, %v2850_v62  ;;  %v3013_v30 = vld [vmem:[#allocation2 + $0xb4] sm:$0xe]  ;;  %v3014_v8 = vld [vmem:[#allocation2 + $0xb8] sm:$0xf]  ;;  %v3015_v37 = vld [vmem:[#allocation2 + $0xbc] sm:$0x1]  ;;  %v6299_v43 = vadd.f32 %v6298_v58, %v6297_v47  ;;  %6553 = vmatprep.mubr.bf16.mxu0 %v6855_v59  ;;  %v6300_v40 = vpop.f32.mrf.mxu0  ;;  %v6237_v1 = vpop.f32.mrf.mxu1  ;;  %v7851_v19 = vadd.f32 %v6235_v20, %v7760_v10 }
 0x1ef   : > { %v3157_v12 = vsel %vm7172_vm13, %v5821_v9, %v3156_v36  ;;  %v3158_v22 = vrot.slane %v3156_v36, 4  ;;  %v5822_v13 = vrot.slane %v3013_v30, 9  ;;  %v6852_v11 = vld [vmem:[#allocation3 + $0x378] ss:$36 sps:$4 sm:$0xff]   ;;  %v6238_v3 = vadd.f32 %v6237_v1, %v6236_v4  ;;  %v2443_v10 = vld [vmem:[#allocation2 + $0xc4] sm:$0xf] }
 0x1f0   : > { %v2846_v48 = vrot.slane %v2845_v5, 4  ;;  %v6854_v18 = vld [vmem:[#allocation3 + $0x37c] ss:$36 sps:$4 sm:$0xff]   ;;  %v2856_v61 = vrot.slane %v2855_v7, 4  ;;  %3238 = vst [vmem:[#allocation3 + $0x380] sm:$0xf] %v3157_v12  ;;  %v7848_v42 = vadd.f32 %v6299_v43, %v7636_v32  ;;  %v6301_v36 = vpop.f32.mrf.mxu0 }
 0x1f1   : > { %v6856_v47 = vld [vmem:[#allocation3 + $0x338] ss:$36 sps:$4 sm:$0xff]   ;;  %v3160_v9 = vsel %vm7172_vm13, %v3158_v22, %v3159_v35  ;;  %v3163_v59 = vrot.slane %v3014_v8, 5  ;;  %v3166_v5 = vrot.slane %v3015_v37, 5  ;;  %5329 = vmatprep.mubr.bf16.mxu1 %v6854_v18  ;;  %v2442_v32 = vld [vmem:[#allocation2 + $0xc0] sm:$0xf]  ;;  %v6302_v4 = vadd.f32 %v6301_v36, %v6300_v40  ;;  %v6239_v40 = vpop.f32.mrf.mxu1 }
 0x1f2   : > { %8205 = vst [vmem:[#allocation7_spill] sm:$0xff] %v7848_v42  ;;  %v2851_v28 = vsel %vm6974_vm6, %v2846_v48, %v2850_v62  ;;  %v2861_v58 = vsel %vm6974_vm6, %v2856_v61, %v2860_v41  ;;  %3239 = vst [vmem:[#allocation3 + $0x3a4] sm:$0xf] %v3160_v9  ;;  %v2520_v7 = vld [vmem:[#allocation2 + $0xc0] sm:$0xf]  ;;  %v7860_v30 = vadd.f32 %v6238_v3, %v7768_v60  ;;  %5330 = vmatmul.mubr.bf16.gmra.mxu1 %v6852_v11  ;;  %v6303_v43 = vpop.f32.mrf.mxu0 }
 0x1f3   : > { %2968 = vst [vmem:[#allocation3 + $0x3c4] sm:$0xf] %v2851_v28  ;;  %6554 = vmatmul.mubr.bf16.gmra.mxu0 %v6856_v47  ;;  %2969 = vst [vmem:[#allocation3 + $0x3e8] sm:$0xf] %v2861_v58  ;;  %v3164_v62 = vsel %vm7172_vm13, %v5822_v13, %v3163_v59  ;;  %v3165_v35 = vrot.slane %v3163_v59, 4  ;;  %v2863_v37 = vshrl.u32 %v2520_v7, 16  ;;  %v7867_v3 = vadd.f32 %v6302_v4, %v7646_v51 }
 0x1f4   : > { %2474 = vst [vmem:[#allocation3 + $0x408] sm:$0xf] %v2442_v32  ;;  %2475 = vst [vmem:[#allocation3 + $0x42c] sm:$0xf] %v2443_v10  ;;  %v2521_v8 = vld [vmem:[#allocation2 + $0xc4] sm:$0xf]  ;;  %v6304_v47 = vpop.f32.mrf.mxu0  ;;  %v6240_v32 = vpop.f32.mrf.mxu1 }
 0x1f5   : > { %v2522_v41 = vld [vmem:[#allocation2 + $0xc8] sm:$0x1]  ;;  %3240 = vst [vmem:[#allocation3 + $0x3c8] sm:$0xf] %v3164_v62  ;;  %v2866_v20 = vshll.u32 %v2520_v7, 16  ;;  %v2872_v48 = vshll.u32 %v2521_v8, 16  ;;  %v3167_v1 = vsel %vm7172_vm13, %v3165_v35, %v3166_v5  ;;  %v6241_v35 = vadd.f32 %v6240_v32, %v6239_v40 }
 0x1f6   : > { %v2876_v12 = vshrl.u32 %v2521_v8, 16  ;;  %v2882_v22 = vshll.u32 %v2522_v41, 16  ;;  %v3016_v60 = vld [vmem:[#allocation2 + $0xc0] sm:$0xe]  ;;  %v2865_v11 = vrot.slane %v2863_v37, 4  ;;  %8206 = vst [vmem:[#allocation8_spill] sm:$0xff] %v7867_v3  ;;  %v6305_v8 = vadd.f32 %v6304_v47, %v6303_v43  ;;  %v6306_v5 = vpop.f32.mrf.mxu0  ;;  %v6242_v3 = vpop.f32.mrf.mxu1 }
 0x1f7   : > { %v3017_v18 = vld [vmem:[#allocation2 + $0xc4] sm:$0xf]  ;;  %v3018_v13 = vld [vmem:[#allocation2 + $0xc8] sm:$0x1]  ;;  %v5823_v61 = vrot.slane %v3016_v60, 9  ;;  %v2868_v28 = vrot.slane %v2866_v20, 5  ;;  %v7875_v43 = vadd.f32 %v6241_v35, %v7793_v26 }
 0x1f8   : > { %3241 = vst [vmem:[#allocation3 + $0x3ec] sm:$0xf] %v3167_v1  ;;  %v2874_v9 = vrot.slane %v2872_v48, 5  ;;  %v2878_v59 = vrot.slane %v2876_v12, 4  ;;  %v2884_v36 = vrot.slane %v2882_v22, 5  ;;  %v3170_v10 = vrot.slane %v3017_v18, 5  ;;  %v6307_v22 = vpop.f32.mrf.mxu0 }
 0x1f9   : > { %v3019_v58 = vld [vmem:[#allocation2 + $0xcc] sm:$0xe]  ;;  %v3173_v7 = vrot.slane %v3018_v13, 5  ;;  %v3020_v62 = vld [vmem:[#allocation2 + $0xd0] sm:$0xf]  ;;  %v2869_v41 = vor.u32 %v2868_v28, %v2865_v11  ;;  %v7872_v12 = vadd.f32 %v6305_v8, %v7661_v25  ;;  %v6308_v47 = vadd.f32 %v6307_v22, %v6306_v5  ;;  %v6243_v28 = vpop.f32.mrf.mxu1 }
 0x1fa   : > { %v2879_v37 = vor.u32 %v2878_v59, %v2874_v9  ;;  %v3021_v60 = vld [vmem:[#allocation2 + $0xd4] sm:$0x1]  ;;  %v5824_v42 = vrot.slane %v3019_v58, 9  ;;  %v3177_v51 = vrot.slane %v3020_v62, 5  ;;  %v2444_v4 = vld [vmem:[#allocation2 + $0xcc] sm:$0xf]  ;;  %v3171_v20 = vsel %vm7172_vm13, %v5823_v61, %v3170_v10 }
 0x1fb   : > { %v6860_v1 = vld [vmem:[#allocation3 + $0x380] ss:$36 sps:$4 sm:$0xff]   ;;  %v3172_v48 = vrot.slane %v3170_v10, 4  ;;  %2476 = vst [vmem:[#allocation3 + $0x450] sm:$0xf] %v2444_v4  ;;  %v2870_v18 = vrot.slane %v2869_v41, 4  ;;  %v6244_v8 = vadd.f32 %v6243_v28, %v6242_v3  ;;  %v6245_v4 = vpop.f32.mrf.mxu1 }
 0x1fc   : > { %v6857_v40 = vld [vmem:[#allocation3 + $0x3c0] ss:$36 sps:$4 sm:$0xff]   ;;  %3242 = vst [vmem:[#allocation3 + $0x410] sm:$0xf] %v3171_v20  ;;  %v3178_v13 = vsel %vm7172_vm13, %v5824_v42, %v3177_v51  ;;  %6557 = vmatprep.mubr.bf16.mxu0 %v6860_v1  ;;  %v2880_v61 = vrot.slane %v2879_v37, 4  ;;  %v3179_v25 = vrot.slane %v3177_v51, 4  ;;  %v7884_v42 = vadd.f32 %v6308_v47, %v7679_v6 }
 0x1fd   : > { %v6859_v11 = vld [vmem:[#allocation3 + $0x3c4] ss:$36 sps:$4 sm:$0xff]   ;;  %v3174_v59 = vsel %vm7172_vm13, %v3172_v48, %v3173_v7  ;;  %v3180_v58 = vrot.slane %v3021_v60, 5  ;;  %3244 = vst [vmem:[#allocation3 + $0x458] sm:$0xf] %v3178_v13  ;;  %v2875_v26 = vsel %vm6974_vm6, %v2870_v18, %v2874_v9  ;;  %v6309_v9 = vpop.f32.mrf.mxu0  ;;  %v7891_v20 = vadd.f32 %v6244_v8, %v7797_v2 }
 0x1fe   : > { %5337 = vmatprep.mubr.bf16.mxu1 %v6859_v11  ;;  %3243 = vst [vmem:[#allocation3 + $0x434] sm:$0xf] %v3174_v59  ;;  %v2445_v32 = vld [vmem:[#allocation2 + $0xd0] sm:$0xf]  ;;  %v2523_v10 = vld [vmem:[#allocation2 + $0xcc] sm:$0xf]  ;;  %v2885_v7 = vsel %vm6974_vm6, %v2880_v61, %v2884_v36 }
 0x1ff   : > { %v2524_v62 = vld [vmem:[#allocation2 + $0xd0] sm:$0xf]  ;;  %5338 = vmatmul.mubr.bf16.gmra.mxu1 %v6857_v40  ;;  %v6861_v5 = vld [vmem:[#allocation3 + $0x3c8] ss:$36 sps:$4 sm:$0xff]   ;;  %2970 = vst [vmem:[#allocation3 + $0x40c] sm:$0xf] %v2875_v26  ;;  %v3181_v35 = vsel %vm7172_vm13, %v3179_v25, %v3180_v58  ;;  %v6310_v1 = vpop.f32.mrf.mxu0  ;;  %v6246_v40 = vpop.f32.mrf.mxu1 }
 0x200   : > { %2477 = vst [vmem:[#allocation3 + $0x474] sm:$0xf] %v2445_v32  ;;  %v2525_v41 = vld [vmem:[#allocation2 + $0xd4] sm:$0x1]  ;;  %2971 = vst [vmem:[#allocation3 + $0x430] sm:$0xf] %v2885_v7  ;;  %6558 = vmatmul.mubr.bf16.gmra.mxu0 %v6861_v5  ;;  %v6311_v11 = vadd.f32 %v6310_v1, %v6309_v9  ;;  %v6247_v13 = vadd.f32 %v6246_v40, %v6245_v4  ;;  %v6138_v5 = vadd.f32 %v7481_v14, %v7471_v54 }
 0x201   : > { %3245 = vst [vmem:[#allocation3 + $0x47c] sm:$0xf] %v3181_v35  ;;  %v2887_v37 = vshrl.u32 %v2523_v10, 16  ;;  %v2890_v60 = vshll.u32 %v2523_v10, 16  ;;  %v2896_v51 = vshll.u32 %v2524_v62, 16  ;;  %v2900_v6 = vshrl.u32 %v2524_v62, 16  ;;  %v6312_v18 = vpop.f32.mrf.mxu0  ;;  %v6248_v59 = vpop.f32.mrf.mxu1 }
 0x202   : > { %v2906_v3 = vshll.u32 %v2525_v41, 16  ;;  %v7894_v58 = vadd.f32 %v6311_v11, %v7690_v34  ;;  %v7897_v2 = vadd.f32 %v6247_v13, %v7460_v29  ;;  %v6862_v7 = vld [vmem:[#allocation3 + $0x408] ss:$36 sps:$4 sm:$0xff]  }
 0x203   : > { %v2889_v36 = vrot.slane %v2887_v37, 4  ;;  %v2892_v48 = vrot.slane %v2890_v60, 5  ;;  %v2898_v56 = vrot.slane %v2896_v51, 5  ;;  %v2902_v22 = vrot.slane %v2900_v6, 4  ;;  %v6313_v26 = vpop.f32.mrf.mxu0  ;;  %v6249_v8 = vpop.f32.mrf.mxu1 }
 0x204   : > { %v2908_v61 = vrot.slane %v2906_v3, 5  ;;  %v6314_v62 = vadd.f32 %v6313_v26, %v6312_v18  ;;  %v6250_v41 = vadd.f32 %v6249_v8, %v6248_v59  ;;  %v6144_v18 = vadd.f32 %v7526_v46, %v7515_v63 }
 0x205   : > { %v2893_v47 = vor.u32 %v2892_v48, %v2889_v36  ;;  %v2903_v28 = vor.u32 %v2902_v22, %v2898_v56  ;;  %v6865_v25 = vld [vmem:[#allocation3 + $0x410] ss:$36 sps:$4 sm:$0xff]   ;;  %v6315_v54 = vpop.f32.mrf.mxu0  ;;  %v6251_v14 = vpop.f32.mrf.mxu1  ;;  %v6150_v8 = vadd.f32 %v7548_v55, %v7542_v23 }
 0x206   : > { %6561 = vmatprep.mubr.bf16.mxu0 %v6865_v25  ;;  %v7906_v29 = vadd.f32 %v6314_v62, %v7694_v49  ;;  %v7908_v60 = vadd.f32 %v6250_v41, %v6138_v5 }
 0x207   : > { %v2894_v32 = vrot.slane %v2893_v47, 4  ;;  %v2904_v10 = vrot.slane %v2903_v28, 4  ;;  %v6864_v35 = vld [vmem:[#allocation3 + $0x40c] ss:$36 sps:$4 sm:$0xff]   ;;  %v6316_v51 = vpop.f32.mrf.mxu0  ;;  %v6252_v4 = vpop.f32.mrf.mxu1 }
 0x208   : > { %v6866_v9 = vld [vmem:[#allocation3 + $0x458] ss:$36 sps:$4 sm:$0xff]   ;;  %5345 = vmatprep.mubr.bf16.mxu1 %v6864_v35  ;;  %v6317_v6 = vadd.f32 %v6316_v51, %v6315_v54  ;;  %v6253_v1 = vadd.f32 %v6252_v4, %v6251_v14  ;;  %v6867_v49 = vld [vmem:[#allocation3 + $0x450] ss:$36 sps:$4 sm:$0xff]  }
 0x209   : > { %v2899_v34 = vsel %vm6974_vm6, %v2894_v32, %v2898_v56  ;;  %v2909_v37 = vsel %vm6974_vm6, %v2904_v10, %v2908_v61  ;;  %5346 = vmatmul.mubr.bf16.gmra.mxu1 %v6862_v7  ;;  %6562 = vmatmul.mubr.bf16.gmra.mxu0 %v6866_v9  ;;  %v6318_v3 = vpop.f32.mrf.mxu0  ;;  %v6254_v36 = vpop.f32.mrf.mxu1 }
 0x20a   : > { %2972 = vst [vmem:[#allocation3 + $0x454] sm:$0xf] %v2899_v34  ;;  %2973 = vst [vmem:[#allocation3 + $0x478] sm:$0xf] %v2909_v37  ;;  %v7911_v33 = vadd.f32 %v6317_v6, %v7730_v52  ;;  %v7914_v56 = vadd.f32 %v6253_v1, %v7495_v57 }
 0x20b   : > { %v6319_v48 = vpop.f32.mrf.mxu0  ;;  %v6255_v11 = vpop.f32.mrf.mxu1 }
 0x20c   : > { %v6320_v40 = vadd.f32 %v6319_v48, %v6318_v3  ;;  %v6256_v13 = vadd.f32 %v6255_v11, %v6254_v36  ;;  %v8208_v11 = vld [vmem:[#allocation5_spill] sm:$0xff] }
 0x20d   : > { %v6321_v52 = vpop.f32.mrf.mxu0  ;;  %v6257_v61 = vpop.f32.mrf.mxu1 }
 0x20e   : > { %v7919_v47 = vadd.f32 %v6320_v40, %v7733_v15  ;;  %v7921_v28 = vadd.f32 %v6256_v13, %v6144_v18  ;;  %v8207_v40 = vld [vmem:[#allocation4_spill] sm:$0xff] }
 0x20f   : > { %v6322_v59 = vpop.f32.mrf.mxu0  ;;  %v6258_v25 = vpop.f32.mrf.mxu1 }
 0x210   : > { %v6323_v57 = vadd.f32 %v6322_v59, %v6321_v52  ;;  %v6259_v26 = vadd.f32 %v6258_v25, %v6257_v61  ;;  %v8209_v59 = vld [vmem:[#allocation6_spill] sm:$0xff] }
 0x211   : > { %v6869_v22 = vld [vmem:[#allocation3 + $0x454] ss:$36 sps:$4 sm:$0xff]   ;;  %v6324_v32 = vpop.f32.mrf.mxu0  ;;  %v6260_v10 = vpop.f32.mrf.mxu1 }
 0x212   : > { %5353 = vmatprep.mubr.bf16.mxu1 %v6869_v22  ;;  %v7924_v62 = vadd.f32 %v6323_v57, %v7750_v45  ;;  %v7927_v63 = vadd.f32 %v6259_v26, %v7540_v16 }
 0x213   : > { %5354 = vmatmul.mubr.bf16.gmra.mxu1 %v6867_v49  ;;  %v6325_v46 = vpop.f32.mrf.mxu0  ;;  %v6261_v15 = vpop.f32.mrf.mxu1 }
 0x214   : > { %v6326_v5 = vadd.f32 %v6325_v46, %v6324_v32  ;;  %v6262_v7 = vadd.f32 %v6261_v15, %v6260_v10 }
 0x215   : > { %v6327_v9 = vpop.f32.mrf.mxu0 }
 0x216   : > { %v7932_v35 = vadd.f32 %v6326_v5, %v7756_v24  ;;  %v7934_v41 = vadd.f32 %v6262_v7, %v6150_v8  ;;  %v6263_v23 = vpop.f32.mrf.mxu1 }
 0x217   : > { %v6328_v34 = vpop.f32.mrf.mxu0 }
 0x218   : > { %v6329_v37 = vadd.f32 %v6328_v34, %v6327_v9  ;;  %v6264_v6 = vpop.f32.mrf.mxu1 }
 0x219   : > { %v6330_v45 = vpop.f32.mrf.mxu0  ;;  %v6265_v24 = vadd.f32 %v6264_v6, %v6263_v23 }
 0x21a   : > { %v7937_v54 = vadd.f32 %v6329_v37, %v7781_v21  ;;  %v6266_v1 = vpop.f32.mrf.mxu1 }
 0x21b   : > { %v6331_v16 = vpop.f32.mrf.mxu0  ;;  %v7943_v49 = vadd.f32 %v6265_v24, %v7560_v39 }
 0x21c   : > { %v6332_v14 = vadd.f32 %v6331_v16, %v6330_v45  ;;  %v6267_v21 = vpop.f32.mrf.mxu1 }
 0x21d   : > { %v6333_v55 = vpop.f32.mrf.mxu0  ;;  %v6268_v18 = vadd.f32 %v6267_v21, %v6266_v1 }
 0x21e   : > { %v7940_v51 = vadd.f32 %v6332_v14, %v7783_v27  ;;  %v6156_v27 = vadd.f32 %v8208_v11, %v8207_v40  ;;  %v7950_v52 = vpop.f32.mrf.mxu1 }
 0x21f   : > { %v6334_v4 = vpop.f32.mrf.mxu0 }
 0x220   : > { %v6335_v3 = vadd.f32 %v6334_v4, %v6333_v55  ;;  %v7952_v61 = vadd.f32 %v6268_v18, %v6156_v27  ;;  %v7957_v39 = vpop.f32.mrf.mxu1 }
 0x221   : > { %v6336_v36 = vpop.f32.mrf.mxu0 }
 0x222   : > { %v7946_v48 = vadd.f32 %v6335_v3, %v7800_v38  ;;  %v7959_v32 = vpop.f32.mrf.mxu1 }
 0x223   : > { %v6337_v22 = vpop.f32.mrf.mxu0 }
 0x224   : > { %v6338_v13 = vadd.f32 %v6337_v22, %v6336_v36  ;;  %v7964_v15 = vpop.f32.mrf.mxu1 }
 0x225   : > { %v6339_v57 = vpop.f32.mrf.mxu0 }
 0x226   : > { %v7955_v25 = vadd.f32 %v6338_v13, %v8209_v59 }
 0x227   : > { %v6340_v26 = vpop.f32.mrf.mxu0 }
 0x228   : > { %v6341_v38 = vadd.f32 %v6340_v26, %v6339_v57 }
 0x229   : > { %v6342_v10 = vpop.f32.mrf.mxu0  ;;  %v7966_v7 = vpop.f32.mrf.mxu1 }
 0x22a   : > { %v7962_v46 = vadd.f32 %v6341_v38, %v7826_v31 }
 0x22b   : > { %v6343_v8 = vpop.f32.mrf.mxu0  ;;  %v7971_v34 = vpop.f32.mrf.mxu1 }
 0x22c   : > { %v6344_v5 = vadd.f32 %v6343_v8, %v6342_v10 }
 0x22d   : > { %v7973_v37 = vpop.f32.mrf.mxu1 }
 0x22e   : > { %v7969_v9 = vadd.f32 %v6344_v5, %v7840_v44 }
 0x22f   : > { %v6345_v45 = vpop.f32.mrf.mxu0  ;;  %v7975_v23 = vpop.f32.mrf.mxu1 }
 0x231   : > { %v6346_v16 = vpop.f32.mrf.mxu0 }
 0x232   : > { %v6347_v14 = vadd.f32 %v6346_v16, %v6345_v45 }
 0x233   : > { %v6348_v31 = vpop.f32.mrf.mxu0 }
 0x234   : > { %v7978_v55 = vadd.f32 %v6347_v14, %v7851_v19 }
 0x235   : > { %v6349_v6 = vpop.f32.mrf.mxu0 }
 0x236   : > { %v6350_v4 = vadd.f32 %v6349_v6, %v6348_v31 }
 0x237   : > { %v7980_v24 = vpop.f32.mrf.mxu1 }
 0x238   : > { %v7983_v44 = vadd.f32 %v6350_v4, %v7860_v30 }
 0x239   : > { %v7985_v3 = vpop.f32.mrf.mxu1 }
 0x23a   : > { %8210 = vst [vmem:[#allocation4_spill] sm:$0xff] %v7983_v44 }
 0x23b   : > { %v6351_v1 = vpop.f32.mrf.mxu0  ;;  %v7987_v36 = vpop.f32.mrf.mxu1 }
 0x23d   : > { %v6352_v21 = vpop.f32.mrf.mxu0  ;;  %v7989_v40 = vpop.f32.mrf.mxu1 }
 0x23e   : > { %v6353_v22 = vadd.f32 %v6352_v21, %v6351_v1 }
 0x23f   : > { %v6354_v11 = vpop.f32.mrf.mxu0 }
 0x240   : > { %v7992_v19 = vadd.f32 %v6353_v22, %v7875_v43 }
 0x241   : > { %v6355_v27 = vpop.f32.mrf.mxu0 }
 0x242   : > { %v6356_v18 = vadd.f32 %v6355_v27, %v6354_v11  ;;  %v7994_v13 = vpop.f32.mrf.mxu1 }
 0x244   : > { %v7997_v30 = vadd.f32 %v6356_v18, %v7891_v20  ;;  %v6416_v59 = vpop.f32.mrf.mxu1 }
 0x246   : > { %v7999_v26 = vpop.f32.mrf.mxu1 }
 0x247   : > { %v6357_v57 = vpop.f32.mrf.mxu0 }
 0x248   : > { %v8001_v8 = vpop.f32.mrf.mxu1 }
 0x249   : > { %v6358_v38 = vpop.f32.mrf.mxu0 }
 0x24a   : > { %v6359_v10 = vadd.f32 %v6358_v38, %v6357_v57 }
 0x24b   : > { %v6360_v5 = vpop.f32.mrf.mxu0 }
 0x24c   : > { %v8004_v45 = vadd.f32 %v6359_v10, %v7897_v2 }
 0x24d   : > { %v6361_v43 = vpop.f32.mrf.mxu0 }
 0x24e   : > { %8211 = vst [vmem:[#allocation5_spill] sm:$0xff] %v8004_v45  ;;  %v6362_v16 = vadd.f32 %v6361_v43, %v6360_v5 }
 0x250   : > { %v8006_v14 = vpop.f32.mrf.mxu1  ;;  %v8009_v31 = vadd.f32 %v6362_v16, %v7908_v60 }
 0x252   : > { %8212 = vst [vmem:[#allocation6_spill] sm:$0xff] %v8009_v31  ;;  %v8011_v20 = vpop.f32.mrf.mxu1 }
 0x254   : > { %v6363_v6 = vpop.f32.mrf.mxu0  ;;  %v8013_v4 = vpop.f32.mrf.mxu1 }
 0x256   : > { %v6364_v1 = vpop.f32.mrf.mxu0  ;;  %v8015_v11 = vpop.f32.mrf.mxu1 }
 0x257   : > { %v6365_v21 = vadd.f32 %v6364_v1, %v6363_v6 }
 0x258   : > { %v6366_v22 = vpop.f32.mrf.mxu0 }
 0x259   : > { %v8018_v2 = vadd.f32 %v6365_v21, %v7914_v56 }
 0x25a   : > { %v6367_v27 = vpop.f32.mrf.mxu0 }
 0x25b   : > { %8213 = vst [vmem:[#allocation9_spill] sm:$0xff] %v8018_v2  ;;  %v6368_v18 = vadd.f32 %v6367_v27, %v6366_v22 }
 0x25d   : > { %v8020_v57 = vpop.f32.mrf.mxu1  ;;  %v8023_v60 = vadd.f32 %v6368_v18, %v7921_v28 }
 0x25f   : > { %8214 = vst [vmem:[#allocation10_spill] sm:$0xff] %v8023_v60  ;;  %v8025_v38 = vpop.f32.mrf.mxu1 }
 0x261   : > { %v6369_v10 = vpop.f32.mrf.mxu0  ;;  %v8027_v5 = vpop.f32.mrf.mxu1 }
 0x263   : > { %v6370_v43 = vpop.f32.mrf.mxu0  ;;  %v8029_v1 = vpop.f32.mrf.mxu1 }
 0x264   : > { %v6371_v16 = vadd.f32 %v6370_v43, %v6369_v10 }
 0x265   : > { %v6372_v6 = vpop.f32.mrf.mxu0 }
 0x266   : > { %v8032_v56 = vadd.f32 %v6371_v16, %v7927_v63  ;;  %v6405_v63 = vadd.f32 %v7971_v34, %v7966_v7 }
 0x267   : > { %v6373_v21 = vpop.f32.mrf.mxu0 }
 0x268   : > { %8215 = vst [vmem:[#allocation11_spill] sm:$0xff] %v8032_v56  ;;  %v6374_v22 = vadd.f32 %v6373_v21, %v6372_v6  ;;  %v6399_v6 = vadd.f32 %v7957_v39, %v7950_v52  ;;  %v5244_v45 = vadd.f32 %v6405_v63, %v7835_v53  ;;  %v6402_v52 = vadd.f32 %v7964_v15, %v7959_v32  ;;  %v8217_v63 = vld [vmem:[#allocation7_spill] sm:$0xff] }
 0x269   : > { %v6411_v32 = vadd.f32 %v7985_v3, %v7980_v24  ;;  %v6414_v24 = vadd.f32 %v7989_v40, %v7987_v36 }
 0x26a   : > { %v8034_v27 = vpop.f32.mrf.mxu1  ;;  %v8037_v28 = vadd.f32 %v6374_v22, %v7934_v41  ;;  %v5236_v34 = vadd.f32 %v6399_v6, %v7818_v50  ;;  %v5239_v50 = vadd.f32 %v6402_v52, %v7823_v0 }
 0x26c   : > { %8216 = vst [vmem:[#allocation12_spill] sm:$0xff] %v8037_v28  ;;  %v8039_v18 = vpop.f32.mrf.mxu1  ;;  %v6408_v28 = vadd.f32 %v7975_v23, %v7973_v37  ;;  %v6417_v23 = vadd.f32 %v6416_v59, %v7994_v13  ;;  %v6420_v13 = vadd.f32 %v8001_v8, %v7999_v26 }
 0x26e   : > { %v8041_v60 = vpop.f32.mrf.mxu1 }
 0x270   : > { %v8043_v10 = vpop.f32.mrf.mxu1 }
 0x274   : > { %v6375_v31 = vpop.f32.mrf.mxu0 }
 0x276   : > { %v6376_v43 = vpop.f32.mrf.mxu0 }
 0x277   : > { %v6377_v16 = vadd.f32 %v6376_v43, %v6375_v31 }
 0x278   : > { %v6378_v56 = vpop.f32.mrf.mxu0  ;;  %v8052_v41 = vpop.f32.mrf.mxu1 }
 0x279   : > { %v8050_v21 = vadd.f32 %v6377_v16, %v7943_v49  ;;  %v5252_v16 = vadd.f32 %v6411_v32, %v8217_v63 }
 0x27a   : > { %v6379_v22 = vpop.f32.mrf.mxu0  ;;  %v8058_v44 = vpop.f32.mrf.mxu1 }
 0x27b   : > { %v6380_v2 = vadd.f32 %v6379_v22, %v6378_v56  ;;  %v5247_v56 = vadd.f32 %v6408_v28, %v7843_v17  ;;  %v5260_v17 = vadd.f32 %v6417_v23, %v7872_v12  ;;  %v5263_v12 = vadd.f32 %v6420_v13, %v7884_v42  ;;  %v8218_v23 = vld [vmem:[#allocation8_spill] sm:$0xff] }
 0x27c   : > { %v6535_v49 = vpop.f32.mrf.mxu0  ;;  %v8071_v53 = vpop.f32.mrf.mxu1 }
 0x27d   : > { %v8068_v39 = vadd.f32 %v6380_v2, %v7952_v61  ;;  %v5405_v7 = vadd.f32 %v6535_v49, %v5244_v45 }
 0x27e   : > { %v5396_v37 = vpop.f32.mrf.mxu0  ;;  %v8076_v43 = vpop.f32.mrf.mxu1 }
 0x27f   : > { %5525 = vst [vmem:[%s8063_s30 + $0x10] sm:$0xff] %v5405_v7  ;;  %v5397_v31 = vadd.f32 %v5396_v37, %v5236_v34  ;;  %v5595_v52 = vmul.f32 %v5405_v7, %v5405_v7 }
 0x280   : > { %v6536_v61 = vpop.f32.mrf.mxu0 }
 0x281   : > { %5523 = vst [vmem:[%s8063_s30] sm:$0xff] %v5397_v31  ;;  %v5408_v15 = vadd.f32 %v6536_v61, %v5247_v56  ;;  %v5593_v0 = vmul.f32 %v5397_v31, %v5397_v31  ;;  %v5255_v56 = vadd.f32 %v6414_v24, %v8218_v23  ;;  %v6423_v24 = vadd.f32 %v8011_v20, %v8006_v14 }
 0x282   : > { %v5399_v59 = vpop.f32.mrf.mxu0 }
 0x283   : > { %v8082_v45 = vpop.f32.mrf.mxu1  ;;  %5526 = vst [vmem:[%s8063_s30 + $0x18] sm:$0xff] %v5408_v15  ;;  %v5400_v2 = vadd.f32 %v5399_v59, %v5239_v50  ;;  %v5596_v32 = vmul.f32 %v5408_v15, %v5408_v15  ;;  %v6429_v59 = vadd.f32 %v8025_v38, %v8020_v57 }
 0x284   : > { %v6539_v3 = vpop.f32.mrf.mxu0 }
 0x285   : > { %v8088_v28 = vpop.f32.mrf.mxu1  ;;  %5524 = vst [vmem:[%s8063_s30 + $0x8] sm:$0xff] %v5400_v2  ;;  %v5555_v6 = vadd.f32 %v5400_v2, %v5397_v31  ;;  %v5594_v22 = vmul.f32 %v5400_v2, %v5400_v2  ;;  %v5421_v26 = vadd.f32 %v6539_v3, %v5260_v17  ;;  %v5276_v38 = vadd.f32 %v6429_v59, %v7911_v33 }
 0x286   : > { %v5412_v8 = vpop.f32.mrf.mxu0 }
 0x287   : > { %v8094_v49 = vpop.f32.mrf.mxu1  ;;  %v5556_v34 = vadd.f32 %v5555_v6, %v5405_v7  ;;  %v5625_v37 = vadd.f32 %v5594_v22, %v5593_v0  ;;  %5529 = vst [vmem:[%s8063_s30 + $0x30] sm:$0xff] %v5421_v26  ;;  %v5413_v36 = vadd.f32 %v5412_v8, %v5252_v16  ;;  %v5599_v6 = vmul.f32 %v5421_v26, %v5421_v26 }
 0x288   : > { %v6540_v40 = vpop.f32.mrf.mxu0 }
 0x289   : > { %v5626_v61 = vadd.f32 %v5625_v37, %v5595_v52  ;;  %5527 = vst [vmem:[%s8063_s30 + $0x20] sm:$0xff] %v5413_v36  ;;  %v5557_v31 = vadd.f32 %v5556_v34, %v5408_v15  ;;  %v5424_v50 = vadd.f32 %v6540_v40, %v5263_v12  ;;  %v8102_v2 = vpop.f32.mrf.mxu1  ;;  %v5597_v13 = vmul.f32 %v5413_v36, %v5413_v36 }
 0x28a   : > { %v5415_v42 = vpop.f32.mrf.mxu0  ;;  %v6432_v15 = vadd.f32 %v8029_v1, %v8027_v5  ;;  %v6426_v52 = vadd.f32 %v8015_v11, %v8013_v4  ;;  %v5268_v34 = vadd.f32 %v6423_v24, %v7894_v58  ;;  %v6441_v1 = vadd.f32 %v8058_v44, %v8052_v41 }
 0x28b   : > { %v5558_v7 = vadd.f32 %v5557_v31, %v5413_v36  ;;  %v5627_v17 = vadd.f32 %v5626_v61, %v5596_v32  ;;  %5530 = vst [vmem:[%s8063_s30 + $0x38] sm:$0xff] %v5424_v50  ;;  %v5416_v3 = vadd.f32 %v5415_v42, %v5255_v56  ;;  %v5600_v37 = vmul.f32 %v5424_v50, %v5424_v50 }
 0x28c   : > { %v5279_v23 = vadd.f32 %v6432_v15, %v7919_v47  ;;  %v5271_v31 = vadd.f32 %v6426_v52, %v7906_v29  ;;  %v6444_v41 = vadd.f32 %v8076_v43, %v8071_v53  ;;  %v5292_v42 = vadd.f32 %v6441_v1, %v7937_v54 }
 0x28d   : > { %v5628_v63 = vadd.f32 %v5627_v17, %v5597_v13  ;;  %5528 = vst [vmem:[%s8063_s30 + $0x28] sm:$0xff] %v5416_v3  ;;  %v5559_v16 = vadd.f32 %v5558_v7, %v5416_v3  ;;  %v5598_v0 = vmul.f32 %v5416_v3, %v5416_v3 }
 0x28e   : > { %v5295_v54 = vadd.f32 %v6444_v41, %v7940_v51  ;;  %v6447_v51 = vadd.f32 %v8088_v28, %v8082_v45 }
 0x28f   : > { %v5560_v22 = vadd.f32 %v5559_v16, %v5421_v26  ;;  %v5629_v8 = vadd.f32 %v5628_v63, %v5598_v0 }
 0x290   : > { %v5300_v45 = vadd.f32 %v6447_v51, %v7946_v48 }
 0x291   : > { %v6451_v57 = vpop.f32.mrf.mxu1  ;;  %v5630_v36 = vadd.f32 %v5629_v8, %v5599_v6  ;;  %v5561_v5 = vadd.f32 %v5560_v22, %v5424_v50  ;;  %v6435_v50 = vadd.f32 %v8039_v18, %v8034_v27  ;;  %v6438_v27 = vadd.f32 %v8043_v10, %v8041_v60 }
 0x292   : > { %v6543_v12 = vpop.f32.mrf.mxu0 }
 0x293   : > { %v5437_v14 = vadd.f32 %v6543_v12, %v5276_v38  ;;  %v6452_v20 = vpop.f32.mrf.mxu1  ;;  %v5631_v56 = vadd.f32 %v5630_v36, %v5600_v37  ;;  %v5284_v53 = vadd.f32 %v6435_v50, %v7924_v62  ;;  %v5287_v10 = vadd.f32 %v6438_v27, %v7932_v35 }
 0x294   : > { %v5428_v40 = vpop.f32.mrf.mxu0  ;;  %v6453_v12 = vadd.f32 %v6452_v20, %v6451_v57 }
 0x295   : > { %5533 = vst [vmem:[%s8063_s30 + $0x50] sm:$0xff] %v5437_v14  ;;  %v5429_v33 = vadd.f32 %v5428_v40, %v5268_v34  ;;  %v6454_v26 = vpop.f32.mrf.mxu1  ;;  %v5603_v24 = vmul.f32 %v5437_v14, %v5437_v14 }
 0x296   : > { %v6544_v32 = vpop.f32.mrf.mxu0 }
 0x297   : > { %5531 = vst [vmem:[%s8063_s30 + $0x40] sm:$0xff] %v5429_v33  ;;  %v5562_v4 = vadd.f32 %v5561_v5, %v5429_v33  ;;  %v5601_v11 = vmul.f32 %v5429_v33, %v5429_v33  ;;  %v5440_v58 = vadd.f32 %v6544_v32, %v5279_v23  ;;  %v6455_v61 = vpop.f32.mrf.mxu1  ;;  %v5308_v23 = vadd.f32 %v6453_v12, %v7962_v46 }
 0x298   : > { %v5431_v44 = vpop.f32.mrf.mxu0  ;;  %v6456_v35 = vadd.f32 %v6455_v61, %v6454_v26  ;;  %v6450_v32 = vadd.f32 %v8102_v2, %v8094_v49 }
 0x299   : > { %v5632_v59 = vadd.f32 %v5631_v56, %v5601_v11  ;;  %5534 = vst [vmem:[%s8063_s30 + $0x58] sm:$0xff] %v5440_v58  ;;  %v5432_v47 = vadd.f32 %v5431_v44, %v5271_v31  ;;  %v5604_v6 = vmul.f32 %v5440_v58, %v5440_v58 }
 0x29a   : > { %v8126_v7 = vpop.f32.mrf.mxu1  ;;  %v6547_v13 = vpop.f32.mrf.mxu0 }
 0x29b   : > { %5532 = vst [vmem:[%s8063_s30 + $0x48] sm:$0xff] %v5432_v47  ;;  %v5563_v17 = vadd.f32 %v5562_v4, %v5432_v47  ;;  %v5602_v3 = vmul.f32 %v5432_v47, %v5432_v47  ;;  %v5453_v29 = vadd.f32 %v6547_v13, %v5292_v42  ;;  %v5303_v13 = vadd.f32 %v6450_v32, %v7955_v25 }
 0x29c   : > { %v6458_v18 = vpop.f32.mrf.mxu1  ;;  %v5444_v43 = vpop.f32.mrf.mxu0 }
 0x29d   : > { %v5564_v63 = vadd.f32 %v5563_v17, %v5437_v14  ;;  %v5633_v16 = vadd.f32 %v5632_v59, %v5602_v3  ;;  %5537 = vst [vmem:[%s8063_s30 + $0x70] sm:$0xff] %v5453_v29  ;;  %v5445_v0 = vadd.f32 %v5444_v43, %v5284_v53  ;;  %v5607_v56 = vmul.f32 %v5453_v29, %v5453_v29 }
 0x29e   : > { %v6460_v15 = vpop.f32.mrf.mxu1  ;;  %v6548_v38 = vpop.f32.mrf.mxu0  ;;  %v5311_v59 = vadd.f32 %v6456_v35, %v7969_v9  ;;  %v6459_v17 = vadd.f32 %v6458_v18, %v8126_v7 }
 0x29f   : > { %v5634_v22 = vadd.f32 %v5633_v16, %v5603_v24  ;;  %v5565_v8 = vadd.f32 %v5564_v63, %v5440_v58  ;;  %v5456_v60 = vadd.f32 %v6548_v38, %v5295_v54  ;;  %5535 = vst [vmem:[%s8063_s30 + $0x60] sm:$0xff] %v5445_v0  ;;  %v5605_v14 = vmul.f32 %v5445_v0, %v5445_v0 }
 0x2a0   : > { %v5447_v62 = vpop.f32.mrf.mxu0  ;;  %v6461_v37 = vpop.f32.mrf.mxu1  ;;  %v5316_v25 = vadd.f32 %v6459_v17, %v7978_v55 }
 0x2a1   : > { %v5566_v52 = vadd.f32 %v5565_v8, %v5445_v0  ;;  %v5635_v34 = vadd.f32 %v5634_v22, %v5604_v6  ;;  %5538 = vst [vmem:[%s8063_s30 + $0x78] sm:$0xff] %v5456_v60  ;;  %v5448_v36 = vadd.f32 %v5447_v62, %v5287_v10  ;;  %v5608_v28 = vmul.f32 %v5456_v60, %v5456_v60 }
 0x2a2   : > { %v6462_v0 = vadd.f32 %v6461_v37, %v6460_v15 }
 0x2a3   : > { %v5636_v40 = vadd.f32 %v5635_v34, %v5605_v14  ;;  %5536 = vst [vmem:[%s8063_s30 + $0x68] sm:$0xff] %v5448_v36  ;;  %v5567_v5 = vadd.f32 %v5566_v52, %v5448_v36  ;;  %v5606_v1 = vmul.f32 %v5448_v36, %v5448_v36  ;;  %v8219_v34 = vld [vmem:[#allocation4_spill] sm:$0xff] }
 0x2a4   : > { %v5319_v55 = vadd.f32 %v6462_v0, %v8219_v34 }
 0x2a5   : > { %v5568_v57 = vadd.f32 %v5567_v5, %v5453_v29  ;;  %v5637_v20 = vadd.f32 %v5636_v40, %v5606_v1 }
 0x2a7   : > { %v5638_v58 = vadd.f32 %v5637_v20, %v5607_v56  ;;  %v5569_v50 = vadd.f32 %v5568_v57, %v5456_v60 }
 0x2a8   : > { %v6463_v33 = vpop.f32.mrf.mxu1 }
 0x2a9   : > { %v5639_v61 = vadd.f32 %v5638_v58, %v5608_v28  ;;  %v8220_v28 = vld [vmem:[#allocation5_spill] sm:$0xff] }
 0x2aa   : > { %v6551_v4 = vpop.f32.mrf.mxu0  ;;  %v6464_v11 = vpop.f32.mrf.mxu1 }
 0x2ab   : > { %v5469_v31 = vadd.f32 %v6551_v4, %v5308_v23  ;;  %v6465_v46 = vadd.f32 %v6464_v11, %v6463_v33 }
 0x2ac   : > { %v5460_v44 = vpop.f32.mrf.mxu0  ;;  %v6466_v41 = vpop.f32.mrf.mxu1 }
 0x2ad   : > { %5541 = vst [vmem:[%s8063_s30 + $0x90] sm:$0xff] %v5469_v31  ;;  %v5461_v26 = vadd.f32 %v5460_v44, %v5300_v45  ;;  %v5324_v43 = vadd.f32 %v6465_v46, %v7992_v19  ;;  %v5611_v18 = vmul.f32 %v5469_v31, %v5469_v31 }
 0x2ae   : > { %v6552_v47 = vpop.f32.mrf.mxu0  ;;  %v6467_v49 = vpop.f32.mrf.mxu1 }
 0x2af   : > { %5539 = vst [vmem:[%s8063_s30 + $0x80] sm:$0xff] %v5461_v26  ;;  %v5570_v2 = vadd.f32 %v5569_v50, %v5461_v26  ;;  %v5609_v42 = vmul.f32 %v5461_v26, %v5461_v26  ;;  %v5472_v48 = vadd.f32 %v6552_v47, %v5311_v59  ;;  %v6468_v27 = vadd.f32 %v6467_v49, %v6466_v41  ;;  %v8221_v26 = vld [vmem:[#allocation9_spill] sm:$0xff] }
 0x2b0   : > { %v5463_v3 = vpop.f32.mrf.mxu0 }
 0x2b1   : > { %v5640_v29 = vadd.f32 %v5639_v61, %v5609_v42  ;;  %5542 = vst [vmem:[%s8063_s30 + $0x98] sm:$0xff] %v5472_v48  ;;  %v5464_v53 = vadd.f32 %v5463_v3, %v5303_v13  ;;  %v5327_v8 = vadd.f32 %v6468_v27, %v7997_v30  ;;  %v5612_v62 = vmul.f32 %v5472_v48, %v5472_v48  ;;  %v8222_v42 = vld [vmem:[#allocation6_spill] sm:$0xff] }
 0x2b2   : > { %v6469_v9 = vpop.f32.mrf.mxu1 }
 0x2b3   : > { %v6555_v24 = vpop.f32.mrf.mxu0  ;;  %5540 = vst [vmem:[%s8063_s30 + $0x88] sm:$0xff] %v5464_v53  ;;  %v5571_v63 = vadd.f32 %v5570_v2, %v5464_v53  ;;  %v5610_v16 = vmul.f32 %v5464_v53, %v5464_v53 }
 0x2b4   : > { %v5485_v54 = vadd.f32 %v6555_v24, %v5324_v43  ;;  %v6470_v38 = vpop.f32.mrf.mxu1  ;;  %v8223_v43 = vld [vmem:[#allocation10_spill] sm:$0xff] }
 0x2b5   : > { %v5476_v7 = vpop.f32.mrf.mxu0  ;;  %v5572_v6 = vadd.f32 %v5571_v63, %v5469_v31  ;;  %v5641_v22 = vadd.f32 %v5640_v29, %v5610_v16  ;;  %v6471_v1 = vadd.f32 %v6470_v38, %v6469_v9 }
 0x2b6   : > { %5545 = vst [vmem:[%s8063_s30 + $0xb0] sm:$0xff] %v5485_v54  ;;  %v5477_v19 = vadd.f32 %v5476_v7, %v5316_v25  ;;  %v6472_v60 = vpop.f32.mrf.mxu1  ;;  %v5615_v56 = vmul.f32 %v5485_v54, %v5485_v54 }
 0x2b7   : > { %v6556_v10 = vpop.f32.mrf.mxu0  ;;  %v5642_v12 = vadd.f32 %v5641_v22, %v5611_v18  ;;  %v5573_v52 = vadd.f32 %v5572_v6, %v5472_v48  ;;  %v5332_v58 = vadd.f32 %v6471_v1, %v8220_v28 }
 0x2b8   : > { %v5488_v15 = vadd.f32 %v6556_v10, %v5327_v8  ;;  %5543 = vst [vmem:[%s8063_s30 + $0xa0] sm:$0xff] %v5477_v19  ;;  %v6473_v14 = vpop.f32.mrf.mxu1  ;;  %v5613_v51 = vmul.f32 %v5477_v19, %v5477_v19 }
 0x2b9   : > { %v5479_v37 = vpop.f32.mrf.mxu0  ;;  %v5574_v36 = vadd.f32 %v5573_v52, %v5477_v19  ;;  %v5643_v40 = vadd.f32 %v5642_v12, %v5612_v62  ;;  %v6474_v57 = vadd.f32 %v6473_v14, %v6472_v60  ;;  %v8224_v12 = vld [vmem:[#allocation11_spill] sm:$0xff] }
 0x2ba   : > { %5546 = vst [vmem:[%s8063_s30 + $0xb8] sm:$0xff] %v5488_v15  ;;  %v5480_v5 = vadd.f32 %v5479_v37, %v5319_v55  ;;  %v5616_v31 = vmul.f32 %v5488_v15, %v5488_v15 }
 0x2bb   : > { %v5644_v30 = vadd.f32 %v5643_v40, %v5613_v51  ;;  %v5335_v48 = vadd.f32 %v6474_v57, %v8222_v42  ;;  %v8225_v40 = vld [vmem:[#allocation12_spill] sm:$0xff] }
 0x2bc   : > { %5544 = vst [vmem:[%s8063_s30 + $0xa8] sm:$0xff] %v5480_v5  ;;  %v5575_v33 = vadd.f32 %v5574_v36, %v5480_v5  ;;  %v5614_v23 = vmul.f32 %v5480_v5, %v5480_v5 }
 0x2be   : > { %v5576_v20 = vadd.f32 %v5575_v33, %v5485_v54  ;;  %v5645_v32 = vadd.f32 %v5644_v30, %v5614_v23 }
 0x2bf   : > { %v6475_v35 = vpop.f32.mrf.mxu1 }
 0x2c0   : > { %v6559_v4 = vpop.f32.mrf.mxu0  ;;  %v5646_v50 = vadd.f32 %v5645_v32, %v5615_v56  ;;  %v5577_v41 = vadd.f32 %v5576_v20, %v5488_v15 }
 0x2c1   : > { %v6476_v11 = vpop.f32.mrf.mxu1 }
 0x2c2   : > { %v6477_v45 = vadd.f32 %v6476_v11, %v6475_v35  ;;  %v5492_v44 = vpop.f32.mrf.mxu0  ;;  %v5647_v47 = vadd.f32 %v5646_v50, %v5616_v31 }
 0x2c3   : > { %v6478_v46 = vpop.f32.mrf.mxu1  ;;  %v5493_v59 = vadd.f32 %v5492_v44, %v5332_v58 }
 0x2c4   : > { %v5340_v61 = vadd.f32 %v6477_v45, %v8221_v26  ;;  %v6560_v49 = vpop.f32.mrf.mxu0 }
 0x2c5   : > { %v6479_v2 = vpop.f32.mrf.mxu1  ;;  %5547 = vst [vmem:[%s8063_s30 + $0xc0] sm:$0xff] %v5493_v59  ;;  %v5578_v17 = vadd.f32 %v5577_v41, %v5493_v59  ;;  %v5617_v3 = vmul.f32 %v5493_v59, %v5493_v59 }
 0x2c6   : > { %v5501_v13 = vadd.f32 %v6559_v4, %v5340_v61  ;;  %v6480_v29 = vadd.f32 %v6479_v2, %v6478_v46  ;;  %v5495_v27 = vpop.f32.mrf.mxu0 }
 0x2c7   : > { %v5648_v53 = vadd.f32 %v5647_v47, %v5617_v3  ;;  %v5496_v24 = vadd.f32 %v5495_v27, %v5335_v48 }
 0x2c8   : > { %5549 = vst [vmem:[%s8063_s30 + $0xd0] sm:$0xff] %v5501_v13  ;;  %v5343_v9 = vadd.f32 %v6480_v29, %v8223_v43  ;;  %v5619_v25 = vmul.f32 %v5501_v13, %v5501_v13 }
 0x2c9   : > { %5548 = vst [vmem:[%s8063_s30 + $0xc8] sm:$0xff] %v5496_v24  ;;  %v5579_v16 = vadd.f32 %v5578_v17, %v5496_v24  ;;  %v5618_v54 = vmul.f32 %v5496_v24, %v5496_v24  ;;  %v6481_v0 = vpop.f32.mrf.mxu1  ;;  %v6563_v38 = vpop.f32.mrf.mxu0 }
 0x2ca   : > { %v5504_v63 = vadd.f32 %v6560_v49, %v5343_v9 }
 0x2cb   : > { %v5580_v18 = vadd.f32 %v5579_v16, %v5501_v13  ;;  %v5649_v6 = vadd.f32 %v5648_v53, %v5618_v54  ;;  %v6482_v22 = vpop.f32.mrf.mxu1  ;;  %v5508_v8 = vpop.f32.mrf.mxu0 }
 0x2cc   : > { %5550 = vst [vmem:[%s8063_s30 + $0xd8] sm:$0xff] %v5504_v63  ;;  %v5620_v7 = vmul.f32 %v5504_v63, %v5504_v63  ;;  %v6483_v19 = vadd.f32 %v6482_v22, %v6481_v0 }
 0x2cd   : > { %v5650_v60 = vadd.f32 %v5649_v6, %v5619_v25  ;;  %v6484_v10 = vpop.f32.mrf.mxu1  ;;  %v5581_v62 = vadd.f32 %v5580_v18, %v5504_v63  ;;  %v6564_v34 = vpop.f32.mrf.mxu0 }
 0x2ce   : > { %v5348_v52 = vadd.f32 %v6483_v19, %v8224_v12 }
 0x2cf   : > { %v5651_v15 = vadd.f32 %v5650_v60, %v5620_v7  ;;  %v6485_v14 = vpop.f32.mrf.mxu1  ;;  %v5511_v30 = vpop.f32.mrf.mxu0 }
 0x2d0   : > { %v5509_v55 = vadd.f32 %v5508_v8, %v5348_v52  ;;  %v6486_v37 = vadd.f32 %v6485_v14, %v6484_v10 }
 0x2d2   : > { %5551 = vst [vmem:[%s8063_s30 + $0xe0] sm:$0xff] %v5509_v55  ;;  %v5582_v36 = vadd.f32 %v5581_v62, %v5509_v55  ;;  %v5621_v51 = vmul.f32 %v5509_v55, %v5509_v55  ;;  %v5351_v5 = vadd.f32 %v6486_v37, %v8225_v40 }
 0x2d3   : > { %v6487_v1 = vpop.f32.mrf.mxu1 }
 0x2d4   : > { %v5652_v33 = vadd.f32 %v5651_v15, %v5621_v51  ;;  %v5512_v23 = vadd.f32 %v5511_v30, %v5351_v5 }
 0x2d5   : > { %v6488_v35 = vpop.f32.mrf.mxu1 }
 0x2d6   : > { %5552 = vst [vmem:[%s8063_s30 + $0xe8] sm:$0xff] %v5512_v23  ;;  %v5583_v56 = vadd.f32 %v5582_v36, %v5512_v23  ;;  %v5622_v57 = vmul.f32 %v5512_v23, %v5512_v23  ;;  %v6489_v20 = vadd.f32 %v6488_v35, %v6487_v1 }
 0x2d7   : > { %v6490_v32 = vpop.f32.mrf.mxu1 }
 0x2d8   : > { %v5653_v4 = vadd.f32 %v5652_v33, %v5622_v57  ;;  %v5356_v11 = vadd.f32 %v6489_v20, %v8050_v21 }
 0x2d9   : > { %v6491_v45 = vpop.f32.mrf.mxu1 }
 0x2da   : > { %v5517_v28 = vadd.f32 %v6563_v38, %v5356_v11  ;;  %v6492_v58 = vadd.f32 %v6491_v45, %v6490_v32 }
 0x2dc   : > { %5553 = vst [vmem:[%s8063_s30 + $0xf0] sm:$0xff] %v5517_v28  ;;  %v5584_v31 = vadd.f32 %v5583_v56, %v5517_v28  ;;  %v5623_v50 = vmul.f32 %v5517_v28, %v5517_v28  ;;  %v5359_v44 = vadd.f32 %v6492_v58, %v8068_v39 }
 0x2de   : > { %v5654_v41 = vadd.f32 %v5653_v4, %v5623_v50  ;;  %v5520_v46 = vadd.f32 %v6564_v34, %v5359_v44 }
 0x2e0   : > { %5554 = vst [vmem:[%s8063_s30 + $0xf8] sm:$0xff] %v5520_v46  ;;  %v5585_v26 = vadd.f32 %v5584_v31, %v5520_v46  ;;  %v5624_v61 = vmul.f32 %v5520_v46, %v5520_v46 }
 0x2e2   : > { %v5586_v59 = vrot.slane %v5585_v26, 4  ;;  %v5655_v47 = vadd.f32 %v5654_v41, %v5624_v61 }
 0x2e4   : > { %v5587_v49 = vadd.f32 %v5586_v59, %v5585_v26  ;;  %v5656_v2 = vrot.slane %v5655_v47, 4 }
 0x2e6   : > { %v5588_v21 = vrot.slane %v5587_v49, 2  ;;  %v5657_v42 = vadd.f32 %v5656_v2, %v5655_v47 }
 0x2e8   : > { %v5589_v48 = vadd.f32 %v5588_v21, %v5587_v49  ;;  %v5658_v13 = vrot.slane %v5657_v42, 2 }
 0x2ea   : > { %v5590_v17 = vrot.slane %v5589_v48, 1  ;;  %v5659_v3 = vadd.f32 %v5658_v13, %v5657_v42 }
 0x2ec   : > { %v5591_v39 = vadd.f32 %v5590_v17, %v5589_v48  ;;  %v5660_v29 = vrot.slane %v5659_v3, 1 }
 0x2ee   : > { %5592 = vst [vmem:[%s211_s7] sm:$0x1] %v5591_v39  ;;  %v5661_v27 = vadd.f32 %v5660_v29, %v5659_v3 }
 0x2f0   : > { %5662 = vst [vmem:[%s214_s10] sm:$0x1] %v5661_v27 }
 0x2f1 PF: > { %s15_s15 = sadd.s32 1, %s6877_s15  }
 0x2f2   : > { %p12_p4 = scmp.ge.s32.totalorder %s15_s15, 4  }
 0x2f4   :  { %14 = sbr.rel (!%p12_p4) target bundleno = 1 (0x1), region = 84 }

// kernel: resblock_forward.4
= control target key start
LH: loop header
LB: loop body
LE: loop exit
PB: predicated region body
PF: predicated region fallthrough
CT: control target
= control target key end

     0   :  { %s7244_s21 = smov 0   ;;  %s8736_s0 = inlined_call_operand.vmem [shape: f32[2,16,16,128], index: 0, kind: input, shape index: {}]   ;;  %s8737_s1 = inlined_call_operand.vmem [shape: f32[1,128], index: 1, kind: input, shape index: {}]   ;;  %s8738_s2 = inlined_call_operand.vmem [shape: f32[1,128], index: 2, kind: input, shape index: {}]   ;;  %s8739_s3 = inlined_call_operand.vmem [shape: bf16[1152,128], index: 3, kind: input, shape index: {}]   ;;  %s8740_s4 = inlined_call_operand.vmem [shape: f32[2,16,16,128], index: 4, kind: output, shape index: {0}]   ;;  %s8741_s5 = inlined_call_operand.vmem [shape: f32[2,1,128], index: 5, kind: output, shape index: {1}]   ;;  %s8742_s6 = inlined_call_operand.vmem [shape: f32[2,1,128], index: 6, kind: output, shape index: {2}]  }
   0x1 LB: > { %s6028_s22 = sadd.s32 4294967295, %s7206_s21   ;;  %p6032_p0 = scmp.ge.s32.totalorder %s7206_s21, 1  ;;  %s7206_s21 = sphi %s7244_s21, %s17_s21  }
   0x2   : > { %p217_p1 = scmp.lt.s32.totalorder %s7206_s21, 3 }
   0x4   : > { %p218_p2 = pnand %p6032_p0, %p217_p1 }
   0x6   : > { %221 = sbr.rel (%p218_p2) target bundleno = 754 (0x2f2), region = 36 }
   0xb   : > { %v6916_v0 = vld [vmem:[%s8739_s3 + $0x78] sm:$0xff]   ;;  %v7208_v2 = vmov 0   ;;  %v6918_v3 = vld [vmem:[%s8739_s3 + $0x70] sm:$0xff]   ;;  %v6920_v5 = vld [vmem:[%s8739_s3 + $0x68] sm:$0xff]   ;;  %p253_p3 = scmp.lt.s32.totalorder %s6028_s22, 1  ;;  %vm886_vm2 = vcmask 1043456  }
   0xc   : > { %v6917_v1 = vld [vmem:[%s8739_s3 + $0x38] sm:$0xff]   ;;  %412 = vst [vmem:[#allocation2] sm:$0xf] %v7208_v2  ;;  %413 = vst [vmem:[#allocation2 + $0x4] sm:$0xf] %v7208_v2  ;;  %6371 = vmatprep.subr.bf16.mxu0 %v6916_v0  ;;  %6891 = vmatprep.subr.bf16.mxu1 %v6916_v0  ;;  %v6919_v4 = vld [vmem:[%s8739_s3 + $0x30] sm:$0xff]  }
   0xd   : > { %414 = vst [vmem:[#allocation2 + $0x8] sm:$0x1] %v7208_v2  ;;  %415 = vst [vmem:[#allocation2 + $0xc] sm:$0xf] %v7208_v2  ;;  %6372 = vmatpush3.bf16.msra.mxu0 %v6917_v1  ;;  %6899 = vmatpush3.bf16.msra.mxu1 %v6917_v1  ;;  %v6921_v6 = vld [vmem:[%s8739_s3 + $0x28] sm:$0xff]   ;;  %v6922_v7 = vld [vmem:[%s8739_s3 + $0x60] sm:$0xff]  }
   0xe   : > { %416 = vst [vmem:[#allocation2 + $0x10] sm:$0xf] %v7208_v2  ;;  %417 = vst [vmem:[#allocation2 + $0x14] sm:$0x1] %v7208_v2  ;;  %6373 = vmatprep.subr.bf16.mxu0 %v6918_v3  ;;  %6892 = vmatprep.subr.bf16.mxu1 %v6918_v3  ;;  %s8775_s22 = smov (!%p253_p3, %s6028_s22), 1  ;;  %v6923_v8 = vld [vmem:[%s8739_s3 + $0x20] sm:$0xff]  }
   0xf   : > { %418 = vst [vmem:[#allocation2 + $0x18] sm:$0xf] %v7208_v2  ;;  %419 = vst [vmem:[#allocation2 + $0x1c] sm:$0xf] %v7208_v2  ;;  %v6924_v9 = vld [vmem:[%s8739_s3 + $0x58] sm:$0xff]   ;;  %s6337_s17 = sshll.u32 %s8775_s22, 8  ;;  %s265_s23 = scalar_lea.vmem %s8741_s5, %s8775_s22 }
  0x10   : > { %420 = vst [vmem:[#allocation2 + $0x20] sm:$0x1] %v7208_v2  ;;  %421 = vst [vmem:[#allocation2 + $0x24] sm:$0xf] %v7208_v2  ;;  %v6925_v10 = vld [vmem:[%s8739_s3 + $0x18] sm:$0xff]   ;;  %v6926_v11 = vld [vmem:[%s8739_s3 + $0x50] sm:$0xff]   ;;  %s7297_s26 = scalar_lea.vmem %s8736_s0, %s6337_s17  ;;  %s8611_s19 = scalar_lea.vmem %s8740_s4, %s6337_s17 }
  0x11   : > { %422 = vst [vmem:[#allocation2 + $0x28] sm:$0xf] %v7208_v2  ;;  %423 = vst [vmem:[#allocation2 + $0x2c] sm:$0x1] %v7208_v2  ;;  %6374 = vmatpush3.bf16.msra.mxu0 %v6919_v4  ;;  %6900 = vmatpush3.bf16.msra.mxu1 %v6919_v4  ;;  %v6927_v15 = vld [vmem:[%s8739_s3 + $0x10] sm:$0xff]   ;;  %v270_v21 = vld [vmem:[%s7297_s26] sm:$0xff] }
  0x12   : > { %424 = vst [vmem:[#allocation2 + $0x30] sm:$0xf] %v7208_v2  ;;  %425 = vst [vmem:[#allocation2 + $0x34] sm:$0xf] %v7208_v2  ;;  %6375 = vmatprep.subr.bf16.mxu0 %v6920_v5  ;;  %6893 = vmatprep.subr.bf16.mxu1 %v6920_v5  ;;  %vm1115_vm0 = vsmask.f32 3328 }
  0x13   : > { %426 = vst [vmem:[#allocation2 + $0x38] sm:$0x1] %v7208_v2  ;;  %427 = vst [vmem:[#allocation2 + $0x3c] sm:$0xf] %v7208_v2  ;;  %v1003_v12 = vld [vmem:[#allocation2] sm:$0xf] }
  0x14   : > { %428 = vst [vmem:[#allocation2 + $0x40] sm:$0xf] %v7208_v2  ;;  %429 = vst [vmem:[#allocation2 + $0x44] sm:$0x1] %v7208_v2  ;;  %v1004_v13 = vld [vmem:[#allocation2 + $0x4] sm:$0xf] }
  0x15   : > { %430 = vst [vmem:[#allocation2 + $0x48] sm:$0xf] %v7208_v2  ;;  %431 = vst [vmem:[#allocation2 + $0x4c] sm:$0xf] %v7208_v2  ;;  %6376 = vmatpush3.bf16.msra.mxu0 %v6921_v6  ;;  %6901 = vmatpush3.bf16.msra.mxu1 %v6921_v6  ;;  %v1067_v14 = vld [vmem:[#allocation2] sm:$0xf] }
  0x16   : > { %432 = vst [vmem:[#allocation2 + $0x50] sm:$0x1] %v7208_v2  ;;  %433 = vst [vmem:[#allocation2 + $0x54] sm:$0xf] %v7208_v2  ;;  %6377 = vmatprep.subr.bf16.mxu0 %v6922_v7  ;;  %6894 = vmatprep.subr.bf16.mxu1 %v6922_v7  ;;  %v1068_v16 = vld [vmem:[#allocation2 + $0x4] sm:$0xf] }
  0x17   : > { %434 = vst [vmem:[#allocation2 + $0x58] sm:$0xf] %v7208_v2  ;;  %435 = vst [vmem:[#allocation2 + $0x5c] sm:$0x1] %v7208_v2  ;;  %v1069_v17 = vld [vmem:[#allocation2 + $0x8] sm:$0x1] }
  0x18   : > { %436 = vst [vmem:[#allocation2 + $0x60] sm:$0xf] %v7208_v2  ;;  %437 = vst [vmem:[#allocation2 + $0x64] sm:$0xf] %v7208_v2  ;;  %vm1116_vm1 = vsmask.f32 7440 }
  0x19   : > { %438 = vst [vmem:[#allocation2 + $0x68] sm:$0x1] %v7208_v2  ;;  %439 = vst [vmem:[#allocation2 + $0x6c] sm:$0xf] %v7208_v2  ;;  %6378 = vmatpush3.bf16.msra.mxu0 %v6923_v8  ;;  %6902 = vmatpush3.bf16.msra.mxu1 %v6923_v8  ;;  %v1119_v18 = vshrl.u32 %v1067_v14, 16  ;;  %v1122_v19 = vshll.u32 %v1067_v14, 16 }
  0x1a   : > { %440 = vst [vmem:[#allocation2 + $0x70] sm:$0xf] %v7208_v2  ;;  %441 = vst [vmem:[#allocation2 + $0x74] sm:$0x1] %v7208_v2  ;;  %6379 = vmatprep.subr.bf16.mxu0 %v6924_v9  ;;  %6895 = vmatprep.subr.bf16.mxu1 %v6924_v9  ;;  %v1128_v20 = vshll.u32 %v1068_v16, 16  ;;  %v6928_v22 = vld [vmem:[%s8739_s3 + $0x48] sm:$0xff]  }
  0x1b   : > { %442 = vst [vmem:[#allocation2 + $0x78] sm:$0xf] %v7208_v2  ;;  %443 = vst [vmem:[#allocation2 + $0x7c] sm:$0xf] %v7208_v2  ;;  %v1132_v23 = vshrl.u32 %v1068_v16, 16  ;;  %v1138_v24 = vshll.u32 %v1069_v17, 16 }
  0x1c   : > { %444 = vst [vmem:[#allocation2 + $0x80] sm:$0x1] %v7208_v2  ;;  %445 = vst [vmem:[#allocation2 + $0x84] sm:$0xf] %v7208_v2  ;;  %v271_v25 = vld [vmem:[%s7297_s26 + $0x8] sm:$0xff]  ;;  %v1121_v27 = vrot.slane %v1119_v18, 4 }
  0x1d   : > { %446 = vst [vmem:[#allocation2 + $0x88] sm:$0xf] %v7208_v2  ;;  %447 = vst [vmem:[#allocation2 + $0x8c] sm:$0x1] %v7208_v2  ;;  %6380 = vmatpush3.bf16.msra.mxu0 %v6925_v10  ;;  %6903 = vmatpush3.bf16.msra.mxu1 %v6925_v10  ;;  %v7310_v26 = vld [vmem:[%s8737_s1] ss:$0 sm:$0xff] }
  0x1e   : > { %448 = vst [vmem:[#allocation2 + $0x90] sm:$0xf] %v7208_v2  ;;  %449 = vst [vmem:[#allocation2 + $0x94] sm:$0xf] %v7208_v2  ;;  %6381 = vmatprep.subr.bf16.mxu0 %v6926_v11  ;;  %6896 = vmatprep.subr.bf16.mxu1 %v6926_v11  ;;  %v1124_v28 = vrot.slane %v1122_v19, 5  ;;  %v1130_v29 = vrot.slane %v1128_v20, 5  ;;  %v309_v30 = vmul.f32 %v7310_v26, %v270_v21 }
  0x1f   : > { %450 = vst [vmem:[#allocation2 + $0x98] sm:$0x1] %v7208_v2  ;;  %451 = vst [vmem:[#allocation2 + $0x9c] sm:$0xf] %v7208_v2  ;;  %v7316_v31 = vld [vmem:[%s8738_s2] ss:$0 sm:$0xff]  ;;  %v310_v34 = vmul.f32 %v7310_v26, %v271_v25 }
  0x20   : > { %452 = vst [vmem:[#allocation2 + $0xa0] sm:$0xf] %v7208_v2  ;;  %453 = vst [vmem:[#allocation2 + $0xa4] sm:$0x1] %v7208_v2  ;;  %v292_v32 = vld [vmem:[%s7297_s26 + $0xb0] sm:$0xff]  ;;  %v1134_v33 = vrot.slane %v1132_v23, 4  ;;  %v1125_v36 = vor.u32 %v1124_v28, %v1121_v27  ;;  %v348_v38 = vadd.f32 %v7316_v31, %v309_v30 }
  0x21   : > { %454 = vst [vmem:[#allocation2 + $0xa8] sm:$0xf] %v7208_v2  ;;  %455 = vst [vmem:[#allocation2 + $0xac] sm:$0xf] %v7208_v2  ;;  %v6929_v35 = vld [vmem:[%s8739_s3 + $0x8] sm:$0xff]   ;;  %v1140_v37 = vrot.slane %v1138_v24, 5  ;;  %6382 = vmatpush3.bf16.msra.mxu0 %v6927_v15  ;;  %6904 = vmatpush3.bf16.msra.mxu1 %v6927_v15  ;;  %v349_v42 = vadd.f32 %v7316_v31, %v310_v34  ;;  %v331_v44 = vmul.f32 %v7310_v26, %v292_v32 }
  0x22   : > { %456 = vst [vmem:[#allocation2 + $0xb0] sm:$0x1] %v7208_v2  ;;  %457 = vst [vmem:[#allocation2 + $0xb4] sm:$0xf] %v7208_v2  ;;  %vm893_vm3 = vcmask 1040384   ;;  %v6930_v39 = vld [vmem:[%s8739_s3 + $0x40] sm:$0xff]   ;;  %v1135_v41 = vor.u32 %v1134_v33, %v1130_v29  ;;  %6383 = vmatprep.subr.bf16.mxu0 %v6928_v22  ;;  %6897 = vmatprep.subr.bf16.mxu1 %v6928_v22 }
  0x23   : > { %458 = vst [vmem:[#allocation2 + $0xb8] sm:$0xf] %v7208_v2  ;;  %459 = vst [vmem:[#allocation2 + $0xbc] sm:$0x1] %v7208_v2  ;;  %vm562_vm5 = vsmask.f32 256  ;;  %v370_v51 = vadd.f32 %v7316_v31, %v331_v44 }
  0x24   : > { %460 = vst [vmem:[#allocation2 + $0xc0] sm:$0xf] %v7208_v2  ;;  %461 = vst [vmem:[#allocation2 + $0xc4] sm:$0xf] %v7208_v2  ;;  %v293_v43 = vld [vmem:[%s7297_s26 + $0xb8] sm:$0xff]  ;;  %v1126_v45 = vrot.slane %v1125_v36, 4 }
  0x25   : > { %462 = vst [vmem:[#allocation2 + $0xc8] sm:$0x1] %v7208_v2  ;;  %463 = vst [vmem:[#allocation2 + $0xcc] sm:$0xf] %v7208_v2  ;;  %v380_v46 = vmax.f32 %v348_v38, 0.0  ;;  %v332_v47 = vmul.f32 %v7310_v26, %v293_v43  ;;  %v6931_v48 = vld [vmem:[%s8739_s3] sm:$0xff]   ;;  %6384 = vmatpush3.bf16.msra.mxu0 %v6929_v35  ;;  %6905 = vmatpush3.bf16.msra.mxu1 %v6929_v35 }
  0x26   : > { %464 = vst [vmem:[#allocation2 + $0xd0] sm:$0xf] %v7208_v2  ;;  %465 = vst [vmem:[#allocation2 + $0xd4] sm:$0x1] %v7208_v2  ;;  %vm563_vm6 = vsmask.f32 4368  ;;  %6385 = vmatprep.subr.bf16.mxu0 %v6930_v39  ;;  %6898 = vmatprep.subr.bf16.mxu1 %v6930_v39 }
  0x27   : > { %1035 = vst [vmem:[#allocation3] sm:$0xf] %v1003_v12  ;;  %1036 = vst [vmem:[#allocation3 + $0x24] sm:$0xf] %v1004_v13  ;;  %v1136_v49 = vrot.slane %v1135_v41, 4  ;;  %v381_v50 = vmax.f32 %v349_v42, 0.0  ;;  %v6339_v53 = vpack.c.bf16 %v380_v46, %v380_v46  ;;  %v371_v54 = vadd.f32 %v7316_v31, %v332_v47 }
  0x28   : > { %vm7329_vm4 = vmor %vm1115_vm0, %vm1116_vm1  ;;  %vm887_vm7 = vsmask.f32 7938  ;;  %v402_v57 = vmax.f32 %v370_v51, 0.0  ;;  %v6940_v58 = vld [vmem:[%s8739_s3 + $0xf8] sm:$0xff]   ;;  %v889_v1 = vld [vmem:[#allocation2 + $0xc] sm:$0xf] }
  0x29   : > { %v1131_v52 = vsel %vm7329_vm4, %v1126_v45, %v1130_v29  ;;  %v1141_v55 = vsel %vm7329_vm4, %v1136_v49, %v1140_v37  ;;  %v6340_v56 = vpack.c.bf16 %v381_v50, %v381_v50  ;;  %v566_v59 = vshrl.u32 %v6339_v53, 16  ;;  %v6941_v62 = vld [vmem:[%s8739_s3 + $0x178] sm:$0xff]   ;;  %vm7354_vm8 = vmand %vm893_vm3, %vm562_vm5  ;;  %6386 = vmatpush3.bf16.msra.mxu0 %v6931_v48  ;;  %6906 = vmatpush3.bf16.msra.mxu1 %v6931_v48  ;;  %v272_v10 = vld [vmem:[%s7297_s26 + $0x10] sm:$0xff] }
  0x2a   : > { %1534 = vst [vmem:[#allocation3 + $0x4] sm:$0xf] %v1131_v52  ;;  %1535 = vst [vmem:[#allocation3 + $0x28] sm:$0xf] %v1141_v55  ;;  %v569_v60 = vshll.u32 %v6339_v53, 16  ;;  %v403_v61 = vmax.f32 %v371_v54, 0.0  ;;  %v6361_v2 = vpack.c.bf16 %v402_v57, %v402_v57  ;;  %6483 = vmatprep.subr.bf16.mxu1 %v6940_v58  ;;  %6595 = vmatprep.subr.bf16.mxu0 %v6941_v62 }
  0x2b   : > { %v574_v63 = vshrl.u32 %v6340_v56, 16  ;;  %v577_v0 = vshll.u32 %v6340_v56, 16  ;;  %v568_v3 = vrot.slane %v566_v59, 7  ;;  %vm7360_vm9 = vmand %vm886_vm2, %vm887_vm7  ;;  %v273_v11 = vld [vmem:[%s7297_s26 + $0x18] sm:$0xff]  ;;  %v895_v15 = vld [vmem:[#allocation2 + $0x14] sm:$0x1]  ;;  %v311_v24 = vmul.f32 %v7310_v26, %v272_v10 }
  0x2c   : > { %v6362_v5 = vpack.c.bf16 %v403_v61, %v403_v61  ;;  %v753_v8 = vshrl.u32 %v6361_v2, 16  ;;  %v756_v9 = vshll.u32 %v6361_v2, 16  ;;  %vm7368_vm10 = vmor %vm562_vm5, %vm563_vm6  ;;  %v294_v18 = vld [vmem:[%s7297_s26 + $0xc0] sm:$0xff]  ;;  %v968_v22 = vld [vmem:[#allocation2 + $0x90] sm:$0xf]  ;;  %v312_v29 = vmul.f32 %v7310_v26, %v273_v11 }
  0x2d   : > { %v576_v6 = vrot.slane %v574_v63, 7  ;;  %v571_v13 = vor.u32 %v569_v60, %v568_v3  ;;  %v572_v14 = vrot.slane %v568_v3, 4  ;;  %v972_v23 = vld [vmem:[#allocation2 + $0x98] sm:$0x1]  ;;  %v295_v30 = vld [vmem:[%s7297_s26 + $0xc8] sm:$0xff]  ;;  %v333_v32 = vmul.f32 %v7310_v26, %v294_v18  ;;  %v6956_v50 = vld [vmem:[%s8739_s3 + $0x170] sm:$0xff]  }
  0x2e   : > { %v761_v16 = vshrl.u32 %v6362_v5, 16  ;;  %v764_v17 = vshll.u32 %v6362_v5, 16  ;;  %v755_v21 = vrot.slane %v753_v8, 7  ;;  %v6944_v28 = vld [vmem:[%s8739_s3 + $0x138] sm:$0xff]   ;;  %v350_v42 = vadd.f32 %v7316_v31, %v311_v24  ;;  %v6958_v56 = vld [vmem:[%s8739_s3 + $0x130] sm:$0xff]   ;;  %v274_v57 = vld [vmem:[%s7297_s26 + $0x20] sm:$0xff] }
  0x2f   : > { %v579_v19 = vor.u32 %v577_v0, %v576_v6  ;;  %v581_v20 = vrot.slane %v576_v6, 4  ;;  %v890_v25 = vsel %vm7360_vm9, %v571_v13, %v889_v1  ;;  %v6932_v33 = vld [vmem:[#allocation3] ss:$36 sps:$4 sm:$0xff]   ;;  %v351_v43 = vadd.f32 %v7316_v31, %v312_v29  ;;  %v275_v11 = vld [vmem:[%s7297_s26 + $0x28] sm:$0xff] }
  0x30   : > { %v763_v27 = vrot.slane %v761_v16, 7  ;;  %891 = vst [vmem:[#allocation2 + $0xc] sm:$0xf] %v890_v25  ;;  %v758_v37 = vor.u32 %v756_v9, %v755_v21  ;;  %v759_v38 = vrot.slane %v755_v21, 4  ;;  %v334_v45 = vmul.f32 %v7310_v26, %v295_v30 }
  0x31   : > { %v6934_v34 = vld [vmem:[#allocation3 + $0x4] ss:$36 sps:$4 sm:$0xff]   ;;  %v580_v35 = vsel %vm7368_vm10, %v572_v14, %v579_v19  ;;  %v896_v36 = vsel %vm7354_vm8, %v581_v20, %v895_v15  ;;  %v372_v46 = vadd.f32 %v7316_v31, %v333_v32  ;;  %v382_v49 = vmax.f32 %v350_v42, 0.0 }
  0x32   : > { %892 = vst [vmem:[#allocation2 + $0x10] sm:$0xf] %v580_v35  ;;  %897 = vst [vmem:[#allocation2 + $0x14] sm:$0x1] %v896_v36  ;;  %v766_v39 = vor.u32 %v764_v17, %v763_v27  ;;  %v768_v41 = vrot.slane %v763_v27, 4  ;;  %5010 = vmatprep.mubr.bf16.mxu0 %v6934_v34  ;;  %v969_v44 = vsel %vm7360_vm9, %v758_v37, %v968_v22  ;;  %v383_v51 = vmax.f32 %v351_v43, 0.0 }
  0x33   : > { %5011 = vmatmul.mubr.bf16.vlgmr.msra.gmra.mxu0 %v6932_v33  ;;  %970 = vst [vmem:[#allocation2 + $0x90] sm:$0xf] %v969_v44  ;;  %v373_v52 = vadd.f32 %v7316_v31, %v334_v45  ;;  %v404_v53 = vmax.f32 %v372_v46, 0.0  ;;  %v6341_v54 = vpack.c.bf16 %v382_v49, %v382_v49  ;;  %v313_v62 = vmul.f32 %v7310_v26, %v274_v57 }
  0x34   : > { %v767_v47 = vsel %vm7368_vm10, %v759_v38, %v766_v39  ;;  %v973_v48 = vsel %vm7354_vm8, %v768_v41, %v972_v23  ;;  %6596 = vmatpush3.bf16.msra.mxu0 %v6944_v28  ;;  %v7405_v2 = vpack.c.bf16 %v383_v51, %v383_v51  ;;  %v314_v17 = vmul.f32 %v7310_v26, %v275_v11  ;;  %v898_v41 = vld [vmem:[#allocation2 + $0x18] sm:$0xf] }
  0x35   : > { %971 = vst [vmem:[#allocation2 + $0x94] sm:$0xf] %v767_v47  ;;  %974 = vst [vmem:[#allocation2 + $0x98] sm:$0x1] %v973_v48  ;;  %6597 = vmatprep.subr.bf16.mxu0 %v6956_v50  ;;  %v405_v55 = vmax.f32 %v373_v52, 0.0  ;;  %v583_v60 = vshrl.u32 %v6341_v54, 16  ;;  %v7407_v3 = vpack.c.bf16 %v404_v53, %v404_v53  ;;  %v352_v18 = vadd.f32 %v7316_v31, %v313_v62 }
  0x36   : > { %v586_v61 = vshll.u32 %v6341_v54, 16  ;;  %v353_v30 = vadd.f32 %v7316_v31, %v314_v17  ;;  %v591_v48 = vshrl.u32 %v7405_v2, 16  ;;  %v594_v49 = vshll.u32 %v7405_v2, 16  ;;  %v902_v54 = vld [vmem:[#allocation2 + $0x20] sm:$0x1] }
  0x37   : > { %v1005_v58 = vld [vmem:[#allocation2 + $0xc] sm:$0xf]  ;;  %v7409_v5 = vpack.c.bf16 %v405_v55, %v405_v55  ;;  %v7412_v16 = vrot.slane %v583_v60, 7  ;;  %v770_v57 = vshrl.u32 %v7407_v3, 16  ;;  %v975_v62 = vld [vmem:[#allocation2 + $0x9c] sm:$0xf] }
  0x38   : > { %v1070_v59 = vld [vmem:[#allocation2 + $0xc] sm:$0xf]  ;;  %1037 = vst [vmem:[#allocation3 + $0x48] sm:$0xf] %v1005_v58  ;;  %6598 = vmatpush3.bf16.msra.mxu0 %v6958_v56  ;;  %v593_v56 = vrot.slane %v591_v48, 7  ;;  %v773_v58 = vshll.u32 %v7407_v3, 16 }
  0x39   : > { %v1006_v63 = vld [vmem:[#allocation2 + $0x10] sm:$0xf]  ;;  %v1072_v1 = vld [vmem:[#allocation2 + $0x14] sm:$0x1]  ;;  %v1143_v6 = vshrl.u32 %v1070_v59, 16  ;;  %v1146_v8 = vshll.u32 %v1070_v59, 16  ;;  %v588_v29 = vor.u32 %v586_v61, %v7412_v16 }
  0x3a   : > { %v1071_v0 = vld [vmem:[#allocation2 + $0x10] sm:$0xf]  ;;  %1038 = vst [vmem:[#allocation3 + $0x6c] sm:$0xf] %v1006_v63  ;;  %v1162_v13 = vshll.u32 %v1072_v1, 16  ;;  %v589_v39 = vrot.slane %v7412_v16, 4  ;;  %v596_v1 = vor.u32 %v594_v49, %v593_v56 }
  0x3b   : > { %v1152_v9 = vshll.u32 %v1071_v0, 16  ;;  %v1156_v10 = vshrl.u32 %v1071_v0, 16  ;;  %v1027_v14 = vld [vmem:[#allocation2 + $0x90] sm:$0xf]  ;;  %v1145_v19 = vrot.slane %v1143_v6, 4  ;;  %v1148_v20 = vrot.slane %v1146_v8, 5 }
  0x3c   : > { %v1103_v15 = vld [vmem:[#allocation2 + $0x90] sm:$0xf]  ;;  %v1028_v23 = vld [vmem:[#allocation2 + $0x94] sm:$0xf]  ;;  %1059 = vst [vmem:[#allocation3 + $0x360] sm:$0xf] %v1027_v14  ;;  %v899_v53 = vsel %vm7360_vm9, %v588_v29, %v898_v41 }
  0x3d   : > { %v1154_v21 = vrot.slane %v1152_v9, 5  ;;  %v1158_v22 = vrot.slane %v1156_v10, 4  ;;  %v1164_v24 = vrot.slane %v1162_v13, 5  ;;  %1060 = vst [vmem:[#allocation3 + $0x384] sm:$0xf] %v1028_v23  ;;  %v1407_v28 = vshrl.u32 %v1103_v15, 16 }
  0x3e   : > { %v1104_v25 = vld [vmem:[#allocation2 + $0x94] sm:$0xf]  ;;  %v1105_v27 = vld [vmem:[#allocation2 + $0x98] sm:$0x1]  ;;  %v1149_v32 = vor.u32 %v1148_v20, %v1145_v19  ;;  %v1410_v34 = vshll.u32 %v1103_v15, 16  ;;  %v778_v60 = vshrl.u32 %v7409_v5, 16 }
  0x3f   : > { %v1159_v33 = vor.u32 %v1158_v22, %v1154_v21  ;;  %v1416_v35 = vshll.u32 %v1104_v25, 16  ;;  %v1409_v36 = vrot.slane %v1407_v28, 4  ;;  %v1420_v37 = vshrl.u32 %v1104_v25, 16  ;;  %900 = vst [vmem:[#allocation2 + $0x18] sm:$0xf] %v899_v53  ;;  %v296_v8 = vld [vmem:[%s7297_s26 + $0xd0] sm:$0xff] }
  0x40   : > { %v1426_v38 = vshll.u32 %v1105_v27, 16  ;;  %v1150_v42 = vrot.slane %v1149_v32, 4  ;;  %v1412_v44 = vrot.slane %v1410_v34, 5  ;;  %v781_v61 = vshll.u32 %v7409_v5, 16  ;;  %v979_v16 = vld [vmem:[#allocation2 + $0xa4] sm:$0x1] }
  0x41   : > { %v1160_v43 = vrot.slane %v1159_v33, 4  ;;  %v1418_v45 = vrot.slane %v1416_v35, 5  ;;  %v1422_v46 = vrot.slane %v1420_v37, 4  ;;  %v384_v63 = vmax.f32 %v352_v18, 0.0  ;;  %v276_v22 = vld [vmem:[%s7297_s26 + $0x30] sm:$0xff]  ;;  %v277_v23 = vld [vmem:[%s7297_s26 + $0x38] sm:$0xff] }
  0x42   : > { %v1428_v47 = vrot.slane %v1426_v38, 5  ;;  %v1155_v50 = vsel %vm7329_vm4, %v1150_v42, %v1154_v21  ;;  %v1413_v52 = vor.u32 %v1412_v44, %v1409_v36  ;;  %v598_v2 = vrot.slane %v593_v56, 4  ;;  %v297_v21 = vld [vmem:[%s7297_s26 + $0xd8] sm:$0xff]  ;;  %v6942_v35 = vld [vmem:[#allocation3 + $0x48] ss:$36 sps:$4 sm:$0xff]  }
  0x43   : > { %v1165_v51 = vsel %vm7329_vm4, %v1160_v43, %v1164_v24  ;;  %1536 = vst [vmem:[#allocation3 + $0x4c] sm:$0xf] %v1155_v50  ;;  %v1423_v55 = vor.u32 %v1422_v46, %v1418_v45  ;;  %v772_v6 = vrot.slane %v770_v57, 7  ;;  %v780_v10 = vrot.slane %v778_v60, 7  ;;  %v905_v38 = vld [vmem:[#allocation2 + $0x24] sm:$0xf] }
  0x44   : > { %1537 = vst [vmem:[#allocation3 + $0x70] sm:$0xf] %v1165_v51  ;;  %v1414_v59 = vrot.slane %v1413_v52, 4  ;;  %v385_v11 = vmax.f32 %v353_v30, 0.0  ;;  %v6343_v3 = vpack.c.bf16 %v384_v63, %v384_v63  ;;  %v597_v5 = vsel %vm7368_vm10, %v589_v39, %v596_v1  ;;  %v298_v48 = vld [vmem:[%s7297_s26 + $0xe0] sm:$0xff]  ;;  %v6943_v49 = vld [vmem:[%s8739_s3 + $0xb8] sm:$0xff]  }
  0x45   : > { %v1424_v0 = vrot.slane %v1423_v55, 4  ;;  %v903_v14 = vsel %vm7354_vm8, %v598_v2, %v902_v54  ;;  %v775_v15 = vor.u32 %v773_v58, %v772_v6  ;;  %901 = vst [vmem:[#allocation2 + $0x1c] sm:$0xf] %v597_v5  ;;  %v776_v17 = vrot.slane %v772_v6, 4  ;;  %v909_v50 = vld [vmem:[#allocation2 + $0x2c] sm:$0x1] }
  0x46   : > { %v1419_v9 = vsel %vm7329_vm4, %v1414_v59, %v1418_v45  ;;  %904 = vst [vmem:[#allocation2 + $0x20] sm:$0x1] %v903_v14  ;;  %v783_v18 = vor.u32 %v781_v61, %v780_v10  ;;  %v785_v19 = vrot.slane %v780_v10, 4  ;;  %v6344_v20 = vpack.c.bf16 %v385_v11, %v385_v11  ;;  %v1007_v36 = vld [vmem:[#allocation2 + $0x18] sm:$0xf]  ;;  %v299_v54 = vld [vmem:[%s7297_s26 + $0xe8] sm:$0xff] }
  0x47   : > { %v1429_v13 = vsel %vm7329_vm4, %v1424_v0, %v1428_v47  ;;  %1558 = vst [vmem:[#allocation3 + $0x364] sm:$0xf] %v1419_v9  ;;  %v976_v24 = vsel %vm7360_vm9, %v775_v15, %v975_v62  ;;  %v600_v25 = vshrl.u32 %v6343_v3, 16  ;;  %v603_v27 = vshll.u32 %v6343_v3, 16  ;;  %v1073_v37 = vld [vmem:[#allocation2 + $0x18] sm:$0xf] }
  0x48   : > { %1559 = vst [vmem:[#allocation3 + $0x388] sm:$0xf] %v1429_v13  ;;  %v335_v28 = vmul.f32 %v7310_v26, %v296_v8  ;;  %v784_v30 = vsel %vm7368_vm10, %v776_v17, %v783_v18  ;;  %977 = vst [vmem:[#allocation2 + $0x9c] sm:$0xf] %v976_v24  ;;  %v980_v32 = vsel %vm7354_vm8, %v785_v19, %v979_v16  ;;  %v608_v33 = vshrl.u32 %v6344_v20, 16  ;;  %v6945_v55 = vld [vmem:[%s8739_s3 + $0xf0] sm:$0xff]  }
  0x49   : > { %v611_v34 = vshll.u32 %v6344_v20, 16  ;;  %978 = vst [vmem:[#allocation2 + $0xa0] sm:$0xf] %v784_v30  ;;  %981 = vst [vmem:[#allocation2 + $0xa4] sm:$0x1] %v980_v32  ;;  %v336_v39 = vmul.f32 %v7310_v26, %v297_v21  ;;  %v315_v42 = vmul.f32 %v7310_v26, %v276_v22  ;;  %v316_v43 = vmul.f32 %v7310_v26, %v277_v23  ;;  %v6946_v13 = vld [vmem:[%s8739_s3 + $0xb0] sm:$0xff]  }
  0x4a   : > { %v374_v41 = vadd.f32 %v7316_v31, %v335_v28  ;;  %1039 = vst [vmem:[#allocation3 + $0x90] sm:$0xf] %v1007_v36  ;;  %v1167_v44 = vshrl.u32 %v1073_v37, 16  ;;  %v1170_v45 = vshll.u32 %v1073_v37, 16  ;;  %v602_v46 = vrot.slane %v600_v25, 7  ;;  %v6974_v18 = vld [vmem:[%s8739_s3 + $0x168] sm:$0xff]  }
  0x4b   : > { %v6935_v29 = vld [vmem:[#allocation3 + $0x4c] ss:$36 sps:$4 sm:$0xff]   ;;  %v610_v47 = vrot.slane %v608_v33, 7  ;;  %v375_v51 = vadd.f32 %v7316_v31, %v336_v39  ;;  %v7460_v53 = vadd.f32 %v7316_v31, %v315_v42  ;;  %v6937_v60 = vld [vmem:[#allocation3 + $0x360] ss:$36 sps:$4 sm:$0xff]   ;;  %v7467_v0 = vadd.f32 %v7316_v31, %v316_v43  ;;  %6599 = vmatprep.subr.bf16.mxu0 %v6974_v18 }
  0x4c   : > { %5018 = vmatprep.mubr.bf16.mxu0 %v6935_v29  ;;  %v406_v52 = vmax.f32 %v374_v41, 0.0  ;;  %v1169_v56 = vrot.slane %v1167_v44, 4  ;;  %v1172_v57 = vrot.slane %v1170_v45, 5  ;;  %v605_v58 = vor.u32 %v603_v27, %v602_v46  ;;  %v1008_v2 = vld [vmem:[#allocation2 + $0x1c] sm:$0xf]  ;;  %v6951_v36 = vld [vmem:[%s8739_s3 + $0xe8] sm:$0xff]  }
  0x4d   : > { %5019 = vmatmul.mubr.bf16.gmra.mxu0 %v6942_v35  ;;  %v606_v59 = vrot.slane %v602_v46, 4  ;;  %v613_v62 = vor.u32 %v611_v34, %v610_v47  ;;  %v615_v63 = vrot.slane %v610_v47, 4  ;;  %v337_v1 = vmul.f32 %v7310_v26, %v298_v48  ;;  %v1074_v6 = vld [vmem:[#allocation2 + $0x1c] sm:$0xf]  ;;  %v1075_v8 = vld [vmem:[#allocation2 + $0x20] sm:$0x1] }
  0x4e   : > { %v1173_v9 = vor.u32 %v1172_v57, %v1169_v56  ;;  %v906_v10 = vsel %vm7360_vm9, %v605_v58, %v905_v38  ;;  %v7472_v11 = vpack.c.bf16 %v406_v52, %v406_v52  ;;  %v7475_v3 = vmul.f32 %v7310_v26, %v299_v54  ;;  %1040 = vst [vmem:[#allocation3 + $0xb4] sm:$0xf] %v1008_v2  ;;  %v6954_v43 = vld [vmem:[%s8739_s3 + $0xa8] sm:$0xff]   ;;  %v6955_v47 = vld [vmem:[%s8739_s3 + $0xe0] sm:$0xff]  }
  0x4f   : > { %v6939_v61 = vld [vmem:[#allocation3 + $0x364] ss:$36 sps:$4 sm:$0xff]   ;;  %v1176_v5 = vshll.u32 %v1074_v6, 16  ;;  %v1180_v14 = vshrl.u32 %v1074_v6, 16  ;;  %v1186_v15 = vshll.u32 %v1075_v8, 16  ;;  %v614_v17 = vsel %vm7368_vm10, %v606_v59, %v613_v62 }
  0x50   : > { %5106 = vmatprep.mubr.bf16.mxu1 %v6939_v61  ;;  %v1029_v16 = vld [vmem:[#allocation2 + $0x9c] sm:$0xf]  ;;  %907 = vst [vmem:[#allocation2 + $0x24] sm:$0xf] %v906_v10  ;;  %v1174_v19 = vrot.slane %v1173_v9, 4  ;;  %v910_v22 = vsel %vm7354_vm8, %v615_v63, %v909_v50  ;;  %v407_v23 = vmax.f32 %v375_v51, 0.0  ;;  %v7488_v24 = vadd.f32 %v7316_v31, %v337_v1 }
  0x51   : > { %5107 = vmatmul.mubr.bf16.vlgmr.msra.gmra.mxu1 %v6937_v60  ;;  %v1030_v20 = vld [vmem:[#allocation2 + $0xa0] sm:$0xf]  ;;  %1061 = vst [vmem:[#allocation3 + $0x3a8] sm:$0xf] %v1029_v16  ;;  %v1106_v21 = vld [vmem:[#allocation2 + $0x9c] sm:$0xf]  ;;  %v7514_v8 = vadd.f32 %v7316_v31, %v7475_v3 }
  0x52   : > { %908 = vst [vmem:[#allocation2 + $0x28] sm:$0xf] %v614_v17  ;;  %6484 = vmatpush3.bf16.msra.mxu1 %v6943_v49  ;;  %v1178_v25 = vrot.slane %v1176_v5, 5  ;;  %v1182_v27 = vrot.slane %v1180_v14, 4  ;;  %v1188_v28 = vrot.slane %v1186_v15, 5  ;;  %v1431_v30 = vshrl.u32 %v1106_v21, 16 }
  0x53   : > { %1062 = vst [vmem:[#allocation3 + $0x3cc] sm:$0xf] %v1030_v20  ;;  %v1107_v29 = vld [vmem:[#allocation2 + $0xa0] sm:$0xf]  ;;  %911 = vst [vmem:[#allocation2 + $0x2c] sm:$0x1] %v910_v22  ;;  %6485 = vmatprep.subr.bf16.mxu1 %v6945_v55  ;;  %v7493_v37 = vpack.c.bf16 %v407_v23, %v407_v23 }
  0x54   : > { %v1108_v32 = vld [vmem:[#allocation2 + $0xa4] sm:$0x1]  ;;  %v1434_v33 = vshll.u32 %v1106_v21, 16  ;;  %v1440_v34 = vshll.u32 %v1107_v29, 16  ;;  %v1444_v35 = vshrl.u32 %v1107_v29, 16  ;;  %v1179_v38 = vsel %vm7329_vm4, %v1174_v19, %v1178_v25  ;;  %v6963_v14 = vld [vmem:[%s8739_s3 + $0xd8] sm:$0xff]  }
  0x55   : > { %v1183_v39 = vor.u32 %v1182_v27, %v1178_v25  ;;  %v1433_v41 = vrot.slane %v1431_v30, 4  ;;  %v1450_v42 = vshll.u32 %v1108_v32, 16  ;;  %1538 = vst [vmem:[#allocation3 + $0x94] sm:$0xf] %v1179_v38  ;;  %v787_v48 = vshrl.u32 %v7472_v11, 16  ;;  %v6957_v61 = vld [vmem:[%s8739_s3 + $0xa0] sm:$0xff]  }
  0x56   : > { %v1436_v44 = vrot.slane %v1434_v33, 5  ;;  %v1442_v45 = vrot.slane %v1440_v34, 5  ;;  %v1446_v46 = vrot.slane %v1444_v35, 4  ;;  %6486 = vmatpush3.bf16.msra.mxu1 %v6946_v13  ;;  %v790_v51 = vshll.u32 %v7472_v11, 16  ;;  %v982_v6 = vld [vmem:[#allocation2 + $0xa8] sm:$0xf] }
  0x57   : > { %v1184_v49 = vrot.slane %v1183_v39, 4  ;;  %v1452_v50 = vrot.slane %v1450_v42, 5  ;;  %v795_v52 = vshrl.u32 %v7493_v37, 16  ;;  %6487 = vmatprep.subr.bf16.mxu1 %v6951_v36  ;;  %v1009_v56 = vld [vmem:[#allocation2 + $0x24] sm:$0xf]  ;;  %v789_v58 = vrot.slane %v787_v48, 7 }
  0x58   : > { %v1437_v54 = vor.u32 %v1436_v44, %v1433_v41  ;;  %v1447_v55 = vor.u32 %v1446_v46, %v1442_v45  ;;  %v1076_v57 = vld [vmem:[#allocation2 + $0x24] sm:$0xf]  ;;  %v798_v59 = vshll.u32 %v7493_v37, 16  ;;  %1041 = vst [vmem:[#allocation3 + $0xd8] sm:$0xf] %v1009_v56  ;;  %v6978_v3 = vld [vmem:[%s8739_s3 + $0x128] sm:$0xff]  }
  0x59   : > { %v1189_v60 = vsel %vm7329_vm4, %v1184_v49, %v1188_v28  ;;  %v1010_v62 = vld [vmem:[#allocation2 + $0x28] sm:$0xf]  ;;  %v1191_v1 = vshrl.u32 %v1076_v57, 16  ;;  %v1194_v2 = vshll.u32 %v1076_v57, 16  ;;  %v792_v18 = vor.u32 %v790_v51, %v789_v58  ;;  %v986_v29 = vld [vmem:[#allocation2 + $0xb0] sm:$0x1]  ;;  %6600 = vmatpush3.bf16.msra.mxu0 %v6978_v3 }
  0x5a   : > { %v1077_v63 = vld [vmem:[#allocation2 + $0x28] sm:$0xf]  ;;  %1539 = vst [vmem:[#allocation3 + $0xb8] sm:$0xf] %v1189_v60  ;;  %v1438_v9 = vrot.slane %v1437_v54, 4  ;;  %v1448_v10 = vrot.slane %v1447_v55, 4  ;;  %6488 = vmatpush3.bf16.msra.mxu1 %v6954_v43 }
  0x5b   : > { %1042 = vst [vmem:[#allocation3 + $0xfc] sm:$0xf] %v1010_v62  ;;  %v1078_v11 = vld [vmem:[#allocation2 + $0x2c] sm:$0x1]  ;;  %v1200_v13 = vshll.u32 %v1077_v63, 16  ;;  %v1204_v5 = vshrl.u32 %v1077_v63, 16  ;;  %6489 = vmatprep.subr.bf16.mxu1 %v6955_v47  ;;  %v983_v32 = vsel %vm7360_vm9, %v792_v18, %v982_v6 }
  0x5c   : > { %v1193_v15 = vrot.slane %v1191_v1, 4  ;;  %v1196_v16 = vrot.slane %v1194_v2, 5  ;;  %v1210_v17 = vshll.u32 %v1078_v11, 16  ;;  %v1443_v19 = vsel %vm7329_vm4, %v1438_v9, %v1442_v45  ;;  %984 = vst [vmem:[#allocation2 + $0xa8] sm:$0xf] %v983_v32  ;;  %v6966_v38 = vld [vmem:[%s8739_s3 + $0x98] sm:$0xff]  }
  0x5d   : > { %v1453_v20 = vsel %vm7329_vm4, %v1448_v10, %v1452_v50  ;;  %v1202_v21 = vrot.slane %v1200_v13, 5  ;;  %v1206_v22 = vrot.slane %v1204_v5, 4  ;;  %1560 = vst [vmem:[#allocation3 + $0x3ac] sm:$0xf] %v1443_v19  ;;  %v793_v27 = vrot.slane %v789_v58, 4  ;;  %v278_v44 = vld [vmem:[%s7297_s26 + $0x40] sm:$0xff] }
  0x5e   : > { %1561 = vst [vmem:[#allocation3 + $0x3d0] sm:$0xf] %v1453_v20  ;;  %v1197_v23 = vor.u32 %v1196_v16, %v1193_v15  ;;  %v1212_v25 = vrot.slane %v1210_v17, 5  ;;  %v797_v28 = vrot.slane %v795_v52, 7  ;;  %v386_v33 = vmax.f32 %v7460_v53, 0.0  ;;  %6490 = vmatpush3.bf16.msra.mxu1 %v6957_v61  ;;  %v6967_v53 = vld [vmem:[%s8739_s3 + $0xd0] sm:$0xff]  }
  0x5f   : > { %v1207_v30 = vor.u32 %v1206_v22, %v1202_v21  ;;  %v387_v34 = vmax.f32 %v7467_v0, 0.0  ;;  %v408_v39 = vmax.f32 %v7488_v24, 0.0  ;;  %6491 = vmatprep.subr.bf16.mxu1 %v6963_v14  ;;  %v409_v0 = vmax.f32 %v7514_v8, 0.0  ;;  %v279_v45 = vld [vmem:[%s7297_s26 + $0x48] sm:$0xff]  ;;  %v7548_v56 = vld [vmem:[#allocation2] sm:$0xe] }
  0x60   : > { %v1198_v35 = vrot.slane %v1197_v23, 4  ;;  %v800_v36 = vor.u32 %v798_v59, %v797_v28  ;;  %v802_v37 = vrot.slane %v797_v28, 4  ;;  %v6345_v42 = vpack.c.bf16 %v386_v33, %v386_v33  ;;  %v6952_v47 = vld [vmem:[#allocation3 + $0x90] ss:$36 sps:$4 sm:$0xff]   ;;  %v6968_v57 = vld [vmem:[%s8739_s3 + $0x90] sm:$0xff]   ;;  %v6989_v2 = vld [vmem:[%s8739_s3 + $0x160] sm:$0xff]  }
  0x61   : > { %v1208_v41 = vrot.slane %v1207_v30, 4  ;;  %v6346_v43 = vpack.c.bf16 %v387_v34, %v387_v34  ;;  %v6947_v46 = vld [vmem:[#allocation3 + $0x94] ss:$36 sps:$4 sm:$0xff]   ;;  %v6367_v50 = vpack.c.bf16 %v408_v39, %v408_v39  ;;  %vm1662_vm11 = vcmask 1042432   ;;  %v916_v60 = vld [vmem:[#allocation2 + $0x38] sm:$0x1]  ;;  %6601 = vmatprep.subr.bf16.mxu0 %v6989_v2 }
  0x62   : > { %v1203_v48 = vsel %vm7329_vm4, %v1198_v35, %v1202_v21  ;;  %v801_v24 = vsel %vm7368_vm10, %v793_v27, %v800_v36  ;;  %v987_v49 = vsel %vm7354_vm8, %v802_v37, %v986_v29  ;;  %v617_v52 = vshrl.u32 %v6345_v42, 16  ;;  %5026 = vmatprep.mubr.bf16.mxu0 %v6947_v46  ;;  %6492 = vmatpush3.bf16.msra.mxu1 %v6966_v38  ;;  %v912_v59 = vld [vmem:[#allocation2 + $0x30] sm:$0xf]  ;;  %v6973_v1 = vld [vmem:[%s8739_s3 + $0xc8] sm:$0xff]   ;;  %v989_v10 = vld [vmem:[#allocation2 + $0xb4] sm:$0xf] }
  0x63   : > { %v1213_v51 = vsel %vm7329_vm4, %v1208_v41, %v1212_v25  ;;  %1540 = vst [vmem:[#allocation3 + $0xdc] sm:$0xf] %v1203_v48  ;;  %985 = vst [vmem:[#allocation2 + $0xac] sm:$0xf] %v801_v24  ;;  %v620_v54 = vshll.u32 %v6345_v42, 16  ;;  %v625_v55 = vshrl.u32 %v6346_v43, 16  ;;  %v7553_v61 = vpack.c.bf16 %v409_v0, %v409_v0  ;;  %5027 = vmatmul.mubr.bf16.gmra.mxu0 %v6952_v47 }
  0x64   : > { %988 = vst [vmem:[#allocation2 + $0xb0] sm:$0x1] %v987_v49  ;;  %vm1663_vm12 = vcmask 1046532   ;;  %1541 = vst [vmem:[#allocation3 + $0x100] sm:$0xf] %v1213_v51  ;;  %v628_v58 = vshll.u32 %v6346_v43, 16  ;;  %6493 = vmatprep.subr.bf16.mxu1 %v6967_v53  ;;  %v317_v11 = vmul.f32 %v7310_v26, %v278_v44  ;;  %v318_v13 = vmul.f32 %v7310_v26, %v279_v45 }
  0x65   : > { %v804_v62 = vshrl.u32 %v6367_v50, 16  ;;  %v807_v63 = vshll.u32 %v6367_v50, 16  ;;  %v6949_v6 = vld [vmem:[#allocation3 + $0x3ac] ss:$36 sps:$4 sm:$0xff]   ;;  %v619_v8 = vrot.slane %v617_v52, 7  ;;  %v627_v9 = vrot.slane %v625_v55, 7  ;;  %vm7612_vm13 = vmor %vm1662_vm11, %vm1663_vm12 }
  0x66   : > { %v6953_v5 = vld [vmem:[#allocation3 + $0x3a8] ss:$36 sps:$4 sm:$0xff]   ;;  %v812_v15 = vshrl.u32 %v7553_v61, 16  ;;  %v815_v16 = vshll.u32 %v7553_v61, 16  ;;  %v6071_v17 = vrot.slane %v7548_v56, 9  ;;  %5114 = vmatprep.mubr.bf16.mxu1 %v6949_v6  ;;  %v6977_v28 = vld [vmem:[%s8739_s3 + $0x88] sm:$0xff]   ;;  %6494 = vmatpush3.bf16.msra.mxu1 %v6968_v57  ;;  %v356_v0 = vadd.f32 %v7316_v31, %v317_v11 }
  0x67   : > { %v7563_v14 = vrot.slane %v804_v62, 7  ;;  %v1031_v18 = vld [vmem:[#allocation2 + $0xa8] sm:$0xf]  ;;  %v622_v19 = vor.u32 %v620_v54, %v619_v8  ;;  %v623_v20 = vrot.slane %v619_v8, 4  ;;  %v630_v21 = vor.u32 %v628_v58, %v627_v9  ;;  %5115 = vmatmul.mubr.bf16.gmra.mxu1 %v6953_v5  ;;  %v6979_v29 = vld [vmem:[%s8739_s3 + $0xc0] sm:$0xff]   ;;  %v280_v39 = vld [vmem:[%s7297_s26 + $0x50] sm:$0xff]  ;;  %6495 = vmatprep.subr.bf16.mxu1 %v6973_v1 }
  0x68   : > { %v1109_v3 = vld [vmem:[#allocation2 + $0xa8] sm:$0xf]  ;;  %v632_v22 = vrot.slane %v627_v9, 4  ;;  %1063 = vst [vmem:[#allocation3 + $0x3f0] sm:$0xf] %v1031_v18  ;;  %v6990_v30 = vld [vmem:[%s8739_s3 + $0x120] sm:$0xff]   ;;  %v357_v44 = vadd.f32 %v7316_v31, %v318_v13 }
  0x69   : > { %v1455_v26 = vshrl.u32 %v1109_v3, 16  ;;  %v1458_v23 = vshll.u32 %v1109_v3, 16  ;;  %v809_v25 = vor.u32 %v807_v63, %v7563_v14  ;;  %v810_v27 = vrot.slane %v7563_v14, 4  ;;  %v993_v36 = vld [vmem:[#allocation2 + $0xbc] sm:$0x1]  ;;  %6602 = vmatpush3.bf16.msra.mxu0 %v6990_v30  ;;  %v6980_v49 = vld [vmem:[%s8739_s3 + $0x80] sm:$0xff]  }
  0x6a   : > { %v631_v32 = vsel %vm7368_vm10, %v623_v20, %v630_v21  ;;  %v913_v33 = vsel %vm7360_vm9, %v622_v19, %v912_v59  ;;  %v917_v34 = vsel %vm7354_vm8, %v632_v22, %v916_v60  ;;  %v814_v35 = vrot.slane %v812_v15, 7  ;;  %v1841_v37 = vld [vmem:[#allocation2 + $0xc] sm:$0xf]  ;;  %v1842_v38 = vld [vmem:[#allocation2 + $0x10] sm:$0xf]  ;;  %v6986_v59 = vld [vmem:[%s8739_s3 + $0x1f8] sm:$0xff]   ;;  %6496 = vmatpush3.bf16.msra.mxu1 %v6977_v28 }
  0x6b   : > { %v1032_v41 = vld [vmem:[#allocation2 + $0xac] sm:$0xf]  ;;  %v1457_v42 = vrot.slane %v1455_v26, 4  ;;  %914 = vst [vmem:[#allocation2 + $0x30] sm:$0xf] %v913_v33  ;;  %v990_v43 = vsel %vm7360_vm9, %v809_v25, %v989_v10  ;;  %v1460_v48 = vrot.slane %v1458_v23, 5  ;;  %6497 = vmatprep.subr.bf16.mxu1 %v6979_v29 }
  0x6c   : > { %v1110_v53 = vld [vmem:[#allocation2 + $0xac] sm:$0xf]  ;;  %915 = vst [vmem:[#allocation2 + $0x34] sm:$0xf] %v631_v32  ;;  %918 = vst [vmem:[#allocation2 + $0x38] sm:$0x1] %v917_v34  ;;  %v817_v24 = vor.u32 %v815_v16, %v814_v35 }
  0x6d   : > { %v7590_v45 = vld [vmem:[#allocation2 + $0x4] sm:$0xf]  ;;  %1873 = vst [vmem:[#allocation3 + $0xc] sm:$0xf] %v1841_v37  ;;  %1874 = vst [vmem:[#allocation3 + $0x30] sm:$0xf] %v1842_v38  ;;  %v1461_v60 = vor.u32 %v1460_v48, %v1457_v42 }
  0x6e   : > { %v6959_v46 = vld [vmem:[#allocation3 + $0xdc] ss:$36 sps:$4 sm:$0xff]   ;;  %1064 = vst [vmem:[#allocation3 + $0x414] sm:$0xf] %v1032_v41  ;;  %v1111_v47 = vld [vmem:[#allocation2 + $0xb0] sm:$0x1]  ;;  %v818_v61 = vsel %vm7368_vm10, %v810_v27, %v817_v24  ;;  %6498 = vmatpush3.bf16.msra.mxu1 %v6980_v49 }
  0x6f   : > { %991 = vst [vmem:[#allocation2 + $0xb4] sm:$0xf] %v990_v43  ;;  %v7595_v50 = vld [vmem:[#allocation2 + $0x8] sm:$0x1]  ;;  %v7600_v31 = vld [vmem:[%s8737_s1] ss:$0 sm:$0xff]  ;;  %5034 = vmatprep.mubr.bf16.mxu0 %v6959_v46  ;;  %6707 = vmatprep.subr.bf16.mxu1 %v6986_v59 }
  0x70   : > { %v319_v51 = vmul.f32 %v7600_v31, %v280_v39  ;;  %v1464_v52 = vshll.u32 %v1110_v53, 16  ;;  %v1468_v54 = vshrl.u32 %v1110_v53, 16  ;;  %v1474_v55 = vshll.u32 %v1111_v47, 16  ;;  %v6964_v57 = vld [vmem:[#allocation3 + $0xd8] ss:$36 sps:$4 sm:$0xff]   ;;  %v281_v10 = vld [vmem:[%s7297_s26 + $0x58] sm:$0xff] }
  0x71   : > { %v819_v58 = vrot.slane %v814_v35, 4  ;;  %v388_v62 = vmax.f32 %v356_v0, 0.0  ;;  %v389_v63 = vmax.f32 %v357_v44, 0.0  ;;  %5035 = vmatmul.mubr.bf16.gmra.mxu0 %v6964_v57  ;;  %992 = vst [vmem:[#allocation2 + $0xb8] sm:$0xf] %v818_v61  ;;  %v1462_v11 = vrot.slane %v1461_v60, 4 }
  0x72   : > { %v1466_v1 = vrot.slane %v1464_v52, 5  ;;  %v1470_v2 = vrot.slane %v1468_v54, 4  ;;  %v1476_v6 = vrot.slane %v1474_v55, 5  ;;  %v1667_v13 = vrot.slane %v7590_v45, 5  ;;  %v282_v16 = vld [vmem:[%s7297_s26 + $0x60] sm:$0xff]  ;;  %v283_v53 = vld [vmem:[%s7297_s26 + $0x68] sm:$0xff] }
  0x73   : > { %v994_v8 = vsel %vm7354_vm8, %v819_v58, %v993_v36  ;;  %v7618_v14 = vpack.c.bf16 %v388_v62, %v388_v62  ;;  %v1670_v15 = vrot.slane %v7595_v50, 5  ;;  %v1011_v3 = vld [vmem:[#allocation2 + $0x30] sm:$0xf]  ;;  %v1012_v19 = vld [vmem:[#allocation2 + $0x34] sm:$0xf]  ;;  %v7624_v21 = vpack.c.bf16 %v389_v63, %v389_v63 }
  0x74   : > { %995 = vst [vmem:[#allocation2 + $0xbc] sm:$0x1] %v994_v8  ;;  %v1471_v5 = vor.u32 %v1470_v2, %v1466_v1  ;;  %v1467_v18 = vsel %vm7329_vm4, %v1462_v11, %v1466_v1  ;;  %v1079_v20 = vld [vmem:[#allocation2 + $0x30] sm:$0xf]  ;;  %v1668_v22 = vsel %vm7612_vm13, %v6071_v17, %v1667_v13  ;;  %v320_v26 = vmul.f32 %v7600_v31, %v281_v10  ;;  %v1080_v25 = vld [vmem:[#allocation2 + $0x34] sm:$0xf] }
  0x75   : > { %1562 = vst [vmem:[#allocation3 + $0x3f4] sm:$0xf] %v1467_v18  ;;  %1043 = vst [vmem:[#allocation3 + $0x120] sm:$0xf] %v1011_v3  ;;  %v1081_v27 = vld [vmem:[#allocation2 + $0x38] sm:$0x1]  ;;  %v321_v17 = vmul.f32 %v7600_v31, %v282_v16  ;;  %v322_v52 = vmul.f32 %v7600_v31, %v283_v53 }
  0x76   : > { %v1472_v23 = vrot.slane %v1471_v5, 4  ;;  %1044 = vst [vmem:[#allocation3 + $0x144] sm:$0xf] %v1012_v19  ;;  %v1215_v28 = vshrl.u32 %v1079_v20, 16  ;;  %1809 = vst [vmem:[#allocation3 + $0x8] sm:$0xf] %v1668_v22 }
  0x77   : > { %v7636_v29 = vld [vmem:[%s8738_s2] ss:$0 sm:$0xff]  ;;  %v1218_v30 = vshll.u32 %v1079_v20, 16  ;;  %v1224_v32 = vshll.u32 %v1080_v25, 16  ;;  %v1228_v33 = vshrl.u32 %v1080_v25, 16  ;;  %v1234_v34 = vshll.u32 %v1081_v27, 16 }
  0x78   : > { %v7639_v56 = vadd.f32 %v7636_v29, %v319_v51  ;;  %v1033_v35 = vld [vmem:[#allocation2 + $0xb4] sm:$0xf]  ;;  %v1477_v36 = vsel %vm7329_vm4, %v1472_v23, %v1476_v6  ;;  %v1217_v37 = vrot.slane %v1215_v28, 4  ;;  %v634_v39 = vshrl.u32 %v7618_v14, 16  ;;  %v1034_v46 = vld [vmem:[#allocation2 + $0xb8] sm:$0xf] }
  0x79   : > { %1065 = vst [vmem:[#allocation3 + $0x438] sm:$0xf] %v1033_v35  ;;  %v1112_v38 = vld [vmem:[#allocation2 + $0xb4] sm:$0xf]  ;;  %v637_v41 = vshll.u32 %v7618_v14, 16  ;;  %v1220_v42 = vrot.slane %v1218_v30, 5  ;;  %v359_v51 = vadd.f32 %v7636_v29, %v320_v26 }
  0x7a   : > { %1563 = vst [vmem:[#allocation3 + $0x418] sm:$0xf] %v1477_v36  ;;  %v1226_v43 = vrot.slane %v1224_v32, 5  ;;  %v1230_v0 = vrot.slane %v1228_v33, 4  ;;  %v1236_v44 = vrot.slane %v1234_v34, 5  ;;  %v1479_v24 = vshrl.u32 %v1112_v38, 16 }
  0x7b   : > { %1066 = vst [vmem:[#allocation3 + $0x45c] sm:$0xf] %v1034_v46  ;;  %v1113_v47 = vld [vmem:[#allocation2 + $0xb8] sm:$0xf]  ;;  %v1114_v48 = vld [vmem:[#allocation2 + $0xbc] sm:$0x1]  ;;  %v1221_v54 = vor.u32 %v1220_v42, %v1217_v37  ;;  %v360_v33 = vadd.f32 %v7636_v29, %v321_v17  ;;  %v361_v34 = vadd.f32 %v7636_v29, %v322_v52 }
  0x7c   : > { %v1482_v49 = vshll.u32 %v1112_v38, 16  ;;  %v1231_v55 = vor.u32 %v1230_v0, %v1226_v43  ;;  %v1488_v57 = vshll.u32 %v1113_v47, 16  ;;  %v1492_v58 = vshrl.u32 %v1113_v47, 16  ;;  %v919_v63 = vld [vmem:[#allocation2 + $0x3c] sm:$0xf] }
  0x7d   : > { %v1481_v59 = vrot.slane %v1479_v24, 4  ;;  %v1498_v61 = vshll.u32 %v1114_v48, 16  ;;  %v636_v62 = vrot.slane %v634_v39, 7  ;;  %v1222_v1 = vrot.slane %v1221_v54, 4  ;;  %v7649_v16 = vld [vmem:[#allocation2 + $0xc] sm:$0xe] }
  0x7e   : > { %v1484_v60 = vrot.slane %v1482_v49, 5  ;;  %v1232_v2 = vrot.slane %v1231_v55, 4  ;;  %v1490_v6 = vrot.slane %v1488_v57, 5  ;;  %v1494_v8 = vrot.slane %v1492_v58, 4  ;;  %v1570_v22 = vld [vmem:[#allocation2 + $0x10] sm:$0xf] }
  0x7f   : > { %v1500_v11 = vrot.slane %v1498_v61, 5  ;;  %v639_v5 = vor.u32 %v637_v41, %v636_v62  ;;  %v640_v14 = vrot.slane %v636_v62, 4  ;;  %v1227_v18 = vsel %vm7329_vm4, %v1222_v1, %v1226_v43  ;;  %v7656_v26 = vld [vmem:[#allocation2 + $0x14] sm:$0x1]  ;;  %v1843_v23 = vld [vmem:[#allocation2 + $0x18] sm:$0xf] }
  0x80   : > { %v1485_v10 = vor.u32 %v1484_v60, %v1481_v59  ;;  %v1237_v3 = vsel %vm7329_vm4, %v1232_v2, %v1236_v44  ;;  %v1495_v19 = vor.u32 %v1494_v8, %v1490_v6  ;;  %v642_v20 = vshrl.u32 %v7624_v21, 16  ;;  %v7001_v25 = vld [vmem:[%s8739_s3 + $0x158] sm:$0xff]   ;;  %v6965_v28 = vld [vmem:[#allocation3 + $0x3f0] ss:$36 sps:$4 sm:$0xff]   ;;  %1542 = vst [vmem:[#allocation3 + $0x124] sm:$0xf] %v1227_v18 }
  0x81   : > { %v6961_v27 = vld [vmem:[#allocation3 + $0x3f4] ss:$36 sps:$4 sm:$0xff]   ;;  %1543 = vst [vmem:[#allocation3 + $0x148] sm:$0xf] %v1237_v3  ;;  %v920_v32 = vsel %vm7360_vm9, %v639_v5, %v919_v63  ;;  %1875 = vst [vmem:[#allocation3 + $0x54] sm:$0xf] %v1843_v23  ;;  %6603 = vmatprep.subr.bf16.mxu0 %v7001_v25 }
  0x82   : > { %v1486_v30 = vrot.slane %v1485_v10, 4  ;;  %v1496_v35 = vrot.slane %v1495_v19, 4  ;;  %v644_v36 = vrot.slane %v642_v20, 7  ;;  %v645_v37 = vshll.u32 %v7624_v21, 16  ;;  %921 = vst [vmem:[#allocation2 + $0x3c] sm:$0xf] %v920_v32  ;;  %5122 = vmatprep.mubr.bf16.mxu1 %v6961_v27 }
  0x83   : > { %v1669_v38 = vrot.slane %v1667_v13, 4  ;;  %v1844_v39 = vld [vmem:[#allocation2 + $0x1c] sm:$0xf]  ;;  %v923_v53 = vld [vmem:[#allocation2 + $0x44] sm:$0x1]  ;;  %v390_v42 = vmax.f32 %v7639_v56, 0.0  ;;  %5123 = vmatmul.mubr.bf16.gmra.mxu1 %v6965_v28 }
  0x84   : > { %v1491_v41 = vsel %vm7329_vm4, %v1486_v30, %v1490_v6  ;;  %v391_v17 = vmax.f32 %v359_v51, 0.0  ;;  %v6072_v43 = vrot.slane %v7649_v16, 9  ;;  %1876 = vst [vmem:[#allocation3 + $0x78] sm:$0xf] %v1844_v39  ;;  %v1501_v21 = vsel %vm7329_vm4, %v1496_v35, %v1500_v11  ;;  %v7005_v56 = vld [vmem:[%s8739_s3 + $0x118] sm:$0xff]  }
  0x85   : > { %1564 = vst [vmem:[#allocation3 + $0x43c] sm:$0xf] %v1491_v41  ;;  %v647_v45 = vor.u32 %v645_v37, %v644_v36  ;;  %v649_v13 = vrot.slane %v644_v36, 4  ;;  %v1671_v0 = vsel %vm7612_vm13, %v1669_v38, %v1670_v15  ;;  %1565 = vst [vmem:[#allocation3 + $0x460] sm:$0xf] %v1501_v21  ;;  %v6349_v44 = vpack.c.bf16 %v390_v42, %v390_v42 }
  0x86   : > { %1810 = vst [vmem:[#allocation3 + $0x2c] sm:$0xf] %v1671_v0  ;;  %v6350_v46 = vpack.c.bf16 %v391_v17, %v391_v17  ;;  %v1674_v47 = vrot.slane %v1570_v22, 5  ;;  %v1677_v48 = vrot.slane %v7656_v26, 5  ;;  %v392_v49 = vmax.f32 %v360_v33, 0.0  ;;  %6604 = vmatpush3.bf16.msra.mxu0 %v7005_v56  ;;  %v284_v0 = vld [vmem:[%s7297_s26 + $0x70] sm:$0xff] }
  0x87   : > { %v648_v24 = vsel %vm7368_vm10, %v640_v14, %v647_v45  ;;  %v924_v50 = vsel %vm7354_vm8, %v649_v13, %v923_v53  ;;  %v393_v51 = vmax.f32 %v361_v34, 0.0  ;;  %v1845_v15 = vld [vmem:[#allocation2 + $0x24] sm:$0xf]  ;;  %v1846_v52 = vld [vmem:[#allocation2 + $0x28] sm:$0xf]  ;;  %v651_v54 = vshrl.u32 %v6349_v44, 16 }
  0x88   : > { %922 = vst [vmem:[#allocation2 + $0x40] sm:$0xf] %v648_v24  ;;  %925 = vst [vmem:[#allocation2 + $0x44] sm:$0x1] %v924_v50  ;;  %v654_v55 = vshll.u32 %v6349_v44, 16  ;;  %v659_v57 = vshrl.u32 %v6350_v46, 16  ;;  %v1675_v60 = vsel %vm7612_vm13, %v6072_v43, %v1674_v47  ;;  %v6351_v62 = vpack.c.bf16 %v392_v49, %v392_v49 }
  0x89   : > { %v662_v58 = vshll.u32 %v6350_v46, 16  ;;  %1877 = vst [vmem:[#allocation3 + $0x9c] sm:$0xf] %v1845_v15  ;;  %1878 = vst [vmem:[#allocation3 + $0xc0] sm:$0xf] %v1846_v52  ;;  %v1676_v61 = vrot.slane %v1674_v47, 4  ;;  %v7688_v63 = vpack.c.bf16 %v393_v51, %v393_v51 }
  0x8a   : > { %v6969_v59 = vld [vmem:[#allocation3 + $0x124] ss:$36 sps:$4 sm:$0xff]   ;;  %v926_v8 = vld [vmem:[#allocation2 + $0x48] sm:$0xf]  ;;  %1811 = vst [vmem:[#allocation3 + $0x50] sm:$0xf] %v1675_v60  ;;  %v323_v60 = vmul.f32 %v7600_v31, %v284_v0 }
  0x8b   : > { %v6975_v1 = vld [vmem:[#allocation3 + $0x120] ss:$36 sps:$4 sm:$0xff]   ;;  %5042 = vmatprep.mubr.bf16.mxu0 %v6969_v59  ;;  %v653_v5 = vrot.slane %v651_v54, 7  ;;  %v661_v14 = vrot.slane %v659_v57, 7  ;;  %v1678_v16 = vsel %vm7612_vm13, %v1676_v61, %v1677_v48  ;;  %v668_v18 = vshrl.u32 %v6351_v62, 16 }
  0x8c   : > { %v1013_v2 = vld [vmem:[#allocation2 + $0x3c] sm:$0xf]  ;;  %5043 = vmatmul.mubr.bf16.gmra.mxu0 %v6975_v1  ;;  %v676_v3 = vshrl.u32 %v7688_v63, 16  ;;  %v6971_v19 = vld [vmem:[#allocation3 + $0x43c] ss:$36 sps:$4 sm:$0xff]   ;;  %v671_v28 = vshll.u32 %v6351_v62, 16 }
  0x8d   : > { %v1082_v6 = vld [vmem:[#allocation2 + $0x3c] sm:$0xf]  ;;  %1045 = vst [vmem:[#allocation3 + $0x168] sm:$0xf] %v1013_v2  ;;  %v6976_v20 = vld [vmem:[#allocation3 + $0x438] ss:$36 sps:$4 sm:$0xff]   ;;  %v656_v26 = vor.u32 %v654_v55, %v653_v5  ;;  %5130 = vmatprep.mubr.bf16.mxu1 %v6971_v19  ;;  %v664_v34 = vor.u32 %v662_v58, %v661_v14 }
  0x8e   : > { %v1239_v10 = vshrl.u32 %v1082_v6, 16  ;;  %v1242_v11 = vshll.u32 %v1082_v6, 16  ;;  %1812 = vst [vmem:[#allocation3 + $0x74] sm:$0xf] %v1678_v16  ;;  %v6985_v25 = vld [vmem:[#allocation3 + $0xc] ss:$36 sps:$4 sm:$0xff]   ;;  %5131 = vmatmul.mubr.bf16.gmra.mxu1 %v6976_v20 }
  0x8f   : > { %v930_v27 = vld [vmem:[#allocation2 + $0x50] sm:$0x1]  ;;  %v1014_v30 = vld [vmem:[#allocation2 + $0x40] sm:$0xf]  ;;  %v1084_v33 = vld [vmem:[#allocation2 + $0x44] sm:$0x1]  ;;  %v927_v35 = vsel %vm7360_vm9, %v656_v26, %v926_v8  ;;  %5171 = vmatprep.mubr.bf16.mxu1 %v6985_v25 }
  0x90   : > { %v1241_v22 = vrot.slane %v1239_v10, 4  ;;  %v1244_v23 = vrot.slane %v1242_v11, 5  ;;  %v1083_v32 = vld [vmem:[#allocation2 + $0x40] sm:$0xf]  ;;  %1046 = vst [vmem:[#allocation3 + $0x18c] sm:$0xf] %v1014_v30 }
  0x91   : > { %v1248_v37 = vshll.u32 %v1083_v32, 16  ;;  %v1252_v38 = vshrl.u32 %v1083_v32, 16  ;;  %v1258_v39 = vshll.u32 %v1084_v33, 16  ;;  %928 = vst [vmem:[#allocation2 + $0x48] sm:$0xf] %v927_v35  ;;  %v657_v17 = vrot.slane %v653_v5, 4 }
  0x92   : > { %v1245_v36 = vor.u32 %v1244_v23, %v1241_v22  ;;  %v933_v41 = vld [vmem:[#allocation2 + $0x54] sm:$0xf]  ;;  %v1572_v53 = vld [vmem:[#allocation2 + $0x18] sm:$0xe]  ;;  %v1573_v42 = vld [vmem:[#allocation2 + $0x1c] sm:$0xf]  ;;  %v362_v22 = vadd.f32 %v7636_v29, %v323_v60 }
  0x93   : > { %v666_v43 = vrot.slane %v661_v14, 4  ;;  %v670_v21 = vrot.slane %v668_v18, 7  ;;  %v678_v45 = vrot.slane %v676_v3, 7  ;;  %v1574_v13 = vld [vmem:[#allocation2 + $0x20] sm:$0x1]  ;;  %v1250_v44 = vrot.slane %v1248_v37, 5 }
  0x94   : > { %v1246_v56 = vrot.slane %v1245_v36, 4  ;;  %v1254_v46 = vrot.slane %v1252_v38, 4  ;;  %v1260_v47 = vrot.slane %v1258_v39, 5  ;;  %v937_v48 = vld [vmem:[#allocation2 + $0x5c] sm:$0x1]  ;;  %v665_v50 = vsel %vm7368_vm10, %v657_v17, %v664_v34  ;;  %v7013_v6 = vld [vmem:[%s8739_s3 + $0x150] sm:$0xff]  }
  0x95   : > { %v6988_v24 = vld [vmem:[%s8739_s3 + $0x1b8] sm:$0xff]   ;;  %v931_v49 = vsel %vm7354_vm8, %v666_v43, %v930_v27  ;;  %v673_v51 = vor.u32 %v671_v28, %v670_v21  ;;  %v674_v15 = vrot.slane %v670_v21, 4  ;;  %v6983_v57 = vld [vmem:[#allocation3 + $0x8] ss:$36 sps:$4 sm:$0xff]   ;;  %929 = vst [vmem:[#allocation2 + $0x4c] sm:$0xf] %v665_v50  ;;  %6605 = vmatprep.subr.bf16.mxu0 %v7013_v6 }
  0x96   : > { %v285_v52 = vld [vmem:[%s7297_s26 + $0x78] sm:$0xff]  ;;  %v1251_v54 = vsel %vm7329_vm4, %v1246_v56, %v1250_v44  ;;  %v1255_v55 = vor.u32 %v1254_v46, %v1250_v44  ;;  %932 = vst [vmem:[#allocation2 + $0x50] sm:$0x1] %v931_v49  ;;  %v6993_v58 = vld [vmem:[#allocation3 + $0x54] ss:$36 sps:$4 sm:$0xff]   ;;  %v679_v59 = vshll.u32 %v7688_v63, 16  ;;  %5172 = vmatmul.mubr.bf16.vlgmr.msra.gmra.mxu1 %v6983_v57 }
  0x97   : > { %1544 = vst [vmem:[#allocation3 + $0x16c] sm:$0xf] %v1251_v54  ;;  %v683_v61 = vrot.slane %v678_v45, 4  ;;  %v934_v62 = vsel %vm7360_vm9, %v673_v51, %v933_v41  ;;  %v6073_v1 = vrot.slane %v1572_v53, 9  ;;  %v1681_v2 = vrot.slane %v1573_v42, 5  ;;  %v7002_v63 = vld [vmem:[%s8739_s3 + $0x1f0] sm:$0xff]   ;;  %6708 = vmatpush3.bf16.msra.mxu1 %v6988_v24  ;;  %5179 = vmatprep.mubr.bf16.mxu1 %v6993_v58 }
  0x98   : > { %v1256_v8 = vrot.slane %v1255_v55, 4  ;;  %v681_v10 = vor.u32 %v679_v59, %v678_v45  ;;  %935 = vst [vmem:[#allocation2 + $0x54] sm:$0xf] %v934_v62  ;;  %v1684_v11 = vrot.slane %v1574_v13, 5  ;;  %v324_v5 = vmul.f32 %v7600_v31, %v285_v52  ;;  %v1015_v14 = vld [vmem:[#allocation2 + $0x48] sm:$0xf]  ;;  %6709 = vmatprep.subr.bf16.mxu1 %v7002_v63 }
  0x99   : > { %v1085_v16 = vld [vmem:[#allocation2 + $0x48] sm:$0xf]  ;;  %v938_v18 = vsel %vm7354_vm8, %v683_v61, %v937_v48  ;;  %v1682_v3 = vsel %vm7612_vm13, %v6073_v1, %v1681_v2  ;;  %v1683_v19 = vrot.slane %v1681_v2, 4  ;;  %v7006_v20 = vld [vmem:[%s8739_s3 + $0x1b0] sm:$0xff]   ;;  %1047 = vst [vmem:[#allocation3 + $0x1b0] sm:$0xf] %v1015_v14 }
  0x9a   : > { %v7014_v26 = vld [vmem:[%s8739_s3 + $0x110] sm:$0xff]   ;;  %v1261_v23 = vsel %vm7329_vm4, %v1256_v8, %v1260_v47  ;;  %v1263_v25 = vshrl.u32 %v1085_v16, 16  ;;  %v1266_v27 = vshll.u32 %v1085_v16, 16  ;;  %v682_v28 = vsel %vm7368_vm10, %v674_v15, %v681_v10  ;;  %939 = vst [vmem:[#allocation2 + $0x5c] sm:$0x1] %v938_v18 }
  0x9b   : > { %1813 = vst [vmem:[#allocation3 + $0x98] sm:$0xf] %v1682_v3  ;;  %v1575_v30 = vld [vmem:[#allocation2 + $0x24] sm:$0xe]  ;;  %v7732_v32 = vld [vmem:[#allocation2 + $0x28] sm:$0xf]  ;;  %v1685_v33 = vsel %vm7612_vm13, %v1683_v19, %v1684_v11  ;;  %v363_v34 = vadd.f32 %v7636_v29, %v324_v5  ;;  %6606 = vmatpush3.bf16.msra.mxu0 %v7014_v26  ;;  %6710 = vmatpush3.bf16.msra.mxu1 %v7006_v20 }
  0x9c   : > { %1545 = vst [vmem:[#allocation3 + $0x190] sm:$0xf] %v1261_v23  ;;  %936 = vst [vmem:[#allocation2 + $0x58] sm:$0xf] %v682_v28  ;;  %v394_v35 = vmax.f32 %v362_v22, 0.0  ;;  %v6074_v37 = vrot.slane %v1575_v30, 9 }
  0x9d   : > { %v7737_v36 = vld [vmem:[#allocation2 + $0x2c] sm:$0x1]  ;;  %v1847_v38 = vld [vmem:[#allocation2 + $0x30] sm:$0xf]  ;;  %v1265_v39 = vrot.slane %v1263_v25, 4  ;;  %v1268_v41 = vrot.slane %v1266_v27, 5 }
  0x9e   : > { %v6996_v53 = vld [vmem:[#allocation3 + $0x50] ss:$36 sps:$4 sm:$0xff]   ;;  %1814 = vst [vmem:[#allocation3 + $0xbc] sm:$0xf] %v1685_v33  ;;  %v1688_v42 = vrot.slane %v7732_v32, 5  ;;  %v1691_v17 = vrot.slane %v7737_v36, 5  ;;  %v6353_v0 = vpack.c.bf16 %v394_v35, %v394_v35 }
  0x9f   : > { %v1848_v43 = vld [vmem:[#allocation2 + $0x34] sm:$0xf]  ;;  %1879 = vst [vmem:[#allocation3 + $0xe4] sm:$0xf] %v1847_v38  ;;  %v1016_v21 = vld [vmem:[#allocation2 + $0x4c] sm:$0xf]  ;;  %v1269_v56 = vor.u32 %v1268_v41, %v1265_v39  ;;  %5180 = vmatmul.mubr.bf16.gmra.mxu1 %v6996_v53 }
  0xa0   : > { %v1086_v45 = vld [vmem:[#allocation2 + $0x4c] sm:$0xf]  ;;  %v1087_v13 = vld [vmem:[#allocation2 + $0x50] sm:$0x1]  ;;  %1880 = vst [vmem:[#allocation3 + $0x108] sm:$0xf] %v1848_v43  ;;  %v1689_v51 = vsel %vm7612_vm13, %v6074_v37, %v1688_v42 }
  0xa1   : > { %1048 = vst [vmem:[#allocation3 + $0x1d4] sm:$0xf] %v1016_v21  ;;  %v1272_v44 = vshll.u32 %v1086_v45, 16  ;;  %v1276_v46 = vshrl.u32 %v1086_v45, 16  ;;  %v1282_v47 = vshll.u32 %v1087_v13, 16  ;;  %v395_v50 = vmax.f32 %v363_v34, 0.0 }
  0xa2   : > { %v1017_v48 = vld [vmem:[#allocation2 + $0x54] sm:$0xf]  ;;  %v685_v49 = vshrl.u32 %v6353_v0, 16  ;;  %v1270_v15 = vrot.slane %v1269_v56, 4  ;;  %1815 = vst [vmem:[#allocation3 + $0xe0] sm:$0xf] %v1689_v51 }
  0xa3   : > { %v1088_v24 = vld [vmem:[#allocation2 + $0x54] sm:$0xf]  ;;  %v1274_v52 = vrot.slane %v1272_v44, 5  ;;  %v1278_v54 = vrot.slane %v1276_v46, 4  ;;  %v1284_v55 = vrot.slane %v1282_v47, 5  ;;  %v6354_v8 = vpack.c.bf16 %v395_v50, %v395_v50  ;;  %v286_v20 = vld [vmem:[%s7297_s26 + $0x80] sm:$0xff] }
  0xa4   : > { %1049 = vst [vmem:[#allocation3 + $0x1f8] sm:$0xf] %v1017_v48  ;;  %v1090_v57 = vld [vmem:[#allocation2 + $0x5c] sm:$0x1]  ;;  %v1287_v58 = vshrl.u32 %v1088_v24, 16  ;;  %v1290_v59 = vshll.u32 %v1088_v24, 16  ;;  %v325_v28 = vmul.f32 %v7600_v31, %v286_v20 }
  0xa5   : > { %v7745_v60 = vrot.slane %v685_v49, 7  ;;  %v6981_v61 = vld [vmem:[#allocation3 + $0x16c] ss:$36 sps:$4 sm:$0xff]   ;;  %v1275_v1 = vsel %vm7329_vm4, %v1270_v15, %v1274_v52  ;;  %v1279_v2 = vor.u32 %v1278_v54, %v1274_v52  ;;  %v1306_v6 = vshll.u32 %v1090_v57, 16  ;;  %v1018_v10 = vld [vmem:[#allocation2 + $0x58] sm:$0xf] }
  0xa6   : > { %v6987_v62 = vld [vmem:[#allocation3 + $0x168] ss:$36 sps:$4 sm:$0xff]   ;;  %1546 = vst [vmem:[#allocation3 + $0x1b4] sm:$0xf] %v1275_v1  ;;  %v1089_v11 = vld [vmem:[#allocation2 + $0x58] sm:$0xf]  ;;  %5050 = vmatprep.mubr.bf16.mxu0 %v6981_v61 }
  0xa7   : > { %v1289_v63 = vrot.slane %v1287_v58, 4  ;;  %v1292_v5 = vrot.slane %v1290_v59, 5  ;;  %v1280_v14 = vrot.slane %v1279_v2, 4  ;;  %1050 = vst [vmem:[#allocation3 + $0x21c] sm:$0xf] %v1018_v10  ;;  %v1296_v16 = vshll.u32 %v1089_v11, 16  ;;  %5051 = vmatmul.mubr.bf16.gmra.mxu0 %v6987_v62 }
  0xa8   : > { %v1300_v18 = vshrl.u32 %v1089_v11, 16  ;;  %v1308_v3 = vrot.slane %v1306_v6, 5  ;;  %v940_v19 = vld [vmem:[#allocation2 + $0x60] sm:$0xf]  ;;  %v6999_v26 = vld [vmem:[#allocation3 + $0x9c] ss:$36 sps:$4 sm:$0xff]  }
  0xa9   : > { %v1293_v22 = vor.u32 %v1292_v5, %v1289_v63  ;;  %v7004_v23 = vld [vmem:[#allocation3 + $0x98] ss:$36 sps:$4 sm:$0xff]   ;;  %v688_v25 = vshll.u32 %v6353_v0, 16  ;;  %v691_v27 = vrot.slane %v7745_v60, 4  ;;  %v1285_v30 = vsel %vm7329_vm4, %v1280_v14, %v1284_v55  ;;  %v287_v37 = vld [vmem:[%s7297_s26 + $0x88] sm:$0xff]  ;;  %5187 = vmatprep.mubr.bf16.mxu1 %v6999_v26 }
  0xaa   : > { %v1298_v33 = vrot.slane %v1296_v16, 5  ;;  %v1302_v34 = vrot.slane %v1300_v18, 4  ;;  %v693_v35 = vshrl.u32 %v6354_v8, 16  ;;  %1547 = vst [vmem:[#allocation3 + $0x1d8] sm:$0xf] %v1285_v30  ;;  %v696_v41 = vshll.u32 %v6354_v8, 16  ;;  %5188 = vmatmul.mubr.bf16.gmra.mxu1 %v7004_v23 }
  0xab   : > { %v1294_v38 = vrot.slane %v1293_v22, 4  ;;  %v690_v39 = vor.u32 %v688_v25, %v7745_v60  ;;  %v1690_v53 = vrot.slane %v1688_v42, 4  ;;  %v944_v45 = vld [vmem:[#allocation2 + $0x68] sm:$0x1]  ;;  %v326_v13 = vmul.f32 %v7600_v31, %v287_v37  ;;  %v1578_v42 = vld [vmem:[#allocation2 + $0x30] sm:$0xe] }
  0xac   : > { %v1303_v43 = vor.u32 %v1302_v34, %v1298_v33  ;;  %v695_v21 = vrot.slane %v693_v35, 7  ;;  %v364_v0 = vadd.f32 %v7636_v29, %v325_v28  ;;  %v7019_v56 = vld [vmem:[%s8739_s3 + $0x1e8] sm:$0xff]   ;;  %v1579_v47 = vld [vmem:[#allocation2 + $0x34] sm:$0xf]  ;;  %v1580_v48 = vld [vmem:[#allocation2 + $0x38] sm:$0x1] }
  0xad   : > { %v1299_v44 = vsel %vm7329_vm4, %v1294_v38, %v1298_v33  ;;  %v941_v46 = vsel %vm7360_vm9, %v690_v39, %v940_v19  ;;  %v1692_v32 = vsel %vm7612_vm13, %v1690_v53, %v1691_v17  ;;  %v365_v51 = vadd.f32 %v7636_v29, %v326_v13  ;;  %v1849_v15 = vld [vmem:[#allocation2 + $0x3c] sm:$0xf]  ;;  %6711 = vmatprep.subr.bf16.mxu1 %v7019_v56  ;;  %v7022_v36 = vld [vmem:[%s8739_s3 + $0x1a8] sm:$0xff]   ;;  %v1850_v57 = vld [vmem:[#allocation2 + $0x40] sm:$0xf] }
  0xae   : > { %v1304_v24 = vrot.slane %v1303_v43, 4  ;;  %1548 = vst [vmem:[#allocation3 + $0x1fc] sm:$0xf] %v1299_v44  ;;  %v698_v50 = vor.u32 %v696_v41, %v695_v21  ;;  %v700_v49 = vrot.slane %v695_v21, 4  ;;  %942 = vst [vmem:[#allocation2 + $0x60] sm:$0xf] %v941_v46  ;;  %6712 = vmatpush3.bf16.msra.mxu1 %v7022_v36 }
  0xaf   : > { %1816 = vst [vmem:[#allocation3 + $0x104] sm:$0xf] %v1692_v32  ;;  %v396_v17 = vmax.f32 %v364_v0, 0.0  ;;  %v6075_v52 = vrot.slane %v1578_v42, 9  ;;  %v1695_v54 = vrot.slane %v1579_v47, 5  ;;  %v1698_v55 = vrot.slane %v1580_v48, 5 }
  0xb0   : > { %1881 = vst [vmem:[#allocation3 + $0x12c] sm:$0xf] %v1849_v15  ;;  %v1309_v58 = vsel %vm7329_vm4, %v1304_v24, %v1308_v3  ;;  %v699_v59 = vsel %vm7368_vm10, %v691_v27, %v698_v50  ;;  %v945_v60 = vsel %vm7354_vm8, %v700_v49, %v944_v45  ;;  %v397_v61 = vmax.f32 %v365_v51, 0.0  ;;  %1882 = vst [vmem:[#allocation3 + $0x150] sm:$0xf] %v1850_v57  ;;  %v288_v62 = vld [vmem:[%s7297_s26 + $0x90] sm:$0xff] }
  0xb1   : > { %1549 = vst [vmem:[#allocation3 + $0x220] sm:$0xf] %v1309_v58  ;;  %943 = vst [vmem:[#allocation2 + $0x64] sm:$0xf] %v699_v59  ;;  %v6355_v1 = vpack.c.bf16 %v396_v17, %v396_v17  ;;  %v1696_v2 = vsel %vm7612_vm13, %v6075_v52, %v1695_v54  ;;  %v1697_v6 = vrot.slane %v1695_v54, 4  ;;  %v289_v8 = vld [vmem:[%s7297_s26 + $0x98] sm:$0xff]  ;;  %v327_v10 = vmul.f32 %v7600_v31, %v288_v62 }
  0xb2   : > { %946 = vst [vmem:[#allocation2 + $0x68] sm:$0x1] %v945_v60  ;;  %v6991_v11 = vld [vmem:[#allocation3 + $0x1b4] ss:$36 sps:$4 sm:$0xff]   ;;  %v6356_v5 = vpack.c.bf16 %v397_v61, %v397_v61  ;;  %1817 = vst [vmem:[#allocation3 + $0x128] sm:$0xf] %v1696_v2  ;;  %v328_v14 = vmul.f32 %v7600_v31, %v289_v8 }
  0xb3   : > { %v6995_v63 = vld [vmem:[#allocation3 + $0x1b0] ss:$36 sps:$4 sm:$0xff]   ;;  %v702_v16 = vshrl.u32 %v6355_v1, 16  ;;  %v705_v18 = vshll.u32 %v6355_v1, 16  ;;  %v1699_v3 = vsel %vm7612_vm13, %v1697_v6, %v1698_v55  ;;  %v366_v19 = vadd.f32 %v7636_v29, %v327_v10  ;;  %5058 = vmatprep.mubr.bf16.mxu0 %v6991_v11  ;;  %v7009_v33 = vld [vmem:[#allocation3 + $0xe4] ss:$36 sps:$4 sm:$0xff]  }
  0xb4   : > { %v710_v20 = vshrl.u32 %v6356_v5, 16  ;;  %v713_v22 = vshll.u32 %v6356_v5, 16  ;;  %v947_v26 = vld [vmem:[#allocation2 + $0x6c] sm:$0xf]  ;;  %1818 = vst [vmem:[#allocation3 + $0x14c] sm:$0xf] %v1699_v3  ;;  %v367_v23 = vadd.f32 %v7636_v29, %v328_v14  ;;  %5059 = vmatmul.mubr.bf16.gmra.mxu0 %v6995_v63  ;;  %5195 = vmatprep.mubr.bf16.mxu1 %v7009_v33 }
  0xb5   : > { %v1019_v25 = vld [vmem:[#allocation2 + $0x60] sm:$0xf]  ;;  %v704_v28 = vrot.slane %v702_v16, 7  ;;  %v398_v39 = vmax.f32 %v366_v19, 0.0  ;;  %v7027_v53 = vld [vmem:[%s8739_s3 + $0x148] sm:$0xff]  }
  0xb6   : > { %v1091_v27 = vld [vmem:[#allocation2 + $0x60] sm:$0xf]  ;;  %1051 = vst [vmem:[#allocation3 + $0x240] sm:$0xf] %v1019_v25  ;;  %v712_v34 = vrot.slane %v710_v20, 7  ;;  %v399_v41 = vmax.f32 %v367_v23, 0.0  ;;  %6607 = vmatprep.subr.bf16.mxu0 %v7027_v53 }
  0xb7   : > { %v1311_v31 = vshrl.u32 %v1091_v27, 16  ;;  %v1314_v30 = vshll.u32 %v1091_v27, 16  ;;  %v7012_v35 = vld [vmem:[#allocation3 + $0xe0] ss:$36 sps:$4 sm:$0xff]   ;;  %v707_v37 = vor.u32 %v705_v18, %v704_v28  ;;  %v708_v38 = vrot.slane %v704_v28, 4  ;;  %v7030_v36 = vld [vmem:[%s8739_s3 + $0x108] sm:$0xff]  }
  0xb8   : > { %v6997_v43 = vld [vmem:[#allocation3 + $0x1fc] ss:$36 sps:$4 sm:$0xff]   ;;  %v715_v13 = vor.u32 %v713_v22, %v712_v34  ;;  %v1020_v56 = vld [vmem:[#allocation2 + $0x64] sm:$0xf]  ;;  %5196 = vmatmul.mubr.bf16.gmra.mxu1 %v7012_v35  ;;  %v6357_v42 = vpack.c.bf16 %v398_v39, %v398_v39  ;;  %v6358_v47 = vpack.c.bf16 %v399_v41, %v399_v41  ;;  %v7796_v48 = vld [vmem:[#allocation2 + $0x3c] sm:$0xe]  ;;  %6608 = vmatpush3.bf16.msra.mxu0 %v7030_v36 }
  0xb9   : > { %v7003_v21 = vld [vmem:[#allocation3 + $0x1f8] ss:$36 sps:$4 sm:$0xff]   ;;  %v1313_v45 = vrot.slane %v1311_v31, 4  ;;  %v1092_v44 = vld [vmem:[#allocation2 + $0x64] sm:$0xf]  ;;  %v948_v32 = vsel %vm7360_vm9, %v707_v37, %v947_v26  ;;  %5066 = vmatprep.mubr.bf16.mxu0 %v6997_v43  ;;  %v1316_v24 = vrot.slane %v1314_v30, 5 }
  0xba   : > { %v951_v0 = vld [vmem:[#allocation2 + $0x74] sm:$0x1]  ;;  %v1093_v46 = vld [vmem:[#allocation2 + $0x68] sm:$0x1]  ;;  %1052 = vst [vmem:[#allocation3 + $0x264] sm:$0xf] %v1020_v56  ;;  %v716_v17 = vsel %vm7368_vm10, %v708_v38, %v715_v13 }
  0xbb   : > { %v1320_v50 = vshll.u32 %v1092_v44, 16  ;;  %v1324_v49 = vshrl.u32 %v1092_v44, 16  ;;  %v1330_v51 = vshll.u32 %v1093_v46, 16  ;;  %949 = vst [vmem:[#allocation2 + $0x6c] sm:$0xf] %v948_v32  ;;  %v717_v52 = vrot.slane %v712_v34, 4 }
  0xbc   : > { %v7798_v15 = vld [vmem:[#allocation2 + $0x40] sm:$0xf]  ;;  %v7017_v54 = vld [vmem:[#allocation3 + $0x12c] ss:$36 sps:$4 sm:$0xff]   ;;  %v1317_v57 = vor.u32 %v1316_v24, %v1313_v45  ;;  %950 = vst [vmem:[#allocation2 + $0x70] sm:$0xf] %v716_v17  ;;  %5067 = vmatmul.mubr.bf16.gmra.mxu0 %v7003_v21 }
  0xbd   : > { %v7021_v55 = vld [vmem:[#allocation3 + $0x128] ss:$36 sps:$4 sm:$0xff]   ;;  %v1322_v58 = vrot.slane %v1320_v50, 5  ;;  %v1326_v59 = vrot.slane %v1324_v49, 4  ;;  %v1332_v60 = vrot.slane %v1330_v51, 5  ;;  %v952_v1 = vsel %vm7354_vm8, %v717_v52, %v951_v0  ;;  %5203 = vmatprep.mubr.bf16.mxu1 %v7017_v54  ;;  %v291_v11 = vld [vmem:[%s7297_s26 + $0xa8] sm:$0xff] }
  0xbe   : > { %v7805_v61 = vld [vmem:[#allocation2 + $0x44] sm:$0x1]  ;;  %v719_v2 = vshrl.u32 %v6357_v42, 16  ;;  %v722_v6 = vshll.u32 %v6357_v42, 16  ;;  %v727_v8 = vshrl.u32 %v6358_v47, 16  ;;  %v1318_v63 = vrot.slane %v1317_v57, 4 }
  0xbf   : > { %v290_v62 = vld [vmem:[%s7297_s26 + $0xa0] sm:$0xff]  ;;  %v1851_v10 = vld [vmem:[#allocation2 + $0x48] sm:$0xf]  ;;  %v1327_v5 = vor.u32 %v1326_v59, %v1322_v58  ;;  %953 = vst [vmem:[#allocation2 + $0x74] sm:$0x1] %v952_v1  ;;  %v730_v14 = vshll.u32 %v6358_v47, 16 }
  0xc0   : > { %v954_v16 = vld [vmem:[#allocation2 + $0x78] sm:$0xf]  ;;  %v958_v18 = vld [vmem:[#allocation2 + $0x80] sm:$0x1]  ;;  %v6076_v3 = vrot.slane %v7796_v48, 9  ;;  %v721_v22 = vrot.slane %v719_v2, 7  ;;  %v1323_v27 = vsel %vm7329_vm4, %v1318_v63, %v1322_v58  ;;  %5204 = vmatmul.mubr.bf16.gmra.mxu1 %v7021_v55 }
  0xc1   : > { %v1852_v19 = vld [vmem:[#allocation2 + $0x4c] sm:$0xf]  ;;  %1883 = vst [vmem:[#allocation3 + $0x174] sm:$0xf] %v1851_v10  ;;  %v7035_v20 = vld [vmem:[%s8739_s3 + $0x1e0] sm:$0xff]   ;;  %v729_v26 = vrot.slane %v727_v8, 7 }
  0xc2   : > { %v1702_v23 = vrot.slane %v7798_v15, 5  ;;  %v1705_v25 = vrot.slane %v7805_v61, 5  ;;  %1884 = vst [vmem:[#allocation3 + $0x198] sm:$0xf] %v1852_v19  ;;  %v1328_v28 = vrot.slane %v1327_v5, 4  ;;  %6713 = vmatprep.subr.bf16.mxu1 %v7035_v20  ;;  %v7038_v34 = vld [vmem:[%s8739_s3 + $0x1a0] sm:$0xff]   ;;  %v724_v38 = vor.u32 %v722_v6, %v721_v22 }
  0xc3   : > { %v7822_v31 = vld [vmem:[%s8737_s1] ss:$0 sm:$0xff]  ;;  %1550 = vst [vmem:[#allocation3 + $0x244] sm:$0xf] %v1323_v27  ;;  %v1021_v35 = vld [vmem:[#allocation2 + $0x6c] sm:$0xf]  ;;  %v732_v41 = vor.u32 %v730_v14, %v729_v26  ;;  %6714 = vmatpush3.bf16.msra.mxu1 %v7038_v34 }
  0xc4   : > { %v329_v30 = vmul.f32 %v7822_v31, %v290_v62  ;;  %v330_v33 = vmul.f32 %v7822_v31, %v291_v11  ;;  %v1094_v37 = vld [vmem:[#allocation2 + $0x6c] sm:$0xf]  ;;  %v725_v39 = vrot.slane %v721_v22, 4  ;;  %v734_v53 = vrot.slane %v729_v26, 4  ;;  %1053 = vst [vmem:[#allocation3 + $0x288] sm:$0xf] %v1021_v35 }
  0xc5   : > { %v1333_v43 = vsel %vm7329_vm4, %v1328_v28, %v1332_v60  ;;  %v1335_v21 = vshrl.u32 %v1094_v37, 16  ;;  %v1338_v45 = vshll.u32 %v1094_v37, 16  ;;  %v1703_v13 = vsel %vm7612_vm13, %v6076_v3, %v1702_v23  ;;  %v1022_v0 = vld [vmem:[#allocation2 + $0x70] sm:$0xf]  ;;  %v7039_v47 = vld [vmem:[%s8739_s3 + $0x140] sm:$0xff]   ;;  %v7051_v3 = vld [vmem:[%s8739_s3 + $0x1d8] sm:$0xff]  }
  0xc6   : > { %1551 = vst [vmem:[#allocation3 + $0x268] sm:$0xf] %v1333_v43  ;;  %v1095_v56 = vld [vmem:[#allocation2 + $0x70] sm:$0xf]  ;;  %v733_v44 = vsel %vm7368_vm10, %v725_v39, %v732_v41  ;;  %v955_v46 = vsel %vm7360_vm9, %v724_v38, %v954_v16  ;;  %v959_v32 = vsel %vm7354_vm8, %v734_v53, %v958_v18  ;;  %v1704_v42 = vrot.slane %v1702_v23, 4  ;;  %6609 = vmatprep.subr.bf16.mxu0 %v7039_v47  ;;  %v7040_v61 = vld [vmem:[%s8739_s3 + $0x100] sm:$0xff]  }
  0xc7   : > { %1819 = vst [vmem:[#allocation3 + $0x170] sm:$0xf] %v1703_v13  ;;  %1054 = vst [vmem:[#allocation3 + $0x2ac] sm:$0xf] %v1022_v0  ;;  %v1337_v48 = vrot.slane %v1335_v21, 4  ;;  %v1340_v24 = vrot.slane %v1338_v45, 5  ;;  %v368_v36 = vadd.f32 %v7636_v29, %v329_v30  ;;  %v369_v17 = vadd.f32 %v7636_v29, %v330_v33  ;;  %6610 = vmatpush3.bf16.msra.mxu0 %v7040_v61 }
  0xc8   : > { %v1344_v50 = vshll.u32 %v1095_v56, 16  ;;  %v1348_v49 = vshrl.u32 %v1095_v56, 16  ;;  %956 = vst [vmem:[#allocation2 + $0x78] sm:$0xf] %v955_v46  ;;  %957 = vst [vmem:[#allocation2 + $0x7c] sm:$0xf] %v733_v44  ;;  %v1706_v15 = vsel %vm7612_vm13, %v1704_v42, %v1705_v25  ;;  %6715 = vmatprep.subr.bf16.mxu1 %v7051_v3 }
  0xc9   : > { %960 = vst [vmem:[#allocation2 + $0x80] sm:$0x1] %v959_v32  ;;  %v1096_v51 = vld [vmem:[#allocation2 + $0x74] sm:$0x1]  ;;  %v1584_v52 = vld [vmem:[#allocation2 + $0x48] sm:$0xe]  ;;  %v1341_v55 = vor.u32 %v1340_v24, %v1337_v48 }
  0xca   : > { %v1585_v54 = vld [vmem:[#allocation2 + $0x4c] sm:$0xf]  ;;  %v1346_v57 = vrot.slane %v1344_v50, 5  ;;  %v1350_v58 = vrot.slane %v1348_v49, 4  ;;  %v1354_v59 = vshll.u32 %v1096_v51, 16  ;;  %v400_v62 = vmax.f32 %v368_v36, 0.0 }
  0xcb   : > { %1820 = vst [vmem:[#allocation3 + $0x194] sm:$0xf] %v1706_v15  ;;  %v1586_v60 = vld [vmem:[#allocation2 + $0x50] sm:$0x1]  ;;  %v401_v1 = vmax.f32 %v369_v17, 0.0  ;;  %v6077_v2 = vrot.slane %v1584_v52, 9 }
  0xcc   : > { %v1709_v6 = vrot.slane %v1585_v54, 5  ;;  %v1853_v8 = vld [vmem:[#allocation2 + $0x54] sm:$0xf]  ;;  %v1342_v10 = vrot.slane %v1341_v55, 4  ;;  %v1351_v29 = vor.u32 %v1350_v58, %v1346_v57  ;;  %v1356_v11 = vrot.slane %v1354_v59, 5  ;;  %v7863_v49 = vld [vmem:[%s8739_s3 + $0x238] sm:$0xff]  }
  0xcd   : > { %v1712_v63 = vrot.slane %v1586_v60, 5  ;;  %v1854_v5 = vld [vmem:[#allocation2 + $0x58] sm:$0xf]  ;;  %1885 = vst [vmem:[#allocation3 + $0x1bc] sm:$0xf] %v1853_v8  ;;  %v6359_v14 = vpack.c.bf16 %v400_v62, %v400_v62  ;;  %v6360_v38 = vpack.c.bf16 %v401_v1, %v401_v1  ;;  %6843 = vmatprep.subr.bf16.mxu0 %v7863_v49 }
  0xce   : > { %v1710_v16 = vsel %vm7612_vm13, %v6077_v2, %v1709_v6  ;;  %v1711_v18 = vrot.slane %v1709_v6, 4  ;;  %1886 = vst [vmem:[#allocation3 + $0x1e0] sm:$0xf] %v1854_v5  ;;  %v7007_v19 = vld [vmem:[#allocation3 + $0x244] ss:$36 sps:$4 sm:$0xff]   ;;  %v1347_v22 = vsel %vm7329_vm4, %v1342_v10, %v1346_v57  ;;  %v1352_v26 = vrot.slane %v1351_v29, 4 }
  0xcf   : > { %v7011_v20 = vld [vmem:[#allocation3 + $0x240] ss:$36 sps:$4 sm:$0xff]   ;;  %1821 = vst [vmem:[#allocation3 + $0x1b8] sm:$0xf] %v1710_v16  ;;  %1552 = vst [vmem:[#allocation3 + $0x28c] sm:$0xf] %v1347_v22  ;;  %5074 = vmatprep.mubr.bf16.mxu0 %v7007_v19 }
  0xd0   : > { %v1023_v23 = vld [vmem:[#allocation2 + $0x78] sm:$0xf]  ;;  %v1024_v25 = vld [vmem:[#allocation2 + $0x7c] sm:$0xf]  ;;  %v1713_v28 = vsel %vm7612_vm13, %v1711_v18, %v1712_v63  ;;  %v1357_v30 = vsel %vm7329_vm4, %v1352_v26, %v1356_v11  ;;  %v1099_v34 = vld [vmem:[#allocation2 + $0x80] sm:$0x1]  ;;  %5075 = vmatmul.mubr.bf16.gmra.mxu0 %v7011_v20 }
  0xd1   : > { %v1097_v27 = vld [vmem:[#allocation2 + $0x78] sm:$0xf]  ;;  %1055 = vst [vmem:[#allocation3 + $0x2d0] sm:$0xf] %v1023_v23  ;;  %1056 = vst [vmem:[#allocation3 + $0x2f4] sm:$0xf] %v1024_v25 }
  0xd2   : > { %v1098_v33 = vld [vmem:[#allocation2 + $0x7c] sm:$0xf]  ;;  %v1359_v35 = vshrl.u32 %v1097_v27, 16  ;;  %v1362_v37 = vshll.u32 %v1097_v27, 16  ;;  %1822 = vst [vmem:[#allocation3 + $0x1dc] sm:$0xf] %v1713_v28 }
  0xd3   : > { %1553 = vst [vmem:[#allocation3 + $0x2b0] sm:$0xf] %v1357_v30  ;;  %v1368_v39 = vshll.u32 %v1098_v33, 16  ;;  %v1372_v41 = vshrl.u32 %v1098_v33, 16  ;;  %v1378_v53 = vshll.u32 %v1099_v34, 16  ;;  %v736_v43 = vshrl.u32 %v6359_v14, 16 }
  0xd4   : > { %v1361_v21 = vrot.slane %v1359_v35, 4  ;;  %v1364_v45 = vrot.slane %v1362_v37, 5  ;;  %v7025_v13 = vld [vmem:[#allocation3 + $0x174] ss:$36 sps:$4 sm:$0xff]   ;;  %v961_v42 = vld [vmem:[#allocation2 + $0x84] sm:$0xf] }
  0xd5   : > { %v7029_v0 = vld [vmem:[#allocation3 + $0x170] ss:$36 sps:$4 sm:$0xff]   ;;  %v1370_v56 = vrot.slane %v1368_v39, 5  ;;  %v1374_v44 = vrot.slane %v1372_v41, 4  ;;  %v1380_v46 = vrot.slane %v1378_v53, 5  ;;  %v738_v32 = vrot.slane %v736_v43, 7  ;;  %5211 = vmatprep.mubr.bf16.mxu1 %v7025_v13 }
  0xd6   : > { %v1365_v47 = vor.u32 %v1364_v45, %v1361_v21  ;;  %v739_v48 = vshll.u32 %v6359_v14, 16  ;;  %v744_v24 = vshrl.u32 %v6360_v38, 16  ;;  %v747_v50 = vshll.u32 %v6360_v38, 16  ;;  %5212 = vmatmul.mubr.bf16.gmra.mxu1 %v7029_v0  ;;  %v965_v36 = vld [vmem:[#allocation2 + $0x8c] sm:$0x1]  ;;  %v7055_v55 = vld [vmem:[%s8739_s3 + $0x198] sm:$0xff]  }
  0xd7   : > { %v1375_v51 = vor.u32 %v1374_v44, %v1370_v56  ;;  %v742_v15 = vrot.slane %v738_v32, 4  ;;  %v7033_v58 = vld [vmem:[#allocation3 + $0x1bc] ss:$36 sps:$4 sm:$0xff]   ;;  %v7020_v61 = vld [vmem:[#allocation3 + $0x288] ss:$36 sps:$4 sm:$0xff]   ;;  %6716 = vmatpush3.bf16.msra.mxu1 %v7055_v55 }
  0xd8   : > { %v1366_v17 = vrot.slane %v1365_v47, 4  ;;  %v741_v52 = vor.u32 %v739_v48, %v738_v32  ;;  %v746_v54 = vrot.slane %v744_v24, 7  ;;  %5219 = vmatprep.mubr.bf16.mxu1 %v7033_v58  ;;  %v1587_v10 = vld [vmem:[#allocation2 + $0x54] sm:$0xe]  ;;  %v1588_v29 = vld [vmem:[#allocation2 + $0x58] sm:$0xf] }
  0xd9   : > { %v1376_v57 = vrot.slane %v1375_v51, 4  ;;  %v7037_v59 = vld [vmem:[#allocation3 + $0x1b8] ss:$36 sps:$4 sm:$0xff]   ;;  %v1589_v5 = vld [vmem:[#allocation2 + $0x5c] sm:$0x1]  ;;  %v6078_v14 = vrot.slane %v1587_v10, 9 }
  0xda   : > { %v7015_v60 = vld [vmem:[#allocation3 + $0x28c] ss:$36 sps:$4 sm:$0xff]   ;;  %v1371_v62 = vsel %vm7329_vm4, %v1366_v17, %v1370_v56  ;;  %v749_v1 = vor.u32 %v747_v50, %v746_v54  ;;  %v751_v2 = vrot.slane %v746_v54, 4  ;;  %v962_v6 = vsel %vm7360_vm9, %v741_v52, %v961_v42  ;;  %v1855_v18 = vld [vmem:[#allocation2 + $0x60] sm:$0xf]  ;;  %v7066_v22 = vld [vmem:[%s8739_s3 + $0x1d0] sm:$0xff]  }
  0xdb   : > { %v1381_v8 = vsel %vm7329_vm4, %v1376_v57, %v1380_v46  ;;  %1554 = vst [vmem:[#allocation3 + $0x2d4] sm:$0xf] %v1371_v62  ;;  %963 = vst [vmem:[#allocation2 + $0x84] sm:$0xf] %v962_v6  ;;  %5082 = vmatprep.mubr.bf16.mxu0 %v7015_v60  ;;  %v1716_v16 = vrot.slane %v1588_v29, 5  ;;  %v1719_v3 = vrot.slane %v1589_v5, 5  ;;  %6717 = vmatprep.subr.bf16.mxu1 %v7066_v22 }
  0xdc   : > { %1555 = vst [vmem:[#allocation3 + $0x2f8] sm:$0xf] %v1381_v8  ;;  %v750_v11 = vsel %vm7368_vm10, %v742_v15, %v749_v1  ;;  %v966_v63 = vsel %vm7354_vm8, %v751_v2, %v965_v36  ;;  %5083 = vmatmul.mubr.bf16.gmra.mxu0 %v7020_v61  ;;  %v1856_v19 = vld [vmem:[#allocation2 + $0x64] sm:$0xf]  ;;  %1887 = vst [vmem:[#allocation3 + $0x204] sm:$0xf] %v1855_v18 }
  0xdd   : > { %964 = vst [vmem:[#allocation2 + $0x88] sm:$0xf] %v750_v11  ;;  %967 = vst [vmem:[#allocation2 + $0x8c] sm:$0x1] %v966_v63  ;;  %v1905_v20 = vld [vmem:[#allocation2 + $0xc] sm:$0xf]  ;;  %v1717_v26 = vsel %vm7612_vm13, %v6078_v14, %v1716_v16 }
  0xde   : > { %v1718_v23 = vrot.slane %v1716_v16, 4  ;;  %1888 = vst [vmem:[#allocation3 + $0x228] sm:$0xf] %v1856_v19  ;;  %v1906_v25 = vld [vmem:[#allocation2 + $0x10] sm:$0xf]  ;;  %v1954_v28 = vshrl.u32 %v1905_v20, 16  ;;  %5220 = vmatmul.mubr.bf16.gmra.mxu1 %v7037_v59 }
  0xdf   : > { %v1907_v27 = vld [vmem:[#allocation2 + $0x14] sm:$0x1]  ;;  %1823 = vst [vmem:[#allocation3 + $0x200] sm:$0xf] %v1717_v26  ;;  %v1957_v30 = vshll.u32 %v1905_v20, 16  ;;  %v1963_v33 = vshll.u32 %v1906_v25, 16 }
  0xe0   : > { %v1967_v34 = vshrl.u32 %v1906_v25, 16  ;;  %v1973_v35 = vshll.u32 %v1907_v27, 16  ;;  %v2401_v37 = vld [vmem:[#allocation2 + $0xc] sm:$0xe]  ;;  %v1720_v38 = vsel %vm7612_vm13, %v1718_v23, %v1719_v3  ;;  %v1956_v39 = vrot.slane %v1954_v28, 4  ;;  %v7070_v26 = vld [vmem:[%s8739_s3 + $0x190] sm:$0xff]  }
  0xe1   : > { %v2402_v41 = vld [vmem:[#allocation2 + $0x10] sm:$0xf]  ;;  %v6087_v53 = vrot.slane %v2401_v37, 9  ;;  %1824 = vst [vmem:[#allocation3 + $0x224] sm:$0xf] %v1720_v38  ;;  %v1959_v43 = vrot.slane %v1957_v30, 5  ;;  %6718 = vmatpush3.bf16.msra.mxu1 %v7070_v26 }
  0xe2   : > { %v1965_v21 = vrot.slane %v1963_v33, 5  ;;  %v1969_v45 = vrot.slane %v1967_v34, 4  ;;  %v1975_v13 = vrot.slane %v1973_v35, 5  ;;  %v1025_v0 = vld [vmem:[#allocation2 + $0x84] sm:$0xf]  ;;  %v2499_v46 = vrot.slane %v2402_v41, 5 }
  0xe3   : > { %v1100_v56 = vld [vmem:[#allocation2 + $0x84] sm:$0xf]  ;;  %v2403_v44 = vld [vmem:[#allocation2 + $0x14] sm:$0x1]  ;;  %v7023_v32 = vld [vmem:[#allocation3 + $0x2d4] ss:$36 sps:$4 sm:$0xff]   ;;  %v1960_v48 = vor.u32 %v1959_v43, %v1956_v39 }
  0xe4   : > { %v7028_v42 = vld [vmem:[#allocation3 + $0x2d0] ss:$36 sps:$4 sm:$0xff]   ;;  %1057 = vst [vmem:[#allocation3 + $0x318] sm:$0xf] %v1025_v0  ;;  %v1383_v47 = vshrl.u32 %v1100_v56, 16  ;;  %v1970_v24 = vor.u32 %v1969_v45, %v1965_v21  ;;  %v2500_v36 = vsel %vm7612_vm13, %v6087_v53, %v2499_v46  ;;  %5090 = vmatprep.mubr.bf16.mxu0 %v7023_v32  ;;  %v1386_v54 = vshll.u32 %v1100_v56, 16 }
  0xe5   : > { %v1026_v50 = vld [vmem:[#allocation2 + $0x88] sm:$0xf]  ;;  %v1102_v15 = vld [vmem:[#allocation2 + $0x8c] sm:$0x1]  ;;  %v1590_v17 = vld [vmem:[#allocation2 + $0x60] sm:$0xe]  ;;  %5091 = vmatmul.mubr.bf16.gmra.mxu0 %v7028_v42 }
  0xe6   : > { %v1101_v51 = vld [vmem:[#allocation2 + $0x88] sm:$0xf]  ;;  %1058 = vst [vmem:[#allocation3 + $0x33c] sm:$0xf] %v1026_v50  ;;  %v1385_v52 = vrot.slane %v1383_v47, 4  ;;  %v1402_v59 = vshll.u32 %v1102_v15, 16 }
  0xe7   : > { %v1392_v55 = vshll.u32 %v1101_v51, 16  ;;  %v1396_v57 = vshrl.u32 %v1101_v51, 16  ;;  %2641 = vst [vmem:[#allocation3 + $0x14] sm:$0xf] %v2500_v36  ;;  %v1591_v58 = vld [vmem:[#allocation2 + $0x64] sm:$0xf] }
  0xe8   : > { %v1961_v60 = vrot.slane %v1960_v48, 4  ;;  %v1971_v61 = vrot.slane %v1970_v24, 4  ;;  %v2501_v62 = vrot.slane %v2499_v46, 4  ;;  %v1388_v1 = vrot.slane %v1386_v54, 5  ;;  %v1592_v10 = vld [vmem:[#allocation2 + $0x68] sm:$0x1] }
  0xe9   : > { %v1394_v2 = vrot.slane %v1392_v55, 5  ;;  %v1398_v6 = vrot.slane %v1396_v57, 4  ;;  %v2502_v8 = vrot.slane %v2403_v44, 5  ;;  %v1404_v29 = vrot.slane %v1402_v59, 5  ;;  %v7041_v11 = vld [vmem:[#allocation3 + $0x204] ss:$36 sps:$4 sm:$0xff]  }
  0xea   : > { %v1966_v63 = vsel %vm7329_vm4, %v1961_v60, %v1965_v21  ;;  %v1976_v5 = vsel %vm7329_vm4, %v1971_v61, %v1975_v13  ;;  %v7046_v14 = vld [vmem:[#allocation3 + $0x200] ss:$36 sps:$4 sm:$0xff]   ;;  %v1389_v16 = vor.u32 %v1388_v1, %v1385_v52  ;;  %v6079_v19 = vrot.slane %v1590_v17, 9  ;;  %v1857_v20 = vld [vmem:[#allocation2 + $0x6c] sm:$0xf]  ;;  %5227 = vmatprep.mubr.bf16.mxu1 %v7041_v11  ;;  %v7096_v11 = vld [vmem:[%s8739_s3 + $0x1c0] sm:$0xff]  }
  0xeb   : > { %v1399_v18 = vor.u32 %v1398_v6, %v1394_v2  ;;  %2369 = vst [vmem:[#allocation3 + $0x10] sm:$0xf] %v1966_v63  ;;  %2370 = vst [vmem:[#allocation3 + $0x34] sm:$0xf] %v1976_v5  ;;  %v2503_v3 = vsel %vm7612_vm13, %v2501_v62, %v2502_v8  ;;  %v1858_v22 = vld [vmem:[#allocation2 + $0x70] sm:$0xf]  ;;  %5228 = vmatmul.mubr.bf16.gmra.mxu1 %v7046_v14 }
  0xec   : > { %2642 = vst [vmem:[#allocation3 + $0x38] sm:$0xf] %v2503_v3  ;;  %v1723_v23 = vrot.slane %v1591_v58, 5  ;;  %v1726_v25 = vrot.slane %v1592_v10, 5  ;;  %1889 = vst [vmem:[#allocation3 + $0x24c] sm:$0xf] %v1857_v20 }
  0xed   : > { %1890 = vst [vmem:[#allocation3 + $0x270] sm:$0xf] %v1858_v22  ;;  %v1908_v27 = vld [vmem:[#allocation2 + $0x18] sm:$0xf]  ;;  %v1909_v28 = vld [vmem:[#allocation2 + $0x1c] sm:$0xf] }
  0xee   : > { %v1390_v30 = vrot.slane %v1389_v16, 4  ;;  %v1400_v33 = vrot.slane %v1399_v18, 4  ;;  %v1910_v34 = vld [vmem:[#allocation2 + $0x20] sm:$0x1]  ;;  %v1978_v35 = vshrl.u32 %v1908_v27, 16  ;;  %v1981_v37 = vshll.u32 %v1908_v27, 16 }
  0xef   : > { %v1724_v38 = vsel %vm7612_vm13, %v6079_v19, %v1723_v23  ;;  %v1725_v39 = vrot.slane %v1723_v23, 4  ;;  %v1987_v41 = vshll.u32 %v1909_v28, 16  ;;  %v1991_v53 = vshrl.u32 %v1909_v28, 16  ;;  %v2404_v43 = vld [vmem:[#allocation2 + $0x18] sm:$0xe]  ;;  %v7081_v21 = vld [vmem:[%s8739_s3 + $0x1c8] sm:$0xff]  }
  0xf0   : > { %v1395_v45 = vsel %vm7329_vm4, %v1390_v30, %v1394_v2  ;;  %v1405_v13 = vsel %vm7329_vm4, %v1400_v33, %v1404_v29  ;;  %1825 = vst [vmem:[#allocation3 + $0x248] sm:$0xf] %v1724_v38  ;;  %v1980_v0 = vrot.slane %v1978_v35, 4  ;;  %v1983_v56 = vrot.slane %v1981_v37, 5  ;;  %v2405_v44 = vld [vmem:[#allocation2 + $0x1c] sm:$0xf]  ;;  %6719 = vmatprep.subr.bf16.mxu1 %v7081_v21 }
  0xf1   : > { %v2406_v46 = vld [vmem:[#allocation2 + $0x20] sm:$0x1]  ;;  %1556 = vst [vmem:[#allocation3 + $0x31c] sm:$0xf] %v1395_v45  ;;  %1557 = vst [vmem:[#allocation3 + $0x340] sm:$0xf] %v1405_v13  ;;  %v1727_v32 = vsel %vm7612_vm13, %v1725_v39, %v1726_v25 }
  0xf2   : > { %v1989_v42 = vrot.slane %v1987_v41, 5  ;;  %v1993_v47 = vrot.slane %v1991_v53, 4  ;;  %v1997_v48 = vshll.u32 %v1910_v34, 16  ;;  %1826 = vst [vmem:[#allocation3 + $0x26c] sm:$0xf] %v1727_v32  ;;  %v1984_v24 = vor.u32 %v1983_v56, %v1980_v0  ;;  %v7085_v36 = vld [vmem:[%s8739_s3 + $0x188] sm:$0xff]  }
  0xf3   : > { %v6088_v50 = vrot.slane %v2404_v43, 9  ;;  %v2506_v51 = vrot.slane %v2405_v44, 5  ;;  %v2509_v15 = vrot.slane %v2406_v46, 5  ;;  %6720 = vmatpush3.bf16.msra.mxu1 %v7085_v36  ;;  %v7045_v59 = vld [vmem:[#allocation3 + $0x14] ss:$36 sps:$4 sm:$0xff]   ;;  %v7100_v13 = vld [vmem:[%s8739_s3 + $0x180] sm:$0xff]  }
  0xf4   : > { %v1994_v17 = vor.u32 %v1993_v47, %v1989_v42  ;;  %v1999_v52 = vrot.slane %v1997_v48, 5  ;;  %v1985_v54 = vrot.slane %v1984_v24, 4  ;;  %v1593_v61 = vld [vmem:[#allocation2 + $0x6c] sm:$0xe]  ;;  %v1594_v62 = vld [vmem:[#allocation2 + $0x70] sm:$0xf]  ;;  %6721 = vmatprep.subr.bf16.mxu1 %v7096_v11 }
  0xf5   : > { %v2507_v55 = vsel %vm7612_vm13, %v6088_v50, %v2506_v51  ;;  %v2508_v58 = vrot.slane %v2506_v51, 4  ;;  %v1595_v1 = vld [vmem:[#allocation2 + $0x74] sm:$0x1]  ;;  %v6080_v8 = vrot.slane %v1593_v61, 9  ;;  %v1730_v10 = vrot.slane %v1594_v62, 5 }
  0xf6   : > { %v1995_v57 = vrot.slane %v1994_v17, 4  ;;  %2643 = vst [vmem:[#allocation3 + $0x5c] sm:$0xf] %v2507_v55  ;;  %v1990_v60 = vsel %vm7329_vm4, %v1985_v54, %v1989_v42  ;;  %v1859_v29 = vld [vmem:[#allocation2 + $0x78] sm:$0xf]  ;;  %v1733_v5 = vrot.slane %v1595_v1, 5 }
  0xf7   : > { %2371 = vst [vmem:[#allocation3 + $0x58] sm:$0xf] %v1990_v60  ;;  %v2510_v6 = vsel %vm7612_vm13, %v2508_v58, %v2509_v15  ;;  %1891 = vst [vmem:[#allocation3 + $0x294] sm:$0xf] %v1859_v29  ;;  %v7036_v14 = vld [vmem:[#allocation3 + $0x318] ss:$36 sps:$4 sm:$0xff]   ;;  %v1731_v18 = vsel %vm7612_vm13, %v6080_v8, %v1730_v10  ;;  %6722 = vmatpush3.bf16.msra.mxu1 %v7100_v13  ;;  %v6387_v13 = vpop.f32.mrf.mxu0 }
  0xf8   : > { %v2000_v2 = vsel %vm7329_vm4, %v1995_v57, %v1999_v52  ;;  %v7031_v63 = vld [vmem:[#allocation3 + $0x31c] ss:$36 sps:$4 sm:$0xff]   ;;  %2644 = vst [vmem:[#allocation3 + $0x80] sm:$0xf] %v2510_v6  ;;  %v7047_v16 = vld [vmem:[#allocation3 + $0x24c] ss:$36 sps:$4 sm:$0xff]  }
  0xf9   : > { %2372 = vst [vmem:[#allocation3 + $0x7c] sm:$0xf] %v2000_v2  ;;  %v1732_v3 = vrot.slane %v1730_v10, 4  ;;  %5098 = vmatprep.mubr.bf16.mxu0 %v7031_v63  ;;  %v7053_v19 = vld [vmem:[#allocation3 + $0x248] ss:$36 sps:$4 sm:$0xff]   ;;  %5235 = vmatprep.mubr.bf16.mxu1 %v7047_v16  ;;  %v7932_v32 = vld [vmem:[%s8739_s3 + $0x230] sm:$0xff]  }
  0xfa   : > { %1827 = vst [vmem:[#allocation3 + $0x290] sm:$0xf] %v1731_v18  ;;  %v1860_v20 = vld [vmem:[#allocation2 + $0x7c] sm:$0xf]  ;;  %v1911_v22 = vld [vmem:[#allocation2 + $0x24] sm:$0xf]  ;;  %5099 = vmatmul.mubr.bf16.gmra.mxu0 %v7036_v14  ;;  %5236 = vmatmul.mubr.bf16.gmra.mxu1 %v7053_v19 }
  0xfb   : > { %v1734_v26 = vsel %vm7612_vm13, %v1732_v3, %v1733_v5  ;;  %1892 = vst [vmem:[#allocation3 + $0x2b8] sm:$0xf] %v1860_v20  ;;  %v1912_v23 = vld [vmem:[#allocation2 + $0x28] sm:$0xf]  ;;  %v1913_v25 = vld [vmem:[#allocation2 + $0x2c] sm:$0x1]  ;;  %5332 = vmatprep.mubr.bf16.mxu0 %v7045_v59 }
  0xfc   : > { %v2002_v27 = vshrl.u32 %v1911_v22, 16  ;;  %v2005_v28 = vshll.u32 %v1911_v22, 16  ;;  %1828 = vst [vmem:[#allocation3 + $0x2b4] sm:$0xf] %v1734_v26  ;;  %v2011_v30 = vshll.u32 %v1912_v23, 16  ;;  %v2015_v33 = vshrl.u32 %v1912_v23, 16 }
  0xfd   : > { %v2021_v34 = vshll.u32 %v1913_v25, 16  ;;  %v2407_v35 = vld [vmem:[#allocation2 + $0x24] sm:$0xe]  ;;  %v7043_v37 = vld [vmem:[#allocation3 + $0x10] ss:$36 sps:$4 sm:$0xff]   ;;  %v300_v50 = vld [vmem:[%s7297_s26 + $0xf0] sm:$0xff] }
  0xfe   : > { %v2004_v38 = vrot.slane %v2002_v27, 4  ;;  %v2007_v39 = vrot.slane %v2005_v28, 5  ;;  %v2408_v41 = vld [vmem:[#allocation2 + $0x28] sm:$0xf]  ;;  %v2409_v53 = vld [vmem:[#allocation2 + $0x2c] sm:$0x1]  ;;  %v339_v2 = vmul.f32 %v7822_v31, %v300_v50 }
  0xff   : > { %v2013_v43 = vrot.slane %v2011_v30, 5  ;;  %v2017_v21 = vrot.slane %v2015_v33, 4  ;;  %v6089_v45 = vrot.slane %v2407_v35, 9  ;;  %v7049_v0 = vld [vmem:[#allocation3 + $0x5c] ss:$36 sps:$4 sm:$0xff]   ;;  %v2023_v44 = vrot.slane %v2021_v34, 5 }
 0x100   : > { %v2008_v56 = vor.u32 %v2007_v39, %v2004_v38  ;;  %v2513_v46 = vrot.slane %v2408_v41, 5  ;;  %v2516_v47 = vrot.slane %v2409_v53, 5  ;;  %v1596_v48 = vld [vmem:[#allocation2 + $0x78] sm:$0xe]  ;;  %v1597_v24 = vld [vmem:[#allocation2 + $0x7c] sm:$0xf] }
 0x101   : > { %v2018_v42 = vor.u32 %v2017_v21, %v2013_v43  ;;  %v1598_v17 = vld [vmem:[#allocation2 + $0x80] sm:$0x1]  ;;  %v6081_v52 = vrot.slane %v1596_v48, 9  ;;  %v1737_v55 = vrot.slane %v1597_v24, 5  ;;  %v1861_v58 = vld [vmem:[#allocation2 + $0x84] sm:$0xf] }
 0x102   : > { %v2009_v51 = vrot.slane %v2008_v56, 4  ;;  %v2514_v15 = vsel %vm7612_vm13, %v6089_v45, %v2513_v46  ;;  %v2515_v36 = vrot.slane %v2513_v46, 4  ;;  %v1740_v57 = vrot.slane %v1598_v17, 5  ;;  %v301_v59 = vld [vmem:[%s7297_s26 + $0xf8] sm:$0xff]  ;;  %5333 = vmatmul.mubr.bf16.vlgmr.msra.gmra.mxu0 %v7043_v37  ;;  %v7056_v60 = vld [vmem:[#allocation3 + $0x294] ss:$36 sps:$4 sm:$0xff]   ;;  %s268_s26 = scalar_lea.vmem %s8742_s6, %s8775_s22 }
 0x103   : > { %v2019_v54 = vrot.slane %v2018_v42, 4  ;;  %2645 = vst [vmem:[#allocation3 + $0xa4] sm:$0xf] %v2514_v15  ;;  %v7060_v1 = vld [vmem:[#allocation3 + $0x290] ss:$36 sps:$4 sm:$0xff]   ;;  %5340 = vmatprep.mubr.bf16.mxu0 %v7049_v0  ;;  %6844 = vmatpush3.bf16.msra.mxu0 %v7863_v49  ;;  %v1738_v8 = vsel %vm7612_vm13, %v6081_v52, %v1737_v55  ;;  %v1739_v10 = vrot.slane %v1737_v55, 4  ;;  %v340_v3 = vmul.f32 %v7822_v31, %v301_v59 }
 0x104   : > { %v2014_v61 = vsel %vm7329_vm4, %v2009_v51, %v2013_v43  ;;  %v2517_v62 = vsel %vm7612_vm13, %v2515_v36, %v2516_v47  ;;  %1893 = vst [vmem:[#allocation3 + $0x2dc] sm:$0xf] %v1861_v58  ;;  %v1862_v29 = vld [vmem:[#allocation2 + $0x88] sm:$0xf]  ;;  %v1914_v11 = vld [vmem:[#allocation2 + $0x30] sm:$0xf]  ;;  %5243 = vmatprep.mubr.bf16.mxu1 %v7056_v60  ;;  %6845 = vmatprep.subr.bf16.mxu0 %v7932_v32 }
 0x105   : > { %v2024_v6 = vsel %vm7329_vm4, %v2019_v54, %v2023_v44  ;;  %2373 = vst [vmem:[#allocation3 + $0xa0] sm:$0xf] %v2014_v61  ;;  %2646 = vst [vmem:[#allocation3 + $0xc8] sm:$0xf] %v2517_v62  ;;  %v7082_v63 = vld [vmem:[%s8739_s3 + $0x228] sm:$0xff]   ;;  %v2026_v16 = vshrl.u32 %v1914_v11, 16  ;;  %5244 = vmatmul.mubr.bf16.gmra.mxu1 %v7060_v1  ;;  %v1741_v19 = vsel %vm7612_vm13, %v1739_v10, %v1740_v57  ;;  %v6388_v54 = vpop.f32.mrf.mxu0 }
 0x106   : > { %v7054_v5 = vld [vmem:[#allocation3 + $0x58] ss:$36 sps:$4 sm:$0xff]   ;;  %2374 = vst [vmem:[#allocation3 + $0xc4] sm:$0xf] %v2024_v6  ;;  %1829 = vst [vmem:[#allocation3 + $0x2d8] sm:$0xf] %v1738_v8  ;;  %v7977_v60 = vadd.f32 %v6388_v54, %v6387_v13 }
 0x107   : > { %1894 = vst [vmem:[#allocation3 + $0x300] sm:$0xf] %v1862_v29  ;;  %v1915_v49 = vld [vmem:[#allocation2 + $0x34] sm:$0xf]  ;;  %v1916_v14 = vld [vmem:[#allocation2 + $0x38] sm:$0x1]  ;;  %6846 = vmatpush3.bf16.msra.mxu0 %v7932_v32 }
 0x108   : > { %v2029_v18 = vshll.u32 %v1914_v11, 16  ;;  %v2035_v20 = vshll.u32 %v1915_v49, 16  ;;  %v2039_v22 = vshrl.u32 %v1915_v49, 16  ;;  %v2045_v26 = vshll.u32 %v1916_v14, 16  ;;  %v2410_v23 = vld [vmem:[#allocation2 + $0x30] sm:$0xe]  ;;  %6847 = vmatprep.subr.bf16.mxu0 %v7082_v63 }
 0x109   : > { %1830 = vst [vmem:[#allocation3 + $0x2fc] sm:$0xf] %v1741_v19  ;;  %v2028_v25 = vrot.slane %v2026_v16, 4  ;;  %v2411_v28 = vld [vmem:[#allocation2 + $0x34] sm:$0xf]  ;;  %v7097_v33 = vld [vmem:[%s8739_s3 + $0x220] sm:$0xff]  }
 0x10a   : > { %v2031_v27 = vrot.slane %v2029_v18, 5  ;;  %v2412_v30 = vld [vmem:[#allocation2 + $0x38] sm:$0x1]  ;;  %v7199_v31 = vld [vmem:[%s8738_s2] ss:$0 sm:$0xff]  ;;  %v2037_v35 = vrot.slane %v2035_v20, 5  ;;  %5341 = vmatmul.mubr.bf16.gmra.mxu0 %v7054_v5 }
 0x10b   : > { %v378_v34 = vadd.f32 %v7199_v31, %v339_v2  ;;  %v2041_v37 = vrot.slane %v2039_v22, 4  ;;  %v2047_v38 = vrot.slane %v2045_v26, 5  ;;  %v6090_v39 = vrot.slane %v2410_v23, 9  ;;  %v1599_v46 = vld [vmem:[#allocation2 + $0x84] sm:$0xe]  ;;  %6848 = vmatpush3.bf16.msra.mxu0 %v7082_v63  ;;  %v7112_v32 = vld [vmem:[%s8739_s3 + $0x218] sm:$0xff]  }
 0x10c   : > { %v2032_v41 = vor.u32 %v2031_v27, %v2028_v25  ;;  %v2520_v53 = vrot.slane %v2411_v28, 5  ;;  %v2523_v43 = vrot.slane %v2412_v30, 5  ;;  %v7962_v45 = vadd.f32 %v7199_v31, %v340_v3  ;;  %v7058_v47 = vld [vmem:[#allocation3 + $0xa4] ss:$36 sps:$4 sm:$0xff]   ;;  %v1600_v15 = vld [vmem:[#allocation2 + $0x88] sm:$0xf]  ;;  %6849 = vmatprep.subr.bf16.mxu0 %v7097_v33 }
 0x10d   : > { %v2042_v21 = vor.u32 %v2041_v37, %v2037_v35  ;;  %v410_v42 = vmax.f32 %v378_v34, 0.0  ;;  %v7061_v24 = vld [vmem:[#allocation3 + $0xa0] ss:$36 sps:$4 sm:$0xff]   ;;  %v1601_v36 = vld [vmem:[#allocation2 + $0x8c] sm:$0x1]  ;;  %v6082_v17 = vrot.slane %v1599_v46, 9  ;;  %5348 = vmatprep.mubr.bf16.mxu0 %v7058_v47 }
 0x10e   : > { %v2033_v0 = vrot.slane %v2032_v41, 4  ;;  %v2521_v56 = vsel %vm7612_vm13, %v6090_v39, %v2520_v53  ;;  %v2522_v44 = vrot.slane %v2520_v53, 4  ;;  %v7062_v55 = vld [vmem:[#allocation3 + $0x2dc] ss:$36 sps:$4 sm:$0xff]   ;;  %v1744_v59 = vrot.slane %v1600_v15, 5 }
 0x10f   : > { %v2043_v48 = vrot.slane %v2042_v21, 4  ;;  %2647 = vst [vmem:[#allocation3 + $0xec] sm:$0xf] %v2521_v56  ;;  %v7973_v52 = vpack.c.bf16 %v410_v42, %v410_v42  ;;  %v1747_v61 = vrot.slane %v1601_v36, 5  ;;  %v1863_v62 = vld [vmem:[#allocation2 + $0x90] sm:$0xf]  ;;  %5251 = vmatprep.mubr.bf16.mxu1 %v7062_v55  ;;  %6850 = vmatpush3.bf16.msra.mxu0 %v7097_v33 }
 0x110   : > { %v2038_v50 = vsel %vm7329_vm4, %v2033_v0, %v2037_v35  ;;  %v2524_v51 = vsel %vm7612_vm13, %v2522_v44, %v2523_v43  ;;  %v7068_v58 = vld [vmem:[#allocation3 + $0x2d8] ss:$36 sps:$4 sm:$0xff]   ;;  %v411_v2 = vmax.f32 %v7962_v45, 0.0  ;;  %v1745_v8 = vsel %vm7612_vm13, %v6082_v17, %v1744_v59  ;;  %1895 = vst [vmem:[#allocation3 + $0x324] sm:$0xf] %v1863_v62  ;;  %6851 = vmatprep.subr.bf16.mxu0 %v7112_v32 }
 0x111   : > { %v2048_v57 = vsel %vm7329_vm4, %v2043_v48, %v2047_v38  ;;  %2375 = vst [vmem:[#allocation3 + $0xe8] sm:$0xf] %v2038_v50  ;;  %2648 = vst [vmem:[#allocation3 + $0x110] sm:$0xf] %v2524_v51  ;;  %v1864_v1 = vld [vmem:[#allocation2 + $0x94] sm:$0xf]  ;;  %5252 = vmatmul.mubr.bf16.gmra.mxu1 %v7068_v58 }
 0x112   : > { %2376 = vst [vmem:[#allocation3 + $0x10c] sm:$0xf] %v2048_v57  ;;  %v7124_v6 = vld [vmem:[%s8739_s3 + $0x210] sm:$0xff]   ;;  %v1746_v10 = vrot.slane %v1744_v59, 4  ;;  %1896 = vst [vmem:[#allocation3 + $0x348] sm:$0xf] %v1864_v1  ;;  %5349 = vmatmul.mubr.bf16.gmra.mxu0 %v7061_v24 }
 0x113   : > { %v1917_v29 = vld [vmem:[#allocation2 + $0x3c] sm:$0xf]  ;;  %v1918_v11 = vld [vmem:[#allocation2 + $0x40] sm:$0xf]  ;;  %v821_v63 = vshrl.u32 %v7973_v52, 16  ;;  %6852 = vmatpush3.bf16.msra.mxu0 %v7112_v32  ;;  %v824_v51 = vshll.u32 %v7973_v52, 16 }
 0x114   : > { %1831 = vst [vmem:[#allocation3 + $0x320] sm:$0xf] %v1745_v8  ;;  %v1919_v5 = vld [vmem:[#allocation2 + $0x44] sm:$0x1]  ;;  %v2050_v49 = vshrl.u32 %v1917_v29, 16  ;;  %v2053_v14 = vshll.u32 %v1917_v29, 16  ;;  %v1748_v3 = vsel %vm7612_vm13, %v1746_v10, %v1747_v61  ;;  %6853 = vmatprep.subr.bf16.mxu0 %v7124_v6 }
 0x115   : > { %v2059_v16 = vshll.u32 %v1918_v11, 16  ;;  %v2063_v18 = vshrl.u32 %v1918_v11, 16  ;;  %v2069_v19 = vshll.u32 %v1919_v5, 16  ;;  %v2413_v20 = vld [vmem:[#allocation2 + $0x3c] sm:$0xe]  ;;  %v7988_v26 = vrot.slane %v821_v63, 7  ;;  %v8006_v11 = vpop.f32.mrf.mxu0 }
 0x116   : > { %v2414_v22 = vld [vmem:[#allocation2 + $0x40] sm:$0xf]  ;;  %1832 = vst [vmem:[#allocation3 + $0x344] sm:$0xf] %v1748_v3  ;;  %v2052_v23 = vrot.slane %v2050_v49, 4  ;;  %v2055_v25 = vrot.slane %v2053_v14, 5 }
 0x117   : > { %v2061_v27 = vrot.slane %v2059_v16, 5  ;;  %v2065_v28 = vrot.slane %v2063_v18, 4  ;;  %v2415_v30 = vld [vmem:[#allocation2 + $0x44] sm:$0x1]  ;;  %v2071_v33 = vrot.slane %v2069_v19, 5  ;;  %v6091_v31 = vrot.slane %v2413_v20, 9  ;;  %6854 = vmatpush3.bf16.msra.mxu0 %v7124_v6 }
 0x118   : > { %v2527_v34 = vrot.slane %v2414_v22, 5  ;;  %v2530_v35 = vrot.slane %v2415_v30, 5  ;;  %v1602_v37 = vld [vmem:[#allocation2 + $0x90] sm:$0xe]  ;;  %v2056_v38 = vor.u32 %v2055_v25, %v2052_v23  ;;  %v1603_v41 = vld [vmem:[#allocation2 + $0x94] sm:$0xf]  ;;  %v8011_v16 = vpack.c.bf16 %v411_v2, %v411_v2 }
 0x119   : > { %v2066_v39 = vor.u32 %v2065_v28, %v2061_v27  ;;  %v1604_v53 = vld [vmem:[#allocation2 + $0x98] sm:$0x1]  ;;  %v6083_v43 = vrot.slane %v1602_v37, 9  ;;  %v7064_v21 = vld [vmem:[#allocation3 + $0xec] ss:$36 sps:$4 sm:$0xff]   ;;  %v1751_v42 = vrot.slane %v1603_v41, 5 }
 0x11a   : > { %v7069_v13 = vld [vmem:[#allocation3 + $0xe8] ss:$36 sps:$4 sm:$0xff]   ;;  %v2528_v0 = vsel %vm7612_vm13, %v6091_v31, %v2527_v34  ;;  %v2529_v56 = vrot.slane %v2527_v34, 4  ;;  %v2057_v44 = vrot.slane %v2056_v38, 4  ;;  %v1754_v47 = vrot.slane %v1604_v53, 5  ;;  %5356 = vmatprep.mubr.bf16.mxu0 %v7064_v21  ;;  %v7137_v58 = vld [vmem:[%s8739_s3 + $0x208] sm:$0xff]  }
 0x11b   : > { %v2067_v46 = vrot.slane %v2066_v39, 4  ;;  %2649 = vst [vmem:[#allocation3 + $0x134] sm:$0xf] %v2528_v0  ;;  %v1865_v48 = vld [vmem:[#allocation2 + $0x9c] sm:$0xf]  ;;  %v1752_v17 = vsel %vm7612_vm13, %v6083_v43, %v1751_v42  ;;  %v1753_v54 = vrot.slane %v1751_v42, 4  ;;  %5357 = vmatmul.mubr.bf16.gmra.mxu0 %v7069_v13  ;;  %6855 = vmatprep.subr.bf16.mxu0 %v7137_v58 }
 0x11c   : > { %v2531_v32 = vsel %vm7612_vm13, %v2529_v56, %v2530_v35  ;;  %v1866_v24 = vld [vmem:[#allocation2 + $0xa0] sm:$0xf]  ;;  %1897 = vst [vmem:[#allocation3 + $0x36c] sm:$0xf] %v1865_v48  ;;  %v1920_v50 = vld [vmem:[#allocation2 + $0x48] sm:$0xf]  ;;  %v2062_v15 = vsel %vm7329_vm4, %v2057_v44, %v2061_v27  ;;  %6856 = vmatpush3.bf16.msra.mxu0 %v7137_v58 }
 0x11d   : > { %v2072_v36 = vsel %vm7329_vm4, %v2067_v46, %v2071_v33  ;;  %2650 = vst [vmem:[#allocation3 + $0x158] sm:$0xf] %v2531_v32  ;;  %1898 = vst [vmem:[#allocation3 + $0x390] sm:$0xf] %v1866_v24  ;;  %v1921_v55 = vld [vmem:[#allocation2 + $0x4c] sm:$0xf]  ;;  %v1755_v1 = vsel %vm7612_vm13, %v1753_v54, %v1754_v47  ;;  %v8014_v33 = vpop.f32.mrf.mxu0 }
 0x11e   : > { %v1922_v57 = vld [vmem:[#allocation2 + $0x50] sm:$0x1]  ;;  %v7071_v59 = vld [vmem:[#allocation3 + $0x324] ss:$36 sps:$4 sm:$0xff]   ;;  %2377 = vst [vmem:[#allocation3 + $0x130] sm:$0xf] %v2062_v15 }
 0x11f   : > { %2378 = vst [vmem:[#allocation3 + $0x154] sm:$0xf] %v2072_v36  ;;  %v7075_v61 = vld [vmem:[#allocation3 + $0x320] ss:$36 sps:$4 sm:$0xff]   ;;  %1833 = vst [vmem:[#allocation3 + $0x368] sm:$0xf] %v1752_v17  ;;  %5259 = vmatprep.mubr.bf16.mxu1 %v7071_v59  ;;  %v6393_v46 = vpop.f32.mrf.mxu0 }
 0x120   : > { %v2074_v62 = vshrl.u32 %v1920_v50, 16  ;;  %v2077_v6 = vshll.u32 %v1920_v50, 16  ;;  %v2083_v8 = vshll.u32 %v1921_v55, 16  ;;  %v2087_v10 = vshrl.u32 %v1921_v55, 16  ;;  %v2416_v29 = vld [vmem:[#allocation2 + $0x48] sm:$0xe]  ;;  %5260 = vmatmul.mubr.bf16.gmra.mxu1 %v7075_v61 }
 0x121   : > { %1834 = vst [vmem:[#allocation3 + $0x38c] sm:$0xf] %v1755_v1  ;;  %v2093_v5 = vshll.u32 %v1922_v57, 16  ;;  %v2417_v49 = vld [vmem:[#allocation2 + $0x4c] sm:$0xf]  ;;  %v6092_v20 = vrot.slane %v2416_v29, 9  ;;  %v6394_v59 = vpop.f32.mrf.mxu0 }
 0x122   : > { %v2076_v63 = vrot.slane %v2074_v62, 4  ;;  %v2418_v14 = vld [vmem:[#allocation2 + $0x50] sm:$0x1]  ;;  %v2079_v18 = vrot.slane %v2077_v6, 5  ;;  %v2085_v3 = vrot.slane %v2083_v8, 5  ;;  %v2089_v19 = vrot.slane %v2087_v10, 4 }
 0x123   : > { %v2095_v22 = vrot.slane %v2093_v5, 5  ;;  %v2534_v23 = vrot.slane %v2417_v49, 5  ;;  %v2537_v25 = vrot.slane %v2418_v14, 5  ;;  %v827_v27 = vrot.slane %v7988_v26, 4  ;;  %v1605_v31 = vld [vmem:[#allocation2 + $0x9c] sm:$0xe] }
 0x124   : > { %v2080_v28 = vor.u32 %v2079_v18, %v2076_v63  ;;  %v2090_v30 = vor.u32 %v2089_v19, %v2085_v3  ;;  %v829_v34 = vshrl.u32 %v8011_v16, 16  ;;  %v7073_v35 = vld [vmem:[#allocation3 + $0x134] ss:$36 sps:$4 sm:$0xff]   ;;  %v1606_v53 = vld [vmem:[#allocation2 + $0xa0] sm:$0xf]  ;;  %v6084_v43 = vrot.slane %v1605_v31, 9  ;;  %v6459_v18 = vpop.f32.mrf.mxu1 }
 0x125   : > { %v2535_v45 = vsel %vm7612_vm13, %v6092_v20, %v2534_v23  ;;  %v2536_v2 = vrot.slane %v2534_v23, 4  ;;  %5364 = vmatprep.mubr.bf16.mxu0 %v7073_v35  ;;  %v7077_v21 = vld [vmem:[#allocation3 + $0x36c] ss:$36 sps:$4 sm:$0xff]   ;;  %v1758_v44 = vrot.slane %v1606_v53, 5  ;;  %v1868_v48 = vld [vmem:[#allocation2 + $0xac] sm:$0xf]  ;;  %v8031_v10 = vadd.f32 %v6394_v59, %v6393_v46 }
 0x126   : > { %v2081_v37 = vrot.slane %v2080_v28, 4  ;;  %v2091_v38 = vrot.slane %v2090_v30, 4  ;;  %2651 = vst [vmem:[#allocation3 + $0x17c] sm:$0xf] %v2535_v45  ;;  %v7076_v39 = vld [vmem:[#allocation3 + $0x130] ss:$36 sps:$4 sm:$0xff]   ;;  %5267 = vmatprep.mubr.bf16.mxu1 %v7077_v21 }
 0x127   : > { %v2538_v41 = vsel %vm7612_vm13, %v2536_v2, %v2537_v25  ;;  %5365 = vmatmul.mubr.bf16.gmra.mxu0 %v7076_v39  ;;  %v1607_v42 = vld [vmem:[#allocation2 + $0xa4] sm:$0x1]  ;;  %v1867_v47 = vld [vmem:[#allocation2 + $0xa8] sm:$0xf]  ;;  %v1759_v32 = vsel %vm7612_vm13, %v6084_v43, %v1758_v44  ;;  %v1760_v24 = vrot.slane %v1758_v44, 4  ;;  %v8029_v8 = vrot.slane %v829_v34, 7  ;;  %v6460_v34 = vpop.f32.mrf.mxu1 }
 0x128   : > { %v2086_v13 = vsel %vm7329_vm4, %v2081_v37, %v2085_v3  ;;  %v2096_v0 = vsel %vm7329_vm4, %v2091_v38, %v2095_v22  ;;  %2652 = vst [vmem:[#allocation3 + $0x1a0] sm:$0xf] %v2538_v41  ;;  %v7083_v56 = vld [vmem:[#allocation3 + $0x368] ss:$36 sps:$4 sm:$0xff]   ;;  %v1761_v50 = vrot.slane %v1607_v42, 5  ;;  %v832_v31 = vshll.u32 %v8011_v16, 16 }
 0x129   : > { %2379 = vst [vmem:[#allocation3 + $0x178] sm:$0xf] %v2086_v13  ;;  %2380 = vst [vmem:[#allocation3 + $0x19c] sm:$0xf] %v2096_v0  ;;  %v1923_v15 = vld [vmem:[#allocation2 + $0x54] sm:$0xf]  ;;  %5268 = vmatmul.mubr.bf16.gmra.mxu1 %v7083_v56  ;;  %v8036_v41 = vadd.f32 %v6460_v34, %v6459_v18 }
 0x12a   : > { %1899 = vst [vmem:[#allocation3 + $0x3b4] sm:$0xf] %v1867_v47  ;;  %1900 = vst [vmem:[#allocation3 + $0x3d8] sm:$0xf] %v1868_v48  ;;  %v1924_v36 = vld [vmem:[#allocation2 + $0x58] sm:$0xf]  ;;  %v1762_v61 = vsel %vm7612_vm13, %v1760_v24, %v1761_v50  ;;  %v834_v0 = vor.u32 %v832_v31, %v8029_v8 }
 0x12b   : > { %1835 = vst [vmem:[#allocation3 + $0x3b0] sm:$0xf] %v1759_v32  ;;  %v1925_v17 = vld [vmem:[#allocation2 + $0x5c] sm:$0x1]  ;;  %v2098_v54 = vshrl.u32 %v1923_v15, 16  ;;  %v2101_v55 = vshll.u32 %v1923_v15, 16 }
 0x12c   : > { %v2107_v57 = vshll.u32 %v1924_v36, 16  ;;  %v2111_v58 = vshrl.u32 %v1924_v36, 16  ;;  %v2117_v62 = vshll.u32 %v1925_v17, 16  ;;  %v2419_v1 = vld [vmem:[#allocation2 + $0x54] sm:$0xe]  ;;  %v7150_v16 = vld [vmem:[%s8739_s3 + $0x200] sm:$0xff]   ;;  %v835_v36 = vsel %vm7368_vm10, %v827_v27, %v834_v0 }
 0x12d   : > { %v2420_v6 = vld [vmem:[#allocation2 + $0x58] sm:$0xf]  ;;  %1836 = vst [vmem:[#allocation3 + $0x3d4] sm:$0xf] %v1762_v61  ;;  %v2100_v29 = vrot.slane %v2098_v54, 4  ;;  %v2103_v63 = vrot.slane %v2101_v55, 5  ;;  %6857 = vmatprep.subr.bf16.mxu0 %v7150_v16 }
 0x12e   : > { %v2109_v5 = vrot.slane %v2107_v57, 5  ;;  %v2113_v49 = vrot.slane %v2111_v58, 4  ;;  %v2421_v14 = vld [vmem:[#allocation2 + $0x5c] sm:$0x1]  ;;  %v2119_v3 = vrot.slane %v2117_v62, 5  ;;  %v6093_v19 = vrot.slane %v2419_v1, 9  ;;  %6858 = vmatpush3.bf16.msra.mxu0 %v7150_v16 }
 0x12f   : > { %v2541_v20 = vrot.slane %v2420_v6, 5  ;;  %v2544_v22 = vrot.slane %v2421_v14, 5  ;;  %v1608_v23 = vld [vmem:[#allocation2 + $0xa8] sm:$0xe]  ;;  %v2104_v25 = vor.u32 %v2103_v63, %v2100_v29  ;;  %v1609_v30 = vld [vmem:[#allocation2 + $0xac] sm:$0xf]  ;;  %v826_v63 = vor.u32 %v824_v51, %v7988_v26 }
 0x130   : > { %v2114_v28 = vor.u32 %v2113_v49, %v2109_v5  ;;  %v1610_v45 = vld [vmem:[#allocation2 + $0xb0] sm:$0x1]  ;;  %v6085_v2 = vrot.slane %v1608_v23, 9  ;;  %v7079_v35 = vld [vmem:[#allocation3 + $0x17c] ss:$36 sps:$4 sm:$0xff]   ;;  %v1765_v39 = vrot.slane %v1609_v30, 5 }
 0x131   : > { %v2542_v37 = vsel %vm7612_vm13, %v6093_v19, %v2541_v20  ;;  %v2543_v38 = vrot.slane %v2541_v20, 4  ;;  %v7084_v53 = vld [vmem:[#allocation3 + $0x178] ss:$36 sps:$4 sm:$0xff]   ;;  %v2105_v43 = vrot.slane %v2104_v25, 4  ;;  %v1768_v13 = vrot.slane %v1610_v45, 5  ;;  %5372 = vmatprep.mubr.bf16.mxu0 %v7079_v35  ;;  %v8063_v45 = vpop.f32.mrf.mxu1 }
 0x132   : > { %v2115_v21 = vrot.slane %v2114_v28, 4  ;;  %2653 = vst [vmem:[#allocation3 + $0x1c4] sm:$0xf] %v2542_v37  ;;  %v1766_v44 = vsel %vm7612_vm13, %v6085_v2, %v1765_v39  ;;  %v1767_v46 = vrot.slane %v1765_v39, 4  ;;  %v1869_v42 = vld [vmem:[#allocation2 + $0xb4] sm:$0xf]  ;;  %5373 = vmatmul.mubr.bf16.gmra.mxu0 %v7084_v53 }
 0x133   : > { %v2545_v56 = vsel %vm7612_vm13, %v2543_v38, %v2544_v22  ;;  %v1870_v47 = vld [vmem:[#allocation2 + $0xb8] sm:$0xf]  ;;  %v2110_v48 = vsel %vm7329_vm4, %v2105_v43, %v2109_v5  ;;  %1837 = vst [vmem:[#allocation3 + $0x3f8] sm:$0xf] %v1766_v44  ;;  %1901 = vst [vmem:[#allocation3 + $0x3fc] sm:$0xf] %v1869_v42 }
 0x134   : > { %v2120_v32 = vsel %vm7329_vm4, %v2115_v21, %v2119_v3  ;;  %2654 = vst [vmem:[#allocation3 + $0x1e8] sm:$0xf] %v2545_v56  ;;  %1902 = vst [vmem:[#allocation3 + $0x420] sm:$0xf] %v1870_v47  ;;  %v1926_v24 = vld [vmem:[#allocation2 + $0x60] sm:$0xf]  ;;  %v1769_v55 = vsel %vm7612_vm13, %v1767_v46, %v1768_v13  ;;  %v8059_v3 = vpop.f32.mrf.mxu0  ;;  %v8075_v56 = vpop.f32.mrf.mxu1 }
 0x135   : > { %v1927_v50 = vld [vmem:[#allocation2 + $0x64] sm:$0xf]  ;;  %v1928_v15 = vld [vmem:[#allocation2 + $0x68] sm:$0x1]  ;;  %v7086_v17 = vld [vmem:[#allocation3 + $0x3b4] ss:$36 sps:$4 sm:$0xff]  }
 0x136   : > { %2381 = vst [vmem:[#allocation3 + $0x1c0] sm:$0xf] %v2110_v48  ;;  %2382 = vst [vmem:[#allocation3 + $0x1e4] sm:$0xf] %v2120_v32  ;;  %v7090_v54 = vld [vmem:[#allocation3 + $0x3b0] ss:$36 sps:$4 sm:$0xff]   ;;  %5275 = vmatprep.mubr.bf16.mxu1 %v7086_v17  ;;  %v8067_v31 = vpop.f32.mrf.mxu0 }
 0x137   : > { %v2122_v57 = vshrl.u32 %v1926_v24, 16  ;;  %999 = vst [vmem:[#allocation2 + $0xc4] sm:$0xf] %v835_v36  ;;  %1838 = vst [vmem:[#allocation3 + $0x41c] sm:$0xf] %v1769_v55  ;;  %v2125_v58 = vshll.u32 %v1926_v24, 16  ;;  %5276 = vmatmul.mubr.bf16.gmra.mxu1 %v7090_v54 }
 0x138   : > { %v2131_v59 = vshll.u32 %v1927_v50, 16  ;;  %v2135_v61 = vshrl.u32 %v1927_v50, 16  ;;  %v2141_v62 = vshll.u32 %v1928_v15, 16  ;;  %v2422_v1 = vld [vmem:[#allocation2 + $0x60] sm:$0xe]  ;;  %v6399_v47 = vpop.f32.mrf.mxu0 }
 0x139   : > { %v2124_v12 = vrot.slane %v2122_v57, 4  ;;  %v2423_v27 = vld [vmem:[#allocation2 + $0x64] sm:$0xf]  ;;  %v2424_v6 = vld [vmem:[#allocation2 + $0x68] sm:$0x1]  ;;  %v6094_v29 = vrot.slane %v2422_v1, 9 }
 0x13a   : > { %v2127_v5 = vrot.slane %v2125_v58, 5  ;;  %v2133_v49 = vrot.slane %v2131_v59, 5  ;;  %v2137_v14 = vrot.slane %v2135_v61, 4  ;;  %v2143_v18 = vrot.slane %v2141_v62, 5  ;;  %v996_v30 = vld [vmem:[#allocation2 + $0xc0] sm:$0xf]  ;;  %v6400_v57 = vpop.f32.mrf.mxu0 }
 0x13b   : > { %v2548_v19 = vrot.slane %v2423_v27, 5  ;;  %v2551_v20 = vrot.slane %v2424_v6, 5  ;;  %v7088_v52 = vld [vmem:[#allocation3 + $0x1c4] ss:$36 sps:$4 sm:$0xff]   ;;  %v997_v2 = vsel %vm7360_vm9, %v826_v63, %v996_v30  ;;  %v7092_v35 = vld [vmem:[#allocation3 + $0x3fc] ss:$36 sps:$4 sm:$0xff]   ;;  %v8081_v27 = vadd.f32 %v6400_v57, %v6399_v47 }
 0x13c   : > { %v2128_v22 = vor.u32 %v2127_v5, %v2124_v12  ;;  %v2138_v23 = vor.u32 %v2137_v14, %v2133_v49  ;;  %998 = vst [vmem:[#allocation2 + $0xc0] sm:$0xf] %v997_v2  ;;  %5380 = vmatprep.mubr.bf16.mxu0 %v7088_v52  ;;  %v1611_v43 = vld [vmem:[#allocation2 + $0xb4] sm:$0xe]  ;;  %v1612_v7 = vld [vmem:[#allocation2 + $0xb8] sm:$0xf]  ;;  %5283 = vmatprep.mubr.bf16.mxu1 %v7092_v35  ;;  %v6465_v12 = vpop.f32.mrf.mxu1  ;;  %v8083_v14 = vpop.f32.mrf.mxu0 }
 0x13d   : > { %v2549_v25 = vsel %vm7612_vm13, %v6094_v29, %v2548_v19  ;;  %v2550_v28 = vrot.slane %v2548_v19, 4  ;;  %v7091_v34 = vld [vmem:[#allocation3 + $0x1c0] ss:$36 sps:$4 sm:$0xff]   ;;  %v6086_v13 = vrot.slane %v1611_v43, 9  ;;  %v1772_v0 = vrot.slane %v1612_v7, 5 }
 0x13e   : > { %v2129_v26 = vrot.slane %v2128_v22, 4  ;;  %v2139_v51 = vrot.slane %v2138_v23, 4  ;;  %2655 = vst [vmem:[#allocation3 + $0x20c] sm:$0xf] %v2549_v25  ;;  %v7098_v53 = vld [vmem:[#allocation3 + $0x3f8] ss:$36 sps:$4 sm:$0xff]   ;;  %5381 = vmatmul.mubr.bf16.gmra.mxu0 %v7091_v34  ;;  %v6466_v25 = vpop.f32.mrf.mxu1  ;;  %v8087_v2 = vpop.f32.mrf.mxu0 }
 0x13f   : > { %v2552_v37 = vsel %vm7612_vm13, %v2550_v28, %v2551_v20  ;;  %v1613_v21 = vld [vmem:[#allocation2 + $0xbc] sm:$0x1]  ;;  %v1872_v16 = vld [vmem:[#allocation2 + $0xc4] sm:$0xf]  ;;  %5284 = vmatmul.mubr.bf16.gmra.mxu1 %v7098_v53  ;;  %v1929_v46 = vld [vmem:[#allocation2 + $0x6c] sm:$0xf]  ;;  %v1773_v48 = vsel %vm7612_vm13, %v6086_v13, %v1772_v0 }
 0x140   : > { %v2134_v38 = vsel %vm7329_vm4, %v2129_v26, %v2133_v49  ;;  %v2144_v39 = vsel %vm7329_vm4, %v2139_v51, %v2143_v18  ;;  %2656 = vst [vmem:[#allocation3 + $0x230] sm:$0xf] %v2552_v37  ;;  %v1775_v44 = vrot.slane %v1613_v21, 5  ;;  %1904 = vst [vmem:[#allocation3 + $0x468] sm:$0xf] %v1872_v16  ;;  %v1774_v32 = vrot.slane %v1772_v0, 4 }
 0x141   : > { %2383 = vst [vmem:[#allocation3 + $0x208] sm:$0xf] %v2134_v38  ;;  %2384 = vst [vmem:[#allocation3 + $0x22c] sm:$0xf] %v2144_v39  ;;  %v1930_v42 = vld [vmem:[#allocation2 + $0x70] sm:$0xf]  ;;  %v8085_v51 = vadd.f32 %v6466_v25, %v6465_v12 }
 0x142   : > { %v1931_v24 = vld [vmem:[#allocation2 + $0x74] sm:$0x1]  ;;  %v2146_v50 = vshrl.u32 %v1929_v46, 16  ;;  %v2149_v15 = vshll.u32 %v1929_v46, 16  ;;  %1839 = vst [vmem:[#allocation3 + $0x440] sm:$0xf] %v1773_v48  ;;  %v1776_v58 = vsel %vm7612_vm13, %v1774_v32, %v1775_v44  ;;  %v6405_v48 = vpop.f32.mrf.mxu0 }
 0x143   : > { %v2155_v36 = vshll.u32 %v1930_v42, 16  ;;  %v2159_v17 = vshrl.u32 %v1930_v42, 16  ;;  %v2165_v54 = vshll.u32 %v1931_v24, 16  ;;  %v2425_v55 = vld [vmem:[#allocation2 + $0x6c] sm:$0xe] }
 0x144   : > { %v2148_v59 = vrot.slane %v2146_v50, 4  ;;  %v2151_v61 = vrot.slane %v2149_v15, 5  ;;  %v2426_v62 = vld [vmem:[#allocation2 + $0x70] sm:$0xf]  ;;  %v2427_v1 = vld [vmem:[#allocation2 + $0x74] sm:$0x1] }
 0x145   : > { %1840 = vst [vmem:[#allocation3 + $0x464] sm:$0xf] %v1776_v58  ;;  %v1871_v6 = vld [vmem:[#allocation2 + $0xc0] sm:$0xf]  ;;  %v2157_v29 = vrot.slane %v2155_v36, 5  ;;  %v2161_v63 = vrot.slane %v2159_v17, 4  ;;  %v6406_v58 = vpop.f32.mrf.mxu0 }
 0x146   : > { %v2167_v5 = vrot.slane %v2165_v54, 5  ;;  %v6095_v49 = vrot.slane %v2425_v55, 9  ;;  %1903 = vst [vmem:[#allocation3 + $0x444] sm:$0xf] %v1871_v6  ;;  %v2152_v18 = vor.u32 %v2151_v61, %v2148_v59  ;;  %v2555_v19 = vrot.slane %v2426_v62, 5 }
 0x147   : > { %v2558_v20 = vrot.slane %v2427_v1, 5  ;;  %v1932_v22 = vld [vmem:[#allocation2 + $0x78] sm:$0xf]  ;;  %v1933_v23 = vld [vmem:[#allocation2 + $0x7c] sm:$0xf]  ;;  %v2162_v30 = vor.u32 %v2161_v63, %v2157_v29  ;;  %v8097_v1 = vadd.f32 %v6406_v58, %v6405_v48 }
 0x148   : > { %v7094_v28 = vld [vmem:[#allocation3 + $0x20c] ss:$36 sps:$4 sm:$0xff]   ;;  %v2170_v52 = vshrl.u32 %v1932_v22, 16  ;;  %v2173_v26 = vshll.u32 %v1932_v22, 16  ;;  %v2153_v35 = vrot.slane %v2152_v18, 4  ;;  %v2556_v37 = vsel %vm7612_vm13, %v6095_v49, %v2555_v19 }
 0x149   : > { %v7099_v34 = vld [vmem:[#allocation3 + $0x208] ss:$36 sps:$4 sm:$0xff]   ;;  %v2557_v38 = vrot.slane %v2555_v19, 4  ;;  %5388 = vmatprep.mubr.bf16.mxu0 %v7094_v28  ;;  %v2163_v53 = vrot.slane %v2162_v30, 4  ;;  %2657 = vst [vmem:[#allocation3 + $0x254] sm:$0xf] %v2556_v37 }
 0x14a   : > { %v1934_v39 = vld [vmem:[#allocation2 + $0x80] sm:$0x1]  ;;  %v2172_v43 = vrot.slane %v2170_v52, 4  ;;  %v2175_v7 = vrot.slane %v2173_v26, 5  ;;  %v2179_v21 = vshll.u32 %v1933_v23, 16  ;;  %5389 = vmatmul.mubr.bf16.gmra.mxu0 %v7099_v34  ;;  %v2158_v0 = vsel %vm7329_vm4, %v2153_v35, %v2157_v29 }
 0x14b   : > { %v2428_v13 = vld [vmem:[#allocation2 + $0x78] sm:$0xe]  ;;  %v2559_v16 = vsel %vm7612_vm13, %v2557_v38, %v2558_v20  ;;  %v2183_v44 = vshrl.u32 %v1933_v23, 16  ;;  %v2189_v46 = vshll.u32 %v1934_v39, 16  ;;  %v2429_v42 = vld [vmem:[#allocation2 + $0x7c] sm:$0xf]  ;;  %v2168_v32 = vsel %vm7329_vm4, %v2163_v53, %v2167_v5 }
 0x14c   : > { %v2430_v47 = vld [vmem:[#allocation2 + $0x80] sm:$0x1]  ;;  %2385 = vst [vmem:[#allocation3 + $0x250] sm:$0xf] %v2158_v0  ;;  %2658 = vst [vmem:[#allocation3 + $0x278] sm:$0xf] %v2559_v16  ;;  %v2176_v24 = vor.u32 %v2175_v7, %v2172_v43 }
 0x14d   : > { %v2181_v50 = vrot.slane %v2179_v21, 5  ;;  %v6096_v15 = vrot.slane %v2428_v13, 9  ;;  %v2674_v36 = vld [vmem:[#allocation2 + $0x18] sm:$0xf]  ;;  %v2675_v17 = vld [vmem:[#allocation2 + $0x1c] sm:$0xf]  ;;  %v8107_v13 = vpop.f32.mrf.mxu1 }
 0x14e   : > { %2386 = vst [vmem:[#allocation3 + $0x274] sm:$0xf] %v2168_v32  ;;  %v2185_v54 = vrot.slane %v2183_v44, 4  ;;  %v2562_v55 = vrot.slane %v2429_v42, 5  ;;  %v2565_v57 = vrot.slane %v2430_v47, 5  ;;  %v2177_v62 = vrot.slane %v2176_v24, 4 }
 0x14f   : > { %2706 = vst [vmem:[#allocation3 + $0x18] sm:$0xf] %v2674_v36  ;;  %2707 = vst [vmem:[#allocation3 + $0x3c] sm:$0xf] %v2675_v17  ;;  %v7101_v59 = vld [vmem:[#allocation3 + $0x444] ss:$36 sps:$4 sm:$0xff]  }
 0x150   : > { %v7105_v61 = vld [vmem:[#allocation3 + $0x440] ss:$36 sps:$4 sm:$0xff]   ;;  %v2186_v12 = vor.u32 %v2185_v54, %v2181_v50  ;;  %v2191_v6 = vrot.slane %v2189_v46, 5  ;;  %v2563_v29 = vsel %vm7612_vm13, %v6096_v15, %v2562_v55  ;;  %v2564_v63 = vrot.slane %v2562_v55, 4  ;;  %5291 = vmatprep.mubr.bf16.mxu1 %v7101_v59  ;;  %v2740_v19 = vld [vmem:[#allocation2 + $0x20] sm:$0x1] }
 0x151   : > { %v2738_v5 = vld [vmem:[#allocation2 + $0x18] sm:$0xf]  ;;  %v2739_v49 = vld [vmem:[#allocation2 + $0x1c] sm:$0xf]  ;;  %v2182_v18 = vsel %vm7329_vm4, %v2177_v62, %v2181_v50  ;;  %2659 = vst [vmem:[#allocation3 + $0x29c] sm:$0xf] %v2563_v29  ;;  %5292 = vmatmul.mubr.bf16.gmra.mxu1 %v7105_v61 }
 0x152   : > { %v2787_v20 = vshrl.u32 %v2738_v5, 16  ;;  %v2790_v22 = vshll.u32 %v2738_v5, 16  ;;  %v2796_v23 = vshll.u32 %v2739_v49, 16  ;;  %v2187_v25 = vrot.slane %v2186_v12, 4  ;;  %2387 = vst [vmem:[#allocation3 + $0x298] sm:$0xf] %v2182_v18  ;;  %v8111_v12 = vpop.f32.mrf.mxu1 }
 0x153   : > { %v2566_v28 = vsel %vm7612_vm13, %v2564_v63, %v2565_v57  ;;  %v2800_v30 = vshrl.u32 %v2739_v49, 16  ;;  %v2806_v52 = vshll.u32 %v2740_v19, 16  ;;  %v1935_v39 = vld [vmem:[#allocation2 + $0x84] sm:$0xf]  ;;  %v7103_v53 = vld [vmem:[#allocation3 + $0x254] ss:$36 sps:$4 sm:$0xff]  }
 0x154   : > { %2660 = vst [vmem:[#allocation3 + $0x2c0] sm:$0xf] %v2566_v28  ;;  %v2789_v26 = vrot.slane %v2787_v20, 4  ;;  %v2792_v34 = vrot.slane %v2790_v22, 5  ;;  %v2798_v35 = vrot.slane %v2796_v23, 5  ;;  %v2192_v37 = vsel %vm7329_vm4, %v2187_v25, %v2191_v6  ;;  %5396 = vmatprep.mubr.bf16.mxu0 %v7103_v53 }
 0x155   : > { %v2802_v38 = vrot.slane %v2800_v30, 4  ;;  %v7106_v43 = vld [vmem:[#allocation3 + $0x250] ss:$36 sps:$4 sm:$0xff]   ;;  %2388 = vst [vmem:[#allocation3 + $0x2bc] sm:$0xf] %v2192_v37  ;;  %v2194_v21 = vshrl.u32 %v1935_v39, 16 }
 0x156   : > { %v2793_v7 = vor.u32 %v2792_v34, %v2789_v26  ;;  %v2808_v16 = vrot.slane %v2806_v52, 5  ;;  %v1936_v44 = vld [vmem:[#allocation2 + $0x88] sm:$0xf]  ;;  %v1937_v46 = vld [vmem:[#allocation2 + $0x8c] sm:$0x1]  ;;  %v2197_v42 = vshll.u32 %v1935_v39, 16  ;;  %5397 = vmatmul.mubr.bf16.gmra.mxu0 %v7106_v43  ;;  %v8118_v34 = vpop.f32.mrf.mxu0  ;;  %v6471_v43 = vpop.f32.mrf.mxu1 }
 0x157   : > { %v2803_v0 = vor.u32 %v2802_v38, %v2798_v35  ;;  %v2196_v48 = vrot.slane %v2194_v21, 4  ;;  %v2203_v32 = vshll.u32 %v1936_v44, 16  ;;  %v2207_v24 = vshrl.u32 %v1936_v44, 16  ;;  %v2431_v50 = vld [vmem:[#allocation2 + $0x84] sm:$0xe] }
 0x158   : > { %v2794_v47 = vrot.slane %v2793_v7, 4  ;;  %v2199_v36 = vrot.slane %v2197_v42, 5  ;;  %v2213_v17 = vshll.u32 %v1937_v46, 16  ;;  %v2432_v54 = vld [vmem:[#allocation2 + $0x88] sm:$0xf]  ;;  %v6097_v55 = vrot.slane %v2431_v50, 9 }
 0x159   : > { %v2804_v15 = vrot.slane %v2803_v0, 4  ;;  %v2205_v58 = vrot.slane %v2203_v32, 5  ;;  %v2209_v59 = vrot.slane %v2207_v24, 4  ;;  %v2433_v61 = vld [vmem:[#allocation2 + $0x8c] sm:$0x1]  ;;  %v2569_v62 = vrot.slane %v2432_v54, 5  ;;  %v6472_v24 = vpop.f32.mrf.mxu1 }
 0x15a   : > { %v2799_v57 = vsel %vm7329_vm4, %v2794_v47, %v2798_v35  ;;  %v2200_v63 = vor.u32 %v2199_v36, %v2196_v48  ;;  %v2572_v5 = vrot.slane %v2433_v61, 5  ;;  %v2676_v49 = vld [vmem:[#allocation2 + $0x24] sm:$0xf]  ;;  %v2677_v18 = vld [vmem:[#allocation2 + $0x28] sm:$0xf]  ;;  %v2215_v20 = vrot.slane %v2213_v17, 5 }
 0x15b   : > { %v2809_v29 = vsel %vm7329_vm4, %v2804_v15, %v2808_v16  ;;  %3202 = vst [vmem:[#allocation3 + $0x1c] sm:$0xf] %v2799_v57  ;;  %v2210_v19 = vor.u32 %v2209_v59, %v2205_v58  ;;  %v2570_v22 = vsel %vm7612_vm13, %v6097_v55, %v2569_v62  ;;  %v2571_v23 = vrot.slane %v2569_v62, 4  ;;  %2708 = vst [vmem:[#allocation3 + $0x60] sm:$0xf] %v2676_v49  ;;  %v8126_v55 = vpop.f32.mrf.mxu0 }
 0x15c   : > { %3203 = vst [vmem:[#allocation3 + $0x40] sm:$0xf] %v2809_v29  ;;  %2709 = vst [vmem:[#allocation3 + $0x84] sm:$0xf] %v2677_v18  ;;  %v2741_v25 = vld [vmem:[#allocation2 + $0x24] sm:$0xf]  ;;  %v8128_v29 = vpop.f32.mrf.mxu1 }
 0x15d   : > { %v2742_v28 = vld [vmem:[#allocation2 + $0x28] sm:$0xf]  ;;  %v7107_v30 = vld [vmem:[#allocation3 + $0x29c] ss:$36 sps:$4 sm:$0xff]   ;;  %v2201_v26 = vrot.slane %v2200_v63, 4  ;;  %v2211_v35 = vrot.slane %v2210_v19, 4  ;;  %v2573_v37 = vsel %vm7612_vm13, %v2571_v23, %v2572_v5  ;;  %v8130_v19 = vadd.f32 %v6472_v24, %v6471_v43 }
 0x15e   : > { %v7113_v52 = vld [vmem:[#allocation3 + $0x298] ss:$36 sps:$4 sm:$0xff]   ;;  %2661 = vst [vmem:[#allocation3 + $0x2e4] sm:$0xf] %v2570_v22  ;;  %v2743_v38 = vld [vmem:[#allocation2 + $0x2c] sm:$0x1]  ;;  %5404 = vmatprep.mubr.bf16.mxu0 %v7107_v30 }
 0x15f   : > { %v2811_v39 = vshrl.u32 %v2741_v25, 16  ;;  %v2814_v53 = vshll.u32 %v2741_v25, 16  ;;  %v2206_v7 = vsel %vm7329_vm4, %v2201_v26, %v2205_v58  ;;  %2662 = vst [vmem:[#allocation3 + $0x308] sm:$0xf] %v2573_v37  ;;  %v2820_v21 = vshll.u32 %v2742_v28, 16  ;;  %5405 = vmatmul.mubr.bf16.gmra.mxu0 %v7113_v52 }
 0x160   : > { %v2824_v0 = vshrl.u32 %v2742_v28, 16  ;;  %v2830_v16 = vshll.u32 %v2743_v38, 16  ;;  %v1938_v44 = vld [vmem:[#allocation2 + $0x90] sm:$0xf]  ;;  %v2216_v46 = vsel %vm7329_vm4, %v2211_v35, %v2215_v20  ;;  %2389 = vst [vmem:[#allocation3 + $0x2e0] sm:$0xf] %v2206_v7  ;;  %v8132_v38 = vpop.f32.mrf.mxu1 }
 0x161   : > { %v2813_v42 = vrot.slane %v2811_v39, 4  ;;  %v2816_v47 = vrot.slane %v2814_v53, 5  ;;  %v1939_v48 = vld [vmem:[#allocation2 + $0x94] sm:$0xf]  ;;  %v1940_v32 = vld [vmem:[#allocation2 + $0x98] sm:$0x1]  ;;  %v6411_v39 = vpop.f32.mrf.mxu0 }
 0x162   : > { %2390 = vst [vmem:[#allocation3 + $0x304] sm:$0xf] %v2216_v46  ;;  %v2822_v50 = vrot.slane %v2820_v21, 5  ;;  %v2826_v15 = vrot.slane %v2824_v0, 4  ;;  %v2832_v36 = vrot.slane %v2830_v16, 5  ;;  %v2218_v17 = vshrl.u32 %v1938_v44, 16 }
 0x163   : > { %v2434_v54 = vld [vmem:[#allocation2 + $0x90] sm:$0xe]  ;;  %v2817_v57 = vor.u32 %v2816_v47, %v2813_v42  ;;  %v2221_v58 = vshll.u32 %v1938_v44, 16  ;;  %v2227_v59 = vshll.u32 %v1939_v48, 16  ;;  %v2231_v61 = vshrl.u32 %v1939_v48, 16 }
 0x164   : > { %v2435_v62 = vld [vmem:[#allocation2 + $0x94] sm:$0xf]  ;;  %v2827_v49 = vor.u32 %v2826_v15, %v2822_v50  ;;  %v2220_v18 = vrot.slane %v2218_v17, 4  ;;  %v2436_v28 = vld [vmem:[#allocation2 + $0x98] sm:$0x1]  ;;  %v2237_v52 = vshll.u32 %v1940_v32, 16  ;;  %v6412_v32 = vpop.f32.mrf.mxu0 }
 0x165   : > { %v7109_v63 = vld [vmem:[#allocation3 + $0x18] ss:$36 sps:$4 sm:$0xff]   ;;  %v2818_v20 = vrot.slane %v2817_v57, 4  ;;  %v2223_v22 = vrot.slane %v2221_v58, 5  ;;  %v2229_v23 = vrot.slane %v2227_v59, 5  ;;  %v2233_v25 = vrot.slane %v2231_v61, 4  ;;  %v6477_v61 = vpop.f32.mrf.mxu1 }
 0x166   : > { %v7111_v5 = vld [vmem:[#allocation3 + $0x1c] ss:$36 sps:$4 sm:$0xff]   ;;  %v2828_v30 = vrot.slane %v2827_v49, 4  ;;  %v6098_v26 = vrot.slane %v2434_v54, 9  ;;  %v2576_v35 = vrot.slane %v2435_v62, 5  ;;  %v2579_v21 = vrot.slane %v2436_v28, 5 }
 0x167   : > { %5493 = vmatprep.mubr.bf16.mxu1 %v7111_v5  ;;  %v2678_v37 = vld [vmem:[#allocation2 + $0x30] sm:$0xf]  ;;  %v2823_v53 = vsel %vm7329_vm4, %v2818_v20, %v2822_v50  ;;  %v2224_v43 = vor.u32 %v2223_v22, %v2220_v18  ;;  %v2234_v7 = vor.u32 %v2233_v25, %v2229_v23  ;;  %v2679_v0 = vld [vmem:[#allocation2 + $0x34] sm:$0xf]  ;;  %v2239_v46 = vrot.slane %v2237_v52, 5  ;;  %v6478_v28 = vpop.f32.mrf.mxu1 }
 0x168   : > { %5494 = vmatmul.mubr.bf16.vlgmr.msra.gmra.mxu1 %v7109_v63  ;;  %2710 = vst [vmem:[#allocation3 + $0xa8] sm:$0xf] %v2678_v37  ;;  %v2744_v16 = vld [vmem:[#allocation2 + $0x30] sm:$0xf]  ;;  %v2833_v44 = vsel %vm7329_vm4, %v2828_v30, %v2832_v36  ;;  %3204 = vst [vmem:[#allocation3 + $0x64] sm:$0xf] %v2823_v53  ;;  %v2577_v42 = vsel %vm7612_vm13, %v6098_v26, %v2576_v35  ;;  %v8140_v17 = vadd.f32 %v6412_v32, %v6411_v39 }
 0x169   : > { %v2578_v47 = vrot.slane %v2576_v35, 4  ;;  %2711 = vst [vmem:[#allocation3 + $0xcc] sm:$0xf] %v2679_v0  ;;  %v2745_v48 = vld [vmem:[#allocation2 + $0x34] sm:$0xf]  ;;  %v2225_v15 = vrot.slane %v2224_v43, 4 }
 0x16a   : > { %v7114_v24 = vld [vmem:[#allocation3 + $0x2e4] ss:$36 sps:$4 sm:$0xff]   ;;  %3205 = vst [vmem:[#allocation3 + $0x88] sm:$0xf] %v2833_v44  ;;  %2663 = vst [vmem:[#allocation3 + $0x32c] sm:$0xf] %v2577_v42  ;;  %v8150_v42 = vadd.f32 %v6478_v28, %v6477_v61 }
 0x16b   : > { %v7118_v50 = vld [vmem:[#allocation3 + $0x2e0] ss:$36 sps:$4 sm:$0xff]   ;;  %v2235_v54 = vrot.slane %v2234_v7, 4  ;;  %v2580_v36 = vsel %vm7612_vm13, %v2578_v47, %v2579_v21  ;;  %v2835_v58 = vshrl.u32 %v2744_v16, 16  ;;  %v2838_v59 = vshll.u32 %v2744_v16, 16  ;;  %5412 = vmatprep.mubr.bf16.mxu0 %v7114_v24  ;;  %v8148_v21 = vpop.f32.mrf.mxu1 }
 0x16c   : > { %v2746_v57 = vld [vmem:[#allocation2 + $0x38] sm:$0x1]  ;;  %v2230_v62 = vsel %vm7329_vm4, %v2225_v15, %v2229_v23  ;;  %2664 = vst [vmem:[#allocation3 + $0x350] sm:$0xf] %v2580_v36  ;;  %v2844_v63 = vshll.u32 %v2745_v48, 16  ;;  %v2848_v5 = vshrl.u32 %v2745_v48, 16  ;;  %5413 = vmatmul.mubr.bf16.gmra.mxu0 %v7118_v50 }
 0x16d   : > { %v2854_v49 = vshll.u32 %v2746_v57, 16  ;;  %v2240_v18 = vsel %vm7329_vm4, %v2235_v54, %v2239_v46  ;;  %2391 = vst [vmem:[#allocation3 + $0x328] sm:$0xf] %v2230_v62  ;;  %v2837_v20 = vrot.slane %v2835_v58, 4  ;;  %v2840_v22 = vrot.slane %v2838_v59, 5  ;;  %8753 = vst [vmem:[#allocation4_spill] sm:$0xff] %v8148_v21  ;;  %v8152_v24 = vpop.f32.mrf.mxu1 }
 0x16e   : > { %v1941_v25 = vld [vmem:[#allocation2 + $0x9c] sm:$0xf]  ;;  %2392 = vst [vmem:[#allocation3 + $0x34c] sm:$0xf] %v2240_v18  ;;  %v2846_v30 = vrot.slane %v2844_v63, 5  ;;  %v2850_v52 = vrot.slane %v2848_v5, 4 }
 0x16f   : > { %v2856_v26 = vrot.slane %v2854_v49, 5  ;;  %v1942_v35 = vld [vmem:[#allocation2 + $0xa0] sm:$0xf]  ;;  %v2242_v37 = vshrl.u32 %v1941_v25, 16  ;;  %v2841_v23 = vor.u32 %v2840_v22, %v2837_v20  ;;  %v1943_v39 = vld [vmem:[#allocation2 + $0xa4] sm:$0x1]  ;;  %v6499_v61 = vpop.f32.mrf.mxu1 }
 0x170   : > { %v2245_v53 = vshll.u32 %v1941_v25, 16  ;;  %v2251_v43 = vshll.u32 %v1942_v35, 16  ;;  %v2255_v7 = vshrl.u32 %v1942_v35, 16  ;;  %v2851_v0 = vor.u32 %v2850_v52, %v2846_v30  ;;  %v2437_v46 = vld [vmem:[#allocation2 + $0x9c] sm:$0xe]  ;;  %8754 = vst [vmem:[#allocation5_spill] sm:$0xff] %v8150_v42 }
 0x171   : > { %v2244_v16 = vrot.slane %v2242_v37, 4  ;;  %v2261_v44 = vshll.u32 %v1943_v39, 16  ;;  %v7116_v47 = vld [vmem:[#allocation3 + $0x64] ss:$36 sps:$4 sm:$0xff]   ;;  %v2842_v32 = vrot.slane %v2841_v23, 4  ;;  %8755 = vst [vmem:[#allocation6_spill] sm:$0xff] %v8152_v24  ;;  %v8162_v23 = vadd.f32 %v8014_v33, %v8006_v11 }
 0x172   : > { %v7119_v48 = vld [vmem:[#allocation3 + $0x60] ss:$36 sps:$4 sm:$0xff]   ;;  %v2852_v50 = vrot.slane %v2851_v0, 4  ;;  %v2247_v15 = vrot.slane %v2245_v53, 5  ;;  %v2253_v54 = vrot.slane %v2251_v43, 5  ;;  %v2257_v36 = vrot.slane %v2255_v7, 4  ;;  %5501 = vmatprep.mubr.bf16.mxu1 %v7116_v47 }
 0x173   : > { %v2438_v57 = vld [vmem:[#allocation2 + $0xa0] sm:$0xf]  ;;  %v2847_v58 = vsel %vm7329_vm4, %v2842_v32, %v2846_v30  ;;  %v2263_v59 = vrot.slane %v2261_v44, 5  ;;  %v2439_v62 = vld [vmem:[#allocation2 + $0xa4] sm:$0x1]  ;;  %v6099_v63 = vrot.slane %v2437_v46, 9  ;;  %5502 = vmatmul.mubr.bf16.gmra.mxu1 %v7119_v48  ;;  %v8166_v0 = vadd.f32 %v8067_v31, %v8059_v3 }
 0x174   : > { %v2583_v5 = vrot.slane %v2438_v57, 5  ;;  %v2857_v49 = vsel %vm7329_vm4, %v2852_v50, %v2856_v26  ;;  %3206 = vst [vmem:[#allocation3 + $0xac] sm:$0xf] %v2847_v58  ;;  %v2248_v18 = vor.u32 %v2247_v15, %v2244_v16  ;;  %v2258_v20 = vor.u32 %v2257_v36, %v2253_v54  ;;  %v2680_v25 = vld [vmem:[#allocation2 + $0x3c] sm:$0xf]  ;;  %v6500_v26 = vpop.f32.mrf.mxu1  ;;  %v8168_v16 = vpop.f32.mrf.mxu0 }
 0x175   : > { %v2586_v22 = vrot.slane %v2439_v62, 5  ;;  %v2681_v28 = vld [vmem:[#allocation2 + $0x40] sm:$0xf]  ;;  %v7120_v52 = vld [vmem:[#allocation3 + $0x32c] ss:$36 sps:$4 sm:$0xff]   ;;  %v6501_v44 = vadd.f32 %v6500_v26, %v6499_v61 }
 0x176   : > { %3207 = vst [vmem:[#allocation3 + $0xd0] sm:$0xf] %v2857_v49  ;;  %v7125_v35 = vld [vmem:[#allocation3 + $0x328] ss:$36 sps:$4 sm:$0xff]   ;;  %v2584_v30 = vsel %vm7612_vm13, %v6099_v63, %v2583_v5  ;;  %v2585_v37 = vrot.slane %v2583_v5, 4  ;;  %v2249_v39 = vrot.slane %v2248_v18, 4  ;;  %5420 = vmatprep.mubr.bf16.mxu0 %v7120_v52  ;;  %v6502_v32 = vpop.f32.mrf.mxu1 }
 0x177   : > { %2712 = vst [vmem:[#allocation3 + $0xf0] sm:$0xf] %v2680_v25  ;;  %2713 = vst [vmem:[#allocation3 + $0x114] sm:$0xf] %v2681_v28  ;;  %v2259_v53 = vrot.slane %v2258_v20, 4  ;;  %5421 = vmatmul.mubr.bf16.gmra.mxu0 %v7125_v35  ;;  %v8176_v28 = vpop.f32.mrf.mxu0 }
 0x178   : > { %2665 = vst [vmem:[#allocation3 + $0x374] sm:$0xf] %v2584_v30  ;;  %v2747_v43 = vld [vmem:[#allocation2 + $0x3c] sm:$0xf]  ;;  %v2748_v7 = vld [vmem:[#allocation2 + $0x40] sm:$0xf]  ;;  %v2587_v46 = vsel %vm7612_vm13, %v2585_v37, %v2586_v22  ;;  %v2254_v50 = vsel %vm7329_vm4, %v2249_v39, %v2253_v54  ;;  %v6503_v49 = vpop.f32.mrf.mxu1 }
 0x179   : > { %v2749_v47 = vld [vmem:[#allocation2 + $0x44] sm:$0x1]  ;;  %v2859_v11 = vshrl.u32 %v2747_v43, 16  ;;  %v2862_v33 = vshll.u32 %v2747_v43, 16  ;;  %v2868_v48 = vshll.u32 %v2748_v7, 16  ;;  %v2264_v3 = vsel %vm7329_vm4, %v2259_v53, %v2263_v59 }
 0x17a   : > { %2666 = vst [vmem:[#allocation3 + $0x398] sm:$0xf] %v2587_v46  ;;  %v2872_v31 = vshrl.u32 %v2748_v7, 16  ;;  %v2878_v15 = vshll.u32 %v2749_v47, 16  ;;  %v1944_v36 = vld [vmem:[#allocation2 + $0xa8] sm:$0xf]  ;;  %v6505_v26 = vpop.f32.mrf.mxu1  ;;  %v8179_v46 = vadd.f32 %v6501_v44, %v7977_v60  ;;  %v6504_v47 = vadd.f32 %v6503_v49, %v6502_v32 }
 0x17b   : > { %v1945_v57 = vld [vmem:[#allocation2 + $0xac] sm:$0xf]  ;;  %2393 = vst [vmem:[#allocation3 + $0x370] sm:$0xf] %v2254_v50  ;;  %2394 = vst [vmem:[#allocation3 + $0x394] sm:$0xf] %v2264_v3 }
 0x17c   : > { %v2861_v58 = vrot.slane %v2859_v11, 4  ;;  %v2864_v62 = vrot.slane %v2862_v33, 5  ;;  %v2870_v63 = vrot.slane %v2868_v48, 5  ;;  %v1946_v5 = vld [vmem:[#allocation2 + $0xb0] sm:$0x1]  ;;  %v2266_v61 = vshrl.u32 %v1944_v36, 16 }
 0x17d   : > { %v2874_v18 = vrot.slane %v2872_v31, 4  ;;  %v2880_v20 = vrot.slane %v2878_v15, 5  ;;  %v2269_v22 = vshll.u32 %v1944_v36, 16  ;;  %v2275_v54 = vshll.u32 %v1945_v57, 16  ;;  %v2440_v25 = vld [vmem:[#allocation2 + $0xa8] sm:$0xe]  ;;  %v6506_v31 = vpop.f32.mrf.mxu1 }
 0x17e   : > { %v2865_v59 = vor.u32 %v2864_v62, %v2861_v58  ;;  %v2268_v52 = vrot.slane %v2266_v61, 4  ;;  %v2279_v35 = vshrl.u32 %v1945_v57, 16  ;;  %v2285_v30 = vshll.u32 %v1946_v5, 16  ;;  %v2441_v37 = vld [vmem:[#allocation2 + $0xac] sm:$0xf]  ;;  %v6417_v5 = vpop.f32.mrf.mxu0 }
 0x17f   : > { %v7122_v39 = vld [vmem:[#allocation3 + $0xac] ss:$36 sps:$4 sm:$0xff]   ;;  %v2875_v43 = vor.u32 %v2874_v18, %v2870_v63  ;;  %v2271_v7 = vrot.slane %v2269_v22, 5  ;;  %v2277_v33 = vrot.slane %v2275_v54, 5  ;;  %v2442_v3 = vld [vmem:[#allocation2 + $0xb0] sm:$0x1]  ;;  %v8184_v18 = vadd.f32 %v6504_v47, %v8162_v23  ;;  %v6508_v22 = vpop.f32.mrf.mxu1 }
 0x180   : > { %v7126_v53 = vld [vmem:[#allocation3 + $0xa8] ss:$36 sps:$4 sm:$0xff]   ;;  %v2866_v11 = vrot.slane %v2865_v59, 4  ;;  %v2281_v48 = vrot.slane %v2279_v35, 4  ;;  %v2287_v50 = vrot.slane %v2285_v30, 5  ;;  %5509 = vmatprep.mubr.bf16.mxu1 %v7122_v39  ;;  %v6100_v57 = vrot.slane %v2440_v25, 9 }
 0x181   : > { %v2876_v15 = vrot.slane %v2875_v43, 4  ;;  %v2272_v36 = vor.u32 %v2271_v7, %v2268_v52  ;;  %v2590_v58 = vrot.slane %v2441_v37, 5  ;;  %v2682_v62 = vld [vmem:[#allocation2 + $0x48] sm:$0xf]  ;;  %5510 = vmatmul.mubr.bf16.gmra.mxu1 %v7126_v53  ;;  %v2593_v44 = vrot.slane %v2442_v3, 5  ;;  %v6509_v7 = vpop.f32.mrf.mxu1 }
 0x182   : > { %v2871_v61 = vsel %vm7329_vm4, %v2866_v11, %v2870_v63  ;;  %v2282_v60 = vor.u32 %v2281_v48, %v2277_v33  ;;  %v2683_v32 = vld [vmem:[#allocation2 + $0x4c] sm:$0xf]  ;;  %2714 = vst [vmem:[#allocation3 + $0x138] sm:$0xf] %v2682_v62  ;;  %v2750_v49 = vld [vmem:[#allocation2 + $0x48] sm:$0xf]  ;;  %v6418_v63 = vpop.f32.mrf.mxu0  ;;  %v6507_v43 = vadd.f32 %v6506_v31, %v6505_v26 }
 0x183   : > { %v7127_v54 = vld [vmem:[#allocation3 + $0x374] ss:$36 sps:$4 sm:$0xff]   ;;  %v2881_v25 = vsel %vm7329_vm4, %v2876_v15, %v2880_v20  ;;  %3208 = vst [vmem:[#allocation3 + $0xf4] sm:$0xf] %v2871_v61  ;;  %v2273_v59 = vrot.slane %v2272_v36, 4  ;;  %v2591_v52 = vsel %vm7612_vm13, %v6100_v57, %v2590_v58  ;;  %v2592_v35 = vrot.slane %v2590_v58, 4  ;;  %v6511_v58 = vpop.f32.mrf.mxu1 }
 0x184   : > { %2715 = vst [vmem:[#allocation3 + $0x15c] sm:$0xf] %v2683_v32  ;;  %3209 = vst [vmem:[#allocation3 + $0x118] sm:$0xf] %v2881_v25  ;;  %v7131_v30 = vld [vmem:[#allocation3 + $0x370] ss:$36 sps:$4 sm:$0xff]   ;;  %v8190_v53 = vadd.f32 %v6418_v63, %v6417_v5  ;;  %5428 = vmatprep.mubr.bf16.mxu0 %v7127_v54  ;;  %v8196_v15 = vpop.f32.mrf.mxu0 }
 0x185   : > { %v2283_v37 = vrot.slane %v2282_v60, 4  ;;  %2667 = vst [vmem:[#allocation3 + $0x3bc] sm:$0xf] %v2591_v52  ;;  %v2751_v39 = vld [vmem:[#allocation2 + $0x4c] sm:$0xf]  ;;  %v2883_v23 = vshrl.u32 %v2750_v49, 16  ;;  %v2278_v20 = vsel %vm7329_vm4, %v2273_v59, %v2277_v33  ;;  %v2594_v47 = vsel %vm7612_vm13, %v2592_v35, %v2593_v44  ;;  %5429 = vmatmul.mubr.bf16.gmra.mxu0 %v7131_v30  ;;  %v6512_v59 = vpop.f32.mrf.mxu1 }
 0x186   : > { %v2752_v11 = vld [vmem:[#allocation2 + $0x50] sm:$0x1]  ;;  %v2886_v48 = vshll.u32 %v2750_v49, 16  ;;  %v2892_v3 = vshll.u32 %v2751_v39, 16  ;;  %2395 = vst [vmem:[#allocation3 + $0x3b8] sm:$0xf] %v2278_v20  ;;  %v8201_v60 = vadd.f32 %v6507_v43, %v8031_v10  ;;  %v6510_v44 = vadd.f32 %v6509_v7, %v6508_v22 }
 0x187   : > { %v2288_v36 = vsel %vm7329_vm4, %v2283_v37, %v2287_v50  ;;  %2668 = vst [vmem:[#allocation3 + $0x3e0] sm:$0xf] %v2594_v47  ;;  %v2885_v26 = vrot.slane %v2883_v23, 4  ;;  %v2896_v31 = vshrl.u32 %v2751_v39, 16  ;;  %v2902_v57 = vshll.u32 %v2752_v11, 16  ;;  %v8203_v39 = vpop.f32.mrf.mxu0  ;;  %v6514_v43 = vpop.f32.mrf.mxu1 }
 0x188   : > { %2396 = vst [vmem:[#allocation3 + $0x3dc] sm:$0xf] %v2288_v36  ;;  %v2888_v33 = vrot.slane %v2886_v48, 5  ;;  %v2894_v62 = vrot.slane %v2892_v3, 5  ;;  %v1947_v5 = vld [vmem:[#allocation2 + $0xb4] sm:$0xf]  ;;  %v8206_v3 = vadd.f32 %v6510_v44, %v8166_v0  ;;  %v6513_v36 = vadd.f32 %v6512_v59, %v6511_v58 }
 0x189   : > { %v1948_v61 = vld [vmem:[#allocation2 + $0xb8] sm:$0xf]  ;;  %v2898_v32 = vrot.slane %v2896_v31, 4  ;;  %v2904_v49 = vrot.slane %v2902_v57, 5  ;;  %v1949_v54 = vld [vmem:[#allocation2 + $0xbc] sm:$0x1]  ;;  %v6423_v6 = vpop.f32.mrf.mxu0 }
 0x18a   : > { %v2290_v25 = vshrl.u32 %v1947_v5, 16  ;;  %v2293_v50 = vshll.u32 %v1947_v5, 16  ;;  %v2889_v52 = vor.u32 %v2888_v33, %v2885_v26  ;;  %v2299_v35 = vshll.u32 %v1948_v61, 16  ;;  %v2443_v37 = vld [vmem:[#allocation2 + $0xb4] sm:$0xe] }
 0x18b   : > { %v2303_v63 = vshrl.u32 %v1948_v61, 16  ;;  %v2309_v30 = vshll.u32 %v1949_v54, 16  ;;  %v2899_v23 = vor.u32 %v2898_v32, %v2894_v62  ;;  %v2444_v11 = vld [vmem:[#allocation2 + $0xb8] sm:$0xf]  ;;  %v6101_v10 = vrot.slane %v2443_v37, 9  ;;  %v6515_v61 = vpop.f32.mrf.mxu1 }
 0x18c   : > { %v2292_v20 = vrot.slane %v2290_v25, 4  ;;  %v2295_v47 = vrot.slane %v2293_v50, 5  ;;  %v7129_v22 = vld [vmem:[#allocation3 + $0xf4] ss:$36 sps:$4 sm:$0xff]   ;;  %v2890_v48 = vrot.slane %v2889_v52, 4  ;;  %v2301_v57 = vrot.slane %v2299_v35, 5 }
 0x18d   : > { %v7132_v7 = vld [vmem:[#allocation3 + $0xf0] ss:$36 sps:$4 sm:$0xff]   ;;  %v2900_v26 = vrot.slane %v2899_v23, 4  ;;  %v2305_v33 = vrot.slane %v2303_v63, 4  ;;  %v2445_v5 = vld [vmem:[#allocation2 + $0xbc] sm:$0x1]  ;;  %5517 = vmatprep.mubr.bf16.mxu1 %v7129_v22  ;;  %v8213_v35 = vadd.f32 %v6513_v36, %v8081_v27 }
 0x18e   : > { %v2296_v31 = vor.u32 %v2295_v47, %v2292_v20  ;;  %v2895_v32 = vsel %vm7329_vm4, %v2890_v48, %v2894_v62  ;;  %v2311_v54 = vrot.slane %v2309_v30, 5  ;;  %v2597_v25 = vrot.slane %v2444_v11, 5  ;;  %v2684_v37 = vld [vmem:[#allocation2 + $0x54] sm:$0xf]  ;;  %5518 = vmatmul.mubr.bf16.gmra.mxu1 %v7132_v7  ;;  %v2685_v30 = vld [vmem:[#allocation2 + $0x58] sm:$0xf]  ;;  %v6424_v47 = vpop.f32.mrf.mxu0 }
 0x18f   : > { %v2600_v50 = vrot.slane %v2445_v5, 5  ;;  %v7133_v52 = vld [vmem:[#allocation3 + $0x3bc] ss:$36 sps:$4 sm:$0xff]   ;;  %v2905_v0 = vsel %vm7329_vm4, %v2900_v26, %v2904_v49  ;;  %3210 = vst [vmem:[#allocation3 + $0x13c] sm:$0xf] %v2895_v32  ;;  %v2306_v59 = vor.u32 %v2305_v33, %v2301_v57  ;;  %v6404_v20 = vadd.f32 %v8087_v2, %v8083_v14 }
 0x190   : > { %v7138_v58 = vld [vmem:[#allocation3 + $0x3b8] ss:$36 sps:$4 sm:$0xff]   ;;  %v2297_v44 = vrot.slane %v2296_v31, 4  ;;  %2716 = vst [vmem:[#allocation3 + $0x180] sm:$0xf] %v2684_v37  ;;  %v2598_v62 = vsel %vm7612_vm13, %v6101_v10, %v2597_v25  ;;  %v2599_v63 = vrot.slane %v2597_v25, 4  ;;  %v6516_v49 = vadd.f32 %v6515_v61, %v6514_v43  ;;  %5436 = vmatprep.mubr.bf16.mxu0 %v7133_v52  ;;  %v8225_v31 = vpop.f32.mrf.mxu0 }
 0x191   : > { %3211 = vst [vmem:[#allocation3 + $0x160] sm:$0xf] %v2905_v0  ;;  %v2753_v23 = vld [vmem:[#allocation2 + $0x54] sm:$0xf]  ;;  %v2307_v22 = vrot.slane %v2306_v59, 4  ;;  %v8221_v36 = vadd.f32 %v6424_v47, %v6423_v6  ;;  %5437 = vmatmul.mubr.bf16.gmra.mxu0 %v7138_v58  ;;  %v8756_v6 = vrot.slane %v8029_v8, 4 }
 0x192   : > { %v2302_v11 = vsel %vm7329_vm4, %v2297_v44, %v2301_v57  ;;  %2669 = vst [vmem:[#allocation3 + $0x404] sm:$0xf] %v2598_v62  ;;  %2717 = vst [vmem:[#allocation3 + $0x1a4] sm:$0xf] %v2685_v30  ;;  %v2754_v27 = vld [vmem:[#allocation2 + $0x58] sm:$0xf]  ;;  %v2601_v10 = vsel %vm7612_vm13, %v2599_v63, %v2600_v50  ;;  %v6517_v57 = vpop.f32.mrf.mxu1  ;;  %v8233_v59 = vpop.f32.mrf.mxu0 }
 0x193   : > { %v2755_v7 = vld [vmem:[#allocation2 + $0x5c] sm:$0x1]  ;;  %v2907_v48 = vshrl.u32 %v2753_v23, 16  ;;  %2397 = vst [vmem:[#allocation3 + $0x400] sm:$0xf] %v2302_v11  ;;  %v2910_v14 = vshll.u32 %v2753_v23, 16  ;;  %v2312_v33 = vsel %vm7329_vm4, %v2307_v22, %v2311_v54 }
 0x194   : > { %v2916_v2 = vshll.u32 %v2754_v27, 16  ;;  %v2920_v43 = vshrl.u32 %v2754_v27, 16  ;;  %v1000_v26 = vld [vmem:[#allocation2 + $0xc8] sm:$0x1]  ;;  %2670 = vst [vmem:[#allocation3 + $0x428] sm:$0xf] %v2601_v10  ;;  %v6518_v54 = vpop.f32.mrf.mxu1 }
 0x195   : > { %v2909_v5 = vrot.slane %v2907_v48, 4  ;;  %v2926_v61 = vshll.u32 %v2755_v7, 16  ;;  %v1001_v32 = vsel %vm7354_vm8, %v8756_v6, %v1000_v26  ;;  %v1950_v25 = vld [vmem:[#allocation2 + $0xc0] sm:$0xf]  ;;  %v1951_v50 = vld [vmem:[#allocation2 + $0xc4] sm:$0xf]  ;;  %v6429_v7 = vpop.f32.mrf.mxu0  ;;  %v6519_v26 = vadd.f32 %v6518_v54, %v6517_v57 }
 0x196   : > { %2398 = vst [vmem:[#allocation3 + $0x424] sm:$0xf] %v2312_v33  ;;  %v2912_v37 = vrot.slane %v2910_v14, 5  ;;  %v2918_v52 = vrot.slane %v2916_v2, 5  ;;  %v2922_v0 = vrot.slane %v2920_v43, 4  ;;  %v2314_v58 = vshrl.u32 %v1950_v25, 16  ;;  %v6520_v48 = vpop.f32.mrf.mxu1 }
 0x197   : > { %1002 = vst [vmem:[#allocation2 + $0xc8] sm:$0x1] %v1001_v32  ;;  %v2446_v44 = vld [vmem:[#allocation2 + $0xc0] sm:$0xe]  ;;  %v2928_v62 = vrot.slane %v2926_v61, 5  ;;  %v2317_v63 = vshll.u32 %v1950_v25, 16  ;;  %v8235_v43 = vadd.f32 %v6516_v49, %v6404_v20 }
 0x198   : > { %v2323_v30 = vshll.u32 %v1951_v50, 16  ;;  %v2327_v23 = vshrl.u32 %v1951_v50, 16  ;;  %v2447_v8 = vld [vmem:[#allocation2 + $0xc4] sm:$0xf]  ;;  %v2913_v47 = vor.u32 %v2912_v37, %v2909_v5  ;;  %v2923_v4 = vor.u32 %v2922_v0, %v2918_v52  ;;  %v2686_v27 = vld [vmem:[#allocation2 + $0x60] sm:$0xf]  ;;  %v6430_v50 = vpop.f32.mrf.mxu0  ;;  %v6521_v5 = vpop.f32.mrf.mxu1 }
 0x199   : > { %v2316_v11 = vrot.slane %v2314_v58, 4  ;;  %v6102_v22 = vrot.slane %v2446_v44, 9  ;;  %v7135_v10 = vld [vmem:[#allocation3 + $0x13c] ss:$36 sps:$4 sm:$0xff]   ;;  %v2319_v2 = vrot.slane %v2317_v63, 5  ;;  %v2604_v0 = vrot.slane %v2447_v8, 5 }
 0x19a   : > { %v7139_v14 = vld [vmem:[#allocation3 + $0x138] ss:$36 sps:$4 sm:$0xff]   ;;  %2718 = vst [vmem:[#allocation3 + $0x1c8] sm:$0xf] %v2686_v27  ;;  %v2914_v33 = vrot.slane %v2913_v47, 4  ;;  %v2924_v61 = vrot.slane %v2923_v4, 4  ;;  %5525 = vmatprep.mubr.bf16.mxu1 %v7135_v10  ;;  %v8237_v24 = vadd.f32 %v6430_v50, %v6429_v7  ;;  %v8240_v63 = vadd.f32 %v6519_v26, %v8097_v1 }
 0x19b   : > { %v2325_v6 = vrot.slane %v2323_v30, 5  ;;  %v2329_v32 = vrot.slane %v2327_v23, 4  ;;  %v2687_v25 = vld [vmem:[#allocation2 + $0x64] sm:$0xf]  ;;  %v2320_v37 = vor.u32 %v2319_v2, %v2316_v11  ;;  %v2756_v58 = vld [vmem:[#allocation2 + $0x60] sm:$0xf]  ;;  %5526 = vmatmul.mubr.bf16.gmra.mxu1 %v7139_v14  ;;  %v6523_v23 = vpop.f32.mrf.mxu1  ;;  %v2605_v1 = vsel %vm7612_vm13, %v6102_v22, %v2604_v0 }
 0x19c   : > { %2719 = vst [vmem:[#allocation3 + $0x1ec] sm:$0xf] %v2687_v25  ;;  %v2757_v44 = vld [vmem:[#allocation2 + $0x64] sm:$0xf]  ;;  %v2919_v20 = vsel %vm7329_vm4, %v2914_v33, %v2918_v52  ;;  %v2929_v49 = vsel %vm7329_vm4, %v2924_v61, %v2928_v62  ;;  %v2758_v54 = vld [vmem:[#allocation2 + $0x68] sm:$0x1]  ;;  %v6522_v11 = vadd.f32 %v6521_v5, %v6520_v48  ;;  %v6410_v62 = vadd.f32 %v8126_v55, %v8118_v34  ;;  %v8252_v5 = vpop.f32.mrf.mxu0 }
 0x19d   : > { %v2330_v57 = vor.u32 %v2329_v32, %v2325_v6  ;;  %v2931_v30 = vshrl.u32 %v2756_v58, 16  ;;  %v7140_v8 = vld [vmem:[#allocation3 + $0x404] ss:$36 sps:$4 sm:$0xff]   ;;  %3212 = vst [vmem:[#allocation3 + $0x184] sm:$0xf] %v2919_v20  ;;  %v2321_v4 = vrot.slane %v2320_v37, 4  ;;  %v6524_v14 = vpop.f32.mrf.mxu1  ;;  %v8258_v20 = vadd.f32 %v8176_v28, %v8168_v16 }
 0x19e   : > { %3213 = vst [vmem:[#allocation3 + $0x1a8] sm:$0xf] %v2929_v49  ;;  %v7144_v47 = vld [vmem:[#allocation3 + $0x400] ss:$36 sps:$4 sm:$0xff]   ;;  %v1952_v27 = vld [vmem:[#allocation2 + $0xc8] sm:$0x1]  ;;  %5444 = vmatprep.mubr.bf16.mxu0 %v7140_v8  ;;  %v8260_v49 = vadd.f32 %v6522_v11, %v6410_v62  ;;  %v8264_v62 = vpop.f32.mrf.mxu0 }
 0x19f   : > { %v2331_v7 = vrot.slane %v2330_v57, 4  ;;  %v2448_v10 = vld [vmem:[#allocation2 + $0xc8] sm:$0x1]  ;;  %v2606_v52 = vrot.slane %v2604_v0, 4  ;;  %2671 = vst [vmem:[#allocation3 + $0x44c] sm:$0xf] %v2605_v1  ;;  %v2326_v2 = vsel %vm7329_vm4, %v2321_v4, %v2325_v6  ;;  %5445 = vmatmul.mubr.bf16.gmra.mxu0 %v7144_v47  ;;  %v6526_v37 = vpop.f32.mrf.mxu1 }
 0x1a0   : > { %v2333_v26 = vshll.u32 %v1952_v27, 16  ;;  %v2607_v33 = vrot.slane %v2448_v10, 5  ;;  %v2933_v61 = vrot.slane %v2931_v30, 4  ;;  %2399 = vst [vmem:[#allocation3 + $0x448] sm:$0xf] %v2326_v2  ;;  %v2934_v22 = vshll.u32 %v2756_v58, 16 }
 0x1a1   : > { %v2940_v48 = vshll.u32 %v2757_v44, 16  ;;  %v2944_v32 = vshrl.u32 %v2757_v44, 16  ;;  %v2950_v25 = vshll.u32 %v2758_v54, 16  ;;  %v2688_v50 = vld [vmem:[#allocation2 + $0x6c] sm:$0xf]  ;;  %v6527_v2 = vpop.f32.mrf.mxu1 }
 0x1a2   : > { %v2335_v0 = vrot.slane %v2333_v26, 5  ;;  %v2608_v34 = vsel %vm7612_vm13, %v2606_v52, %v2607_v33  ;;  %v2689_v55 = vld [vmem:[#allocation2 + $0x70] sm:$0xf]  ;;  %2720 = vst [vmem:[#allocation3 + $0x210] sm:$0xf] %v2688_v50  ;;  %v2936_v58 = vrot.slane %v2934_v22, 5 }
 0x1a3   : > { %v2759_v6 = vld [vmem:[#allocation2 + $0x6c] sm:$0xf]  ;;  %2672 = vst [vmem:[#allocation3 + $0x470] sm:$0xf] %v2608_v34  ;;  %v2942_v44 = vrot.slane %v2940_v48, 5  ;;  %v2946_v57 = vrot.slane %v2944_v32, 4  ;;  %v6525_v32 = vadd.f32 %v6524_v14, %v6523_v23 }
 0x1a4   : > { %v2952_v54 = vrot.slane %v2950_v25, 5  ;;  %2721 = vst [vmem:[#allocation3 + $0x234] sm:$0xf] %v2689_v55  ;;  %v2760_v30 = vld [vmem:[#allocation2 + $0x70] sm:$0xf]  ;;  %v2336_v8 = vsel %vm7329_vm4, %v2331_v7, %v2335_v0  ;;  %v2955_v4 = vshrl.u32 %v2759_v6, 16  ;;  %v2937_v16 = vor.u32 %v2936_v58, %v2933_v61 }
 0x1a5   : > { %v2761_v47 = vld [vmem:[#allocation2 + $0x74] sm:$0x1]  ;;  %v2958_v1 = vshll.u32 %v2759_v6, 16  ;;  %v2964_v27 = vshll.u32 %v2760_v30, 16  ;;  %v7142_v10 = vld [vmem:[#allocation3 + $0x184] ss:$36 sps:$4 sm:$0xff]   ;;  %v2947_v28 = vor.u32 %v2946_v57, %v2942_v44  ;;  %v8267_v57 = vadd.f32 %v6525_v32, %v8140_v17 }
 0x1a6   : > { %2400 = vst [vmem:[#allocation3 + $0x46c] sm:$0xf] %v2336_v8  ;;  %v2968_v11 = vshrl.u32 %v2760_v30, 16  ;;  %v2974_v52 = vshll.u32 %v2761_v47, 16  ;;  %v7145_v26 = vld [vmem:[#allocation3 + $0x180] ss:$36 sps:$4 sm:$0xff]   ;;  %5533 = vmatprep.mubr.bf16.mxu1 %v7142_v10  ;;  %v6528_v30 = vadd.f32 %v6527_v2, %v6526_v37 }
 0x1a7   : > { %v2957_v33 = vrot.slane %v2955_v4, 4  ;;  %v2960_v22 = vrot.slane %v2958_v1, 5  ;;  %v2966_v48 = vrot.slane %v2964_v27, 5  ;;  %v2938_v7 = vrot.slane %v2937_v16, 4  ;;  %v3234_v34 = vld [vmem:[#allocation2 + $0x18] sm:$0xe]  ;;  %5534 = vmatmul.mubr.bf16.gmra.mxu1 %v7145_v26  ;;  %v6435_v27 = vpop.f32.mrf.mxu0 }
 0x1a8   : > { %v2948_v25 = vrot.slane %v2947_v28, 4  ;;  %v2970_v50 = vrot.slane %v2968_v11, 4  ;;  %v2976_v0 = vrot.slane %v2974_v52, 5  ;;  %v3235_v61 = vld [vmem:[#allocation2 + $0x1c] sm:$0xf]  ;;  %v6103_v58 = vrot.slane %v3234_v34, 9 }
 0x1a9   : > { %v2961_v55 = vor.u32 %v2960_v22, %v2957_v33  ;;  %v3236_v6 = vld [vmem:[#allocation2 + $0x20] sm:$0x1]  ;;  %v2943_v8 = vsel %vm7329_vm4, %v2938_v7, %v2942_v44  ;;  %v3332_v47 = vrot.slane %v3235_v61, 5  ;;  %v3237_v4 = vld [vmem:[#allocation2 + $0x24] sm:$0xe] }
 0x1aa   : > { %v2953_v23 = vsel %vm7329_vm4, %v2948_v25, %v2952_v54  ;;  %v2971_v14 = vor.u32 %v2970_v50, %v2966_v48  ;;  %v3238_v1 = vld [vmem:[#allocation2 + $0x28] sm:$0xf]  ;;  %3214 = vst [vmem:[#allocation3 + $0x1cc] sm:$0xf] %v2943_v8  ;;  %v3335_v16 = vrot.slane %v3236_v6, 5  ;;  %v6104_v11 = vrot.slane %v3237_v4, 9  ;;  %v6436_v54 = vpop.f32.mrf.mxu0 }
 0x1ab   : > { %3215 = vst [vmem:[#allocation3 + $0x1f0] sm:$0xf] %v2953_v23  ;;  %v2962_v10 = vrot.slane %v2961_v55, 4  ;;  %v3239_v28 = vld [vmem:[#allocation2 + $0x2c] sm:$0x1]  ;;  %v3339_v17 = vrot.slane %v3238_v1, 5  ;;  %v3333_v37 = vsel %vm7612_vm13, %v6103_v58, %v3332_v47  ;;  %v8279_v50 = vadd.f32 %v6436_v54, %v6435_v27  ;;  %v6529_v23 = vpop.f32.mrf.mxu1 }
 0x1ac   : > { %v2972_v52 = vrot.slane %v2971_v14, 4  ;;  %v3334_v44 = vrot.slane %v3332_v47, 4  ;;  %v3342_v2 = vrot.slane %v3239_v28, 5  ;;  %v2690_v26 = vld [vmem:[#allocation2 + $0x78] sm:$0xf]  ;;  %v8286_v8 = vadd.f32 %v6528_v30, %v8258_v20 }
 0x1ad   : > { %v7146_v33 = vld [vmem:[#allocation3 + $0x44c] ss:$36 sps:$4 sm:$0xff]   ;;  %v2967_v32 = vsel %vm7329_vm4, %v2962_v10, %v2966_v48  ;;  %3474 = vst [vmem:[#allocation3 + $0x20] sm:$0xf] %v3333_v37  ;;  %v3340_v7 = vsel %vm7612_vm13, %v6104_v11, %v3339_v17  ;;  %v3341_v25 = vrot.slane %v3339_v17, 4  ;;  %v6438_v48 = vpop.f32.mrf.mxu0  ;;  %v6530_v30 = vpop.f32.mrf.mxu1 }
 0x1ae   : > { %v7151_v22 = vld [vmem:[#allocation3 + $0x448] ss:$36 sps:$4 sm:$0xff]   ;;  %2722 = vst [vmem:[#allocation3 + $0x258] sm:$0xf] %v2690_v26  ;;  %v2977_v34 = vsel %vm7329_vm4, %v2972_v52, %v2976_v0  ;;  %3216 = vst [vmem:[#allocation3 + $0x214] sm:$0xf] %v2967_v32  ;;  %v3336_v55 = vsel %vm7612_vm13, %v3334_v44, %v3335_v16  ;;  %5452 = vmatprep.mubr.bf16.mxu0 %v7146_v33  ;;  %v6531_v32 = vadd.f32 %v6530_v30, %v6529_v23 }
 0x1af   : > { %3476 = vst [vmem:[#allocation3 + $0x68] sm:$0xf] %v3340_v7  ;;  %v2691_v61 = vld [vmem:[#allocation2 + $0x7c] sm:$0xf]  ;;  %v2762_v6 = vld [vmem:[#allocation2 + $0x78] sm:$0xf]  ;;  %v3343_v14 = vsel %vm7612_vm13, %v3341_v25, %v3342_v2  ;;  %5453 = vmatmul.mubr.bf16.gmra.mxu0 %v7151_v22  ;;  %v6439_v20 = vpop.f32.mrf.mxu0  ;;  %v6532_v7 = vpop.f32.mrf.mxu1 }
 0x1b0   : > { %v2763_v58 = vld [vmem:[#allocation2 + $0x7c] sm:$0xf]  ;;  %3217 = vst [vmem:[#allocation3 + $0x238] sm:$0xf] %v2977_v34  ;;  %3475 = vst [vmem:[#allocation3 + $0x44] sm:$0xf] %v3336_v55  ;;  %v8290_v33 = vadd.f32 %v6439_v20, %v6438_v48 }
 0x1b1   : > { %2723 = vst [vmem:[#allocation3 + $0x27c] sm:$0xf] %v2691_v61  ;;  %v2764_v0 = vld [vmem:[#allocation2 + $0x80] sm:$0x1]  ;;  %v2979_v47 = vshrl.u32 %v2762_v6, 16  ;;  %v2982_v4 = vshll.u32 %v2762_v6, 16 }
 0x1b2   : > { %v2988_v1 = vshll.u32 %v2763_v58, 16  ;;  %3477 = vst [vmem:[#allocation3 + $0x8c] sm:$0xf] %v3343_v14  ;;  %v2992_v27 = vshrl.u32 %v2763_v58, 16  ;;  %v2998_v10 = vshll.u32 %v2764_v0, 16  ;;  %v6441_v0 = vpop.f32.mrf.mxu0 }
 0x1b3   : > { %v3240_v16 = vld [vmem:[#allocation2 + $0x30] sm:$0xe]  ;;  %v3241_v28 = vld [vmem:[#allocation2 + $0x34] sm:$0xf]  ;;  %v2981_v11 = vrot.slane %v2979_v47, 4  ;;  %v2984_v17 = vrot.slane %v2982_v4, 5  ;;  %v8293_v47 = vadd.f32 %v6531_v32, %v8190_v53  ;;  %v6533_v4 = vpop.f32.mrf.mxu1 }
 0x1b4   : > { %v2990_v52 = vrot.slane %v2988_v1, 5  ;;  %v3242_v37 = vld [vmem:[#allocation2 + $0x38] sm:$0x1]  ;;  %v6105_v44 = vrot.slane %v3240_v16, 9  ;;  %v7148_v26 = vld [vmem:[#allocation3 + $0x1cc] ss:$36 sps:$4 sm:$0xff]   ;;  %v6442_v20 = vpop.f32.mrf.mxu0  ;;  %v6534_v30 = vadd.f32 %v6533_v4, %v6532_v7 }
 0x1b5   : > { %v2994_v2 = vrot.slane %v2992_v27, 4  ;;  %v3000_v54 = vrot.slane %v2998_v10, 5  ;;  %v7152_v22 = vld [vmem:[#allocation3 + $0x1c8] ss:$36 sps:$4 sm:$0xff]   ;;  %v2985_v25 = vor.u32 %v2984_v17, %v2981_v11  ;;  %v3346_v34 = vrot.slane %v3241_v28, 5  ;;  %5541 = vmatprep.mubr.bf16.mxu1 %v7148_v26  ;;  %v6535_v11 = vpop.f32.mrf.mxu1 }
 0x1b6   : > { %v3349_v55 = vrot.slane %v3242_v37, 5  ;;  %v3243_v61 = vld [vmem:[#allocation2 + $0x3c] sm:$0xe]  ;;  %v3244_v58 = vld [vmem:[#allocation2 + $0x40] sm:$0xf]  ;;  %5542 = vmatmul.mubr.bf16.gmra.mxu1 %v7152_v22  ;;  %v6422_v28 = vadd.f32 %v8203_v39, %v8196_v15  ;;  %v6444_v22 = vpop.f32.mrf.mxu0 }
 0x1b7   : > { %v2995_v6 = vor.u32 %v2994_v2, %v2990_v52  ;;  %v3245_v14 = vld [vmem:[#allocation2 + $0x44] sm:$0x1]  ;;  %v2986_v1 = vrot.slane %v2985_v25, 4  ;;  %v3347_v48 = vsel %vm7612_vm13, %v6105_v44, %v3346_v34  ;;  %v3348_v23 = vrot.slane %v3346_v34, 4  ;;  %v7153_v10 = vld [vmem:[#allocation3 + $0x214] ss:$36 sps:$4 sm:$0xff]   ;;  %v6536_v34 = vpop.f32.mrf.mxu1 }
 0x1b8   : > { %v6106_v27 = vrot.slane %v3243_v61, 9  ;;  %3478 = vst [vmem:[#allocation3 + $0xb0] sm:$0xf] %v3347_v48  ;;  %v7155_v17 = vld [vmem:[#allocation3 + $0x20] ss:$36 sps:$4 sm:$0xff]   ;;  %v8303_v44 = vadd.f32 %v6442_v20, %v6441_v0  ;;  %5549 = vmatprep.mubr.bf16.mxu1 %v7153_v10  ;;  %v3353_v15 = vrot.slane %v3244_v58, 5  ;;  %v8307_v25 = vadd.f32 %v6534_v30, %v6422_v28  ;;  %v6445_v48 = vpop.f32.mrf.mxu0 }
 0x1b9   : > { %v2996_v16 = vrot.slane %v2995_v6, 4  ;;  %v7156_v53 = vld [vmem:[#allocation3 + $0x210] ss:$36 sps:$4 sm:$0xff]   ;;  %v2991_v37 = vsel %vm7329_vm4, %v2986_v1, %v2990_v52  ;;  %v3350_v26 = vsel %vm7612_vm13, %v3348_v23, %v3349_v55  ;;  %v7157_v2 = vld [vmem:[#allocation3 + $0x68] ss:$36 sps:$4 sm:$0xff]   ;;  %v3356_v39 = vrot.slane %v3245_v14, 5  ;;  %6859 = vmatprep.mubr.bf16.mxu0 %v7155_v17  ;;  %v6538_v23 = vpop.f32.mrf.mxu1 }
 0x1ba   : > { %3218 = vst [vmem:[#allocation3 + $0x25c] sm:$0xf] %v2991_v37  ;;  %3479 = vst [vmem:[#allocation3 + $0xd4] sm:$0xf] %v3350_v26  ;;  %v2692_v7 = vld [vmem:[#allocation2 + $0x84] sm:$0xf]  ;;  %v6428_v6 = vadd.f32 %v8233_v59, %v8225_v31  ;;  %v6537_v0 = vadd.f32 %v6536_v34, %v6535_v11  ;;  %6860 = vmatmul.mubr.bf16.vlgmr.msra.gmra.mxu0 %v7157_v2  ;;  %v8313_v30 = vadd.f32 %v6445_v48, %v6444_v22  ;;  %v6447_v34 = vpop.f32.mrf.mxu0 }
 0x1bb   : > { %v3001_v32 = vsel %vm7329_vm4, %v2996_v16, %v3000_v54  ;;  %v2693_v52 = vld [vmem:[#allocation2 + $0x88] sm:$0xf]  ;;  %2724 = vst [vmem:[#allocation3 + $0x2a0] sm:$0xf] %v2692_v7  ;;  %v2765_v55 = vld [vmem:[#allocation2 + $0x84] sm:$0xf]  ;;  %v3354_v54 = vsel %vm7612_vm13, %v6106_v27, %v3353_v15  ;;  %v6539_v26 = vpop.f32.mrf.mxu1 }
 0x1bc   : > { %3219 = vst [vmem:[#allocation3 + $0x280] sm:$0xf] %v3001_v32  ;;  %v2766_v61 = vld [vmem:[#allocation2 + $0x88] sm:$0xf]  ;;  %v3355_v58 = vrot.slane %v3353_v15, 4  ;;  %v3003_v4 = vshrl.u32 %v2765_v55, 16  ;;  %v8318_v37 = vadd.f32 %v6537_v0, %v8221_v36 }
 0x1bd   : > { %2725 = vst [vmem:[#allocation3 + $0x2c4] sm:$0xf] %v2693_v52  ;;  %v2767_v14 = vld [vmem:[#allocation2 + $0x8c] sm:$0x1]  ;;  %v3006_v1 = vshll.u32 %v2765_v55, 16  ;;  %v3012_v10 = vshll.u32 %v2766_v61, 16 }
 0x1be   : > { %3480 = vst [vmem:[#allocation3 + $0xf8] sm:$0xf] %v3354_v54  ;;  %v3016_v16 = vshrl.u32 %v2766_v61, 16  ;;  %v3022_v28 = vshll.u32 %v2767_v14, 16  ;;  %v3246_v20 = vld [vmem:[#allocation2 + $0x48] sm:$0xe]  ;;  %v3357_v31 = vsel %vm7612_vm13, %v3355_v58, %v3356_v39  ;;  %5550 = vmatmul.mubr.bf16.gmra.mxu1 %v7156_v53  ;;  %v6540_v54 = vadd.f32 %v6539_v26, %v6538_v23  ;;  %v6541_v26 = vpop.f32.mrf.mxu1 }
 0x1bf   : > { %v3005_v59 = vrot.slane %v3003_v4, 4  ;;  %v3008_v11 = vrot.slane %v3006_v1, 5  ;;  %v3247_v27 = vld [vmem:[#allocation2 + $0x4c] sm:$0xf]  ;;  %v3248_v17 = vld [vmem:[#allocation2 + $0x50] sm:$0x1]  ;;  %v6448_v1 = vpop.f32.mrf.mxu0 }
 0x1c0   : > { %3481 = vst [vmem:[#allocation3 + $0x11c] sm:$0xf] %v3357_v31  ;;  %v3014_v2 = vrot.slane %v3012_v10, 5  ;;  %v3018_v32 = vrot.slane %v3016_v16, 4  ;;  %v3024_v15 = vrot.slane %v3022_v28, 5  ;;  %v6107_v7 = vrot.slane %v3246_v20, 9 }
 0x1c1   : > { %v3009_v22 = vor.u32 %v3008_v11, %v3005_v59  ;;  %v3360_v52 = vrot.slane %v3247_v27, 5  ;;  %v3363_v55 = vrot.slane %v3248_v17, 5  ;;  %v3249_v61 = vld [vmem:[#allocation2 + $0x54] sm:$0xe]  ;;  %v3250_v39 = vld [vmem:[#allocation2 + $0x58] sm:$0xf]  ;;  %v8322_v10 = vadd.f32 %v6448_v1, %v6447_v34  ;;  %v6450_v59 = vpop.f32.mrf.mxu0 }
 0x1c2   : > { %v7161_v58 = vld [vmem:[#allocation3 + $0xb0] ss:$36 sps:$4 sm:$0xff]   ;;  %v3019_v14 = vor.u32 %v3018_v32, %v3014_v2  ;;  %v6108_v4 = vrot.slane %v3249_v61, 9  ;;  %v7158_v36 = vld [vmem:[#allocation3 + $0x258] ss:$36 sps:$4 sm:$0xff]   ;;  %v8324_v16 = vadd.f32 %v6540_v54, %v6428_v6  ;;  %v3367_v23 = vrot.slane %v3250_v39, 5 }
 0x1c3   : > { %v7160_v0 = vld [vmem:[#allocation3 + $0x25c] ss:$36 sps:$4 sm:$0xff]   ;;  %v3010_v48 = vrot.slane %v3009_v22, 4  ;;  %v3361_v53 = vsel %vm7612_vm13, %v6107_v7, %v3360_v52  ;;  %6863 = vmatprep.mubr.bf16.mxu0 %v7161_v58  ;;  %v3362_v20 = vrot.slane %v3360_v52, 4  ;;  %v3251_v31 = vld [vmem:[#allocation2 + $0x5c] sm:$0x1]  ;;  %v6451_v61 = vpop.f32.mrf.mxu0 }
 0x1c4   : > { %v3020_v28 = vrot.slane %v3019_v14, 4  ;;  %3482 = vst [vmem:[#allocation3 + $0x140] sm:$0xf] %v3361_v53  ;;  %5557 = vmatprep.mubr.bf16.mxu1 %v7160_v0  ;;  %v3370_v27 = vrot.slane %v3251_v31, 5  ;;  %v2694_v17 = vld [vmem:[#allocation2 + $0x90] sm:$0xf]  ;;  %v3368_v7 = vsel %vm7612_vm13, %v6108_v4, %v3367_v23  ;;  %v8334_v54 = vadd.f32 %v6451_v61, %v6450_v59 }
 0x1c5   : > { %v3015_v11 = vsel %vm7329_vm4, %v3010_v48, %v3014_v2  ;;  %v3364_v6 = vsel %vm7612_vm13, %v3362_v20, %v3363_v55  ;;  %v3369_v34 = vrot.slane %v3367_v23, 4  ;;  %v2695_v22 = vld [vmem:[#allocation2 + $0x94] sm:$0xf]  ;;  %2726 = vst [vmem:[#allocation3 + $0x2e8] sm:$0xf] %v2694_v17 }
 0x1c6   : > { %v3025_v32 = vsel %vm7329_vm4, %v3020_v28, %v3024_v15  ;;  %3220 = vst [vmem:[#allocation3 + $0x2a4] sm:$0xf] %v3015_v11  ;;  %v2768_v52 = vld [vmem:[#allocation2 + $0x90] sm:$0xf]  ;;  %3483 = vst [vmem:[#allocation3 + $0x164] sm:$0xf] %v3364_v6  ;;  %v6542_v15 = vpop.f32.mrf.mxu1  ;;  %5558 = vmatmul.mubr.bf16.gmra.mxu1 %v7158_v36 }
 0x1c7   : > { %v7162_v39 = vld [vmem:[#allocation3 + $0xf8] ss:$36 sps:$4 sm:$0xff]   ;;  %3221 = vst [vmem:[#allocation3 + $0x2c8] sm:$0xf] %v3025_v32  ;;  %3484 = vst [vmem:[#allocation3 + $0x188] sm:$0xf] %v3368_v7  ;;  %v3371_v55 = vsel %vm7612_vm13, %v3369_v34, %v3370_v27  ;;  %v6543_v20 = vadd.f32 %v6542_v15, %v6541_v26 }
 0x1c8   : > { %2727 = vst [vmem:[#allocation3 + $0x30c] sm:$0xf] %v2695_v22  ;;  %v2769_v2 = vld [vmem:[#allocation2 + $0x94] sm:$0xf]  ;;  %v2770_v58 = vld [vmem:[#allocation2 + $0x98] sm:$0x1]  ;;  %6864 = vmatmul.mubr.bf16.gmra.mxu0 %v7162_v39  ;;  %v6544_v31 = vpop.f32.mrf.mxu1 }
 0x1c9   : > { %v3027_v14 = vshrl.u32 %v2768_v52, 16  ;;  %v3030_v4 = vshll.u32 %v2768_v52, 16  ;;  %v3036_v1 = vshll.u32 %v2769_v2, 16  ;;  %3485 = vst [vmem:[#allocation3 + $0x1ac] sm:$0xf] %v3371_v55  ;;  %v3040_v0 = vshrl.u32 %v2769_v2, 16 }
 0x1ca   : > { %v3046_v48 = vshll.u32 %v2770_v58, 16  ;;  %v3252_v53 = vld [vmem:[#allocation2 + $0x60] sm:$0xe]  ;;  %v3253_v28 = vld [vmem:[#allocation2 + $0x64] sm:$0xf]  ;;  %v6545_v34 = vpop.f32.mrf.mxu1  ;;  %v6434_v2 = vadd.f32 %v8264_v62, %v8252_v5  ;;  %v8341_v26 = vadd.f32 %v6543_v20, %v8237_v24 }
 0x1cb   : > { %v3029_v23 = vrot.slane %v3027_v14, 4  ;;  %v3032_v59 = vrot.slane %v3030_v4, 5  ;;  %v3038_v11 = vrot.slane %v3036_v1, 5  ;;  %v3254_v17 = vld [vmem:[#allocation2 + $0x68] sm:$0x1]  ;;  %v6109_v36 = vrot.slane %v3252_v53, 9 }
 0x1cc   : > { %v3042_v32 = vrot.slane %v3040_v0, 4  ;;  %v3048_v6 = vrot.slane %v3046_v48, 5  ;;  %v3374_v27 = vrot.slane %v3253_v28, 5  ;;  %v3377_v7 = vrot.slane %v3254_v17, 5  ;;  %v3255_v52 = vld [vmem:[#allocation2 + $0x6c] sm:$0xe] }
 0x1cd   : > { %v3033_v22 = vor.u32 %v3032_v59, %v3029_v23  ;;  %v3256_v61 = vld [vmem:[#allocation2 + $0x70] sm:$0xf]  ;;  %v3257_v39 = vld [vmem:[#allocation2 + $0x74] sm:$0x1]  ;;  %v6546_v15 = vadd.f32 %v6545_v34, %v6544_v31  ;;  %v6110_v4 = vrot.slane %v3255_v52, 9  ;;  %v6453_v52 = vpop.f32.mrf.mxu0 }
 0x1ce   : > { %v3043_v55 = vor.u32 %v3042_v32, %v3038_v11  ;;  %v3375_v58 = vsel %vm7612_vm13, %v6109_v36, %v3374_v27  ;;  %v3376_v14 = vrot.slane %v3374_v27, 4  ;;  %v2696_v1 = vld [vmem:[#allocation2 + $0x9c] sm:$0xf]  ;;  %v3381_v31 = vrot.slane %v3256_v61, 5  ;;  %v2697_v17 = vld [vmem:[#allocation2 + $0xa0] sm:$0xf] }
 0x1cf   : > { %v7163_v0 = vld [vmem:[#allocation3 + $0x2a0] ss:$36 sps:$4 sm:$0xff]   ;;  %v3034_v53 = vrot.slane %v3033_v22, 4  ;;  %3486 = vst [vmem:[#allocation3 + $0x1d0] sm:$0xf] %v3375_v58  ;;  %v8345_v28 = vadd.f32 %v6546_v15, %v6434_v2  ;;  %v3384_v59 = vrot.slane %v3257_v39, 5  ;;  %v6547_v58 = vpop.f32.mrf.mxu1 }
 0x1d0   : > { %v7165_v48 = vld [vmem:[#allocation3 + $0x2a4] ss:$36 sps:$4 sm:$0xff]   ;;  %2728 = vst [vmem:[#allocation3 + $0x330] sm:$0xf] %v2696_v1  ;;  %v3378_v24 = vsel %vm7612_vm13, %v3376_v14, %v3377_v7  ;;  %v3044_v20 = vrot.slane %v3043_v55, 4  ;;  %v3382_v27 = vsel %vm7612_vm13, %v6110_v4, %v3381_v31  ;;  %v3383_v7 = vrot.slane %v3381_v31, 4 }
 0x1d1   : > { %v7166_v23 = vld [vmem:[#allocation3 + $0x140] ss:$36 sps:$4 sm:$0xff]   ;;  %5565 = vmatprep.mubr.bf16.mxu1 %v7165_v48  ;;  %v7167_v5 = vld [vmem:[#allocation3 + $0x188] ss:$36 sps:$4 sm:$0xff]   ;;  %v3039_v62 = vsel %vm7329_vm4, %v3034_v53, %v3038_v11  ;;  %3487 = vst [vmem:[#allocation3 + $0x1f4] sm:$0xf] %v3378_v24  ;;  %v6454_v48 = vpop.f32.mrf.mxu0 }
 0x1d2   : > { %6867 = vmatprep.mubr.bf16.mxu0 %v7166_v23  ;;  %5566 = vmatmul.mubr.bf16.gmra.mxu1 %v7163_v0  ;;  %3222 = vst [vmem:[#allocation3 + $0x2ec] sm:$0xf] %v3039_v62  ;;  %v2771_v36 = vld [vmem:[#allocation2 + $0x9c] sm:$0xf]  ;;  %v3049_v32 = vsel %vm7329_vm4, %v3044_v20, %v3048_v6  ;;  %2729 = vst [vmem:[#allocation3 + $0x354] sm:$0xf] %v2697_v17  ;;  %v3385_v6 = vsel %vm7612_vm13, %v3383_v7, %v3384_v59  ;;  %v6548_v62 = vpop.f32.mrf.mxu1 }
 0x1d3   : > { %6868 = vmatmul.mubr.bf16.gmra.mxu0 %v7167_v5  ;;  %v2772_v34 = vld [vmem:[#allocation2 + $0xa0] sm:$0xf]  ;;  %v2773_v11 = vld [vmem:[#allocation2 + $0xa4] sm:$0x1]  ;;  %v3051_v22 = vshrl.u32 %v2771_v36, 16  ;;  %v3054_v61 = vshll.u32 %v2771_v36, 16 }
 0x1d4   : > { %3223 = vst [vmem:[#allocation3 + $0x310] sm:$0xf] %v3049_v32  ;;  %3488 = vst [vmem:[#allocation3 + $0x218] sm:$0xf] %v3382_v27  ;;  %v3060_v2 = vshll.u32 %v2772_v34, 16  ;;  %v3064_v39 = vshrl.u32 %v2772_v34, 16  ;;  %v8357_v32 = vadd.f32 %v6454_v48, %v6453_v52  ;;  %v6456_v27 = vpop.f32.mrf.mxu0  ;;  %v6549_v34 = vadd.f32 %v6548_v62, %v6547_v58 }
 0x1d5   : > { %v3070_v15 = vshll.u32 %v2773_v11, 16  ;;  %v3258_v55 = vld [vmem:[#allocation2 + $0x78] sm:$0xe]  ;;  %v3053_v14 = vrot.slane %v3051_v22, 4  ;;  %v3259_v1 = vld [vmem:[#allocation2 + $0x7c] sm:$0xf] }
 0x1d6   : > { %v3260_v4 = vld [vmem:[#allocation2 + $0x80] sm:$0x1]  ;;  %v6111_v0 = vrot.slane %v3258_v55, 9  ;;  %3489 = vst [vmem:[#allocation3 + $0x23c] sm:$0xf] %v3385_v6  ;;  %v3056_v53 = vrot.slane %v3054_v61, 5  ;;  %v6550_v55 = vpop.f32.mrf.mxu1 }
 0x1d7   : > { %v3062_v23 = vrot.slane %v3060_v2, 5  ;;  %v3066_v24 = vrot.slane %v3064_v39, 4  ;;  %v3072_v5 = vrot.slane %v3070_v15, 5  ;;  %v3388_v20 = vrot.slane %v3259_v1, 5  ;;  %v3261_v17 = vld [vmem:[#allocation2 + $0x84] sm:$0xe]  ;;  %v6457_v1 = vpop.f32.mrf.mxu0 }
 0x1d8   : > { %v3391_v31 = vrot.slane %v3260_v4, 5  ;;  %v3262_v36 = vld [vmem:[#allocation2 + $0x88] sm:$0xf]  ;;  %v3057_v7 = vor.u32 %v3056_v53, %v3053_v14  ;;  %v3263_v22 = vld [vmem:[#allocation2 + $0x8c] sm:$0x1]  ;;  %v6112_v39 = vrot.slane %v3261_v17, 9  ;;  %v8361_v58 = vadd.f32 %v6457_v1, %v6456_v27  ;;  %v6551_v14 = vpop.f32.mrf.mxu1 }
 0x1d9   : > { %v7171_v59 = vld [vmem:[#allocation3 + $0x1d0] ss:$36 sps:$4 sm:$0xff]   ;;  %v3067_v11 = vor.u32 %v3066_v24, %v3062_v23  ;;  %v3389_v61 = vsel %vm7612_vm13, %v6111_v0, %v3388_v20  ;;  %v3390_v2 = vrot.slane %v3388_v20, 4  ;;  %v3395_v15 = vrot.slane %v3262_v36, 5  ;;  %v7168_v53 = vld [vmem:[#allocation3 + $0x2e8] ss:$36 sps:$4 sm:$0xff]   ;;  %v6611_v17 = vpop.f32.mrf.mxu0 }
 0x1da   : > { %v2698_v6 = vld [vmem:[#allocation2 + $0xa8] sm:$0xf]  ;;  %6871 = vmatprep.mubr.bf16.mxu0 %v7171_v59  ;;  %v3058_v4 = vrot.slane %v3057_v7, 4  ;;  %3490 = vst [vmem:[#allocation3 + $0x260] sm:$0xf] %v3389_v61  ;;  %v3398_v52 = vrot.slane %v3263_v22, 5  ;;  %v8368_v36 = vadd.f32 %v6549_v34, %v8279_v50 }
 0x1db   : > { %v3068_v21 = vrot.slane %v3067_v11, 4  ;;  %v2699_v48 = vld [vmem:[#allocation2 + $0xac] sm:$0xf]  ;;  %2730 = vst [vmem:[#allocation3 + $0x378] sm:$0xf] %v2698_v6  ;;  %v3392_v0 = vsel %vm7612_vm13, %v3390_v2, %v3391_v31  ;;  %v3396_v62 = vsel %vm7612_vm13, %v6112_v39, %v3395_v15  ;;  %v3397_v20 = vrot.slane %v3395_v15, 4  ;;  %v6612_v34 = vpop.f32.mrf.mxu0  ;;  %v6553_v15 = vpop.f32.mrf.mxu1 }
 0x1dc   : > { %v7170_v24 = vld [vmem:[#allocation3 + $0x2ec] ss:$36 sps:$4 sm:$0xff]   ;;  %2731 = vst [vmem:[#allocation3 + $0x39c] sm:$0xf] %v2699_v48  ;;  %8757 = vst [vmem:[#allocation7_spill] sm:$0xff] %v8368_v36  ;;  %v3063_v59 = vsel %vm7329_vm4, %v3058_v4, %v3062_v23  ;;  %v6552_v31 = vadd.f32 %v6551_v14, %v6550_v55  ;;  %v6613_v48 = vadd.f32 %v6612_v34, %v6611_v17 }
 0x1dd   : > { %v3073_v27 = vsel %vm7329_vm4, %v3068_v21, %v3072_v5  ;;  %3491 = vst [vmem:[#allocation3 + $0x284] sm:$0xf] %v3392_v0  ;;  %3492 = vst [vmem:[#allocation3 + $0x2a8] sm:$0xf] %v3396_v62  ;;  %v2774_v7 = vld [vmem:[#allocation2 + $0xa8] sm:$0xf]  ;;  %5573 = vmatprep.mubr.bf16.mxu1 %v7170_v24  ;;  %v3399_v61 = vsel %vm7612_vm13, %v3397_v20, %v3398_v52  ;;  %v6614_v14 = vpop.f32.mrf.mxu0 }
 0x1de   : > { %v2775_v11 = vld [vmem:[#allocation2 + $0xac] sm:$0xf]  ;;  %v7172_v22 = vld [vmem:[#allocation3 + $0x218] ss:$36 sps:$4 sm:$0xff]   ;;  %3224 = vst [vmem:[#allocation3 + $0x334] sm:$0xf] %v3063_v59  ;;  %5574 = vmatmul.mubr.bf16.gmra.mxu1 %v7168_v53  ;;  %v8377_v24 = vadd.f32 %v6552_v31, %v8290_v33  ;;  %v6554_v59 = vpop.f32.mrf.mxu1  ;;  %v8380_v34 = vadd.f32 %v6613_v48, %v8179_v46 }
 0x1df   : > { %3225 = vst [vmem:[#allocation3 + $0x358] sm:$0xf] %v3073_v27  ;;  %v2776_v50 = vld [vmem:[#allocation2 + $0xb0] sm:$0x1]  ;;  %3493 = vst [vmem:[#allocation3 + $0x2cc] sm:$0xf] %v3399_v61  ;;  %6872 = vmatmul.mubr.bf16.gmra.mxu0 %v7172_v22  ;;  %v6615_v22 = vpop.f32.mrf.mxu0 }
 0x1e0   : > { %v3075_v23 = vshrl.u32 %v2774_v7, 16  ;;  %v3078_v2 = vshll.u32 %v2774_v7, 16  ;;  %v3084_v39 = vshll.u32 %v2775_v11, 16  ;;  %v3088_v21 = vshrl.u32 %v2775_v11, 16  ;;  %v3264_v5 = vld [vmem:[#allocation2 + $0x90] sm:$0xe]  ;;  %v6556_v31 = vpop.f32.mrf.mxu1 }
 0x1e1   : > { %v3094_v6 = vshll.u32 %v2776_v50, 16  ;;  %v3265_v55 = vld [vmem:[#allocation2 + $0x94] sm:$0xf]  ;;  %v3266_v1 = vld [vmem:[#allocation2 + $0x98] sm:$0x1]  ;;  %v6113_v4 = vrot.slane %v3264_v5, 9  ;;  %v6616_v33 = vadd.f32 %v6615_v22, %v6614_v14 }
 0x1e2   : > { %v3077_v52 = vrot.slane %v3075_v23, 4  ;;  %v3080_v0 = vrot.slane %v3078_v2, 5  ;;  %v3086_v53 = vrot.slane %v3084_v39, 5  ;;  %v3090_v62 = vrot.slane %v3088_v21, 4  ;;  %v3267_v20 = vld [vmem:[#allocation2 + $0x9c] sm:$0xe]  ;;  %v6617_v39 = vpop.f32.mrf.mxu0 }
 0x1e3   : > { %v3096_v27 = vrot.slane %v3094_v6, 5  ;;  %v3402_v7 = vrot.slane %v3265_v55, 5  ;;  %v3405_v11 = vrot.slane %v3266_v1, 5  ;;  %v6114_v61 = vrot.slane %v3267_v20, 9  ;;  %v3268_v42 = vld [vmem:[#allocation2 + $0xa0] sm:$0xf] }
 0x1e4   : > { %v3081_v50 = vor.u32 %v3080_v0, %v3077_v52  ;;  %v3091_v36 = vor.u32 %v3090_v62, %v3086_v53  ;;  %v3269_v5 = vld [vmem:[#allocation2 + $0xa4] sm:$0x1]  ;;  %v2700_v17 = vld [vmem:[#allocation2 + $0xb4] sm:$0xf]  ;;  %8758 = vst [vmem:[#allocation8_spill] sm:$0xff] %v8380_v34  ;;  %v6555_v21 = vadd.f32 %v6554_v59, %v6553_v15  ;;  %v8385_v52 = vadd.f32 %v6616_v33, %v8184_v18  ;;  %v6557_v0 = vpop.f32.mrf.mxu1  ;;  %v6618_v48 = vpop.f32.mrf.mxu0 }
 0x1e5   : > { %v7176_v23 = vld [vmem:[#allocation3 + $0x260] ss:$36 sps:$4 sm:$0xff]   ;;  %v3403_v2 = vsel %vm7612_vm13, %v6113_v4, %v3402_v7  ;;  %2732 = vst [vmem:[#allocation3 + $0x3c0] sm:$0xf] %v2700_v17  ;;  %v7173_v6 = vld [vmem:[#allocation3 + $0x330] ss:$36 sps:$4 sm:$0xff]   ;;  %v6558_v20 = vadd.f32 %v6557_v0, %v6556_v31  ;;  %v6619_v31 = vadd.f32 %v6618_v48, %v6617_v39 }
 0x1e6   : > { %v3082_v55 = vrot.slane %v3081_v50, 4  ;;  %v3092_v1 = vrot.slane %v3091_v36, 4  ;;  %3494 = vst [vmem:[#allocation3 + $0x2f0] sm:$0xf] %v3403_v2  ;;  %8759 = vst [vmem:[#allocation9_spill] sm:$0xff] %v8385_v52  ;;  %6875 = vmatprep.mubr.bf16.mxu0 %v7176_v23  ;;  %v8388_v14 = vadd.f32 %v6555_v21, %v8303_v44  ;;  %v3404_v36 = vrot.slane %v3402_v7, 4  ;;  %v6620_v23 = vpop.f32.mrf.mxu0 }
 0x1e7   : > { %v7175_v62 = vld [vmem:[#allocation3 + $0x334] ss:$36 sps:$4 sm:$0xff]   ;;  %v7177_v46 = vld [vmem:[#allocation3 + $0x2a8] ss:$36 sps:$4 sm:$0xff]   ;;  %v3409_v59 = vrot.slane %v3268_v42, 5  ;;  %v3412_v50 = vrot.slane %v3269_v5, 5 }
 0x1e8   : > { %v3087_v4 = vsel %vm7329_vm4, %v3082_v55, %v3086_v53  ;;  %v3097_v15 = vsel %vm7329_vm4, %v3092_v1, %v3096_v27  ;;  %v2701_v22 = vld [vmem:[#allocation2 + $0xb8] sm:$0xf]  ;;  %v2777_v18 = vld [vmem:[#allocation2 + $0xb4] sm:$0xf]  ;;  %5581 = vmatprep.mubr.bf16.mxu1 %v7175_v62  ;;  %6876 = vmatmul.mubr.bf16.gmra.mxu0 %v7177_v46  ;;  %v2779_v44 = vld [vmem:[#allocation2 + $0xbc] sm:$0x1]  ;;  %v8395_v53 = vadd.f32 %v6558_v20, %v8313_v30  ;;  %v6621_v30 = vpop.f32.mrf.mxu0  ;;  %v6559_v46 = vpop.f32.mrf.mxu1 }
 0x1e9   : > { %3226 = vst [vmem:[#allocation3 + $0x37c] sm:$0xf] %v3087_v4  ;;  %3227 = vst [vmem:[#allocation3 + $0x3a0] sm:$0xf] %v3097_v15  ;;  %v2778_v17 = vld [vmem:[#allocation2 + $0xb8] sm:$0xf]  ;;  %5582 = vmatmul.mubr.bf16.gmra.mxu1 %v7173_v6  ;;  %v3406_v42 = vsel %vm7612_vm13, %v3404_v36, %v3405_v11  ;;  %v3410_v27 = vsel %vm7612_vm13, %v6114_v61, %v3409_v59 }
 0x1ea   : > { %2733 = vst [vmem:[#allocation3 + $0x3e4] sm:$0xf] %v2701_v22  ;;  %v3099_v33 = vshrl.u32 %v2777_v18, 16  ;;  %v3411_v7 = vrot.slane %v3409_v59, 4  ;;  %v3102_v2 = vshll.u32 %v2777_v18, 16  ;;  %v3108_v1 = vshll.u32 %v2778_v17, 16  ;;  %v6623_v22 = vpop.f32.mrf.mxu0  ;;  %v6560_v18 = vpop.f32.mrf.mxu1 }
 0x1eb   : > { %v3270_v21 = vld [vmem:[#allocation2 + $0xa8] sm:$0xe]  ;;  %v3271_v5 = vld [vmem:[#allocation2 + $0xac] sm:$0xf]  ;;  %3495 = vst [vmem:[#allocation3 + $0x314] sm:$0xf] %v3406_v42 }
 0x1ec   : > { %3496 = vst [vmem:[#allocation3 + $0x338] sm:$0xf] %v3410_v27  ;;  %v3101_v55 = vrot.slane %v3099_v33, 4  ;;  %v3112_v39 = vshrl.u32 %v2778_v17, 16  ;;  %v3118_v0 = vshll.u32 %v2779_v44, 16  ;;  %v3413_v6 = vsel %vm7612_vm13, %v3411_v7, %v3412_v50 }
 0x1ed   : > { %v3272_v62 = vld [vmem:[#allocation2 + $0xb0] sm:$0x1]  ;;  %v3104_v11 = vrot.slane %v3102_v2, 5  ;;  %v6115_v48 = vrot.slane %v3270_v21, 9  ;;  %v3416_v20 = vrot.slane %v3271_v5, 5  ;;  %v3110_v4 = vrot.slane %v3108_v1, 5 }
 0x1ee   : > { %v3273_v61 = vld [vmem:[#allocation2 + $0xb4] sm:$0xe]  ;;  %3497 = vst [vmem:[#allocation3 + $0x35c] sm:$0xf] %v3413_v6  ;;  %v3114_v15 = vrot.slane %v3112_v39, 4  ;;  %v3120_v36 = vrot.slane %v3118_v0, 5  ;;  %v8406_v1 = vadd.f32 %v6619_v31, %v8201_v60  ;;  %v6624_v39 = vpop.f32.mrf.mxu0  ;;  %v6562_v0 = vpop.f32.mrf.mxu1 }
 0x1ef   : > { %v3419_v59 = vrot.slane %v3272_v62, 5  ;;  %v3105_v33 = vor.u32 %v3104_v11, %v3101_v55  ;;  %v3417_v17 = vsel %vm7612_vm13, %v6115_v48, %v3416_v20  ;;  %v3418_v44 = vrot.slane %v3416_v20, 4  ;;  %v3274_v42 = vld [vmem:[#allocation2 + $0xb8] sm:$0xf]  ;;  %v3275_v27 = vld [vmem:[#allocation2 + $0xbc] sm:$0x1] }
 0x1f0   : > { %v6116_v52 = vrot.slane %v3273_v61, 9  ;;  %v3115_v50 = vor.u32 %v3114_v15, %v3110_v4  ;;  %3498 = vst [vmem:[#allocation3 + $0x380] sm:$0xf] %v3417_v17  ;;  %v3423_v7 = vrot.slane %v3274_v42, 5  ;;  %v3426_v2 = vrot.slane %v3275_v27, 5  ;;  %v6626_v31 = vpop.f32.mrf.mxu0  ;;  %v6563_v27 = vpop.f32.mrf.mxu1 }
 0x1f1   : > { %v2702_v21 = vld [vmem:[#allocation2 + $0xc0] sm:$0xf]  ;;  %v2703_v5 = vld [vmem:[#allocation2 + $0xc4] sm:$0xf]  ;;  %v7178_v62 = vld [vmem:[#allocation3 + $0x378] ss:$36 sps:$4 sm:$0xff]   ;;  %v3420_v6 = vsel %vm7612_vm13, %v3418_v44, %v3419_v59  ;;  %v6622_v11 = vadd.f32 %v6621_v30, %v6620_v23  ;;  %v6625_v48 = vadd.f32 %v6624_v39, %v6623_v22  ;;  %v6561_v42 = vadd.f32 %v6560_v18, %v6559_v46 }
 0x1f2   : > { %v3106_v55 = vrot.slane %v3105_v33, 4  ;;  %2734 = vst [vmem:[#allocation3 + $0x408] sm:$0xf] %v2702_v21  ;;  %2735 = vst [vmem:[#allocation3 + $0x42c] sm:$0xf] %v2703_v5  ;;  %v3116_v61 = vrot.slane %v3115_v50, 4  ;;  %v3424_v15 = vsel %vm7612_vm13, %v6116_v52, %v3423_v7  ;;  %v6564_v30 = vadd.f32 %v6563_v27, %v6562_v0  ;;  %v6627_v50 = vpop.f32.mrf.mxu0 }
 0x1f3   : > { %v7180_v20 = vld [vmem:[#allocation3 + $0x37c] ss:$36 sps:$4 sm:$0xff]   ;;  %3499 = vst [vmem:[#allocation3 + $0x3a4] sm:$0xf] %v3420_v6  ;;  %v3425_v17 = vrot.slane %v3423_v7, 4  ;;  %v8415_v59 = vadd.f32 %v6622_v11, %v8206_v3  ;;  %v8418_v23 = vadd.f32 %v6625_v48, %v8213_v35  ;;  %v6628_v21 = vadd.f32 %v6627_v50, %v6626_v31 }
 0x1f4   : > { %v2780_v60 = vld [vmem:[#allocation2 + $0xc0] sm:$0xf]  ;;  %v7181_v34 = vld [vmem:[#allocation3 + $0x2f0] ss:$36 sps:$4 sm:$0xff]   ;;  %v3111_v33 = vsel %vm7329_vm4, %v3106_v55, %v3110_v4  ;;  %3500 = vst [vmem:[#allocation3 + $0x3c8] sm:$0xf] %v3424_v15  ;;  %5589 = vmatprep.mubr.bf16.mxu1 %v7180_v20  ;;  %v3121_v52 = vsel %vm7329_vm4, %v3116_v61, %v3120_v36  ;;  %v8425_v5 = vadd.f32 %v6561_v42, %v8322_v10  ;;  %v6629_v55 = vpop.f32.mrf.mxu0 }
 0x1f5   : > { %3228 = vst [vmem:[#allocation3 + $0x3c4] sm:$0xf] %v3111_v33  ;;  %v3427_v46 = vsel %vm7612_vm13, %v3425_v17, %v3426_v2  ;;  %v2781_v22 = vld [vmem:[#allocation2 + $0xc4] sm:$0xf]  ;;  %v2782_v18 = vld [vmem:[#allocation2 + $0xc8] sm:$0x1]  ;;  %6879 = vmatprep.mubr.bf16.mxu0 %v7181_v34  ;;  %5590 = vmatmul.mubr.bf16.gmra.mxu1 %v7178_v62  ;;  %v8428_v6 = vadd.f32 %v6564_v30, %v8334_v54 }
 0x1f6   : > { %v3123_v44 = vshrl.u32 %v2780_v60, 16  ;;  %v3126_v4 = vshll.u32 %v2780_v60, 16  ;;  %v7182_v3 = vld [vmem:[#allocation3 + $0x338] ss:$36 sps:$4 sm:$0xff]   ;;  %3229 = vst [vmem:[#allocation3 + $0x3e8] sm:$0xf] %v3121_v52  ;;  %v8431_v48 = vadd.f32 %v6628_v21, %v8235_v43  ;;  %v6630_v17 = vpop.f32.mrf.mxu0  ;;  %v6565_v60 = vpop.f32.mrf.mxu1 }
 0x1f7   : > { %3501 = vst [vmem:[#allocation3 + $0x3ec] sm:$0xf] %v3427_v46  ;;  %v3132_v35 = vshll.u32 %v2781_v22, 16  ;;  %v3136_v7 = vshrl.u32 %v2781_v22, 16  ;;  %v3142_v0 = vshll.u32 %v2782_v18, 16  ;;  %6880 = vmatmul.mubr.bf16.gmra.mxu0 %v7182_v3  ;;  %v6631_v52 = vadd.f32 %v6630_v17, %v6629_v55 }
 0x1f8   : > { %v3125_v36 = vrot.slane %v3123_v44, 4  ;;  %v3128_v39 = vrot.slane %v3126_v4, 5  ;;  %v3276_v2 = vld [vmem:[#allocation2 + $0xc0] sm:$0xe]  ;;  %v3277_v11 = vld [vmem:[#allocation2 + $0xc4] sm:$0xf]  ;;  %v6632_v18 = vpop.f32.mrf.mxu0  ;;  %v6566_v43 = vpop.f32.mrf.mxu1 }
 0x1f9   : > { %v3134_v34 = vrot.slane %v3132_v35, 5  ;;  %v3138_v62 = vrot.slane %v3136_v7, 4  ;;  %v3278_v61 = vld [vmem:[#allocation2 + $0xc8] sm:$0x1]  ;;  %v6117_v15 = vrot.slane %v3276_v2, 9  ;;  %v3430_v10 = vrot.slane %v3277_v11, 5 }
 0x1fa   : > { %v3129_v20 = vor.u32 %v3128_v39, %v3125_v36  ;;  %v7186_v31 = vld [vmem:[#allocation3 + $0x380] ss:$36 sps:$4 sm:$0xff]   ;;  %v3144_v27 = vrot.slane %v3142_v0, 5  ;;  %v3433_v33 = vrot.slane %v3278_v61, 5  ;;  %v3279_v22 = vld [vmem:[#allocation2 + $0xcc] sm:$0xe]  ;;  %v8436_v3 = vadd.f32 %v6631_v52, %v8240_v63  ;;  %v6633_v2 = vpop.f32.mrf.mxu0  ;;  %v6568_v55 = vpop.f32.mrf.mxu1 }
 0x1fb   : > { %v3139_v42 = vor.u32 %v3138_v62, %v3134_v34  ;;  %v3431_v30 = vsel %vm7612_vm13, %v6117_v15, %v3430_v10  ;;  %v3432_v46 = vrot.slane %v3430_v10, 4  ;;  %6883 = vmatprep.mubr.bf16.mxu0 %v7186_v31  ;;  %v3280_v4 = vld [vmem:[#allocation2 + $0xd0] sm:$0xf]  ;;  %v3281_v50 = vld [vmem:[#allocation2 + $0xd4] sm:$0x1]  ;;  %v6567_v35 = vadd.f32 %v6566_v43, %v6565_v60 }
 0x1fc   : > { %v3130_v54 = vrot.slane %v3129_v20, 4  ;;  %3502 = vst [vmem:[#allocation3 + $0x410] sm:$0xf] %v3431_v30  ;;  %v7183_v7 = vld [vmem:[#allocation3 + $0x3c0] ss:$36 sps:$4 sm:$0xff]   ;;  %v6118_v0 = vrot.slane %v3279_v22, 9  ;;  %v6634_v61 = vadd.f32 %v6633_v2, %v6632_v18  ;;  %v6569_v60 = vpop.f32.mrf.mxu1  ;;  %v6635_v30 = vpop.f32.mrf.mxu0 }
 0x1fd   : > { %v3140_v44 = vrot.slane %v3139_v42, 4  ;;  %v7185_v21 = vld [vmem:[#allocation3 + $0x3c4] ss:$36 sps:$4 sm:$0xff]   ;;  %v3434_v39 = vsel %vm7612_vm13, %v3432_v46, %v3433_v33  ;;  %v3437_v63 = vrot.slane %v3280_v4, 5  ;;  %v3440_v20 = vrot.slane %v3281_v50, 5 }
 0x1fe   : > { %v3135_v36 = vsel %vm7329_vm4, %v3130_v54, %v3134_v34  ;;  %v7187_v62 = vld [vmem:[#allocation3 + $0x3c8] ss:$36 sps:$4 sm:$0xff]   ;;  %3503 = vst [vmem:[#allocation3 + $0x434] sm:$0xf] %v3434_v39  ;;  %5597 = vmatprep.mubr.bf16.mxu1 %v7185_v21  ;;  %v2704_v15 = vld [vmem:[#allocation2 + $0xcc] sm:$0xf]  ;;  %v8445_v17 = vadd.f32 %v6567_v35, %v8357_v32  ;;  %v8450_v54 = vadd.f32 %v6634_v61, %v8260_v49  ;;  %v6636_v4 = vpop.f32.mrf.mxu0  ;;  %v6571_v35 = vpop.f32.mrf.mxu1 }
 0x1ff   : > { %v3145_v11 = vsel %vm7329_vm4, %v3140_v44, %v3144_v27  ;;  %3230 = vst [vmem:[#allocation3 + $0x40c] sm:$0xf] %v3135_v36  ;;  %v2705_v10 = vld [vmem:[#allocation2 + $0xd0] sm:$0xf]  ;;  %v2783_v34 = vld [vmem:[#allocation2 + $0xcc] sm:$0xf]  ;;  %5598 = vmatmul.mubr.bf16.gmra.mxu1 %v7183_v7  ;;  %6884 = vmatmul.mubr.bf16.gmra.mxu0 %v7187_v62  ;;  %v3438_v31 = vsel %vm7612_vm13, %v6118_v0, %v3437_v63 }
 0x200   : > { %3231 = vst [vmem:[#allocation3 + $0x430] sm:$0xf] %v3145_v11  ;;  %v3439_v42 = vrot.slane %v3437_v63, 4  ;;  %2736 = vst [vmem:[#allocation3 + $0x450] sm:$0xf] %v2704_v15  ;;  %v3147_v52 = vshrl.u32 %v2783_v34, 16  ;;  %v6570_v50 = vadd.f32 %v6569_v60, %v6568_v55  ;;  %v6637_v39 = vadd.f32 %v6636_v4, %v6635_v30  ;;  %v6638_v49 = vpop.f32.mrf.mxu0  ;;  %v6572_v2 = vpop.f32.mrf.mxu1 }
 0x201   : > { %2737 = vst [vmem:[#allocation3 + $0x474] sm:$0xf] %v2705_v10  ;;  %v2784_v27 = vld [vmem:[#allocation2 + $0xd0] sm:$0xf]  ;;  %v2785_v33 = vld [vmem:[#allocation2 + $0xd4] sm:$0x1]  ;;  %v6573_v9 = vadd.f32 %v6572_v2, %v6571_v35  ;;  %v6470_v2 = vadd.f32 %v8111_v12, %v8107_v13 }
 0x202   : > { %3504 = vst [vmem:[#allocation3 + $0x458] sm:$0xf] %v3438_v31  ;;  %v3150_v46 = vshll.u32 %v2783_v34, 16  ;;  %v3156_v32 = vshll.u32 %v2784_v27, 16  ;;  %v3160_v22 = vshrl.u32 %v2784_v27, 16  ;;  %v3166_v18 = vshll.u32 %v2785_v33, 16  ;;  %v6639_v10 = vpop.f32.mrf.mxu0  ;;  %v6574_v34 = vpop.f32.mrf.mxu1 }
 0x203   : > { %v3441_v43 = vsel %vm7612_vm13, %v3439_v42, %v3440_v20  ;;  %v3149_v44 = vrot.slane %v3147_v52, 4  ;;  %v8455_v0 = vadd.f32 %v6570_v50, %v8361_v58  ;;  %v7188_v20 = vld [vmem:[#allocation3 + $0x408] ss:$36 sps:$4 sm:$0xff]   ;;  %v8458_v55 = vadd.f32 %v6637_v39, %v8267_v57 }
 0x204   : > { %3505 = vst [vmem:[#allocation3 + $0x47c] sm:$0xf] %v3441_v43  ;;  %v3152_v7 = vrot.slane %v3150_v46, 5  ;;  %v3158_v21 = vrot.slane %v3156_v32, 5  ;;  %v3162_v36 = vrot.slane %v3160_v22, 4  ;;  %v3168_v61 = vrot.slane %v3166_v18, 5  ;;  %v6575_v33 = vpop.f32.mrf.mxu1 }
 0x205   : > { %v7191_v62 = vld [vmem:[#allocation3 + $0x410] ss:$36 sps:$4 sm:$0xff]   ;;  %v6640_v42 = vadd.f32 %v6639_v10, %v6638_v49  ;;  %v8461_v58 = vadd.f32 %v6573_v9, %v8036_v41  ;;  %v6464_v27 = vadd.f32 %v8075_v56, %v8063_v45  ;;  %v6576_v46 = vadd.f32 %v6575_v33, %v6574_v34  ;;  %v6641_v41 = vpop.f32.mrf.mxu0 }
 0x206   : > { %v3153_v11 = vor.u32 %v3152_v7, %v3149_v44  ;;  %v3163_v63 = vor.u32 %v3162_v36, %v3158_v21  ;;  %6887 = vmatprep.mubr.bf16.mxu0 %v7191_v62  ;;  %v6577_v43 = vpop.f32.mrf.mxu1 }
 0x207   : > { %v7190_v15 = vld [vmem:[#allocation3 + $0x40c] ss:$36 sps:$4 sm:$0xff]   ;;  %v8470_v30 = vadd.f32 %v6640_v42, %v8286_v8  ;;  %v8472_v22 = vadd.f32 %v6576_v46, %v6464_v27  ;;  %v6642_v45 = vpop.f32.mrf.mxu0 }
 0x208   : > { %v3154_v60 = vrot.slane %v3153_v11, 4  ;;  %v3164_v31 = vrot.slane %v3163_v63, 4  ;;  %5605 = vmatprep.mubr.bf16.mxu1 %v7190_v15  ;;  %v6643_v56 = vadd.f32 %v6642_v45, %v6641_v41  ;;  %v6578_v4 = vpop.f32.mrf.mxu1  ;;  %v7193_v50 = vld [vmem:[#allocation3 + $0x450] ss:$36 sps:$4 sm:$0xff]  }
 0x209   : > { %5606 = vmatmul.mubr.bf16.gmra.mxu1 %v7188_v20  ;;  %v6644_v18 = vpop.f32.mrf.mxu0  ;;  %v6579_v35 = vadd.f32 %v6578_v4, %v6577_v43 }
 0x20a   : > { %v3159_v52 = vsel %vm7329_vm4, %v3154_v60, %v3158_v21  ;;  %v3169_v57 = vsel %vm7329_vm4, %v3164_v31, %v3168_v61  ;;  %v8475_v44 = vadd.f32 %v6643_v56, %v8293_v47  ;;  %v6580_v21 = vpop.f32.mrf.mxu1  ;;  %v6476_v31 = vadd.f32 %v8132_v38, %v8128_v29 }
 0x20b   : > { %v7192_v32 = vld [vmem:[#allocation3 + $0x458] ss:$36 sps:$4 sm:$0xff]   ;;  %3232 = vst [vmem:[#allocation3 + $0x454] sm:$0xf] %v3159_v52  ;;  %3233 = vst [vmem:[#allocation3 + $0x478] sm:$0xf] %v3169_v57  ;;  %v6645_v40 = vpop.f32.mrf.mxu0  ;;  %v8481_v39 = vadd.f32 %v6579_v35, %v8085_v51 }
 0x20c   : > { %6888 = vmatmul.mubr.bf16.gmra.mxu0 %v7192_v32  ;;  %v6646_v8 = vadd.f32 %v6645_v40, %v6644_v18  ;;  %v6581_v49 = vpop.f32.mrf.mxu1 }
 0x20d   : > { %v6647_v47 = vpop.f32.mrf.mxu0  ;;  %v6582_v62 = vadd.f32 %v6581_v49, %v6580_v21 }
 0x20e   : > { %v8478_v36 = vadd.f32 %v6646_v8, %v8307_v25  ;;  %v6583_v11 = vpop.f32.mrf.mxu1  ;;  %v8762_v8 = vld [vmem:[#allocation6_spill] sm:$0xff] }
 0x20f   : > { %v6648_v63 = vpop.f32.mrf.mxu0  ;;  %v8485_v61 = vadd.f32 %v6582_v62, %v6470_v2 }
 0x210   : > { %v6649_v9 = vadd.f32 %v6648_v63, %v6647_v47  ;;  %v6584_v20 = vpop.f32.mrf.mxu1  ;;  %v8763_v47 = vld [vmem:[#allocation7_spill] sm:$0xff] }
 0x211   : > { %v6650_v15 = vpop.f32.mrf.mxu0  ;;  %v6585_v25 = vadd.f32 %v6584_v20, %v6583_v11 }
 0x212   : > { %v7195_v7 = vld [vmem:[#allocation3 + $0x454] ss:$36 sps:$4 sm:$0xff]   ;;  %v8488_v10 = vadd.f32 %v6649_v9, %v8318_v37  ;;  %v6586_v51 = vpop.f32.mrf.mxu1 }
 0x213   : > { %5613 = vmatprep.mubr.bf16.mxu1 %v7195_v7  ;;  %v6651_v34 = vpop.f32.mrf.mxu0  ;;  %v8491_v60 = vadd.f32 %v6585_v25, %v8130_v19 }
 0x214   : > { %5614 = vmatmul.mubr.bf16.gmra.mxu1 %v7193_v50  ;;  %v6652_v13 = vadd.f32 %v6651_v34, %v6650_v15  ;;  %v6587_v12 = vpop.f32.mrf.mxu1  ;;  %v8761_v50 = vld [vmem:[#allocation4_spill] sm:$0xff] }
 0x215   : > { %v6588_v42 = vadd.f32 %v6587_v12, %v6586_v51  ;;  %v6653_v33 = vpop.f32.mrf.mxu0  ;;  %v6482_v35 = vadd.f32 %v8762_v8, %v8761_v50 }
 0x216   : > { %v8496_v27 = vadd.f32 %v6652_v13, %v8324_v16  ;;  %v6589_v41 = vpop.f32.mrf.mxu1  ;;  %v8760_v16 = vld [vmem:[#allocation5_spill] sm:$0xff] }
 0x217   : > { %v8498_v52 = vadd.f32 %v6588_v42, %v6476_v31  ;;  %v6654_v57 = vpop.f32.mrf.mxu0 }
 0x218   : > { %v6655_v37 = vadd.f32 %v6654_v57, %v6653_v33  ;;  %v6590_v56 = vpop.f32.mrf.mxu1 }
 0x219   : > { %v6656_v46 = vpop.f32.mrf.mxu0  ;;  %v6591_v29 = vadd.f32 %v6590_v56, %v6589_v41 }
 0x21a   : > { %v8501_v32 = vadd.f32 %v6655_v37, %v8341_v26  ;;  %v6592_v38 = vpop.f32.mrf.mxu1 }
 0x21b   : > { %v6657_v19 = vpop.f32.mrf.mxu0  ;;  %v8507_v43 = vadd.f32 %v6591_v29, %v8760_v16 }
 0x21c   : > { %v6658_v45 = vadd.f32 %v6657_v19, %v6656_v46  ;;  %v6593_v4 = vpop.f32.mrf.mxu1 }
 0x21d   : > { %v6659_v40 = vpop.f32.mrf.mxu0  ;;  %v6594_v7 = vadd.f32 %v6593_v4, %v6592_v38 }
 0x21e   : > { %v8504_v18 = vadd.f32 %v6658_v45, %v8345_v28 }
 0x21f   : > { %v6660_v26 = vpop.f32.mrf.mxu0  ;;  %v8511_v49 = vadd.f32 %v6594_v7, %v6482_v35 }
 0x220   : > { %v6661_v21 = vadd.f32 %v6660_v26, %v6659_v40 }
 0x221   : > { %v6662_v2 = vpop.f32.mrf.mxu0 }
 0x222   : > { %v8514_v62 = vadd.f32 %v6661_v21, %v8763_v47 }
 0x223   : > { %v6663_v28 = vpop.f32.mrf.mxu0 }
 0x224   : > { %v6664_v11 = vadd.f32 %v6663_v28, %v6662_v2 }
 0x225   : > { %v6665_v63 = vpop.f32.mrf.mxu0 }
 0x226   : > { %v8517_v9 = vadd.f32 %v6664_v11, %v8377_v24 }
 0x227   : > { %v6666_v20 = vpop.f32.mrf.mxu0 }
 0x228   : > { %v6667_v15 = vadd.f32 %v6666_v20, %v6665_v63  ;;  %v8519_v51 = vpop.f32.mrf.mxu1 }
 0x229   : > { %v6668_v25 = vpop.f32.mrf.mxu0 }
 0x22a   : > { %v8522_v34 = vadd.f32 %v6667_v15, %v8388_v14  ;;  %v8524_v12 = vpop.f32.mrf.mxu1 }
 0x22b   : > { %v6669_v13 = vpop.f32.mrf.mxu0 }
 0x22c   : > { %v6670_v31 = vadd.f32 %v6669_v13, %v6668_v25  ;;  %v8526_v42 = vpop.f32.mrf.mxu1 }
 0x22d   : > { %v6671_v57 = vpop.f32.mrf.mxu0 }
 0x22e   : > { %v8529_v33 = vadd.f32 %v6670_v31, %v8395_v53  ;;  %v8531_v37 = vpop.f32.mrf.mxu1 }
 0x22f   : > { %v6672_v24 = vpop.f32.mrf.mxu0 }
 0x230   : > { %v6673_v46 = vadd.f32 %v6672_v24, %v6671_v57 }
 0x231   : > { %v6674_v19 = vpop.f32.mrf.mxu0 }
 0x232   : > { %v8534_v41 = vadd.f32 %v6673_v46, %v8425_v5 }
 0x233   : > { %v6675_v14 = vpop.f32.mrf.mxu0  ;;  %v6729_v45 = vpop.f32.mrf.mxu1 }
 0x234   : > { %v6676_v56 = vadd.f32 %v6675_v14, %v6674_v19 }
 0x235   : > { %v6730_v29 = vpop.f32.mrf.mxu1 }
 0x236   : > { %v8537_v38 = vadd.f32 %v6676_v56, %v8428_v6 }
 0x237   : > { %v6732_v16 = vpop.f32.mrf.mxu1  ;;  %v6677_v40 = vpop.f32.mrf.mxu0 }
 0x239   : > { %v6678_v53 = vpop.f32.mrf.mxu0  ;;  %v6733_v4 = vpop.f32.mrf.mxu1 }
 0x23a   : > { %v6679_v50 = vadd.f32 %v6678_v53, %v6677_v40 }
 0x23b   : > { %v6680_v8 = vpop.f32.mrf.mxu0 }
 0x23c   : > { %v8540_v35 = vadd.f32 %v6679_v50, %v8445_v17 }
 0x23d   : > { %v6681_v7 = vpop.f32.mrf.mxu0 }
 0x23e   : > { %v6682_v5 = vadd.f32 %v6681_v7, %v6680_v8 }
 0x240   : > { %v8547_v2 = vadd.f32 %v6682_v5, %v8455_v0 }
 0x241   : > { %v8542_v26 = vpop.f32.mrf.mxu1 }
 0x243   : > { %v8544_v21 = vpop.f32.mrf.mxu1 }
 0x245   : > { %v8549_v6 = vpop.f32.mrf.mxu1  ;;  %v6683_v47 = vpop.f32.mrf.mxu0 }
 0x247   : > { %v6684_v28 = vpop.f32.mrf.mxu0  ;;  %v8551_v63 = vpop.f32.mrf.mxu1 }
 0x248   : > { %v6685_v11 = vadd.f32 %v6684_v28, %v6683_v47 }
 0x249   : > { %v6686_v20 = vpop.f32.mrf.mxu0 }
 0x24a   : > { %v8554_v17 = vadd.f32 %v6685_v11, %v8461_v58 }
 0x24b   : > { %v6687_v15 = vpop.f32.mrf.mxu0 }
 0x24c   : > { %v6688_v25 = vadd.f32 %v6687_v15, %v6686_v20 }
 0x24e   : > { %v6741_v13 = vpop.f32.mrf.mxu1  ;;  %v8557_v31 = vadd.f32 %v6688_v25, %v8472_v22 }
 0x250   : > { %8764 = vst [vmem:[#allocation5_spill] sm:$0xff] %v8557_v31  ;;  %v6742_v57 = vpop.f32.mrf.mxu1 }
 0x251   : > { %v6689_v0 = vpop.f32.mrf.mxu0 }
 0x252   : > { %v8559_v24 = vpop.f32.mrf.mxu1 }
 0x253   : > { %v6690_v46 = vpop.f32.mrf.mxu0 }
 0x254   : > { %v6691_v19 = vadd.f32 %v6690_v46, %v6689_v0  ;;  %v8561_v14 = vpop.f32.mrf.mxu1 }
 0x255   : > { %v6692_v56 = vpop.f32.mrf.mxu0 }
 0x256   : > { %v8564_v40 = vadd.f32 %v6691_v19, %v8481_v39 }
 0x257   : > { %v6693_v58 = vpop.f32.mrf.mxu0 }
 0x258   : > { %v6694_v53 = vadd.f32 %v6693_v58, %v6692_v56 }
 0x25a   : > { %v8569_v8 = vadd.f32 %v6694_v53, %v8485_v61 }
 0x25b   : > { %v8566_v50 = vpop.f32.mrf.mxu1 }
 0x25c   : > { %8765 = vst [vmem:[#allocation4_spill] sm:$0xff] %v8569_v8 }
 0x25d   : > { %v8571_v22 = vpop.f32.mrf.mxu1 }
 0x25f   : > { %v8573_v7 = vpop.f32.mrf.mxu1  ;;  %v6695_v5 = vpop.f32.mrf.mxu0 }
 0x261   : > { %v6696_v47 = vpop.f32.mrf.mxu0  ;;  %v8575_v28 = vpop.f32.mrf.mxu1 }
 0x262   : > { %v6697_v11 = vadd.f32 %v6696_v47, %v6695_v5 }
 0x263   : > { %v6698_v20 = vpop.f32.mrf.mxu0 }
 0x264   : > { %v8578_v39 = vadd.f32 %v6697_v11, %v8491_v60  ;;  %v6731_v60 = vadd.f32 %v6730_v29, %v6729_v45 }
 0x265   : > { %v6699_v15 = vpop.f32.mrf.mxu0 }
 0x266   : > { %8766 = vst [vmem:[#allocation6_spill] sm:$0xff] %v8578_v39  ;;  %v6700_v0 = vadd.f32 %v6699_v15, %v6698_v20  ;;  %v5504_v45 = vadd.f32 %v6731_v60, %v8406_v1 }
 0x267   : > { %v8580_v25 = vpop.f32.mrf.mxu1 }
 0x268   : > { %v8585_v61 = vadd.f32 %v6700_v0, %v8498_v52  ;;  %v6725_v52 = vadd.f32 %v8524_v12, %v8519_v51  ;;  %v6728_v51 = vadd.f32 %v8531_v37, %v8526_v42  ;;  %v8769_v42 = vld [vmem:[#allocation9_spill] sm:$0xff] }
 0x269   : > { %v8582_v46 = vpop.f32.mrf.mxu1 }
 0x26a   : > { %8767 = vst [vmem:[#allocation7_spill] sm:$0xff] %v8585_v61  ;;  %v6734_v61 = vadd.f32 %v6733_v4, %v6732_v16  ;;  %v5499_v37 = vadd.f32 %v6728_v51, %v8769_v42 }
 0x26b   : > { %v8587_v19 = vpop.f32.mrf.mxu1 }
 0x26d   : > { %v8589_v58 = vpop.f32.mrf.mxu1 }
 0x26f   : > { %v6701_v56 = vpop.f32.mrf.mxu0 }
 0x271   : > { %v6702_v53 = vpop.f32.mrf.mxu0 }
 0x272   : > { %v6703_v5 = vadd.f32 %v6702_v53, %v6701_v56  ;;  %v5507_v53 = vadd.f32 %v6734_v61, %v8415_v59 }
 0x273   : > { %v6704_v47 = vpop.f32.mrf.mxu0 }
 0x274   : > { %v8594_v39 = vadd.f32 %v6703_v5, %v8507_v43 }
 0x275   : > { %v6705_v20 = vpop.f32.mrf.mxu0 }
 0x276   : > { %v8591_v11 = vpop.f32.mrf.mxu1  ;;  %v6706_v0 = vadd.f32 %v6705_v20, %v6704_v47  ;;  %v6743_v20 = vadd.f32 %v6742_v57, %v6741_v13  ;;  %v6746_v13 = vadd.f32 %v8561_v14, %v8559_v24 }
 0x278   : > { %v8598_v15 = vpop.f32.mrf.mxu1  ;;  %v8603_v31 = vadd.f32 %v6706_v0, %v8511_v49  ;;  %v8768_v49 = vld [vmem:[#allocation8_spill] sm:$0xff] }
 0x279   : > { %v5496_v16 = vadd.f32 %v6725_v52, %v8768_v49 }
 0x27a   : > { %v8600_v8 = vpop.f32.mrf.mxu1  ;;  %v6861_v43 = vpop.f32.mrf.mxu0 }
 0x27b   : > { %v5665_v29 = vadd.f32 %v6861_v43, %v5504_v45  ;;  %v6737_v43 = vadd.f32 %v8544_v21, %v8542_v26  ;;  %v6740_v26 = vadd.f32 %v8551_v63, %v8549_v6  ;;  %v6755_v6 = vadd.f32 %v8582_v46, %v8580_v25 }
 0x27c   : > { %v8615_v12 = vpop.f32.mrf.mxu1  ;;  %v5656_v4 = vpop.f32.mrf.mxu0  ;;  %v6758_v25 = vadd.f32 %v8589_v58, %v8587_v19 }
 0x27d   : > { %5785 = vst [vmem:[%s8611_s19 + $0x10] sm:$0xff] %v5665_v29  ;;  %v5657_v56 = vadd.f32 %v5656_v4, %v5496_v16  ;;  %v5520_v4 = vadd.f32 %v6743_v20, %v8436_v3  ;;  %v5855_v57 = vmul.f32 %v5665_v29, %v5665_v29  ;;  %v5512_v42 = vadd.f32 %v6737_v43, %v8418_v23 }
 0x27e   : > { %v8618_v1 = vpop.f32.mrf.mxu1  ;;  %v6862_v5 = vpop.f32.mrf.mxu0  ;;  %v5539_v58 = vadd.f32 %v6758_v25, %v8478_v36  ;;  %v6761_v36 = vadd.f32 %v8598_v15, %v8591_v11 }
 0x27f   : > { %5783 = vst [vmem:[%s8611_s19] sm:$0xff] %v5657_v56  ;;  %v5668_v60 = vadd.f32 %v6862_v5, %v5507_v53  ;;  %v5853_v49 = vmul.f32 %v5657_v56, %v5657_v56 }
 0x280   : > { %v8622_v47 = vpop.f32.mrf.mxu1  ;;  %v5659_v0 = vpop.f32.mrf.mxu0  ;;  %v5544_v11 = vadd.f32 %v6761_v36, %v8488_v10 }
 0x281   : > { %5786 = vst [vmem:[%s8611_s19 + $0x18] sm:$0xff] %v5668_v60  ;;  %v5660_v52 = vadd.f32 %v5659_v0, %v5499_v37 }
 0x282   : > { %v8626_v45 = vpop.f32.mrf.mxu1 }
 0x283   : > { %5784 = vst [vmem:[%s8611_s19 + $0x8] sm:$0xff] %v5660_v52  ;;  %v5815_v59 = vadd.f32 %v5660_v52, %v5657_v56  ;;  %v5854_v61 = vmul.f32 %v5660_v52, %v5660_v52  ;;  %v5856_v56 = vmul.f32 %v5668_v60, %v5668_v60 }
 0x284   : > { %v8631_v16 = vpop.f32.mrf.mxu1 }
 0x285   : > { %v5816_v51 = vadd.f32 %v5815_v59, %v5665_v29  ;;  %v5885_v53 = vadd.f32 %v5854_v61, %v5853_v49  ;;  %v5523_v49 = vadd.f32 %v6746_v13, %v8450_v54  ;;  %v5536_v13 = vadd.f32 %v6755_v6, %v8475_v44 }
 0x286   : > { %v8637_v5 = vpop.f32.mrf.mxu1 }
 0x287   : > { %v5886_v37 = vadd.f32 %v5885_v53, %v5855_v57  ;;  %v5817_v3 = vadd.f32 %v5816_v51, %v5668_v60  ;;  %v5515_v60 = vadd.f32 %v6740_v26, %v8431_v48  ;;  %v6752_v48 = vadd.f32 %v8575_v28, %v8573_v7 }
 0x288   : > { %v6865_v21 = vpop.f32.mrf.mxu0  ;;  %v8642_v52 = vpop.f32.mrf.mxu1 }
 0x289   : > { %v5681_v0 = vadd.f32 %v6865_v21, %v5520_v4  ;;  %v5887_v14 = vadd.f32 %v5886_v37, %v5856_v56  ;;  %v6749_v4 = vadd.f32 %v8571_v22, %v8566_v50  ;;  %v5531_v6 = vadd.f32 %v6752_v48, %v8470_v30 }
 0x28a   : > { %v5672_v20 = vpop.f32.mrf.mxu0  ;;  %v8645_v29 = vpop.f32.mrf.mxu1  ;;  %v6770_v30 = vadd.f32 %v8631_v16, %v8626_v45  ;;  %v6773_v10 = vadd.f32 %v8642_v52, %v8637_v5 }
 0x28b   : > { %5789 = vst [vmem:[%s8611_s19 + $0x30] sm:$0xff] %v5681_v0  ;;  %v5673_v24 = vadd.f32 %v5672_v20, %v5512_v42  ;;  %v5528_v26 = vadd.f32 %v6749_v4, %v8458_v55  ;;  %v5859_v56 = vmul.f32 %v5681_v0, %v5681_v0  ;;  %v6767_v55 = vadd.f32 %v8622_v47, %v8618_v1 }
 0x28c   : > { %v6866_v23 = vpop.f32.mrf.mxu0  ;;  %v8651_v61 = vpop.f32.mrf.mxu1 }
 0x28d   : > { %5787 = vst [vmem:[%s8611_s19 + $0x20] sm:$0xff] %v5673_v24  ;;  %v5818_v63 = vadd.f32 %v5817_v3, %v5673_v24  ;;  %v5857_v43 = vmul.f32 %v5673_v24, %v5673_v24  ;;  %v5684_v59 = vadd.f32 %v6866_v23, %v5523_v49 }
 0x28e   : > { %v5675_v57 = vpop.f32.mrf.mxu0 }
 0x28f   : > { %v5888_v51 = vadd.f32 %v5887_v14, %v5857_v43  ;;  %5790 = vst [vmem:[%s8611_s19 + $0x38] sm:$0xff] %v5684_v59  ;;  %v5676_v54 = vadd.f32 %v5675_v57, %v5515_v60  ;;  %v5860_v24 = vmul.f32 %v5684_v59, %v5684_v59 }
 0x291   : > { %5788 = vst [vmem:[%s8611_s19 + $0x28] sm:$0xff] %v5676_v54  ;;  %v5819_v53 = vadd.f32 %v5818_v63, %v5676_v54  ;;  %v5858_v21 = vmul.f32 %v5676_v54, %v5676_v54  ;;  %v5552_v54 = vadd.f32 %v6767_v55, %v8501_v32  ;;  %v5560_v55 = vadd.f32 %v6773_v10, %v8514_v62 }
 0x292   : > { %v6777_v46 = vpop.f32.mrf.mxu1 }
 0x293   : > { %v6869_v42 = vpop.f32.mrf.mxu0  ;;  %v5820_v37 = vadd.f32 %v5819_v53, %v5681_v0  ;;  %v5889_v3 = vadd.f32 %v5888_v51, %v5858_v21  ;;  %v6764_v53 = vadd.f32 %v8615_v12, %v8600_v8 }
 0x294   : > { %v5697_v50 = vadd.f32 %v6869_v42, %v5536_v13  ;;  %v6778_v22 = vpop.f32.mrf.mxu1 }
 0x295   : > { %v5688_v20 = vpop.f32.mrf.mxu0  ;;  %v5890_v14 = vadd.f32 %v5889_v3, %v5859_v56  ;;  %v5821_v49 = vadd.f32 %v5820_v37, %v5684_v59  ;;  %v6779_v37 = vadd.f32 %v6778_v22, %v6777_v46  ;;  %v5555_v3 = vadd.f32 %v6770_v30, %v8504_v18 }
 0x296   : > { %5793 = vst [vmem:[%s8611_s19 + $0x50] sm:$0xff] %v5697_v50  ;;  %v5689_v19 = vadd.f32 %v5688_v20, %v5528_v26  ;;  %v6780_v44 = vpop.f32.mrf.mxu1  ;;  %v5863_v1 = vmul.f32 %v5697_v50, %v5697_v50  ;;  %v5547_v8 = vadd.f32 %v6764_v53, %v8496_v27 }
 0x297   : > { %v6870_v7 = vpop.f32.mrf.mxu0  ;;  %v5891_v63 = vadd.f32 %v5890_v14, %v5860_v24  ;;  %v5568_v18 = vadd.f32 %v6779_v37, %v8522_v34 }
 0x298   : > { %5791 = vst [vmem:[%s8611_s19 + $0x40] sm:$0xff] %v5689_v19  ;;  %v5700_v28 = vadd.f32 %v6870_v7, %v5539_v58  ;;  %v5822_v0 = vadd.f32 %v5821_v49, %v5689_v19  ;;  %v5861_v23 = vmul.f32 %v5689_v19, %v5689_v19  ;;  %v6781_v60 = vpop.f32.mrf.mxu1  ;;  %v6776_v7 = vadd.f32 %v8651_v61, %v8645_v29 }
 0x299   : > { %v5691_v43 = vpop.f32.mrf.mxu0  ;;  %v6782_v46 = vadd.f32 %v6781_v60, %v6780_v44 }
 0x29a   : > { %5794 = vst [vmem:[%s8611_s19 + $0x58] sm:$0xff] %v5700_v28  ;;  %v5692_v4 = vadd.f32 %v5691_v43, %v5531_v6  ;;  %v5892_v57 = vadd.f32 %v5891_v63, %v5861_v23  ;;  %v5864_v15 = vmul.f32 %v5700_v28, %v5700_v28  ;;  %v5563_v61 = vadd.f32 %v6776_v7, %v8517_v9 }
 0x29c   : > { %5792 = vst [vmem:[%s8611_s19 + $0x48] sm:$0xff] %v5692_v4  ;;  %v5823_v59 = vadd.f32 %v5822_v0, %v5692_v4  ;;  %v5862_v51 = vmul.f32 %v5692_v4, %v5692_v4  ;;  %v5571_v0 = vadd.f32 %v6782_v46, %v8529_v33 }
 0x29e   : > { %v5824_v47 = vadd.f32 %v5823_v59, %v5697_v50  ;;  %v5893_v25 = vadd.f32 %v5892_v57, %v5862_v51  ;;  %v8677_v13 = vpop.f32.mrf.mxu1 }
 0x29f   : > { %v6873_v21 = vpop.f32.mrf.mxu0 }
 0x2a0   : > { %v5894_v42 = vadd.f32 %v5893_v25, %v5863_v1  ;;  %v5713_v48 = vadd.f32 %v6873_v21, %v5552_v54  ;;  %v6784_v32 = vpop.f32.mrf.mxu1  ;;  %v5825_v26 = vadd.f32 %v5824_v47, %v5700_v28 }
 0x2a1   : > { %v5704_v56 = vpop.f32.mrf.mxu0  ;;  %v6785_v9 = vadd.f32 %v6784_v32, %v8677_v13 }
 0x2a2   : > { %5797 = vst [vmem:[%s8611_s19 + $0x70] sm:$0xff] %v5713_v48  ;;  %v5705_v45 = vadd.f32 %v5704_v56, %v5544_v11  ;;  %v5895_v16 = vadd.f32 %v5894_v42, %v5864_v15  ;;  %v6786_v50 = vpop.f32.mrf.mxu1  ;;  %v5867_v23 = vmul.f32 %v5713_v48, %v5713_v48 }
 0x2a3   : > { %v6874_v20 = vpop.f32.mrf.mxu0 }
 0x2a4   : > { %5795 = vst [vmem:[%s8611_s19 + $0x60] sm:$0xff] %v5705_v45  ;;  %v5826_v12 = vadd.f32 %v5825_v26, %v5705_v45  ;;  %v5865_v19 = vmul.f32 %v5705_v45, %v5705_v45  ;;  %v5716_v58 = vadd.f32 %v6874_v20, %v5555_v3  ;;  %v6787_v24 = vpop.f32.mrf.mxu1 }
 0x2a5   : > { %v5707_v22 = vpop.f32.mrf.mxu0  ;;  %v6788_v45 = vadd.f32 %v6787_v24, %v6786_v50 }
 0x2a6   : > { %v5896_v14 = vadd.f32 %v5895_v16, %v5865_v19  ;;  %5798 = vst [vmem:[%s8611_s19 + $0x78] sm:$0xff] %v5716_v58  ;;  %v5708_v49 = vadd.f32 %v5707_v22, %v5547_v8  ;;  %v5868_v4 = vmul.f32 %v5716_v58, %v5716_v58  ;;  %v5576_v19 = vadd.f32 %v6785_v9, %v8534_v41 }
 0x2a7   : > { %v5579_v24 = vadd.f32 %v6788_v45, %v8537_v38 }
 0x2a8   : > { %v6877_v27 = vpop.f32.mrf.mxu0  ;;  %5796 = vst [vmem:[%s8611_s19 + $0x68] sm:$0xff] %v5708_v49  ;;  %v5827_v28 = vadd.f32 %v5826_v12, %v5708_v49  ;;  %v5866_v5 = vmul.f32 %v5708_v49, %v5708_v49 }
 0x2a9   : > { %v6789_v52 = vpop.f32.mrf.mxu1  ;;  %v5729_v6 = vadd.f32 %v6877_v27, %v5568_v18 }
 0x2aa   : > { %v5720_v44 = vpop.f32.mrf.mxu0  ;;  %v5828_v63 = vadd.f32 %v5827_v28, %v5713_v48  ;;  %v5897_v43 = vadd.f32 %v5896_v14, %v5866_v5 }
 0x2ab   : > { %5801 = vst [vmem:[%s8611_s19 + $0x90] sm:$0xff] %v5729_v6  ;;  %v6790_v34 = vpop.f32.mrf.mxu1  ;;  %v5721_v60 = vadd.f32 %v5720_v44, %v5560_v55  ;;  %v5871_v15 = vmul.f32 %v5729_v6, %v5729_v6 }
 0x2ac   : > { %v6878_v29 = vpop.f32.mrf.mxu0  ;;  %v5898_v36 = vadd.f32 %v5897_v43, %v5867_v23  ;;  %v5829_v57 = vadd.f32 %v5828_v63, %v5716_v58  ;;  %v6791_v25 = vadd.f32 %v6790_v34, %v6789_v52 }
 0x2ad   : > { %5799 = vst [vmem:[%s8611_s19 + $0x80] sm:$0xff] %v5721_v60  ;;  %v6792_v59 = vpop.f32.mrf.mxu1  ;;  %v5732_v62 = vadd.f32 %v6878_v29, %v5571_v0  ;;  %v5869_v33 = vmul.f32 %v5721_v60, %v5721_v60 }
 0x2ae   : > { %v5723_v51 = vpop.f32.mrf.mxu0  ;;  %v5830_v54 = vadd.f32 %v5829_v57, %v5721_v60  ;;  %v5899_v30 = vadd.f32 %v5898_v36, %v5868_v4  ;;  %v5584_v37 = vadd.f32 %v6791_v25, %v8540_v35 }
 0x2af   : > { %5802 = vst [vmem:[%s8611_s19 + $0x98] sm:$0xff] %v5732_v62  ;;  %v6793_v1 = vpop.f32.mrf.mxu1  ;;  %v5724_v47 = vadd.f32 %v5723_v51, %v5563_v61  ;;  %v5872_v16 = vmul.f32 %v5732_v62, %v5732_v62  ;;  %v8770_v51 = vld [vmem:[#allocation5_spill] sm:$0xff] }
 0x2b0   : > { %v5900_v53 = vadd.f32 %v5899_v30, %v5869_v33  ;;  %v6794_v56 = vadd.f32 %v6793_v1, %v6792_v59 }
 0x2b1   : > { %5800 = vst [vmem:[%s8611_s19 + $0x88] sm:$0xff] %v5724_v47  ;;  %v5831_v21 = vadd.f32 %v5830_v54, %v5724_v47  ;;  %v5870_v11 = vmul.f32 %v5724_v47, %v5724_v47 }
 0x2b2   : > { %v5587_v22 = vadd.f32 %v6794_v56, %v8547_v2 }
 0x2b3   : > { %v5832_v42 = vadd.f32 %v5831_v21, %v5729_v6  ;;  %v5901_v48 = vadd.f32 %v5900_v53, %v5870_v11  ;;  %v8771_v11 = vld [vmem:[#allocation4_spill] sm:$0xff] }
 0x2b5   : > { %v6795_v26 = vpop.f32.mrf.mxu1  ;;  %v5902_v3 = vadd.f32 %v5901_v48, %v5871_v15  ;;  %v5833_v10 = vadd.f32 %v5832_v42, %v5732_v62 }
 0x2b7   : > { %v6881_v20 = vpop.f32.mrf.mxu0  ;;  %v6796_v8 = vpop.f32.mrf.mxu1  ;;  %v5903_v13 = vadd.f32 %v5902_v3, %v5872_v16 }
 0x2b8   : > { %v5745_v12 = vadd.f32 %v6881_v20, %v5584_v37  ;;  %v6797_v14 = vadd.f32 %v6796_v8, %v6795_v26 }
 0x2b9   : > { %v5736_v58 = vpop.f32.mrf.mxu0  ;;  %v6798_v32 = vpop.f32.mrf.mxu1 }
 0x2ba   : > { %5805 = vst [vmem:[%s8611_s19 + $0xb0] sm:$0xff] %v5745_v12  ;;  %v5737_v46 = vadd.f32 %v5736_v58, %v5576_v19  ;;  %v5592_v2 = vadd.f32 %v6797_v14, %v8554_v17  ;;  %v5875_v44 = vmul.f32 %v5745_v12, %v5745_v12 }
 0x2bb   : > { %v6882_v35 = vpop.f32.mrf.mxu0  ;;  %v6799_v50 = vpop.f32.mrf.mxu1 }
 0x2bc   : > { %5803 = vst [vmem:[%s8611_s19 + $0xa0] sm:$0xff] %v5737_v46  ;;  %v5834_v49 = vadd.f32 %v5833_v10, %v5737_v46  ;;  %v5873_v18 = vmul.f32 %v5737_v46, %v5737_v46  ;;  %v5748_v7 = vadd.f32 %v6882_v35, %v5587_v22  ;;  %v6800_v0 = vadd.f32 %v6799_v50, %v6798_v32 }
 0x2bd   : > { %v5739_v27 = vpop.f32.mrf.mxu0 }
 0x2be   : > { %v5904_v41 = vadd.f32 %v5903_v13, %v5873_v18  ;;  %5806 = vst [vmem:[%s8611_s19 + $0xb8] sm:$0xff] %v5748_v7  ;;  %v5740_v28 = vadd.f32 %v5739_v27, %v5579_v24  ;;  %v5876_v4 = vmul.f32 %v5748_v7, %v5748_v7  ;;  %v5595_v54 = vadd.f32 %v6800_v0, %v8770_v51 }
 0x2bf   : > { %v6801_v5 = vpop.f32.mrf.mxu1  ;;  %v6885_v52 = vpop.f32.mrf.mxu0 }
 0x2c0   : > { %5804 = vst [vmem:[%s8611_s19 + $0xa8] sm:$0xff] %v5740_v28  ;;  %v5835_v6 = vadd.f32 %v5834_v49, %v5740_v28  ;;  %v5874_v55 = vmul.f32 %v5740_v28, %v5740_v28  ;;  %v8773_v49 = vld [vmem:[#allocation7_spill] sm:$0xff] }
 0x2c1   : > { %v6802_v38 = vpop.f32.mrf.mxu1  ;;  %v5752_v23 = vpop.f32.mrf.mxu0 }
 0x2c2   : > { %v5836_v63 = vadd.f32 %v5835_v6, %v5745_v12  ;;  %v5905_v43 = vadd.f32 %v5904_v41, %v5874_v55  ;;  %v6803_v34 = vadd.f32 %v6802_v38, %v6801_v5  ;;  %v5753_v60 = vadd.f32 %v5752_v23, %v5592_v2  ;;  %v8772_v12 = vld [vmem:[#allocation6_spill] sm:$0xff] }
 0x2c3   : > { %v6804_v29 = vpop.f32.mrf.mxu1  ;;  %v6886_v61 = vpop.f32.mrf.mxu0 }
 0x2c4   : > { %v5906_v36 = vadd.f32 %v5905_v43, %v5875_v44  ;;  %v5600_v57 = vadd.f32 %v6803_v34, %v8564_v40  ;;  %5807 = vst [vmem:[%s8611_s19 + $0xc0] sm:$0xff] %v5753_v60  ;;  %v5837_v59 = vadd.f32 %v5836_v63, %v5748_v7  ;;  %v5877_v62 = vmul.f32 %v5753_v60, %v5753_v60 }
 0x2c5   : > { %v6805_v17 = vpop.f32.mrf.mxu1  ;;  %v5755_v33 = vpop.f32.mrf.mxu0 }
 0x2c6   : > { %v5761_v30 = vadd.f32 %v6885_v52, %v5600_v57  ;;  %v5838_v1 = vadd.f32 %v5837_v59, %v5753_v60  ;;  %v5907_v47 = vadd.f32 %v5906_v36, %v5876_v4  ;;  %v6806_v25 = vadd.f32 %v6805_v17, %v6804_v29 }
 0x2c7   : > { %v5756_v53 = vadd.f32 %v5755_v33, %v5595_v54 }
 0x2c8   : > { %5809 = vst [vmem:[%s8611_s19 + $0xd0] sm:$0xff] %v5761_v30  ;;  %v5908_v21 = vadd.f32 %v5907_v47, %v5877_v62  ;;  %v5603_v9 = vadd.f32 %v6806_v25, %v8771_v11  ;;  %v5879_v56 = vmul.f32 %v5761_v30, %v5761_v30 }
 0x2c9   : > { %v6807_v15 = vpop.f32.mrf.mxu1  ;;  %5808 = vst [vmem:[%s8611_s19 + $0xc8] sm:$0xff] %v5756_v53  ;;  %v5839_v40 = vadd.f32 %v5838_v1, %v5756_v53  ;;  %v5878_v42 = vmul.f32 %v5756_v53, %v5756_v53 }
 0x2ca   : > { %v5764_v48 = vadd.f32 %v6886_v61, %v5603_v9 }
 0x2cb   : > { %v6808_v26 = vpop.f32.mrf.mxu1  ;;  %v5840_v37 = vadd.f32 %v5839_v40, %v5761_v30  ;;  %v5909_v45 = vadd.f32 %v5908_v21, %v5878_v42 }
 0x2cc   : > { %v6809_v16 = vadd.f32 %v6808_v26, %v6807_v15  ;;  %v6889_v3 = vpop.f32.mrf.mxu0  ;;  %5810 = vst [vmem:[%s8611_s19 + $0xd8] sm:$0xff] %v5764_v48  ;;  %v5880_v20 = vmul.f32 %v5764_v48, %v5764_v48 }
 0x2cd   : > { %v6810_v8 = vpop.f32.mrf.mxu1  ;;  %v5910_v10 = vadd.f32 %v5909_v45, %v5879_v56  ;;  %v5841_v13 = vadd.f32 %v5840_v37, %v5764_v48 }
 0x2ce   : > { %v5608_v19 = vadd.f32 %v6809_v16, %v8772_v12  ;;  %v5768_v58 = vpop.f32.mrf.mxu0 }
 0x2cf   : > { %v6811_v32 = vpop.f32.mrf.mxu1  ;;  %v5911_v22 = vadd.f32 %v5910_v10, %v5880_v20 }
 0x2d0   : > { %v5769_v46 = vadd.f32 %v5768_v58, %v5608_v19  ;;  %v6812_v35 = vadd.f32 %v6811_v32, %v6810_v8  ;;  %v6890_v50 = vpop.f32.mrf.mxu0 }
 0x2d2   : > { %5811 = vst [vmem:[%s8611_s19 + $0xe0] sm:$0xff] %v5769_v46  ;;  %v5842_v24 = vadd.f32 %v5841_v13, %v5769_v46  ;;  %v5881_v14 = vmul.f32 %v5769_v46, %v5769_v46  ;;  %v5611_v18 = vadd.f32 %v6812_v35, %v8773_v49  ;;  %v5771_v7 = vpop.f32.mrf.mxu0 }
 0x2d4   : > { %v5912_v27 = vadd.f32 %v5911_v22, %v5881_v14  ;;  %v5772_v41 = vadd.f32 %v5771_v7, %v5611_v18  ;;  %v6813_v28 = vpop.f32.mrf.mxu1 }
 0x2d6   : > { %5812 = vst [vmem:[%s8611_s19 + $0xe8] sm:$0xff] %v5772_v41  ;;  %v5843_v5 = vadd.f32 %v5842_v24, %v5772_v41  ;;  %v5882_v52 = vmul.f32 %v5772_v41, %v5772_v41  ;;  %v6814_v6 = vpop.f32.mrf.mxu1 }
 0x2d7   : > { %v6815_v2 = vadd.f32 %v6814_v6, %v6813_v28 }
 0x2d8   : > { %v5913_v55 = vadd.f32 %v5912_v27, %v5882_v52  ;;  %v6816_v44 = vpop.f32.mrf.mxu1 }
 0x2d9   : > { %v5616_v0 = vadd.f32 %v6815_v2, %v8594_v39 }
 0x2da   : > { %v6817_v38 = vpop.f32.mrf.mxu1 }
 0x2db   : > { %v5777_v23 = vadd.f32 %v6889_v3, %v5616_v0  ;;  %v6818_v63 = vadd.f32 %v6817_v38, %v6816_v44 }
 0x2dd   : > { %5813 = vst [vmem:[%s8611_s19 + $0xf0] sm:$0xff] %v5777_v23  ;;  %v5844_v43 = vadd.f32 %v5843_v5, %v5777_v23  ;;  %v5883_v34 = vmul.f32 %v5777_v23, %v5777_v23  ;;  %v5619_v60 = vadd.f32 %v6818_v63, %v8603_v31 }
 0x2df   : > { %v5914_v29 = vadd.f32 %v5913_v55, %v5883_v34  ;;  %v5780_v61 = vadd.f32 %v6890_v50, %v5619_v60 }
 0x2e1   : > { %5814 = vst [vmem:[%s8611_s19 + $0xf8] sm:$0xff] %v5780_v61  ;;  %v5845_v4 = vadd.f32 %v5844_v43, %v5780_v61  ;;  %v5884_v36 = vmul.f32 %v5780_v61, %v5780_v61 }
 0x2e3   : > { %v5846_v57 = vrot.slane %v5845_v4, 4  ;;  %v5915_v59 = vadd.f32 %v5914_v29, %v5884_v36 }
 0x2e5   : > { %v5847_v62 = vadd.f32 %v5846_v57, %v5845_v4  ;;  %v5916_v17 = vrot.slane %v5915_v59, 4 }
 0x2e7   : > { %v5848_v39 = vrot.slane %v5847_v62, 2  ;;  %v5917_v51 = vadd.f32 %v5916_v17, %v5915_v59 }
 0x2e9   : > { %v5849_v54 = vadd.f32 %v5848_v39, %v5847_v62  ;;  %v5918_v33 = vrot.slane %v5917_v51, 2 }
 0x2eb   : > { %v5850_v30 = vrot.slane %v5849_v54, 1  ;;  %v5919_v1 = vadd.f32 %v5918_v33, %v5917_v51 }
 0x2ed   : > { %v5851_v31 = vadd.f32 %v5850_v30, %v5849_v54  ;;  %v5920_v47 = vrot.slane %v5919_v1, 1 }
 0x2ef   : > { %5852 = vst [vmem:[%s265_s23] sm:$0x1] %v5851_v31  ;;  %v5921_v25 = vadd.f32 %v5920_v47, %v5919_v1 }
 0x2f1   : > { %5922 = vst [vmem:[%s268_s26] sm:$0x1] %v5921_v25 }
 0x2f2 PF: > { %s17_s21 = sadd.s32 1, %s7206_s21  }
 0x2f3   : > { %p14_p4 = scmp.ge.s32.totalorder %s17_s21, 4  }
 0x2f5   :  { %16 = sbr.rel (!%p14_p4) target bundleno = 1 (0x1), region = 92 }

</bundles_post_ra>
